<compile_context>
chip_gen: v7x
topology: tpu7x:2x2x1
jax: 0.10.0
libtpu: 0.0.40
codegen_flags: <defaults>
</compile_context>

<pallas_src>
import math

import jax
import jax.numpy as jnp
from jax.experimental import pallas as pl
from jax.experimental.pallas import tpu as pltpu

BACKBONE_CONFIG = [(32, 4, 2, 0), (64, 3, 2, 0), (128, 3, 2, 0), (256, 2, 1, 0), (512, 2, 1, 0)]
GRID_SHAPE = (9, 9)
N_CLASSES = 10
BN_EPS = 1e-5


# ---------------------------------------------------------------------------
# Parameter init (same tensor shapes as the PyTorch module, BN folded for eval)
# ---------------------------------------------------------------------------
def init_params(key, config=BACKBONE_CONFIG, in_channels=1,
                grid_shape=GRID_SHAPE, n_classes=N_CLASSES):
    layers = []
    cin = in_channels
    for (cout, k, s, pad) in config:
        key, k1, k2, k3, k4, k5, k6 = jax.random.split(key, 7)
        w = jax.random.normal(k1, (cout, cin, k, k), jnp.float32) / math.sqrt(cin * k * k)
        b = 0.01 * jax.random.normal(k2, (cout,), jnp.float32)           # conv bias
        gamma = 1.0 + 0.1 * jax.random.normal(k3, (cout,), jnp.float32)  # BN weight
        beta = 0.1 * jax.random.normal(k4, (cout,), jnp.float32)         # BN bias
        mean = 0.1 * jax.random.normal(k5, (cout,), jnp.float32)         # running mean
        var = jax.random.uniform(k6, (cout,), jnp.float32, minval=0.5, maxval=1.5)
        scale = gamma / jnp.sqrt(var + BN_EPS)
        shift = beta + (b - mean) * scale
        # PyTorch (Cout, Cin, KH, KW) -> per-tap (KH*KW, Cin, Cout); fold BN scale into W.
        w_taps = jnp.transpose(w, (2, 3, 1, 0)).reshape(k * k, cin, cout) * scale[None, None, :]
        layers.append(dict(kh=k, kw=k, stride=s, pad=pad, cin=cin, cout=cout,
                           w_taps=w_taps.astype(jnp.bfloat16),
                           shift=shift.reshape(1, cout).astype(jnp.float32)))
        cin = cout
    key, kfw, kfb = jax.random.split(key, 3)
    n_groups = grid_shape[0] * grid_shape[1]
    n_out = n_groups * n_classes
    fc_w = jax.random.normal(kfw, (cin, n_out), jnp.float32) / math.sqrt(cin)
    fc_b = 0.01 * jax.random.normal(kfb, (1, n_out), jnp.float32)
    # 0/1 selection matrices for the per-group softmax over groups of `n_classes`
    # contiguous lanes: group_sum[g*nc + c, g] = 1, group_bcast = transpose.
    gsum_mat = jnp.repeat(jnp.eye(n_groups, dtype=jnp.float32), n_classes, axis=0)  # (n_out, n_groups)
    return dict(conv_layers=layers,
                fc_w=fc_w.astype(jnp.bfloat16), fc_b=fc_b,
                group_sum=gsum_mat, group_bcast=gsum_mat.T,
                grid_shape=grid_shape, n_classes=n_classes)


# ---------------------------------------------------------------------------
# XLA glue: im2col for the FIRST layer only (raw input is tiny; everything
# after layer 1 stays inside the fused Pallas kernel).
# ---------------------------------------------------------------------------
def _im2col_first_layer(x_nhwc, kh, kw, stride, pad):
    if pad > 0:
        x_nhwc = jnp.pad(x_nhwc, ((0, 0), (pad, pad), (pad, pad), (0, 0)))
    B, H, W, C = x_nhwc.shape
    oh = (H - kh) // stride + 1
    ow = (W - kw) // stride + 1
    cols = []
    for i in range(kh):
        for j in range(kw):
            cols.append(x_nhwc[:, i:i + stride * (oh - 1) + 1:stride,
                               j:j + stride * (ow - 1) + 1:stride, :])
    p = jnp.concatenate(cols, axis=-1)          # (B, oh, ow, kh*kw*C), (i, j, c) order
    return p.reshape(B, oh * ow, kh * kw * C), oh, ow


# ---------------------------------------------------------------------------
# Single fused Pallas kernel: conv2..conv5 tap accumulation + pool + FC + softmax
# ---------------------------------------------------------------------------
def _make_fused_kernel(layer_info):
    n_conv = len(layer_info)

    def kernel(*refs):
        # refs: p1, (w_l, shift_l) x n_conv, fc_w, fc_b, gsum, gbcast, out,
        #       act_0 .. act_{n_conv-2}   (flat (OH*OW, C) f32 VMEM scratch)
        p1_ref = refs[0]
        w_refs = [refs[1 + 2 * l] for l in range(n_conv)]
        s_refs = [refs[2 + 2 * l] for l in range(n_conv)]
        base = 1 + 2 * n_conv
        fcw_ref, fcb_ref, gsum_ref, gbc_ref = refs[base:base + 4]
        out_ref = refs[base + 4]
        act_refs = list(refs[base + 5:])

        # ---- layer 1: one matmul on the pre-built patches (M=OH*OW, K=kh*kw*Cin) ----
        y = jnp.dot(p1_ref[...], w_refs[0][...], preferred_element_type=jnp.float32)
        act_refs[0][...] = jnp.maximum(y + s_refs[0][...], 0.0)

        # ---- layers 2..n: tap accumulation fully in VMEM, one output row per step ----
        pooled = None
        for l in range(1, n_conv):
            info = layer_info[l]
            kh, kw, s = info['kh'], info['kw'], info['stride']
            in_w, oh_n, ow_n, cout = info['in_w'], info['oh'], info['ow'], info['cout']
            in_ref = act_refs[l - 1]
            w_taps = [w_refs[l][t] for t in range(kh * kw)]           # (Cin, Cout) bf16
            shift = jnp.broadcast_to(s_refs[l][...], (ow_n, cout))    # hoisted out of the loop
            is_last = (l == n_conv - 1)
            if is_last:
                pooled = jnp.zeros((1, cout), jnp.float32)
            for oh in range(oh_n):
                acc = shift
                for i in range(kh):
                    for j in range(kw):
                        start = (s * oh + i) * in_w + j               # static Python int
                        if s == 1:
                            tap = in_ref[pl.ds(start, ow_n), :]
                        else:
                            tap = in_ref[pl.ds(start, ow_n, s), :]    # sublane-strided read
                        acc = acc + jnp.dot(tap.astype(jnp.bfloat16), w_taps[i * kw + j],
                                            preferred_element_type=jnp.float32)
                yrow = jnp.maximum(acc, 0.0)
                if is_last:
                    pooled = pooled + jnp.sum(yrow, axis=0, keepdims=True)
                else:
                    act_refs[l][pl.ds(oh * ow_n, ow_n), :] = yrow
            if is_last:
                pooled = pooled * (1.0 / float(oh_n * ow_n))          # global average pool

        # ---- classifier: FC + grouped softmax, lane-dense (n_out lanes) output ----
        logits = jnp.dot(pooled.astype(jnp.bfloat16), fcw_ref[...],
                         preferred_element_type=jnp.float32) + fcb_ref[...]     # (1, n_out)
        m = jnp.max(logits, axis=-1, keepdims=True)   # row max: cancels within each group
        e = jnp.exp(logits - m)
        group_sums = jnp.dot(e, gsum_ref[...], preferred_element_type=jnp.float32)   # (1, n_groups)
        denom = jnp.dot(group_sums, gbc_ref[...], preferred_element_type=jnp.float32)  # (1, n_out)
        out_ref[...] = e / denom

    return kernel


def _fused_forward(p1, params, padded_hw):
    conv = params['conv_layers']
    n_conv = len(conv)
    B = p1.shape[0]

    # Static per-layer geometry (Python ints baked into the kernel trace).
    layer_info = []
    h, w = padded_hw
    for li, lyr in enumerate(conv):
        if li > 0:
            assert lyr['pad'] == 0, 'only the first layer may be padded'
        kh, kw, s = lyr['kh'], lyr['kw'], lyr['stride']
        oh = (h - kh) // s + 1
        ow = (w - kw) // s + 1
        layer_info.append(dict(kh=kh, kw=kw, stride=s, cout=lyr['cout'],
                               in_w=w, oh=oh, ow=ow))
        h, w = oh, ow
    assert p1.shape[1] == layer_info[0]['oh'] * layer_info[0]['ow']

    n_out = params['fc_w'].shape[1]

    # Kernel inputs: layer-1 patches, per-layer (weights, shift), FC, softmax helpers.
    w1_flat = conv[0]['w_taps'].reshape(-1, conv[0]['cout'])          # (kh*kw*Cin, Cout) bf16
    inputs = [p1, w1_flat, conv[0]['shift']]
    for lyr in conv[1:]:
        inputs += [lyr['w_taps'], lyr['shift']]
    inputs += [params['fc_w'], params['fc_b'], params['group_sum'], params['group_bcast']]

    def _pinned_full(arr):
        nd = arr.ndim
        return pl.BlockSpec(tuple(arr.shape), lambda b, _nd=nd: (0,) * _nd)

    in_specs = [pl.BlockSpec((None,) + tuple(p1.shape[1:]), lambda b: (b, 0, 0))]
    in_specs += [_pinned_full(a) for a in inputs[1:]]

    scratch_shapes = [
        pltpu.VMEM((layer_info[l]['oh'] * layer_info[l]['ow'], layer_info[l]['cout']),
                   jnp.float32)
        for l in range(n_conv - 1)
    ]

    out = pl.pallas_call(
        _make_fused_kernel(layer_info),
        out_shape=jax.ShapeDtypeStruct((B, 1, n_out), jnp.float32),
        grid=(B,),
        in_specs=in_specs,
        out_specs=pl.BlockSpec((None, 1, n_out), lambda b: (b, 0, 0)),
        scratch_shapes=scratch_shapes,
        compiler_params=pltpu.CompilerParams(dimension_semantics=("parallel",)),
    )(*inputs)
    return out.reshape(B, n_out)


# ---------------------------------------------------------------------------
# Forward pass (eval mode)
# ---------------------------------------------------------------------------
def whole_image_cnn_forward(x_nchw, params):
    B = x_nchw.shape[0]
    x = jnp.transpose(x_nchw, (0, 2, 3, 1)).astype(jnp.float32)       # NCHW -> NHWC
    l1 = params['conv_layers'][0]
    # Layer-1 patches are built once by XLA from the tiny raw input; every
    # later activation stays inside the single fused Pallas kernel (VMEM).
    p1, _, _ = _im2col_first_layer(x, l1['kh'], l1['kw'], l1['stride'], l1['pad'])
    p1 = p1.astype(jnp.bfloat16)
    padded_hw = (x.shape[1] + 2 * l1['pad'], x.shape[2] + 2 * l1['pad'])
    probs = _fused_forward(p1, params, padded_hw)                     # (B, 81*n_classes)
    # TODO(synk): nn.Dropout(p=0.25) is identity in eval mode; training-mode
    # stochastic masking is intentionally not emulated here.
    g0, g1 = params['grid_shape']
    return {'predictions': probs.reshape(B, g0 * g1, params['n_classes'])}


if __name__ == "__main__":
    key = jax.random.PRNGKey(0)
    pkey, xkey = jax.random.split(key)
    params = init_params(pkey)
    # Smallest spatial size surviving the 5 conv layers (k4s2,k3s2,k3s2,k2s1,k2s1) is 32.
    x = jax.random.normal(xkey, (2, 1, 32, 32), jnp.float32)          # NCHW, 1 input channel
    out = whole_image_cnn_forward(x, params)
    preds = jax.block_until_ready(out['predictions'])
    assert preds.shape == (2, 81, 10)
    assert bool(jnp.all(jnp.isfinite(preds)))
    # rows of the softmax output must sum to 1
    assert bool(jnp.allclose(jnp.sum(preds, axis=-1), 1.0, atol=1e-5))
    print("KERNEL_OK")
</pallas_src>

<mosaic_0001>
module attributes {stable_mosaic.version = 11 : i64} {
  func.func @kernel(%arg0: i32, %arg1: memref<1x225x16xbf16, #tpu.memory_space<vmem>>, %arg2: memref<16x32xbf16, #tpu.memory_space<vmem>>, %arg3: memref<1x32xf32, #tpu.memory_space<vmem>>, %arg4: memref<9x32x64xbf16, #tpu.memory_space<vmem>>, %arg5: memref<1x64xf32, #tpu.memory_space<vmem>>, %arg6: memref<9x64x128xbf16, #tpu.memory_space<vmem>>, %arg7: memref<1x128xf32, #tpu.memory_space<vmem>>, %arg8: memref<4x128x256xbf16, #tpu.memory_space<vmem>>, %arg9: memref<1x256xf32, #tpu.memory_space<vmem>>, %arg10: memref<4x256x512xbf16, #tpu.memory_space<vmem>>, %arg11: memref<1x512xf32, #tpu.memory_space<vmem>>, %arg12: memref<512x810xbf16, #tpu.memory_space<vmem>>, %arg13: memref<1x810xf32, #tpu.memory_space<vmem>>, %arg14: memref<810x81xf32, #tpu.memory_space<vmem>>, %arg15: memref<81x810xf32, #tpu.memory_space<vmem>>, %arg16: memref<1x1x810xf32, #tpu.memory_space<vmem>>, %arg17: memref<225x32xf32, #tpu.memory_space<vmem>>, %arg18: memref<49x64xf32, #tpu.memory_space<vmem>>, %arg19: memref<9x128xf32, #tpu.memory_space<vmem>>, %arg20: memref<4x256xf32, #tpu.memory_space<vmem>>) attributes {dimension_semantics = [#tpu.dimension_semantics<parallel>], iteration_bounds = array<i64: 2>, scalar_prefetch = 0 : i64, scratch_operands = 4 : i64, tpu.core_type = #tpu.core_type<tc>, window_params = [{transform_indices = @transform_0, window_bounds = array<i64: 1, 225, 16>}, {pipeline_mode = #tpu.pipeline_mode<synchronous>, transform_indices = @transform_1, window_bounds = array<i64: 16, 32>}, {pipeline_mode = #tpu.pipeline_mode<synchronous>, transform_indices = @transform_2, window_bounds = array<i64: 1, 32>}, {pipeline_mode = #tpu.pipeline_mode<synchronous>, transform_indices = @transform_3, window_bounds = array<i64: 9, 32, 64>}, {pipeline_mode = #tpu.pipeline_mode<synchronous>, transform_indices = @transform_4, window_bounds = array<i64: 1, 64>}, {pipeline_mode = #tpu.pipeline_mode<synchronous>, transform_indices = @transform_5, window_bounds = array<i64: 9, 64, 128>}, {pipeline_mode = #tpu.pipeline_mode<synchronous>, transform_indices = @transform_6, window_bounds = array<i64: 1, 128>}, {pipeline_mode = #tpu.pipeline_mode<synchronous>, transform_indices = @transform_7, window_bounds = array<i64: 4, 128, 256>}, {pipeline_mode = #tpu.pipeline_mode<synchronous>, transform_indices = @transform_8, window_bounds = array<i64: 1, 256>}, {pipeline_mode = #tpu.pipeline_mode<synchronous>, transform_indices = @transform_9, window_bounds = array<i64: 4, 256, 512>}, {pipeline_mode = #tpu.pipeline_mode<synchronous>, transform_indices = @transform_10, window_bounds = array<i64: 1, 512>}, {pipeline_mode = #tpu.pipeline_mode<synchronous>, transform_indices = @transform_11, window_bounds = array<i64: 512, 810>}, {pipeline_mode = #tpu.pipeline_mode<synchronous>, transform_indices = @transform_12, window_bounds = array<i64: 1, 810>}, {pipeline_mode = #tpu.pipeline_mode<synchronous>, transform_indices = @transform_13, window_bounds = array<i64: 810, 81>}, {pipeline_mode = #tpu.pipeline_mode<synchronous>, transform_indices = @transform_14, window_bounds = array<i64: 81, 810>}, {transform_indices = @transform_15, window_bounds = array<i64: 1, 1, 810>}]} {
    %c0 = arith.constant 0 : index
    %c0_0 = arith.constant 0 : index
    %c0_1 = arith.constant 0 : index
    %0 = vector.load %arg1[%c0, %c0_0, %c0_1] : memref<1x225x16xbf16, #tpu.memory_space<vmem>>, vector<1x225x16xbf16>
    %1 = vector.shape_cast %0 : vector<1x225x16xbf16> to vector<225x16xbf16>
    %c0_2 = arith.constant 0 : index
    %c0_3 = arith.constant 0 : index
    %2 = vector.load %arg2[%c0_2, %c0_3] : memref<16x32xbf16, #tpu.memory_space<vmem>>, vector<16x32xbf16>
    %cst = arith.constant dense<0.000000e+00> : vector<225x32xf32>
    %3 = tpu.matmul %1, %2, %cst {dimension_numbers = #tpu.dot_dimension_numbers<[1], [0], [0], [1], [0, 0, 1, 1], [], []>} : vector<225x16xbf16>, vector<16x32xbf16>, vector<225x32xf32> -> vector<225x32xf32>
    %c0_4 = arith.constant 0 : index
    %c0_5 = arith.constant 0 : index
    %4 = vector.load %arg3[%c0_4, %c0_5] : memref<1x32xf32, #tpu.memory_space<vmem>>, vector<1x32xf32>
    %5 = vector.broadcast %4 : vector<1x32xf32> to vector<225x32xf32>
    %6 = arith.addf %3, %5 : vector<225x32xf32>
    %cst_6 = arith.constant 0.000000e+00 : f32
    %7 = vector.broadcast %cst_6 : f32 to vector<225x32xf32>
    %8 = arith.maximumf %6, %7 : vector<225x32xf32>
    %c0_7 = arith.constant 0 : index
    %c0_8 = arith.constant 0 : index
    %9 = vector.load %arg17[%c0_7, %c0_8] : memref<225x32xf32, #tpu.memory_space<vmem>>, vector<225x32xf32>
    tpu.vector_store %arg17[%c0_7, %c0_8], %8 {strides = array<i32>} : memref<225x32xf32, #tpu.memory_space<vmem>>, vector<225x32xf32>,
    %c0_9 = arith.constant 0 : index
    %c0_10 = arith.constant 0 : index
    %c0_11 = arith.constant 0 : index
    %10 = vector.load %arg4[%c0_9, %c0_10, %c0_11] : memref<9x32x64xbf16, #tpu.memory_space<vmem>>, vector<1x32x64xbf16>
    %11 = vector.shape_cast %10 : vector<1x32x64xbf16> to vector<32x64xbf16>
    %c1 = arith.constant 1 : index
    %c0_12 = arith.constant 0 : index
    %c0_13 = arith.constant 0 : index
    %12 = vector.load %arg4[%c1, %c0_12, %c0_13] : memref<9x32x64xbf16, #tpu.memory_space<vmem>>, vector<1x32x64xbf16>
    %13 = vector.shape_cast %12 : vector<1x32x64xbf16> to vector<32x64xbf16>
    %c2 = arith.constant 2 : index
    %c0_14 = arith.constant 0 : index
    %c0_15 = arith.constant 0 : index
    %14 = vector.load %arg4[%c2, %c0_14, %c0_15] : memref<9x32x64xbf16, #tpu.memory_space<vmem>>, vector<1x32x64xbf16>
    %15 = vector.shape_cast %14 : vector<1x32x64xbf16> to vector<32x64xbf16>
    %c3 = arith.constant 3 : index
    %c0_16 = arith.constant 0 : index
    %c0_17 = arith.constant 0 : index
    %16 = vector.load %arg4[%c3, %c0_16, %c0_17] : memref<9x32x64xbf16, #tpu.memory_space<vmem>>, vector<1x32x64xbf16>
    %17 = vector.shape_cast %16 : vector<1x32x64xbf16> to vector<32x64xbf16>
    %c4 = arith.constant 4 : index
    %c0_18 = arith.constant 0 : index
    %c0_19 = arith.constant 0 : index
    %18 = vector.load %arg4[%c4, %c0_18, %c0_19] : memref<9x32x64xbf16, #tpu.memory_space<vmem>>, vector<1x32x64xbf16>
    %19 = vector.shape_cast %18 : vector<1x32x64xbf16> to vector<32x64xbf16>
    %c5 = arith.constant 5 : index
    %c0_20 = arith.constant 0 : index
    %c0_21 = arith.constant 0 : index
    %20 = vector.load %arg4[%c5, %c0_20, %c0_21] : memref<9x32x64xbf16, #tpu.memory_space<vmem>>, vector<1x32x64xbf16>
    %21 = vector.shape_cast %20 : vector<1x32x64xbf16> to vector<32x64xbf16>
    %c6 = arith.constant 6 : index
    %c0_22 = arith.constant 0 : index
    %c0_23 = arith.constant 0 : index
    %22 = vector.load %arg4[%c6, %c0_22, %c0_23] : memref<9x32x64xbf16, #tpu.memory_space<vmem>>, vector<1x32x64xbf16>
    %23 = vector.shape_cast %22 : vector<1x32x64xbf16> to vector<32x64xbf16>
    %c7 = arith.constant 7 : index
    %c0_24 = arith.constant 0 : index
    %c0_25 = arith.constant 0 : index
    %24 = vector.load %arg4[%c7, %c0_24, %c0_25] : memref<9x32x64xbf16, #tpu.memory_space<vmem>>, vector<1x32x64xbf16>
    %25 = vector.shape_cast %24 : vector<1x32x64xbf16> to vector<32x64xbf16>
    %c8 = arith.constant 8 : index
    %c0_26 = arith.constant 0 : index
    %c0_27 = arith.constant 0 : index
    %26 = vector.load %arg4[%c8, %c0_26, %c0_27] : memref<9x32x64xbf16, #tpu.memory_space<vmem>>, vector<1x32x64xbf16>
    %27 = vector.shape_cast %26 : vector<1x32x64xbf16> to vector<32x64xbf16>
    %c0_28 = arith.constant 0 : index
    %c0_29 = arith.constant 0 : index
    %28 = vector.load %arg5[%c0_28, %c0_29] : memref<1x64xf32, #tpu.memory_space<vmem>>, vector<1x64xf32>
    %29 = vector.shape_cast %28 : vector<1x64xf32> to vector<1x64xf32>
    %30 = vector.broadcast %29 : vector<1x64xf32> to vector<7x64xf32>
    %c0_30 = arith.constant 0 : index
    %c0_31 = arith.constant 0 : index
    %31 = tpu.strided_load %arg17[%c0_30, %c0_31] {strides = array<i32: 2, 1>} : memref<225x32xf32, #tpu.memory_space<vmem>>, vector<7x32xf32>
    %32 = arith.truncf %31 : vector<7x32xf32> to vector<7x32xbf16>
    %cst_32 = arith.constant dense<0.000000e+00> : vector<7x64xf32>
    %33 = tpu.matmul %32, %11, %cst_32 {dimension_numbers = #tpu.dot_dimension_numbers<[1], [0], [0], [1], [0, 0, 1, 1], [], []>} : vector<7x32xbf16>, vector<32x64xbf16>, vector<7x64xf32> -> vector<7x64xf32>
    %34 = arith.addf %30, %33 : vector<7x64xf32>
    %c1_33 = arith.constant 1 : index
    %c0_34 = arith.constant 0 : index
    %35 = tpu.strided_load %arg17[%c1_33, %c0_34] {strides = array<i32: 2, 1>} : memref<225x32xf32, #tpu.memory_space<vmem>>, vector<7x32xf32>
    %36 = arith.truncf %35 : vector<7x32xf32> to vector<7x32xbf16>
    %cst_35 = arith.constant dense<0.000000e+00> : vector<7x64xf32>
    %37 = tpu.matmul %36, %13, %cst_35 {dimension_numbers = #tpu.dot_dimension_numbers<[1], [0], [0], [1], [0, 0, 1, 1], [], []>} : vector<7x32xbf16>, vector<32x64xbf16>, vector<7x64xf32> -> vector<7x64xf32>
    %38 = arith.addf %34, %37 : vector<7x64xf32>
    %c2_36 = arith.constant 2 : index
    %c0_37 = arith.constant 0 : index
    %39 = tpu.strided_load %arg17[%c2_36, %c0_37] {strides = array<i32: 2, 1>} : memref<225x32xf32, #tpu.memory_space<vmem>>, vector<7x32xf32>
    %40 = arith.truncf %39 : vector<7x32xf32> to vector<7x32xbf16>
    %cst_38 = arith.constant dense<0.000000e+00> : vector<7x64xf32>
    %41 = tpu.matmul %40, %15, %cst_38 {dimension_numbers = #tpu.dot_dimension_numbers<[1], [0], [0], [1], [0, 0, 1, 1], [], []>} : vector<7x32xbf16>, vector<32x64xbf16>, vector<7x64xf32> -> vector<7x64xf32>
    %42 = arith.addf %38, %41 : vector<7x64xf32>
    %c15 = arith.constant 15 : index
    %c0_39 = arith.constant 0 : index
    %43 = tpu.strided_load %arg17[%c15, %c0_39] {strides = array<i32: 2, 1>} : memref<225x32xf32, #tpu.memory_space<vmem>>, vector<7x32xf32>
    %44 = arith.truncf %43 : vector<7x32xf32> to vector<7x32xbf16>
    %cst_40 = arith.constant dense<0.000000e+00> : vector<7x64xf32>
    %45 = tpu.matmul %44, %17, %cst_40 {dimension_numbers = #tpu.dot_dimension_numbers<[1], [0], [0], [1], [0, 0, 1, 1], [], []>} : vector<7x32xbf16>, vector<32x64xbf16>, vector<7x64xf32> -> vector<7x64xf32>
    %46 = arith.addf %42, %45 : vector<7x64xf32>
    %c16 = arith.constant 16 : index
    %c0_41 = arith.constant 0 : index
    %47 = tpu.strided_load %arg17[%c16, %c0_41] {strides = array<i32: 2, 1>} : memref<225x32xf32, #tpu.memory_space<vmem>>, vector<7x32xf32>
    %48 = arith.truncf %47 : vector<7x32xf32> to vector<7x32xbf16>
    %cst_42 = arith.constant dense<0.000000e+00> : vector<7x64xf32>
    %49 = tpu.matmul %48, %19, %cst_42 {dimension_numbers = #tpu.dot_dimension_numbers<[1], [0], [0], [1], [0, 0, 1, 1], [], []>} : vector<7x32xbf16>, vector<32x64xbf16>, vector<7x64xf32> -> vector<7x64xf32>
    %50 = arith.addf %46, %49 : vector<7x64xf32>
    %c17 = arith.constant 17 : index
    %c0_43 = arith.constant 0 : index
    %51 = tpu.strided_load %arg17[%c17, %c0_43] {strides = array<i32: 2, 1>} : memref<225x32xf32, #tpu.memory_space<vmem>>, vector<7x32xf32>
    %52 = arith.truncf %51 : vector<7x32xf32> to vector<7x32xbf16>
    %cst_44 = arith.constant dense<0.000000e+00> : vector<7x64xf32>
    %53 = tpu.matmul %52, %21, %cst_44 {dimension_numbers = #tpu.dot_dimension_numbers<[1], [0], [0], [1], [0, 0, 1, 1], [], []>} : vector<7x32xbf16>, vector<32x64xbf16>, vector<7x64xf32> -> vector<7x64xf32>
    %54 = arith.addf %50, %53 : vector<7x64xf32>
    %c30 = arith.constant 30 : index
    %c0_45 = arith.constant 0 : index
    %55 = tpu.strided_load %arg17[%c30, %c0_45] {strides = array<i32: 2, 1>} : memref<225x32xf32, #tpu.memory_space<vmem>>, vector<7x32xf32>
    %56 = arith.truncf %55 : vector<7x32xf32> to vector<7x32xbf16>
    %cst_46 = arith.constant dense<0.000000e+00> : vector<7x64xf32>
    %57 = tpu.matmul %56, %23, %cst_46 {dimension_numbers = #tpu.dot_dimension_numbers<[1], [0], [0], [1], [0, 0, 1, 1], [], []>} : vector<7x32xbf16>, vector<32x64xbf16>, vector<7x64xf32> -> vector<7x64xf32>
    %58 = arith.addf %54, %57 : vector<7x64xf32>
    %c31 = arith.constant 31 : index
    %c0_47 = arith.constant 0 : index
    %59 = tpu.strided_load %arg17[%c31, %c0_47] {strides = array<i32: 2, 1>} : memref<225x32xf32, #tpu.memory_space<vmem>>, vector<7x32xf32>
    %60 = arith.truncf %59 : vector<7x32xf32> to vector<7x32xbf16>
    %cst_48 = arith.constant dense<0.000000e+00> : vector<7x64xf32>
    %61 = tpu.matmul %60, %25, %cst_48 {dimension_numbers = #tpu.dot_dimension_numbers<[1], [0], [0], [1], [0, 0, 1, 1], [], []>} : vector<7x32xbf16>, vector<32x64xbf16>, vector<7x64xf32> -> vector<7x64xf32>
    %62 = arith.addf %58, %61 : vector<7x64xf32>
    %c32 = arith.constant 32 : index
    %c0_49 = arith.constant 0 : index
    %63 = tpu.strided_load %arg17[%c32, %c0_49] {strides = array<i32: 2, 1>} : memref<225x32xf32, #tpu.memory_space<vmem>>, vector<7x32xf32>
    %64 = arith.truncf %63 : vector<7x32xf32> to vector<7x32xbf16>
    %cst_50 = arith.constant dense<0.000000e+00> : vector<7x64xf32>
    %65 = tpu.matmul %64, %27, %cst_50 {dimension_numbers = #tpu.dot_dimension_numbers<[1], [0], [0], [1], [0, 0, 1, 1], [], []>} : vector<7x32xbf16>, vector<32x64xbf16>, vector<7x64xf32> -> vector<7x64xf32>
    %66 = arith.addf %62, %65 : vector<7x64xf32>
    %cst_51 = arith.constant 0.000000e+00 : f32
    %67 = vector.broadcast %cst_51 : f32 to vector<7x64xf32>
    %68 = arith.maximumf %66, %67 : vector<7x64xf32>
    %c0_52 = arith.constant 0 : index
    %c0_53 = arith.constant 0 : index
    %69 = vector.load %arg18[%c0_52, %c0_53] : memref<49x64xf32, #tpu.memory_space<vmem>>, vector<7x64xf32>
    tpu.vector_store %arg18[%c0_52, %c0_53], %68 {strides = array<i32>} : memref<49x64xf32, #tpu.memory_space<vmem>>, vector<7x64xf32>,
    %c30_54 = arith.constant 30 : index
    %c0_55 = arith.constant 0 : index
    %70 = tpu.strided_load %arg17[%c30_54, %c0_55] {strides = array<i32: 2, 1>} : memref<225x32xf32, #tpu.memory_space<vmem>>, vector<7x32xf32>
    %71 = arith.truncf %70 : vector<7x32xf32> to vector<7x32xbf16>
    %cst_56 = arith.constant dense<0.000000e+00> : vector<7x64xf32>
    %72 = tpu.matmul %71, %11, %cst_56 {dimension_numbers = #tpu.dot_dimension_numbers<[1], [0], [0], [1], [0, 0, 1, 1], [], []>} : vector<7x32xbf16>, vector<32x64xbf16>, vector<7x64xf32> -> vector<7x64xf32>
    %73 = arith.addf %30, %72 : vector<7x64xf32>
    %c31_57 = arith.constant 31 : index
    %c0_58 = arith.constant 0 : index
    %74 = tpu.strided_load %arg17[%c31_57, %c0_58] {strides = array<i32: 2, 1>} : memref<225x32xf32, #tpu.memory_space<vmem>>, vector<7x32xf32>
    %75 = arith.truncf %74 : vector<7x32xf32> to vector<7x32xbf16>
    %cst_59 = arith.constant dense<0.000000e+00> : vector<7x64xf32>
    %76 = tpu.matmul %75, %13, %cst_59 {dimension_numbers = #tpu.dot_dimension_numbers<[1], [0], [0], [1], [0, 0, 1, 1], [], []>} : vector<7x32xbf16>, vector<32x64xbf16>, vector<7x64xf32> -> vector<7x64xf32>
    %77 = arith.addf %73, %76 : vector<7x64xf32>
    %c32_60 = arith.constant 32 : index
    %c0_61 = arith.constant 0 : index
    %78 = tpu.strided_load %arg17[%c32_60, %c0_61] {strides = array<i32: 2, 1>} : memref<225x32xf32, #tpu.memory_space<vmem>>, vector<7x32xf32>
    %79 = arith.truncf %78 : vector<7x32xf32> to vector<7x32xbf16>
    %cst_62 = arith.constant dense<0.000000e+00> : vector<7x64xf32>
    %80 = tpu.matmul %79, %15, %cst_62 {dimension_numbers = #tpu.dot_dimension_numbers<[1], [0], [0], [1], [0, 0, 1, 1], [], []>} : vector<7x32xbf16>, vector<32x64xbf16>, vector<7x64xf32> -> vector<7x64xf32>
    %81 = arith.addf %77, %80 : vector<7x64xf32>
    %c45 = arith.constant 45 : index
    %c0_63 = arith.constant 0 : index
    %82 = tpu.strided_load %arg17[%c45, %c0_63] {strides = array<i32: 2, 1>} : memref<225x32xf32, #tpu.memory_space<vmem>>, vector<7x32xf32>
    %83 = arith.truncf %82 : vector<7x32xf32> to vector<7x32xbf16>
    %cst_64 = arith.constant dense<0.000000e+00> : vector<7x64xf32>
    %84 = tpu.matmul %83, %17, %cst_64 {dimension_numbers = #tpu.dot_dimension_numbers<[1], [0], [0], [1], [0, 0, 1, 1], [], []>} : vector<7x32xbf16>, vector<32x64xbf16>, vector<7x64xf32> -> vector<7x64xf32>
    %85 = arith.addf %81, %84 : vector<7x64xf32>
    %c46 = arith.constant 46 : index
    %c0_65 = arith.constant 0 : index
    %86 = tpu.strided_load %arg17[%c46, %c0_65] {strides = array<i32: 2, 1>} : memref<225x32xf32, #tpu.memory_space<vmem>>, vector<7x32xf32>
    %87 = arith.truncf %86 : vector<7x32xf32> to vector<7x32xbf16>
    %cst_66 = arith.constant dense<0.000000e+00> : vector<7x64xf32>
    %88 = tpu.matmul %87, %19, %cst_66 {dimension_numbers = #tpu.dot_dimension_numbers<[1], [0], [0], [1], [0, 0, 1, 1], [], []>} : vector<7x32xbf16>, vector<32x64xbf16>, vector<7x64xf32> -> vector<7x64xf32>
    %89 = arith.addf %85, %88 : vector<7x64xf32>
    %c47 = arith.constant 47 : index
    %c0_67 = arith.constant 0 : index
    %90 = tpu.strided_load %arg17[%c47, %c0_67] {strides = array<i32: 2, 1>} : memref<225x32xf32, #tpu.memory_space<vmem>>, vector<7x32xf32>
    %91 = arith.truncf %90 : vector<7x32xf32> to vector<7x32xbf16>
    %cst_68 = arith.constant dense<0.000000e+00> : vector<7x64xf32>
    %92 = tpu.matmul %91, %21, %cst_68 {dimension_numbers = #tpu.dot_dimension_numbers<[1], [0], [0], [1], [0, 0, 1, 1], [], []>} : vector<7x32xbf16>, vector<32x64xbf16>, vector<7x64xf32> -> vector<7x64xf32>
    %93 = arith.addf %89, %92 : vector<7x64xf32>
    %c60 = arith.constant 60 : index
    %c0_69 = arith.constant 0 : index
    %94 = tpu.strided_load %arg17[%c60, %c0_69] {strides = array<i32: 2, 1>} : memref<225x32xf32, #tpu.memory_space<vmem>>, vector<7x32xf32>
    %95 = arith.truncf %94 : vector<7x32xf32> to vector<7x32xbf16>
    %cst_70 = arith.constant dense<0.000000e+00> : vector<7x64xf32>
    %96 = tpu.matmul %95, %23, %cst_70 {dimension_numbers = #tpu.dot_dimension_numbers<[1], [0], [0], [1], [0, 0, 1, 1], [], []>} : vector<7x32xbf16>, vector<32x64xbf16>, vector<7x64xf32> -> vector<7x64xf32>
    %97 = arith.addf %93, %96 : vector<7x64xf32>
    %c61 = arith.constant 61 : index
    %c0_71 = arith.constant 0 : index
    %98 = tpu.strided_load %arg17[%c61, %c0_71] {strides = array<i32: 2, 1>} : memref<225x32xf32, #tpu.memory_space<vmem>>, vector<7x32xf32>
    %99 = arith.truncf %98 : vector<7x32xf32> to vector<7x32xbf16>
    %cst_72 = arith.constant dense<0.000000e+00> : vector<7x64xf32>
    %100 = tpu.matmul %99, %25, %cst_72 {dimension_numbers = #tpu.dot_dimension_numbers<[1], [0], [0], [1], [0, 0, 1, 1], [], []>} : vector<7x32xbf16>, vector<32x64xbf16>, vector<7x64xf32> -> vector<7x64xf32>
    %101 = arith.addf %97, %100 : vector<7x64xf32>
    %c62 = arith.constant 62 : index
    %c0_73 = arith.constant 0 : index
    %102 = tpu.strided_load %arg17[%c62, %c0_73] {strides = array<i32: 2, 1>} : memref<225x32xf32, #tpu.memory_space<vmem>>, vector<7x32xf32>
    %103 = arith.truncf %102 : vector<7x32xf32> to vector<7x32xbf16>
    %cst_74 = arith.constant dense<0.000000e+00> : vector<7x64xf32>
    %104 = tpu.matmul %103, %27, %cst_74 {dimension_numbers = #tpu.dot_dimension_numbers<[1], [0], [0], [1], [0, 0, 1, 1], [], []>} : vector<7x32xbf16>, vector<32x64xbf16>, vector<7x64xf32> -> vector<7x64xf32>
    %105 = arith.addf %101, %104 : vector<7x64xf32>
    %cst_75 = arith.constant 0.000000e+00 : f32
    %106 = vector.broadcast %cst_75 : f32 to vector<7x64xf32>
    %107 = arith.maximumf %105, %106 : vector<7x64xf32>
    %c7_76 = arith.constant 7 : index
    %c0_77 = arith.constant 0 : index
    %108 = vector.load %arg18[%c7_76, %c0_77] : memref<49x64xf32, #tpu.memory_space<vmem>>, vector<7x64xf32>
    tpu.vector_store %arg18[%c7_76, %c0_77], %107 {strides = array<i32>} : memref<49x64xf32, #tpu.memory_space<vmem>>, vector<7x64xf32>,
    %c60_78 = arith.constant 60 : index
    %c0_79 = arith.constant 0 : index
    %109 = tpu.strided_load %arg17[%c60_78, %c0_79] {strides = array<i32: 2, 1>} : memref<225x32xf32, #tpu.memory_space<vmem>>, vector<7x32xf32>
    %110 = arith.truncf %109 : vector<7x32xf32> to vector<7x32xbf16>
    %cst_80 = arith.constant dense<0.000000e+00> : vector<7x64xf32>
    %111 = tpu.matmul %110, %11, %cst_80 {dimension_numbers = #tpu.dot_dimension_numbers<[1], [0], [0], [1], [0, 0, 1, 1], [], []>} : vector<7x32xbf16>, vector<32x64xbf16>, vector<7x64xf32> -> vector<7x64xf32>
    %112 = arith.addf %30, %111 : vector<7x64xf32>
    %c61_81 = arith.constant 61 : index
    %c0_82 = arith.constant 0 : index
    %113 = tpu.strided_load %arg17[%c61_81, %c0_82] {strides = array<i32: 2, 1>} : memref<225x32xf32, #tpu.memory_space<vmem>>, vector<7x32xf32>
    %114 = arith.truncf %113 : vector<7x32xf32> to vector<7x32xbf16>
    %cst_83 = arith.constant dense<0.000000e+00> : vector<7x64xf32>
    %115 = tpu.matmul %114, %13, %cst_83 {dimension_numbers = #tpu.dot_dimension_numbers<[1], [0], [0], [1], [0, 0, 1, 1], [], []>} : vector<7x32xbf16>, vector<32x64xbf16>, vector<7x64xf32> -> vector<7x64xf32>
    %116 = arith.addf %112, %115 : vector<7x64xf32>
    %c62_84 = arith.constant 62 : index
    %c0_85 = arith.constant 0 : index
    %117 = tpu.strided_load %arg17[%c62_84, %c0_85] {strides = array<i32: 2, 1>} : memref<225x32xf32, #tpu.memory_space<vmem>>, vector<7x32xf32>
    %118 = arith.truncf %117 : vector<7x32xf32> to vector<7x32xbf16>
    %cst_86 = arith.constant dense<0.000000e+00> : vector<7x64xf32>
    %119 = tpu.matmul %118, %15, %cst_86 {dimension_numbers = #tpu.dot_dimension_numbers<[1], [0], [0], [1], [0, 0, 1, 1], [], []>} : vector<7x32xbf16>, vector<32x64xbf16>, vector<7x64xf32> -> vector<7x64xf32>
    %120 = arith.addf %116, %119 : vector<7x64xf32>
    %c75 = arith.constant 75 : index
    %c0_87 = arith.constant 0 : index
    %121 = tpu.strided_load %arg17[%c75, %c0_87] {strides = array<i32: 2, 1>} : memref<225x32xf32, #tpu.memory_space<vmem>>, vector<7x32xf32>
    %122 = arith.truncf %121 : vector<7x32xf32> to vector<7x32xbf16>
    %cst_88 = arith.constant dense<0.000000e+00> : vector<7x64xf32>
    %123 = tpu.matmul %122, %17, %cst_88 {dimension_numbers = #tpu.dot_dimension_numbers<[1], [0], [0], [1], [0, 0, 1, 1], [], []>} : vector<7x32xbf16>, vector<32x64xbf16>, vector<7x64xf32> -> vector<7x64xf32>
    %124 = arith.addf %120, %123 : vector<7x64xf32>
    %c76 = arith.constant 76 : index
    %c0_89 = arith.constant 0 : index
    %125 = tpu.strided_load %arg17[%c76, %c0_89] {strides = array<i32: 2, 1>} : memref<225x32xf32, #tpu.memory_space<vmem>>, vector<7x32xf32>
    %126 = arith.truncf %125 : vector<7x32xf32> to vector<7x32xbf16>
    %cst_90 = arith.constant dense<0.000000e+00> : vector<7x64xf32>
    %127 = tpu.matmul %126, %19, %cst_90 {dimension_numbers = #tpu.dot_dimension_numbers<[1], [0], [0], [1], [0, 0, 1, 1], [], []>} : vector<7x32xbf16>, vector<32x64xbf16>, vector<7x64xf32> -> vector<7x64xf32>
    %128 = arith.addf %124, %127 : vector<7x64xf32>
    %c77 = arith.constant 77 : index
    %c0_91 = arith.constant 0 : index
    %129 = tpu.strided_load %arg17[%c77, %c0_91] {strides = array<i32: 2, 1>} : memref<225x32xf32, #tpu.memory_space<vmem>>, vector<7x32xf32>
    %130 = arith.truncf %129 : vector<7x32xf32> to vector<7x32xbf16>
    %cst_92 = arith.constant dense<0.000000e+00> : vector<7x64xf32>
    %131 = tpu.matmul %130, %21, %cst_92 {dimension_numbers = #tpu.dot_dimension_numbers<[1], [0], [0], [1], [0, 0, 1, 1], [], []>} : vector<7x32xbf16>, vector<32x64xbf16>, vector<7x64xf32> -> vector<7x64xf32>
    %132 = arith.addf %128, %131 : vector<7x64xf32>
    %c90 = arith.constant 90 : index
    %c0_93 = arith.constant 0 : index
    %133 = tpu.strided_load %arg17[%c90, %c0_93] {strides = array<i32: 2, 1>} : memref<225x32xf32, #tpu.memory_space<vmem>>, vector<7x32xf32>
    %134 = arith.truncf %133 : vector<7x32xf32> to vector<7x32xbf16>
    %cst_94 = arith.constant dense<0.000000e+00> : vector<7x64xf32>
    %135 = tpu.matmul %134, %23, %cst_94 {dimension_numbers = #tpu.dot_dimension_numbers<[1], [0], [0], [1], [0, 0, 1, 1], [], []>} : vector<7x32xbf16>, vector<32x64xbf16>, vector<7x64xf32> -> vector<7x64xf32>
    %136 = arith.addf %132, %135 : vector<7x64xf32>
    %c91 = arith.constant 91 : index
    %c0_95 = arith.constant 0 : index
    %137 = tpu.strided_load %arg17[%c91, %c0_95] {strides = array<i32: 2, 1>} : memref<225x32xf32, #tpu.memory_space<vmem>>, vector<7x32xf32>
    %138 = arith.truncf %137 : vector<7x32xf32> to vector<7x32xbf16>
    %cst_96 = arith.constant dense<0.000000e+00> : vector<7x64xf32>
    %139 = tpu.matmul %138, %25, %cst_96 {dimension_numbers = #tpu.dot_dimension_numbers<[1], [0], [0], [1], [0, 0, 1, 1], [], []>} : vector<7x32xbf16>, vector<32x64xbf16>, vector<7x64xf32> -> vector<7x64xf32>
    %140 = arith.addf %136, %139 : vector<7x64xf32>
    %c92 = arith.constant 92 : index
    %c0_97 = arith.constant 0 : index
    %141 = tpu.strided_load %arg17[%c92, %c0_97] {strides = array<i32: 2, 1>} : memref<225x32xf32, #tpu.memory_space<vmem>>, vector<7x32xf32>
    %142 = arith.truncf %141 : vector<7x32xf32> to vector<7x32xbf16>
    %cst_98 = arith.constant dense<0.000000e+00> : vector<7x64xf32>
    %143 = tpu.matmul %142, %27, %cst_98 {dimension_numbers = #tpu.dot_dimension_numbers<[1], [0], [0], [1], [0, 0, 1, 1], [], []>} : vector<7x32xbf16>, vector<32x64xbf16>, vector<7x64xf32> -> vector<7x64xf32>
    %144 = arith.addf %140, %143 : vector<7x64xf32>
    %cst_99 = arith.constant 0.000000e+00 : f32
    %145 = vector.broadcast %cst_99 : f32 to vector<7x64xf32>
    %146 = arith.maximumf %144, %145 : vector<7x64xf32>
    %c14 = arith.constant 14 : index
    %c0_100 = arith.constant 0 : index
    %147 = vector.load %arg18[%c14, %c0_100] : memref<49x64xf32, #tpu.memory_space<vmem>>, vector<7x64xf32>
    tpu.vector_store %arg18[%c14, %c0_100], %146 {strides = array<i32>} : memref<49x64xf32, #tpu.memory_space<vmem>>, vector<7x64xf32>,
    %c90_101 = arith.constant 90 : index
    %c0_102 = arith.constant 0 : index
    %148 = tpu.strided_load %arg17[%c90_101, %c0_102] {strides = array<i32: 2, 1>} : memref<225x32xf32, #tpu.memory_space<vmem>>, vector<7x32xf32>
    %149 = arith.truncf %148 : vector<7x32xf32> to vector<7x32xbf16>
    %cst_103 = arith.constant dense<0.000000e+00> : vector<7x64xf32>
    %150 = tpu.matmul %149, %11, %cst_103 {dimension_numbers = #tpu.dot_dimension_numbers<[1], [0], [0], [1], [0, 0, 1, 1], [], []>} : vector<7x32xbf16>, vector<32x64xbf16>, vector<7x64xf32> -> vector<7x64xf32>
    %151 = arith.addf %30, %150 : vector<7x64xf32>
    %c91_104 = arith.constant 91 : index
    %c0_105 = arith.constant 0 : index
    %152 = tpu.strided_load %arg17[%c91_104, %c0_105] {strides = array<i32: 2, 1>} : memref<225x32xf32, #tpu.memory_space<vmem>>, vector<7x32xf32>
    %153 = arith.truncf %152 : vector<7x32xf32> to vector<7x32xbf16>
    %cst_106 = arith.constant dense<0.000000e+00> : vector<7x64xf32>
    %154 = tpu.matmul %153, %13, %cst_106 {dimension_numbers = #tpu.dot_dimension_numbers<[1], [0], [0], [1], [0, 0, 1, 1], [], []>} : vector<7x32xbf16>, vector<32x64xbf16>, vector<7x64xf32> -> vector<7x64xf32>
    %155 = arith.addf %151, %154 : vector<7x64xf32>
    %c92_107 = arith.constant 92 : index
    %c0_108 = arith.constant 0 : index
    %156 = tpu.strided_load %arg17[%c92_107, %c0_108] {strides = array<i32: 2, 1>} : memref<225x32xf32, #tpu.memory_space<vmem>>, vector<7x32xf32>
    %157 = arith.truncf %156 : vector<7x32xf32> to vector<7x32xbf16>
    %cst_109 = arith.constant dense<0.000000e+00> : vector<7x64xf32>
    %158 = tpu.matmul %157, %15, %cst_109 {dimension_numbers = #tpu.dot_dimension_numbers<[1], [0], [0], [1], [0, 0, 1, 1], [], []>} : vector<7x32xbf16>, vector<32x64xbf16>, vector<7x64xf32> -> vector<7x64xf32>
    %159 = arith.addf %155, %158 : vector<7x64xf32>
    %c105 = arith.constant 105 : index
    %c0_110 = arith.constant 0 : index
    %160 = tpu.strided_load %arg17[%c105, %c0_110] {strides = array<i32: 2, 1>} : memref<225x32xf32, #tpu.memory_space<vmem>>, vector<7x32xf32>
    %161 = arith.truncf %160 : vector<7x32xf32> to vector<7x32xbf16>
    %cst_111 = arith.constant dense<0.000000e+00> : vector<7x64xf32>
    %162 = tpu.matmul %161, %17, %cst_111 {dimension_numbers = #tpu.dot_dimension_numbers<[1], [0], [0], [1], [0, 0, 1, 1], [], []>} : vector<7x32xbf16>, vector<32x64xbf16>, vector<7x64xf32> -> vector<7x64xf32>
    %163 = arith.addf %159, %162 : vector<7x64xf32>
    %c106 = arith.constant 106 : index
    %c0_112 = arith.constant 0 : index
    %164 = tpu.strided_load %arg17[%c106, %c0_112] {strides = array<i32: 2, 1>} : memref<225x32xf32, #tpu.memory_space<vmem>>, vector<7x32xf32>
    %165 = arith.truncf %164 : vector<7x32xf32> to vector<7x32xbf16>
    %cst_113 = arith.constant dense<0.000000e+00> : vector<7x64xf32>
    %166 = tpu.matmul %165, %19, %cst_113 {dimension_numbers = #tpu.dot_dimension_numbers<[1], [0], [0], [1], [0, 0, 1, 1], [], []>} : vector<7x32xbf16>, vector<32x64xbf16>, vector<7x64xf32> -> vector<7x64xf32>
    %167 = arith.addf %163, %166 : vector<7x64xf32>
    %c107 = arith.constant 107 : index
    %c0_114 = arith.constant 0 : index
    %168 = tpu.strided_load %arg17[%c107, %c0_114] {strides = array<i32: 2, 1>} : memref<225x32xf32, #tpu.memory_space<vmem>>, vector<7x32xf32>
    %169 = arith.truncf %168 : vector<7x32xf32> to vector<7x32xbf16>
    %cst_115 = arith.constant dense<0.000000e+00> : vector<7x64xf32>
    %170 = tpu.matmul %169, %21, %cst_115 {dimension_numbers = #tpu.dot_dimension_numbers<[1], [0], [0], [1], [0, 0, 1, 1], [], []>} : vector<7x32xbf16>, vector<32x64xbf16>, vector<7x64xf32> -> vector<7x64xf32>
    %171 = arith.addf %167, %170 : vector<7x64xf32>
    %c120 = arith.constant 120 : index
    %c0_116 = arith.constant 0 : index
    %172 = tpu.strided_load %arg17[%c120, %c0_116] {strides = array<i32: 2, 1>} : memref<225x32xf32, #tpu.memory_space<vmem>>, vector<7x32xf32>
    %173 = arith.truncf %172 : vector<7x32xf32> to vector<7x32xbf16>
    %cst_117 = arith.constant dense<0.000000e+00> : vector<7x64xf32>
    %174 = tpu.matmul %173, %23, %cst_117 {dimension_numbers = #tpu.dot_dimension_numbers<[1], [0], [0], [1], [0, 0, 1, 1], [], []>} : vector<7x32xbf16>, vector<32x64xbf16>, vector<7x64xf32> -> vector<7x64xf32>
    %175 = arith.addf %171, %174 : vector<7x64xf32>
    %c121 = arith.constant 121 : index
    %c0_118 = arith.constant 0 : index
    %176 = tpu.strided_load %arg17[%c121, %c0_118] {strides = array<i32: 2, 1>} : memref<225x32xf32, #tpu.memory_space<vmem>>, vector<7x32xf32>
    %177 = arith.truncf %176 : vector<7x32xf32> to vector<7x32xbf16>
    %cst_119 = arith.constant dense<0.000000e+00> : vector<7x64xf32>
    %178 = tpu.matmul %177, %25, %cst_119 {dimension_numbers = #tpu.dot_dimension_numbers<[1], [0], [0], [1], [0, 0, 1, 1], [], []>} : vector<7x32xbf16>, vector<32x64xbf16>, vector<7x64xf32> -> vector<7x64xf32>
    %179 = arith.addf %175, %178 : vector<7x64xf32>
    %c122 = arith.constant 122 : index
    %c0_120 = arith.constant 0 : index
    %180 = tpu.strided_load %arg17[%c122, %c0_120] {strides = array<i32: 2, 1>} : memref<225x32xf32, #tpu.memory_space<vmem>>, vector<7x32xf32>
    %181 = arith.truncf %180 : vector<7x32xf32> to vector<7x32xbf16>
    %cst_121 = arith.constant dense<0.000000e+00> : vector<7x64xf32>
    %182 = tpu.matmul %181, %27, %cst_121 {dimension_numbers = #tpu.dot_dimension_numbers<[1], [0], [0], [1], [0, 0, 1, 1], [], []>} : vector<7x32xbf16>, vector<32x64xbf16>, vector<7x64xf32> -> vector<7x64xf32>
    %183 = arith.addf %179, %182 : vector<7x64xf32>
    %cst_122 = arith.constant 0.000000e+00 : f32
    %184 = vector.broadcast %cst_122 : f32 to vector<7x64xf32>
    %185 = arith.maximumf %183, %184 : vector<7x64xf32>
    %c21 = arith.constant 21 : index
    %c0_123 = arith.constant 0 : index
    %186 = vector.load %arg18[%c21, %c0_123] : memref<49x64xf32, #tpu.memory_space<vmem>>, vector<7x64xf32>
    tpu.vector_store %arg18[%c21, %c0_123], %185 {strides = array<i32>} : memref<49x64xf32, #tpu.memory_space<vmem>>, vector<7x64xf32>,
    %c120_124 = arith.constant 120 : index
    %c0_125 = arith.constant 0 : index
    %187 = tpu.strided_load %arg17[%c120_124, %c0_125] {strides = array<i32: 2, 1>} : memref<225x32xf32, #tpu.memory_space<vmem>>, vector<7x32xf32>
    %188 = arith.truncf %187 : vector<7x32xf32> to vector<7x32xbf16>
    %cst_126 = arith.constant dense<0.000000e+00> : vector<7x64xf32>
    %189 = tpu.matmul %188, %11, %cst_126 {dimension_numbers = #tpu.dot_dimension_numbers<[1], [0], [0], [1], [0, 0, 1, 1], [], []>} : vector<7x32xbf16>, vector<32x64xbf16>, vector<7x64xf32> -> vector<7x64xf32>
    %190 = arith.addf %30, %189 : vector<7x64xf32>
    %c121_127 = arith.constant 121 : index
    %c0_128 = arith.constant 0 : index
    %191 = tpu.strided_load %arg17[%c121_127, %c0_128] {strides = array<i32: 2, 1>} : memref<225x32xf32, #tpu.memory_space<vmem>>, vector<7x32xf32>
    %192 = arith.truncf %191 : vector<7x32xf32> to vector<7x32xbf16>
    %cst_129 = arith.constant dense<0.000000e+00> : vector<7x64xf32>
    %193 = tpu.matmul %192, %13, %cst_129 {dimension_numbers = #tpu.dot_dimension_numbers<[1], [0], [0], [1], [0, 0, 1, 1], [], []>} : vector<7x32xbf16>, vector<32x64xbf16>, vector<7x64xf32> -> vector<7x64xf32>
    %194 = arith.addf %190, %193 : vector<7x64xf32>
    %c122_130 = arith.constant 122 : index
    %c0_131 = arith.constant 0 : index
    %195 = tpu.strided_load %arg17[%c122_130, %c0_131] {strides = array<i32: 2, 1>} : memref<225x32xf32, #tpu.memory_space<vmem>>, vector<7x32xf32>
    %196 = arith.truncf %195 : vector<7x32xf32> to vector<7x32xbf16>
    %cst_132 = arith.constant dense<0.000000e+00> : vector<7x64xf32>
    %197 = tpu.matmul %196, %15, %cst_132 {dimension_numbers = #tpu.dot_dimension_numbers<[1], [0], [0], [1], [0, 0, 1, 1], [], []>} : vector<7x32xbf16>, vector<32x64xbf16>, vector<7x64xf32> -> vector<7x64xf32>
    %198 = arith.addf %194, %197 : vector<7x64xf32>
    %c135 = arith.constant 135 : index
    %c0_133 = arith.constant 0 : index
    %199 = tpu.strided_load %arg17[%c135, %c0_133] {strides = array<i32: 2, 1>} : memref<225x32xf32, #tpu.memory_space<vmem>>, vector<7x32xf32>
    %200 = arith.truncf %199 : vector<7x32xf32> to vector<7x32xbf16>
    %cst_134 = arith.constant dense<0.000000e+00> : vector<7x64xf32>
    %201 = tpu.matmul %200, %17, %cst_134 {dimension_numbers = #tpu.dot_dimension_numbers<[1], [0], [0], [1], [0, 0, 1, 1], [], []>} : vector<7x32xbf16>, vector<32x64xbf16>, vector<7x64xf32> -> vector<7x64xf32>
    %202 = arith.addf %198, %201 : vector<7x64xf32>
    %c136 = arith.constant 136 : index
    %c0_135 = arith.constant 0 : index
    %203 = tpu.strided_load %arg17[%c136, %c0_135] {strides = array<i32: 2, 1>} : memref<225x32xf32, #tpu.memory_space<vmem>>, vector<7x32xf32>
    %204 = arith.truncf %203 : vector<7x32xf32> to vector<7x32xbf16>
    %cst_136 = arith.constant dense<0.000000e+00> : vector<7x64xf32>
    %205 = tpu.matmul %204, %19, %cst_136 {dimension_numbers = #tpu.dot_dimension_numbers<[1], [0], [0], [1], [0, 0, 1, 1], [], []>} : vector<7x32xbf16>, vector<32x64xbf16>, vector<7x64xf32> -> vector<7x64xf32>
    %206 = arith.addf %202, %205 : vector<7x64xf32>
    %c137 = arith.constant 137 : index
    %c0_137 = arith.constant 0 : index
    %207 = tpu.strided_load %arg17[%c137, %c0_137] {strides = array<i32: 2, 1>} : memref<225x32xf32, #tpu.memory_space<vmem>>, vector<7x32xf32>
    %208 = arith.truncf %207 : vector<7x32xf32> to vector<7x32xbf16>
    %cst_138 = arith.constant dense<0.000000e+00> : vector<7x64xf32>
    %209 = tpu.matmul %208, %21, %cst_138 {dimension_numbers = #tpu.dot_dimension_numbers<[1], [0], [0], [1], [0, 0, 1, 1], [], []>} : vector<7x32xbf16>, vector<32x64xbf16>, vector<7x64xf32> -> vector<7x64xf32>
    %210 = arith.addf %206, %209 : vector<7x64xf32>
    %c150 = arith.constant 150 : index
    %c0_139 = arith.constant 0 : index
    %211 = tpu.strided_load %arg17[%c150, %c0_139] {strides = array<i32: 2, 1>} : memref<225x32xf32, #tpu.memory_space<vmem>>, vector<7x32xf32>
    %212 = arith.truncf %211 : vector<7x32xf32> to vector<7x32xbf16>
    %cst_140 = arith.constant dense<0.000000e+00> : vector<7x64xf32>
    %213 = tpu.matmul %212, %23, %cst_140 {dimension_numbers = #tpu.dot_dimension_numbers<[1], [0], [0], [1], [0, 0, 1, 1], [], []>} : vector<7x32xbf16>, vector<32x64xbf16>, vector<7x64xf32> -> vector<7x64xf32>
    %214 = arith.addf %210, %213 : vector<7x64xf32>
    %c151 = arith.constant 151 : index
    %c0_141 = arith.constant 0 : index
    %215 = tpu.strided_load %arg17[%c151, %c0_141] {strides = array<i32: 2, 1>} : memref<225x32xf32, #tpu.memory_space<vmem>>, vector<7x32xf32>
    %216 = arith.truncf %215 : vector<7x32xf32> to vector<7x32xbf16>
    %cst_142 = arith.constant dense<0.000000e+00> : vector<7x64xf32>
    %217 = tpu.matmul %216, %25, %cst_142 {dimension_numbers = #tpu.dot_dimension_numbers<[1], [0], [0], [1], [0, 0, 1, 1], [], []>} : vector<7x32xbf16>, vector<32x64xbf16>, vector<7x64xf32> -> vector<7x64xf32>
    %218 = arith.addf %214, %217 : vector<7x64xf32>
    %c152 = arith.constant 152 : index
    %c0_143 = arith.constant 0 : index
    %219 = tpu.strided_load %arg17[%c152, %c0_143] {strides = array<i32: 2, 1>} : memref<225x32xf32, #tpu.memory_space<vmem>>, vector<7x32xf32>
    %220 = arith.truncf %219 : vector<7x32xf32> to vector<7x32xbf16>
    %cst_144 = arith.constant dense<0.000000e+00> : vector<7x64xf32>
    %221 = tpu.matmul %220, %27, %cst_144 {dimension_numbers = #tpu.dot_dimension_numbers<[1], [0], [0], [1], [0, 0, 1, 1], [], []>} : vector<7x32xbf16>, vector<32x64xbf16>, vector<7x64xf32> -> vector<7x64xf32>
    %222 = arith.addf %218, %221 : vector<7x64xf32>
    %cst_145 = arith.constant 0.000000e+00 : f32
    %223 = vector.broadcast %cst_145 : f32 to vector<7x64xf32>
    %224 = arith.maximumf %222, %223 : vector<7x64xf32>
    %c28 = arith.constant 28 : index
    %c0_146 = arith.constant 0 : index
    %225 = vector.load %arg18[%c28, %c0_146] : memref<49x64xf32, #tpu.memory_space<vmem>>, vector<7x64xf32>
    tpu.vector_store %arg18[%c28, %c0_146], %224 {strides = array<i32>} : memref<49x64xf32, #tpu.memory_space<vmem>>, vector<7x64xf32>,
    %c150_147 = arith.constant 150 : index
    %c0_148 = arith.constant 0 : index
    %226 = tpu.strided_load %arg17[%c150_147, %c0_148] {strides = array<i32: 2, 1>} : memref<225x32xf32, #tpu.memory_space<vmem>>, vector<7x32xf32>
    %227 = arith.truncf %226 : vector<7x32xf32> to vector<7x32xbf16>
    %cst_149 = arith.constant dense<0.000000e+00> : vector<7x64xf32>
    %228 = tpu.matmul %227, %11, %cst_149 {dimension_numbers = #tpu.dot_dimension_numbers<[1], [0], [0], [1], [0, 0, 1, 1], [], []>} : vector<7x32xbf16>, vector<32x64xbf16>, vector<7x64xf32> -> vector<7x64xf32>
    %229 = arith.addf %30, %228 : vector<7x64xf32>
    %c151_150 = arith.constant 151 : index
    %c0_151 = arith.constant 0 : index
    %230 = tpu.strided_load %arg17[%c151_150, %c0_151] {strides = array<i32: 2, 1>} : memref<225x32xf32, #tpu.memory_space<vmem>>, vector<7x32xf32>
    %231 = arith.truncf %230 : vector<7x32xf32> to vector<7x32xbf16>
    %cst_152 = arith.constant dense<0.000000e+00> : vector<7x64xf32>
    %232 = tpu.matmul %231, %13, %cst_152 {dimension_numbers = #tpu.dot_dimension_numbers<[1], [0], [0], [1], [0, 0, 1, 1], [], []>} : vector<7x32xbf16>, vector<32x64xbf16>, vector<7x64xf32> -> vector<7x64xf32>
    %233 = arith.addf %229, %232 : vector<7x64xf32>
    %c152_153 = arith.constant 152 : index
    %c0_154 = arith.constant 0 : index
    %234 = tpu.strided_load %arg17[%c152_153, %c0_154] {strides = array<i32: 2, 1>} : memref<225x32xf32, #tpu.memory_space<vmem>>, vector<7x32xf32>
    %235 = arith.truncf %234 : vector<7x32xf32> to vector<7x32xbf16>
    %cst_155 = arith.constant dense<0.000000e+00> : vector<7x64xf32>
    %236 = tpu.matmul %235, %15, %cst_155 {dimension_numbers = #tpu.dot_dimension_numbers<[1], [0], [0], [1], [0, 0, 1, 1], [], []>} : vector<7x32xbf16>, vector<32x64xbf16>, vector<7x64xf32> -> vector<7x64xf32>
    %237 = arith.addf %233, %236 : vector<7x64xf32>
    %c165 = arith.constant 165 : index
    %c0_156 = arith.constant 0 : index
    %238 = tpu.strided_load %arg17[%c165, %c0_156] {strides = array<i32: 2, 1>} : memref<225x32xf32, #tpu.memory_space<vmem>>, vector<7x32xf32>
    %239 = arith.truncf %238 : vector<7x32xf32> to vector<7x32xbf16>
    %cst_157 = arith.constant dense<0.000000e+00> : vector<7x64xf32>
    %240 = tpu.matmul %239, %17, %cst_157 {dimension_numbers = #tpu.dot_dimension_numbers<[1], [0], [0], [1], [0, 0, 1, 1], [], []>} : vector<7x32xbf16>, vector<32x64xbf16>, vector<7x64xf32> -> vector<7x64xf32>
    %241 = arith.addf %237, %240 : vector<7x64xf32>
    %c166 = arith.constant 166 : index
    %c0_158 = arith.constant 0 : index
    %242 = tpu.strided_load %arg17[%c166, %c0_158] {strides = array<i32: 2, 1>} : memref<225x32xf32, #tpu.memory_space<vmem>>, vector<7x32xf32>
    %243 = arith.truncf %242 : vector<7x32xf32> to vector<7x32xbf16>
    %cst_159 = arith.constant dense<0.000000e+00> : vector<7x64xf32>
    %244 = tpu.matmul %243, %19, %cst_159 {dimension_numbers = #tpu.dot_dimension_numbers<[1], [0], [0], [1], [0, 0, 1, 1], [], []>} : vector<7x32xbf16>, vector<32x64xbf16>, vector<7x64xf32> -> vector<7x64xf32>
    %245 = arith.addf %241, %244 : vector<7x64xf32>
    %c167 = arith.constant 167 : index
    %c0_160 = arith.constant 0 : index
    %246 = tpu.strided_load %arg17[%c167, %c0_160] {strides = array<i32: 2, 1>} : memref<225x32xf32, #tpu.memory_space<vmem>>, vector<7x32xf32>
    %247 = arith.truncf %246 : vector<7x32xf32> to vector<7x32xbf16>
    %cst_161 = arith.constant dense<0.000000e+00> : vector<7x64xf32>
    %248 = tpu.matmul %247, %21, %cst_161 {dimension_numbers = #tpu.dot_dimension_numbers<[1], [0], [0], [1], [0, 0, 1, 1], [], []>} : vector<7x32xbf16>, vector<32x64xbf16>, vector<7x64xf32> -> vector<7x64xf32>
    %249 = arith.addf %245, %248 : vector<7x64xf32>
    %c180 = arith.constant 180 : index
    %c0_162 = arith.constant 0 : index
    %250 = tpu.strided_load %arg17[%c180, %c0_162] {strides = array<i32: 2, 1>} : memref<225x32xf32, #tpu.memory_space<vmem>>, vector<7x32xf32>
    %251 = arith.truncf %250 : vector<7x32xf32> to vector<7x32xbf16>
    %cst_163 = arith.constant dense<0.000000e+00> : vector<7x64xf32>
    %252 = tpu.matmul %251, %23, %cst_163 {dimension_numbers = #tpu.dot_dimension_numbers<[1], [0], [0], [1], [0, 0, 1, 1], [], []>} : vector<7x32xbf16>, vector<32x64xbf16>, vector<7x64xf32> -> vector<7x64xf32>
    %253 = arith.addf %249, %252 : vector<7x64xf32>
    %c181 = arith.constant 181 : index
    %c0_164 = arith.constant 0 : index
    %254 = tpu.strided_load %arg17[%c181, %c0_164] {strides = array<i32: 2, 1>} : memref<225x32xf32, #tpu.memory_space<vmem>>, vector<7x32xf32>
    %255 = arith.truncf %254 : vector<7x32xf32> to vector<7x32xbf16>
    %cst_165 = arith.constant dense<0.000000e+00> : vector<7x64xf32>
    %256 = tpu.matmul %255, %25, %cst_165 {dimension_numbers = #tpu.dot_dimension_numbers<[1], [0], [0], [1], [0, 0, 1, 1], [], []>} : vector<7x32xbf16>, vector<32x64xbf16>, vector<7x64xf32> -> vector<7x64xf32>
    %257 = arith.addf %253, %256 : vector<7x64xf32>
    %c182 = arith.constant 182 : index
    %c0_166 = arith.constant 0 : index
    %258 = tpu.strided_load %arg17[%c182, %c0_166] {strides = array<i32: 2, 1>} : memref<225x32xf32, #tpu.memory_space<vmem>>, vector<7x32xf32>
    %259 = arith.truncf %258 : vector<7x32xf32> to vector<7x32xbf16>
    %cst_167 = arith.constant dense<0.000000e+00> : vector<7x64xf32>
    %260 = tpu.matmul %259, %27, %cst_167 {dimension_numbers = #tpu.dot_dimension_numbers<[1], [0], [0], [1], [0, 0, 1, 1], [], []>} : vector<7x32xbf16>, vector<32x64xbf16>, vector<7x64xf32> -> vector<7x64xf32>
    %261 = arith.addf %257, %260 : vector<7x64xf32>
    %cst_168 = arith.constant 0.000000e+00 : f32
    %262 = vector.broadcast %cst_168 : f32 to vector<7x64xf32>
    %263 = arith.maximumf %261, %262 : vector<7x64xf32>
    %c35 = arith.constant 35 : index
    %c0_169 = arith.constant 0 : index
    %264 = vector.load %arg18[%c35, %c0_169] : memref<49x64xf32, #tpu.memory_space<vmem>>, vector<7x64xf32>
    tpu.vector_store %arg18[%c35, %c0_169], %263 {strides = array<i32>} : memref<49x64xf32, #tpu.memory_space<vmem>>, vector<7x64xf32>,
    %c180_170 = arith.constant 180 : index
    %c0_171 = arith.constant 0 : index
    %265 = tpu.strided_load %arg17[%c180_170, %c0_171] {strides = array<i32: 2, 1>} : memref<225x32xf32, #tpu.memory_space<vmem>>, vector<7x32xf32>
    %266 = arith.truncf %265 : vector<7x32xf32> to vector<7x32xbf16>
    %cst_172 = arith.constant dense<0.000000e+00> : vector<7x64xf32>
    %267 = tpu.matmul %266, %11, %cst_172 {dimension_numbers = #tpu.dot_dimension_numbers<[1], [0], [0], [1], [0, 0, 1, 1], [], []>} : vector<7x32xbf16>, vector<32x64xbf16>, vector<7x64xf32> -> vector<7x64xf32>
    %268 = arith.addf %30, %267 : vector<7x64xf32>
    %c181_173 = arith.constant 181 : index
    %c0_174 = arith.constant 0 : index
    %269 = tpu.strided_load %arg17[%c181_173, %c0_174] {strides = array<i32: 2, 1>} : memref<225x32xf32, #tpu.memory_space<vmem>>, vector<7x32xf32>
    %270 = arith.truncf %269 : vector<7x32xf32> to vector<7x32xbf16>
    %cst_175 = arith.constant dense<0.000000e+00> : vector<7x64xf32>
    %271 = tpu.matmul %270, %13, %cst_175 {dimension_numbers = #tpu.dot_dimension_numbers<[1], [0], [0], [1], [0, 0, 1, 1], [], []>} : vector<7x32xbf16>, vector<32x64xbf16>, vector<7x64xf32> -> vector<7x64xf32>
    %272 = arith.addf %268, %271 : vector<7x64xf32>
    %c182_176 = arith.constant 182 : index
    %c0_177 = arith.constant 0 : index
    %273 = tpu.strided_load %arg17[%c182_176, %c0_177] {strides = array<i32: 2, 1>} : memref<225x32xf32, #tpu.memory_space<vmem>>, vector<7x32xf32>
    %274 = arith.truncf %273 : vector<7x32xf32> to vector<7x32xbf16>
    %cst_178 = arith.constant dense<0.000000e+00> : vector<7x64xf32>
    %275 = tpu.matmul %274, %15, %cst_178 {dimension_numbers = #tpu.dot_dimension_numbers<[1], [0], [0], [1], [0, 0, 1, 1], [], []>} : vector<7x32xbf16>, vector<32x64xbf16>, vector<7x64xf32> -> vector<7x64xf32>
    %276 = arith.addf %272, %275 : vector<7x64xf32>
    %c195 = arith.constant 195 : index
    %c0_179 = arith.constant 0 : index
    %277 = tpu.strided_load %arg17[%c195, %c0_179] {strides = array<i32: 2, 1>} : memref<225x32xf32, #tpu.memory_space<vmem>>, vector<7x32xf32>
    %278 = arith.truncf %277 : vector<7x32xf32> to vector<7x32xbf16>
    %cst_180 = arith.constant dense<0.000000e+00> : vector<7x64xf32>
    %279 = tpu.matmul %278, %17, %cst_180 {dimension_numbers = #tpu.dot_dimension_numbers<[1], [0], [0], [1], [0, 0, 1, 1], [], []>} : vector<7x32xbf16>, vector<32x64xbf16>, vector<7x64xf32> -> vector<7x64xf32>
    %280 = arith.addf %276, %279 : vector<7x64xf32>
    %c196 = arith.constant 196 : index
    %c0_181 = arith.constant 0 : index
    %281 = tpu.strided_load %arg17[%c196, %c0_181] {strides = array<i32: 2, 1>} : memref<225x32xf32, #tpu.memory_space<vmem>>, vector<7x32xf32>
    %282 = arith.truncf %281 : vector<7x32xf32> to vector<7x32xbf16>
    %cst_182 = arith.constant dense<0.000000e+00> : vector<7x64xf32>
    %283 = tpu.matmul %282, %19, %cst_182 {dimension_numbers = #tpu.dot_dimension_numbers<[1], [0], [0], [1], [0, 0, 1, 1], [], []>} : vector<7x32xbf16>, vector<32x64xbf16>, vector<7x64xf32> -> vector<7x64xf32>
    %284 = arith.addf %280, %283 : vector<7x64xf32>
    %c197 = arith.constant 197 : index
    %c0_183 = arith.constant 0 : index
    %285 = tpu.strided_load %arg17[%c197, %c0_183] {strides = array<i32: 2, 1>} : memref<225x32xf32, #tpu.memory_space<vmem>>, vector<7x32xf32>
    %286 = arith.truncf %285 : vector<7x32xf32> to vector<7x32xbf16>
    %cst_184 = arith.constant dense<0.000000e+00> : vector<7x64xf32>
    %287 = tpu.matmul %286, %21, %cst_184 {dimension_numbers = #tpu.dot_dimension_numbers<[1], [0], [0], [1], [0, 0, 1, 1], [], []>} : vector<7x32xbf16>, vector<32x64xbf16>, vector<7x64xf32> -> vector<7x64xf32>
    %288 = arith.addf %284, %287 : vector<7x64xf32>
    %c210 = arith.constant 210 : index
    %c0_185 = arith.constant 0 : index
    %289 = tpu.strided_load %arg17[%c210, %c0_185] {strides = array<i32: 2, 1>} : memref<225x32xf32, #tpu.memory_space<vmem>>, vector<7x32xf32>
    %290 = arith.truncf %289 : vector<7x32xf32> to vector<7x32xbf16>
    %cst_186 = arith.constant dense<0.000000e+00> : vector<7x64xf32>
    %291 = tpu.matmul %290, %23, %cst_186 {dimension_numbers = #tpu.dot_dimension_numbers<[1], [0], [0], [1], [0, 0, 1, 1], [], []>} : vector<7x32xbf16>, vector<32x64xbf16>, vector<7x64xf32> -> vector<7x64xf32>
    %292 = arith.addf %288, %291 : vector<7x64xf32>
    %c211 = arith.constant 211 : index
    %c0_187 = arith.constant 0 : index
    %293 = tpu.strided_load %arg17[%c211, %c0_187] {strides = array<i32: 2, 1>} : memref<225x32xf32, #tpu.memory_space<vmem>>, vector<7x32xf32>
    %294 = arith.truncf %293 : vector<7x32xf32> to vector<7x32xbf16>
    %cst_188 = arith.constant dense<0.000000e+00> : vector<7x64xf32>
    %295 = tpu.matmul %294, %25, %cst_188 {dimension_numbers = #tpu.dot_dimension_numbers<[1], [0], [0], [1], [0, 0, 1, 1], [], []>} : vector<7x32xbf16>, vector<32x64xbf16>, vector<7x64xf32> -> vector<7x64xf32>
    %296 = arith.addf %292, %295 : vector<7x64xf32>
    %c212 = arith.constant 212 : index
    %c0_189 = arith.constant 0 : index
    %297 = tpu.strided_load %arg17[%c212, %c0_189] {strides = array<i32: 2, 1>} : memref<225x32xf32, #tpu.memory_space<vmem>>, vector<7x32xf32>
    %298 = arith.truncf %297 : vector<7x32xf32> to vector<7x32xbf16>
    %cst_190 = arith.constant dense<0.000000e+00> : vector<7x64xf32>
    %299 = tpu.matmul %298, %27, %cst_190 {dimension_numbers = #tpu.dot_dimension_numbers<[1], [0], [0], [1], [0, 0, 1, 1], [], []>} : vector<7x32xbf16>, vector<32x64xbf16>, vector<7x64xf32> -> vector<7x64xf32>
    %300 = arith.addf %296, %299 : vector<7x64xf32>
    %cst_191 = arith.constant 0.000000e+00 : f32
    %301 = vector.broadcast %cst_191 : f32 to vector<7x64xf32>
    %302 = arith.maximumf %300, %301 : vector<7x64xf32>
    %c42 = arith.constant 42 : index
    %c0_192 = arith.constant 0 : index
    %303 = vector.load %arg18[%c42, %c0_192] : memref<49x64xf32, #tpu.memory_space<vmem>>, vector<7x64xf32>
    tpu.vector_store %arg18[%c42, %c0_192], %302 {strides = array<i32>} : memref<49x64xf32, #tpu.memory_space<vmem>>, vector<7x64xf32>,
    %c0_193 = arith.constant 0 : index
    %c0_194 = arith.constant 0 : index
    %c0_195 = arith.constant 0 : index
    %304 = vector.load %arg6[%c0_193, %c0_194, %c0_195] : memref<9x64x128xbf16, #tpu.memory_space<vmem>>, vector<1x64x128xbf16>
    %305 = vector.shape_cast %304 : vector<1x64x128xbf16> to vector<64x128xbf16>
    %c1_196 = arith.constant 1 : index
    %c0_197 = arith.constant 0 : index
    %c0_198 = arith.constant 0 : index
    %306 = vector.load %arg6[%c1_196, %c0_197, %c0_198] : memref<9x64x128xbf16, #tpu.memory_space<vmem>>, vector<1x64x128xbf16>
    %307 = vector.shape_cast %306 : vector<1x64x128xbf16> to vector<64x128xbf16>
    %c2_199 = arith.constant 2 : index
    %c0_200 = arith.constant 0 : index
    %c0_201 = arith.constant 0 : index
    %308 = vector.load %arg6[%c2_199, %c0_200, %c0_201] : memref<9x64x128xbf16, #tpu.memory_space<vmem>>, vector<1x64x128xbf16>
    %309 = vector.shape_cast %308 : vector<1x64x128xbf16> to vector<64x128xbf16>
    %c3_202 = arith.constant 3 : index
    %c0_203 = arith.constant 0 : index
    %c0_204 = arith.constant 0 : index
    %310 = vector.load %arg6[%c3_202, %c0_203, %c0_204] : memref<9x64x128xbf16, #tpu.memory_space<vmem>>, vector<1x64x128xbf16>
    %311 = vector.shape_cast %310 : vector<1x64x128xbf16> to vector<64x128xbf16>
    %c4_205 = arith.constant 4 : index
    %c0_206 = arith.constant 0 : index
    %c0_207 = arith.constant 0 : index
    %312 = vector.load %arg6[%c4_205, %c0_206, %c0_207] : memref<9x64x128xbf16, #tpu.memory_space<vmem>>, vector<1x64x128xbf16>
    %313 = vector.shape_cast %312 : vector<1x64x128xbf16> to vector<64x128xbf16>
    %c5_208 = arith.constant 5 : index
    %c0_209 = arith.constant 0 : index
    %c0_210 = arith.constant 0 : index
    %314 = vector.load %arg6[%c5_208, %c0_209, %c0_210] : memref<9x64x128xbf16, #tpu.memory_space<vmem>>, vector<1x64x128xbf16>
    %315 = vector.shape_cast %314 : vector<1x64x128xbf16> to vector<64x128xbf16>
    %c6_211 = arith.constant 6 : index
    %c0_212 = arith.constant 0 : index
    %c0_213 = arith.constant 0 : index
    %316 = vector.load %arg6[%c6_211, %c0_212, %c0_213] : memref<9x64x128xbf16, #tpu.memory_space<vmem>>, vector<1x64x128xbf16>
    %317 = vector.shape_cast %316 : vector<1x64x128xbf16> to vector<64x128xbf16>
    %c7_214 = arith.constant 7 : index
    %c0_215 = arith.constant 0 : index
    %c0_216 = arith.constant 0 : index
    %318 = vector.load %arg6[%c7_214, %c0_215, %c0_216] : memref<9x64x128xbf16, #tpu.memory_space<vmem>>, vector<1x64x128xbf16>
    %319 = vector.shape_cast %318 : vector<1x64x128xbf16> to vector<64x128xbf16>
    %c8_217 = arith.constant 8 : index
    %c0_218 = arith.constant 0 : index
    %c0_219 = arith.constant 0 : index
    %320 = vector.load %arg6[%c8_217, %c0_218, %c0_219] : memref<9x64x128xbf16, #tpu.memory_space<vmem>>, vector<1x64x128xbf16>
    %321 = vector.shape_cast %320 : vector<1x64x128xbf16> to vector<64x128xbf16>
    %c0_220 = arith.constant 0 : index
    %c0_221 = arith.constant 0 : index
    %322 = vector.load %arg7[%c0_220, %c0_221] : memref<1x128xf32, #tpu.memory_space<vmem>>, vector<1x128xf32>
    %323 = vector.shape_cast %322 : vector<1x128xf32> to vector<1x128xf32>
    %324 = vector.broadcast %323 : vector<1x128xf32> to vector<3x128xf32>
    %c0_222 = arith.constant 0 : index
    %c0_223 = arith.constant 0 : index
    %325 = tpu.strided_load %arg18[%c0_222, %c0_223] {strides = array<i32: 2, 1>} : memref<49x64xf32, #tpu.memory_space<vmem>>, vector<3x64xf32>
    %326 = arith.truncf %325 : vector<3x64xf32> to vector<3x64xbf16>
    %cst_224 = arith.constant dense<0.000000e+00> : vector<3x128xf32>
    %327 = tpu.matmul %326, %305, %cst_224 {dimension_numbers = #tpu.dot_dimension_numbers<[1], [0], [0], [1], [0, 0, 1, 1], [], []>} : vector<3x64xbf16>, vector<64x128xbf16>, vector<3x128xf32> -> vector<3x128xf32>
    %328 = arith.addf %324, %327 : vector<3x128xf32>
    %c1_225 = arith.constant 1 : index
    %c0_226 = arith.constant 0 : index
    %329 = tpu.strided_load %arg18[%c1_225, %c0_226] {strides = array<i32: 2, 1>} : memref<49x64xf32, #tpu.memory_space<vmem>>, vector<3x64xf32>
    %330 = arith.truncf %329 : vector<3x64xf32> to vector<3x64xbf16>
    %cst_227 = arith.constant dense<0.000000e+00> : vector<3x128xf32>
    %331 = tpu.matmul %330, %307, %cst_227 {dimension_numbers = #tpu.dot_dimension_numbers<[1], [0], [0], [1], [0, 0, 1, 1], [], []>} : vector<3x64xbf16>, vector<64x128xbf16>, vector<3x128xf32> -> vector<3x128xf32>
    %332 = arith.addf %328, %331 : vector<3x128xf32>
    %c2_228 = arith.constant 2 : index
    %c0_229 = arith.constant 0 : index
    %333 = tpu.strided_load %arg18[%c2_228, %c0_229] {strides = array<i32: 2, 1>} : memref<49x64xf32, #tpu.memory_space<vmem>>, vector<3x64xf32>
    %334 = arith.truncf %333 : vector<3x64xf32> to vector<3x64xbf16>
    %cst_230 = arith.constant dense<0.000000e+00> : vector<3x128xf32>
    %335 = tpu.matmul %334, %309, %cst_230 {dimension_numbers = #tpu.dot_dimension_numbers<[1], [0], [0], [1], [0, 0, 1, 1], [], []>} : vector<3x64xbf16>, vector<64x128xbf16>, vector<3x128xf32> -> vector<3x128xf32>
    %336 = arith.addf %332, %335 : vector<3x128xf32>
    %c7_231 = arith.constant 7 : index
    %c0_232 = arith.constant 0 : index
    %337 = tpu.strided_load %arg18[%c7_231, %c0_232] {strides = array<i32: 2, 1>} : memref<49x64xf32, #tpu.memory_space<vmem>>, vector<3x64xf32>
    %338 = arith.truncf %337 : vector<3x64xf32> to vector<3x64xbf16>
    %cst_233 = arith.constant dense<0.000000e+00> : vector<3x128xf32>
    %339 = tpu.matmul %338, %311, %cst_233 {dimension_numbers = #tpu.dot_dimension_numbers<[1], [0], [0], [1], [0, 0, 1, 1], [], []>} : vector<3x64xbf16>, vector<64x128xbf16>, vector<3x128xf32> -> vector<3x128xf32>
    %340 = arith.addf %336, %339 : vector<3x128xf32>
    %c8_234 = arith.constant 8 : index
    %c0_235 = arith.constant 0 : index
    %341 = tpu.strided_load %arg18[%c8_234, %c0_235] {strides = array<i32: 2, 1>} : memref<49x64xf32, #tpu.memory_space<vmem>>, vector<3x64xf32>
    %342 = arith.truncf %341 : vector<3x64xf32> to vector<3x64xbf16>
    %cst_236 = arith.constant dense<0.000000e+00> : vector<3x128xf32>
    %343 = tpu.matmul %342, %313, %cst_236 {dimension_numbers = #tpu.dot_dimension_numbers<[1], [0], [0], [1], [0, 0, 1, 1], [], []>} : vector<3x64xbf16>, vector<64x128xbf16>, vector<3x128xf32> -> vector<3x128xf32>
    %344 = arith.addf %340, %343 : vector<3x128xf32>
    %c9 = arith.constant 9 : index
    %c0_237 = arith.constant 0 : index
    %345 = tpu.strided_load %arg18[%c9, %c0_237] {strides = array<i32: 2, 1>} : memref<49x64xf32, #tpu.memory_space<vmem>>, vector<3x64xf32>
    %346 = arith.truncf %345 : vector<3x64xf32> to vector<3x64xbf16>
    %cst_238 = arith.constant dense<0.000000e+00> : vector<3x128xf32>
    %347 = tpu.matmul %346, %315, %cst_238 {dimension_numbers = #tpu.dot_dimension_numbers<[1], [0], [0], [1], [0, 0, 1, 1], [], []>} : vector<3x64xbf16>, vector<64x128xbf16>, vector<3x128xf32> -> vector<3x128xf32>
    %348 = arith.addf %344, %347 : vector<3x128xf32>
    %c14_239 = arith.constant 14 : index
    %c0_240 = arith.constant 0 : index
    %349 = tpu.strided_load %arg18[%c14_239, %c0_240] {strides = array<i32: 2, 1>} : memref<49x64xf32, #tpu.memory_space<vmem>>, vector<3x64xf32>
    %350 = arith.truncf %349 : vector<3x64xf32> to vector<3x64xbf16>
    %cst_241 = arith.constant dense<0.000000e+00> : vector<3x128xf32>
    %351 = tpu.matmul %350, %317, %cst_241 {dimension_numbers = #tpu.dot_dimension_numbers<[1], [0], [0], [1], [0, 0, 1, 1], [], []>} : vector<3x64xbf16>, vector<64x128xbf16>, vector<3x128xf32> -> vector<3x128xf32>
    %352 = arith.addf %348, %351 : vector<3x128xf32>
    %c15_242 = arith.constant 15 : index
    %c0_243 = arith.constant 0 : index
    %353 = tpu.strided_load %arg18[%c15_242, %c0_243] {strides = array<i32: 2, 1>} : memref<49x64xf32, #tpu.memory_space<vmem>>, vector<3x64xf32>
    %354 = arith.truncf %353 : vector<3x64xf32> to vector<3x64xbf16>
    %cst_244 = arith.constant dense<0.000000e+00> : vector<3x128xf32>
    %355 = tpu.matmul %354, %319, %cst_244 {dimension_numbers = #tpu.dot_dimension_numbers<[1], [0], [0], [1], [0, 0, 1, 1], [], []>} : vector<3x64xbf16>, vector<64x128xbf16>, vector<3x128xf32> -> vector<3x128xf32>
    %356 = arith.addf %352, %355 : vector<3x128xf32>
    %c16_245 = arith.constant 16 : index
    %c0_246 = arith.constant 0 : index
    %357 = tpu.strided_load %arg18[%c16_245, %c0_246] {strides = array<i32: 2, 1>} : memref<49x64xf32, #tpu.memory_space<vmem>>, vector<3x64xf32>
    %358 = arith.truncf %357 : vector<3x64xf32> to vector<3x64xbf16>
    %cst_247 = arith.constant dense<0.000000e+00> : vector<3x128xf32>
    %359 = tpu.matmul %358, %321, %cst_247 {dimension_numbers = #tpu.dot_dimension_numbers<[1], [0], [0], [1], [0, 0, 1, 1], [], []>} : vector<3x64xbf16>, vector<64x128xbf16>, vector<3x128xf32> -> vector<3x128xf32>
    %360 = arith.addf %356, %359 : vector<3x128xf32>
    %cst_248 = arith.constant 0.000000e+00 : f32
    %361 = vector.broadcast %cst_248 : f32 to vector<3x128xf32>
    %362 = arith.maximumf %360, %361 : vector<3x128xf32>
    %c0_249 = arith.constant 0 : index
    %c0_250 = arith.constant 0 : index
    %363 = vector.load %arg19[%c0_249, %c0_250] : memref<9x128xf32, #tpu.memory_space<vmem>>, vector<3x128xf32>
    tpu.vector_store %arg19[%c0_249, %c0_250], %362 {strides = array<i32>} : memref<9x128xf32, #tpu.memory_space<vmem>>, vector<3x128xf32>,
    %c14_251 = arith.constant 14 : index
    %c0_252 = arith.constant 0 : index
    %364 = tpu.strided_load %arg18[%c14_251, %c0_252] {strides = array<i32: 2, 1>} : memref<49x64xf32, #tpu.memory_space<vmem>>, vector<3x64xf32>
    %365 = arith.truncf %364 : vector<3x64xf32> to vector<3x64xbf16>
    %cst_253 = arith.constant dense<0.000000e+00> : vector<3x128xf32>
    %366 = tpu.matmul %365, %305, %cst_253 {dimension_numbers = #tpu.dot_dimension_numbers<[1], [0], [0], [1], [0, 0, 1, 1], [], []>} : vector<3x64xbf16>, vector<64x128xbf16>, vector<3x128xf32> -> vector<3x128xf32>
    %367 = arith.addf %324, %366 : vector<3x128xf32>
    %c15_254 = arith.constant 15 : index
    %c0_255 = arith.constant 0 : index
    %368 = tpu.strided_load %arg18[%c15_254, %c0_255] {strides = array<i32: 2, 1>} : memref<49x64xf32, #tpu.memory_space<vmem>>, vector<3x64xf32>
    %369 = arith.truncf %368 : vector<3x64xf32> to vector<3x64xbf16>
    %cst_256 = arith.constant dense<0.000000e+00> : vector<3x128xf32>
    %370 = tpu.matmul %369, %307, %cst_256 {dimension_numbers = #tpu.dot_dimension_numbers<[1], [0], [0], [1], [0, 0, 1, 1], [], []>} : vector<3x64xbf16>, vector<64x128xbf16>, vector<3x128xf32> -> vector<3x128xf32>
    %371 = arith.addf %367, %370 : vector<3x128xf32>
    %c16_257 = arith.constant 16 : index
    %c0_258 = arith.constant 0 : index
    %372 = tpu.strided_load %arg18[%c16_257, %c0_258] {strides = array<i32: 2, 1>} : memref<49x64xf32, #tpu.memory_space<vmem>>, vector<3x64xf32>
    %373 = arith.truncf %372 : vector<3x64xf32> to vector<3x64xbf16>
    %cst_259 = arith.constant dense<0.000000e+00> : vector<3x128xf32>
    %374 = tpu.matmul %373, %309, %cst_259 {dimension_numbers = #tpu.dot_dimension_numbers<[1], [0], [0], [1], [0, 0, 1, 1], [], []>} : vector<3x64xbf16>, vector<64x128xbf16>, vector<3x128xf32> -> vector<3x128xf32>
    %375 = arith.addf %371, %374 : vector<3x128xf32>
    %c21_260 = arith.constant 21 : index
    %c0_261 = arith.constant 0 : index
    %376 = tpu.strided_load %arg18[%c21_260, %c0_261] {strides = array<i32: 2, 1>} : memref<49x64xf32, #tpu.memory_space<vmem>>, vector<3x64xf32>
    %377 = arith.truncf %376 : vector<3x64xf32> to vector<3x64xbf16>
    %cst_262 = arith.constant dense<0.000000e+00> : vector<3x128xf32>
    %378 = tpu.matmul %377, %311, %cst_262 {dimension_numbers = #tpu.dot_dimension_numbers<[1], [0], [0], [1], [0, 0, 1, 1], [], []>} : vector<3x64xbf16>, vector<64x128xbf16>, vector<3x128xf32> -> vector<3x128xf32>
    %379 = arith.addf %375, %378 : vector<3x128xf32>
    %c22 = arith.constant 22 : index
    %c0_263 = arith.constant 0 : index
    %380 = tpu.strided_load %arg18[%c22, %c0_263] {strides = array<i32: 2, 1>} : memref<49x64xf32, #tpu.memory_space<vmem>>, vector<3x64xf32>
    %381 = arith.truncf %380 : vector<3x64xf32> to vector<3x64xbf16>
    %cst_264 = arith.constant dense<0.000000e+00> : vector<3x128xf32>
    %382 = tpu.matmul %381, %313, %cst_264 {dimension_numbers = #tpu.dot_dimension_numbers<[1], [0], [0], [1], [0, 0, 1, 1], [], []>} : vector<3x64xbf16>, vector<64x128xbf16>, vector<3x128xf32> -> vector<3x128xf32>
    %383 = arith.addf %379, %382 : vector<3x128xf32>
    %c23 = arith.constant 23 : index
    %c0_265 = arith.constant 0 : index
    %384 = tpu.strided_load %arg18[%c23, %c0_265] {strides = array<i32: 2, 1>} : memref<49x64xf32, #tpu.memory_space<vmem>>, vector<3x64xf32>
    %385 = arith.truncf %384 : vector<3x64xf32> to vector<3x64xbf16>
    %cst_266 = arith.constant dense<0.000000e+00> : vector<3x128xf32>
    %386 = tpu.matmul %385, %315, %cst_266 {dimension_numbers = #tpu.dot_dimension_numbers<[1], [0], [0], [1], [0, 0, 1, 1], [], []>} : vector<3x64xbf16>, vector<64x128xbf16>, vector<3x128xf32> -> vector<3x128xf32>
    %387 = arith.addf %383, %386 : vector<3x128xf32>
    %c28_267 = arith.constant 28 : index
    %c0_268 = arith.constant 0 : index
    %388 = tpu.strided_load %arg18[%c28_267, %c0_268] {strides = array<i32: 2, 1>} : memref<49x64xf32, #tpu.memory_space<vmem>>, vector<3x64xf32>
    %389 = arith.truncf %388 : vector<3x64xf32> to vector<3x64xbf16>
    %cst_269 = arith.constant dense<0.000000e+00> : vector<3x128xf32>
    %390 = tpu.matmul %389, %317, %cst_269 {dimension_numbers = #tpu.dot_dimension_numbers<[1], [0], [0], [1], [0, 0, 1, 1], [], []>} : vector<3x64xbf16>, vector<64x128xbf16>, vector<3x128xf32> -> vector<3x128xf32>
    %391 = arith.addf %387, %390 : vector<3x128xf32>
    %c29 = arith.constant 29 : index
    %c0_270 = arith.constant 0 : index
    %392 = tpu.strided_load %arg18[%c29, %c0_270] {strides = array<i32: 2, 1>} : memref<49x64xf32, #tpu.memory_space<vmem>>, vector<3x64xf32>
    %393 = arith.truncf %392 : vector<3x64xf32> to vector<3x64xbf16>
    %cst_271 = arith.constant dense<0.000000e+00> : vector<3x128xf32>
    %394 = tpu.matmul %393, %319, %cst_271 {dimension_numbers = #tpu.dot_dimension_numbers<[1], [0], [0], [1], [0, 0, 1, 1], [], []>} : vector<3x64xbf16>, vector<64x128xbf16>, vector<3x128xf32> -> vector<3x128xf32>
    %395 = arith.addf %391, %394 : vector<3x128xf32>
    %c30_272 = arith.constant 30 : index
    %c0_273 = arith.constant 0 : index
    %396 = tpu.strided_load %arg18[%c30_272, %c0_273] {strides = array<i32: 2, 1>} : memref<49x64xf32, #tpu.memory_space<vmem>>, vector<3x64xf32>
    %397 = arith.truncf %396 : vector<3x64xf32> to vector<3x64xbf16>
    %cst_274 = arith.constant dense<0.000000e+00> : vector<3x128xf32>
    %398 = tpu.matmul %397, %321, %cst_274 {dimension_numbers = #tpu.dot_dimension_numbers<[1], [0], [0], [1], [0, 0, 1, 1], [], []>} : vector<3x64xbf16>, vector<64x128xbf16>, vector<3x128xf32> -> vector<3x128xf32>
    %399 = arith.addf %395, %398 : vector<3x128xf32>
    %cst_275 = arith.constant 0.000000e+00 : f32
    %400 = vector.broadcast %cst_275 : f32 to vector<3x128xf32>
    %401 = arith.maximumf %399, %400 : vector<3x128xf32>
    %c3_276 = arith.constant 3 : index
    %c0_277 = arith.constant 0 : index
    %402 = vector.load %arg19[%c3_276, %c0_277] : memref<9x128xf32, #tpu.memory_space<vmem>>, vector<3x128xf32>
    tpu.vector_store %arg19[%c3_276, %c0_277], %401 {strides = array<i32>} : memref<9x128xf32, #tpu.memory_space<vmem>>, vector<3x128xf32>,
    %c28_278 = arith.constant 28 : index
    %c0_279 = arith.constant 0 : index
    %403 = tpu.strided_load %arg18[%c28_278, %c0_279] {strides = array<i32: 2, 1>} : memref<49x64xf32, #tpu.memory_space<vmem>>, vector<3x64xf32>
    %404 = arith.truncf %403 : vector<3x64xf32> to vector<3x64xbf16>
    %cst_280 = arith.constant dense<0.000000e+00> : vector<3x128xf32>
    %405 = tpu.matmul %404, %305, %cst_280 {dimension_numbers = #tpu.dot_dimension_numbers<[1], [0], [0], [1], [0, 0, 1, 1], [], []>} : vector<3x64xbf16>, vector<64x128xbf16>, vector<3x128xf32> -> vector<3x128xf32>
    %406 = arith.addf %324, %405 : vector<3x128xf32>
    %c29_281 = arith.constant 29 : index
    %c0_282 = arith.constant 0 : index
    %407 = tpu.strided_load %arg18[%c29_281, %c0_282] {strides = array<i32: 2, 1>} : memref<49x64xf32, #tpu.memory_space<vmem>>, vector<3x64xf32>
    %408 = arith.truncf %407 : vector<3x64xf32> to vector<3x64xbf16>
    %cst_283 = arith.constant dense<0.000000e+00> : vector<3x128xf32>
    %409 = tpu.matmul %408, %307, %cst_283 {dimension_numbers = #tpu.dot_dimension_numbers<[1], [0], [0], [1], [0, 0, 1, 1], [], []>} : vector<3x64xbf16>, vector<64x128xbf16>, vector<3x128xf32> -> vector<3x128xf32>
    %410 = arith.addf %406, %409 : vector<3x128xf32>
    %c30_284 = arith.constant 30 : index
    %c0_285 = arith.constant 0 : index
    %411 = tpu.strided_load %arg18[%c30_284, %c0_285] {strides = array<i32: 2, 1>} : memref<49x64xf32, #tpu.memory_space<vmem>>, vector<3x64xf32>
    %412 = arith.truncf %411 : vector<3x64xf32> to vector<3x64xbf16>
    %cst_286 = arith.constant dense<0.000000e+00> : vector<3x128xf32>
    %413 = tpu.matmul %412, %309, %cst_286 {dimension_numbers = #tpu.dot_dimension_numbers<[1], [0], [0], [1], [0, 0, 1, 1], [], []>} : vector<3x64xbf16>, vector<64x128xbf16>, vector<3x128xf32> -> vector<3x128xf32>
    %414 = arith.addf %410, %413 : vector<3x128xf32>
    %c35_287 = arith.constant 35 : index
    %c0_288 = arith.constant 0 : index
    %415 = tpu.strided_load %arg18[%c35_287, %c0_288] {strides = array<i32: 2, 1>} : memref<49x64xf32, #tpu.memory_space<vmem>>, vector<3x64xf32>
    %416 = arith.truncf %415 : vector<3x64xf32> to vector<3x64xbf16>
    %cst_289 = arith.constant dense<0.000000e+00> : vector<3x128xf32>
    %417 = tpu.matmul %416, %311, %cst_289 {dimension_numbers = #tpu.dot_dimension_numbers<[1], [0], [0], [1], [0, 0, 1, 1], [], []>} : vector<3x64xbf16>, vector<64x128xbf16>, vector<3x128xf32> -> vector<3x128xf32>
    %418 = arith.addf %414, %417 : vector<3x128xf32>
    %c36 = arith.constant 36 : index
    %c0_290 = arith.constant 0 : index
    %419 = tpu.strided_load %arg18[%c36, %c0_290] {strides = array<i32: 2, 1>} : memref<49x64xf32, #tpu.memory_space<vmem>>, vector<3x64xf32>
    %420 = arith.truncf %419 : vector<3x64xf32> to vector<3x64xbf16>
    %cst_291 = arith.constant dense<0.000000e+00> : vector<3x128xf32>
    %421 = tpu.matmul %420, %313, %cst_291 {dimension_numbers = #tpu.dot_dimension_numbers<[1], [0], [0], [1], [0, 0, 1, 1], [], []>} : vector<3x64xbf16>, vector<64x128xbf16>, vector<3x128xf32> -> vector<3x128xf32>
    %422 = arith.addf %418, %421 : vector<3x128xf32>
    %c37 = arith.constant 37 : index
    %c0_292 = arith.constant 0 : index
    %423 = tpu.strided_load %arg18[%c37, %c0_292] {strides = array<i32: 2, 1>} : memref<49x64xf32, #tpu.memory_space<vmem>>, vector<3x64xf32>
    %424 = arith.truncf %423 : vector<3x64xf32> to vector<3x64xbf16>
    %cst_293 = arith.constant dense<0.000000e+00> : vector<3x128xf32>
    %425 = tpu.matmul %424, %315, %cst_293 {dimension_numbers = #tpu.dot_dimension_numbers<[1], [0], [0], [1], [0, 0, 1, 1], [], []>} : vector<3x64xbf16>, vector<64x128xbf16>, vector<3x128xf32> -> vector<3x128xf32>
    %426 = arith.addf %422, %425 : vector<3x128xf32>
    %c42_294 = arith.constant 42 : index
    %c0_295 = arith.constant 0 : index
    %427 = tpu.strided_load %arg18[%c42_294, %c0_295] {strides = array<i32: 2, 1>} : memref<49x64xf32, #tpu.memory_space<vmem>>, vector<3x64xf32>
    %428 = arith.truncf %427 : vector<3x64xf32> to vector<3x64xbf16>
    %cst_296 = arith.constant dense<0.000000e+00> : vector<3x128xf32>
    %429 = tpu.matmul %428, %317, %cst_296 {dimension_numbers = #tpu.dot_dimension_numbers<[1], [0], [0], [1], [0, 0, 1, 1], [], []>} : vector<3x64xbf16>, vector<64x128xbf16>, vector<3x128xf32> -> vector<3x128xf32>
    %430 = arith.addf %426, %429 : vector<3x128xf32>
    %c43 = arith.constant 43 : index
    %c0_297 = arith.constant 0 : index
    %431 = tpu.strided_load %arg18[%c43, %c0_297] {strides = array<i32: 2, 1>} : memref<49x64xf32, #tpu.memory_space<vmem>>, vector<3x64xf32>
    %432 = arith.truncf %431 : vector<3x64xf32> to vector<3x64xbf16>
    %cst_298 = arith.constant dense<0.000000e+00> : vector<3x128xf32>
    %433 = tpu.matmul %432, %319, %cst_298 {dimension_numbers = #tpu.dot_dimension_numbers<[1], [0], [0], [1], [0, 0, 1, 1], [], []>} : vector<3x64xbf16>, vector<64x128xbf16>, vector<3x128xf32> -> vector<3x128xf32>
    %434 = arith.addf %430, %433 : vector<3x128xf32>
    %c44 = arith.constant 44 : index
    %c0_299 = arith.constant 0 : index
    %435 = tpu.strided_load %arg18[%c44, %c0_299] {strides = array<i32: 2, 1>} : memref<49x64xf32, #tpu.memory_space<vmem>>, vector<3x64xf32>
    %436 = arith.truncf %435 : vector<3x64xf32> to vector<3x64xbf16>
    %cst_300 = arith.constant dense<0.000000e+00> : vector<3x128xf32>
    %437 = tpu.matmul %436, %321, %cst_300 {dimension_numbers = #tpu.dot_dimension_numbers<[1], [0], [0], [1], [0, 0, 1, 1], [], []>} : vector<3x64xbf16>, vector<64x128xbf16>, vector<3x128xf32> -> vector<3x128xf32>
    %438 = arith.addf %434, %437 : vector<3x128xf32>
    %cst_301 = arith.constant 0.000000e+00 : f32
    %439 = vector.broadcast %cst_301 : f32 to vector<3x128xf32>
    %440 = arith.maximumf %438, %439 : vector<3x128xf32>
    %c6_302 = arith.constant 6 : index
    %c0_303 = arith.constant 0 : index
    %441 = vector.load %arg19[%c6_302, %c0_303] : memref<9x128xf32, #tpu.memory_space<vmem>>, vector<3x128xf32>
    tpu.vector_store %arg19[%c6_302, %c0_303], %440 {strides = array<i32>} : memref<9x128xf32, #tpu.memory_space<vmem>>, vector<3x128xf32>,
    %c0_304 = arith.constant 0 : index
    %c0_305 = arith.constant 0 : index
    %c0_306 = arith.constant 0 : index
    %442 = vector.load %arg8[%c0_304, %c0_305, %c0_306] : memref<4x128x256xbf16, #tpu.memory_space<vmem>>, vector<1x128x256xbf16>
    %443 = vector.shape_cast %442 : vector<1x128x256xbf16> to vector<128x256xbf16>
    %c1_307 = arith.constant 1 : index
    %c0_308 = arith.constant 0 : index
    %c0_309 = arith.constant 0 : index
    %444 = vector.load %arg8[%c1_307, %c0_308, %c0_309] : memref<4x128x256xbf16, #tpu.memory_space<vmem>>, vector<1x128x256xbf16>
    %445 = vector.shape_cast %444 : vector<1x128x256xbf16> to vector<128x256xbf16>
    %c2_310 = arith.constant 2 : index
    %c0_311 = arith.constant 0 : index
    %c0_312 = arith.constant 0 : index
    %446 = vector.load %arg8[%c2_310, %c0_311, %c0_312] : memref<4x128x256xbf16, #tpu.memory_space<vmem>>, vector<1x128x256xbf16>
    %447 = vector.shape_cast %446 : vector<1x128x256xbf16> to vector<128x256xbf16>
    %c3_313 = arith.constant 3 : index
    %c0_314 = arith.constant 0 : index
    %c0_315 = arith.constant 0 : index
    %448 = vector.load %arg8[%c3_313, %c0_314, %c0_315] : memref<4x128x256xbf16, #tpu.memory_space<vmem>>, vector<1x128x256xbf16>
    %449 = vector.shape_cast %448 : vector<1x128x256xbf16> to vector<128x256xbf16>
    %c0_316 = arith.constant 0 : index
    %c0_317 = arith.constant 0 : index
    %450 = vector.load %arg9[%c0_316, %c0_317] : memref<1x256xf32, #tpu.memory_space<vmem>>, vector<1x256xf32>
    %451 = vector.shape_cast %450 : vector<1x256xf32> to vector<1x256xf32>
    %452 = vector.broadcast %451 : vector<1x256xf32> to vector<2x256xf32>
    %c0_318 = arith.constant 0 : index
    %c0_319 = arith.constant 0 : index
    %453 = vector.load %arg19[%c0_318, %c0_319] : memref<9x128xf32, #tpu.memory_space<vmem>>, vector<2x128xf32>
    %454 = arith.truncf %453 : vector<2x128xf32> to vector<2x128xbf16>
    %cst_320 = arith.constant dense<0.000000e+00> : vector<2x256xf32>
    %455 = tpu.matmul %454, %443, %cst_320 {dimension_numbers = #tpu.dot_dimension_numbers<[1], [0], [0], [1], [0, 0, 1, 1], [], []>} : vector<2x128xbf16>, vector<128x256xbf16>, vector<2x256xf32> -> vector<2x256xf32>
    %456 = arith.addf %452, %455 : vector<2x256xf32>
    %c1_321 = arith.constant 1 : index
    %c0_322 = arith.constant 0 : index
    %457 = vector.load %arg19[%c1_321, %c0_322] : memref<9x128xf32, #tpu.memory_space<vmem>>, vector<2x128xf32>
    %458 = arith.truncf %457 : vector<2x128xf32> to vector<2x128xbf16>
    %cst_323 = arith.constant dense<0.000000e+00> : vector<2x256xf32>
    %459 = tpu.matmul %458, %445, %cst_323 {dimension_numbers = #tpu.dot_dimension_numbers<[1], [0], [0], [1], [0, 0, 1, 1], [], []>} : vector<2x128xbf16>, vector<128x256xbf16>, vector<2x256xf32> -> vector<2x256xf32>
    %460 = arith.addf %456, %459 : vector<2x256xf32>
    %c3_324 = arith.constant 3 : index
    %c0_325 = arith.constant 0 : index
    %461 = vector.load %arg19[%c3_324, %c0_325] : memref<9x128xf32, #tpu.memory_space<vmem>>, vector<2x128xf32>
    %462 = arith.truncf %461 : vector<2x128xf32> to vector<2x128xbf16>
    %cst_326 = arith.constant dense<0.000000e+00> : vector<2x256xf32>
    %463 = tpu.matmul %462, %447, %cst_326 {dimension_numbers = #tpu.dot_dimension_numbers<[1], [0], [0], [1], [0, 0, 1, 1], [], []>} : vector<2x128xbf16>, vector<128x256xbf16>, vector<2x256xf32> -> vector<2x256xf32>
    %464 = arith.addf %460, %463 : vector<2x256xf32>
    %c4_327 = arith.constant 4 : index
    %c0_328 = arith.constant 0 : index
    %465 = vector.load %arg19[%c4_327, %c0_328] : memref<9x128xf32, #tpu.memory_space<vmem>>, vector<2x128xf32>
    %466 = arith.truncf %465 : vector<2x128xf32> to vector<2x128xbf16>
    %cst_329 = arith.constant dense<0.000000e+00> : vector<2x256xf32>
    %467 = tpu.matmul %466, %449, %cst_329 {dimension_numbers = #tpu.dot_dimension_numbers<[1], [0], [0], [1], [0, 0, 1, 1], [], []>} : vector<2x128xbf16>, vector<128x256xbf16>, vector<2x256xf32> -> vector<2x256xf32>
    %468 = arith.addf %464, %467 : vector<2x256xf32>
    %cst_330 = arith.constant 0.000000e+00 : f32
    %469 = vector.broadcast %cst_330 : f32 to vector<2x256xf32>
    %470 = arith.maximumf %468, %469 : vector<2x256xf32>
    %c0_331 = arith.constant 0 : index
    %c0_332 = arith.constant 0 : index
    %471 = vector.load %arg20[%c0_331, %c0_332] : memref<4x256xf32, #tpu.memory_space<vmem>>, vector<2x256xf32>
    tpu.vector_store %arg20[%c0_331, %c0_332], %470 {strides = array<i32>} : memref<4x256xf32, #tpu.memory_space<vmem>>, vector<2x256xf32>,
    %c3_333 = arith.constant 3 : index
    %c0_334 = arith.constant 0 : index
    %472 = vector.load %arg19[%c3_333, %c0_334] : memref<9x128xf32, #tpu.memory_space<vmem>>, vector<2x128xf32>
    %473 = arith.truncf %472 : vector<2x128xf32> to vector<2x128xbf16>
    %cst_335 = arith.constant dense<0.000000e+00> : vector<2x256xf32>
    %474 = tpu.matmul %473, %443, %cst_335 {dimension_numbers = #tpu.dot_dimension_numbers<[1], [0], [0], [1], [0, 0, 1, 1], [], []>} : vector<2x128xbf16>, vector<128x256xbf16>, vector<2x256xf32> -> vector<2x256xf32>
    %475 = arith.addf %452, %474 : vector<2x256xf32>
    %c4_336 = arith.constant 4 : index
    %c0_337 = arith.constant 0 : index
    %476 = vector.load %arg19[%c4_336, %c0_337] : memref<9x128xf32, #tpu.memory_space<vmem>>, vector<2x128xf32>
    %477 = arith.truncf %476 : vector<2x128xf32> to vector<2x128xbf16>
    %cst_338 = arith.constant dense<0.000000e+00> : vector<2x256xf32>
    %478 = tpu.matmul %477, %445, %cst_338 {dimension_numbers = #tpu.dot_dimension_numbers<[1], [0], [0], [1], [0, 0, 1, 1], [], []>} : vector<2x128xbf16>, vector<128x256xbf16>, vector<2x256xf32> -> vector<2x256xf32>
    %479 = arith.addf %475, %478 : vector<2x256xf32>
    %c6_339 = arith.constant 6 : index
    %c0_340 = arith.constant 0 : index
    %480 = vector.load %arg19[%c6_339, %c0_340] : memref<9x128xf32, #tpu.memory_space<vmem>>, vector<2x128xf32>
    %481 = arith.truncf %480 : vector<2x128xf32> to vector<2x128xbf16>
    %cst_341 = arith.constant dense<0.000000e+00> : vector<2x256xf32>
    %482 = tpu.matmul %481, %447, %cst_341 {dimension_numbers = #tpu.dot_dimension_numbers<[1], [0], [0], [1], [0, 0, 1, 1], [], []>} : vector<2x128xbf16>, vector<128x256xbf16>, vector<2x256xf32> -> vector<2x256xf32>
    %483 = arith.addf %479, %482 : vector<2x256xf32>
    %c7_342 = arith.constant 7 : index
    %c0_343 = arith.constant 0 : index
    %484 = vector.load %arg19[%c7_342, %c0_343] : memref<9x128xf32, #tpu.memory_space<vmem>>, vector<2x128xf32>
    %485 = arith.truncf %484 : vector<2x128xf32> to vector<2x128xbf16>
    %cst_344 = arith.constant dense<0.000000e+00> : vector<2x256xf32>
    %486 = tpu.matmul %485, %449, %cst_344 {dimension_numbers = #tpu.dot_dimension_numbers<[1], [0], [0], [1], [0, 0, 1, 1], [], []>} : vector<2x128xbf16>, vector<128x256xbf16>, vector<2x256xf32> -> vector<2x256xf32>
    %487 = arith.addf %483, %486 : vector<2x256xf32>
    %cst_345 = arith.constant 0.000000e+00 : f32
    %488 = vector.broadcast %cst_345 : f32 to vector<2x256xf32>
    %489 = arith.maximumf %487, %488 : vector<2x256xf32>
    %c2_346 = arith.constant 2 : index
    %c0_347 = arith.constant 0 : index
    %490 = vector.load %arg20[%c2_346, %c0_347] : memref<4x256xf32, #tpu.memory_space<vmem>>, vector<2x256xf32>
    tpu.vector_store %arg20[%c2_346, %c0_347], %489 {strides = array<i32>} : memref<4x256xf32, #tpu.memory_space<vmem>>, vector<2x256xf32>,
    %c0_348 = arith.constant 0 : index
    %c0_349 = arith.constant 0 : index
    %c0_350 = arith.constant 0 : index
    %491 = vector.load %arg10[%c0_348, %c0_349, %c0_350] : memref<4x256x512xbf16, #tpu.memory_space<vmem>>, vector<1x256x512xbf16>
    %492 = vector.shape_cast %491 : vector<1x256x512xbf16> to vector<256x512xbf16>
    %c1_351 = arith.constant 1 : index
    %c0_352 = arith.constant 0 : index
    %c0_353 = arith.constant 0 : index
    %493 = vector.load %arg10[%c1_351, %c0_352, %c0_353] : memref<4x256x512xbf16, #tpu.memory_space<vmem>>, vector<1x256x512xbf16>
    %494 = vector.shape_cast %493 : vector<1x256x512xbf16> to vector<256x512xbf16>
    %c2_354 = arith.constant 2 : index
    %c0_355 = arith.constant 0 : index
    %c0_356 = arith.constant 0 : index
    %495 = vector.load %arg10[%c2_354, %c0_355, %c0_356] : memref<4x256x512xbf16, #tpu.memory_space<vmem>>, vector<1x256x512xbf16>
    %496 = vector.shape_cast %495 : vector<1x256x512xbf16> to vector<256x512xbf16>
    %c3_357 = arith.constant 3 : index
    %c0_358 = arith.constant 0 : index
    %c0_359 = arith.constant 0 : index
    %497 = vector.load %arg10[%c3_357, %c0_358, %c0_359] : memref<4x256x512xbf16, #tpu.memory_space<vmem>>, vector<1x256x512xbf16>
    %498 = vector.shape_cast %497 : vector<1x256x512xbf16> to vector<256x512xbf16>
    %c0_360 = arith.constant 0 : index
    %c0_361 = arith.constant 0 : index
    %499 = vector.load %arg11[%c0_360, %c0_361] : memref<1x512xf32, #tpu.memory_space<vmem>>, vector<1x512xf32>
    %cst_362 = arith.constant 0.000000e+00 : f32
    %500 = vector.broadcast %cst_362 : f32 to vector<1x512xf32>
    %c0_363 = arith.constant 0 : index
    %c0_364 = arith.constant 0 : index
    %501 = vector.load %arg20[%c0_363, %c0_364] : memref<4x256xf32, #tpu.memory_space<vmem>>, vector<1x256xf32>
    %502 = arith.truncf %501 : vector<1x256xf32> to vector<1x256xbf16>
    %cst_365 = arith.constant dense<0.000000e+00> : vector<1x512xf32>
    %503 = tpu.matmul %502, %492, %cst_365 {dimension_numbers = #tpu.dot_dimension_numbers<[1], [0], [0], [1], [0, 0, 1, 1], [], []>} : vector<1x256xbf16>, vector<256x512xbf16>, vector<1x512xf32> -> vector<1x512xf32>
    %504 = arith.addf %499, %503 : vector<1x512xf32>
    %c1_366 = arith.constant 1 : index
    %c0_367 = arith.constant 0 : index
    %505 = vector.load %arg20[%c1_366, %c0_367] : memref<4x256xf32, #tpu.memory_space<vmem>>, vector<1x256xf32>
    %506 = arith.truncf %505 : vector<1x256xf32> to vector<1x256xbf16>
    %cst_368 = arith.constant dense<0.000000e+00> : vector<1x512xf32>
    %507 = tpu.matmul %506, %494, %cst_368 {dimension_numbers = #tpu.dot_dimension_numbers<[1], [0], [0], [1], [0, 0, 1, 1], [], []>} : vector<1x256xbf16>, vector<256x512xbf16>, vector<1x512xf32> -> vector<1x512xf32>
    %508 = arith.addf %504, %507 : vector<1x512xf32>
    %c2_369 = arith.constant 2 : index
    %c0_370 = arith.constant 0 : index
    %509 = vector.load %arg20[%c2_369, %c0_370] : memref<4x256xf32, #tpu.memory_space<vmem>>, vector<1x256xf32>
    %510 = arith.truncf %509 : vector<1x256xf32> to vector<1x256xbf16>
    %cst_371 = arith.constant dense<0.000000e+00> : vector<1x512xf32>
    %511 = tpu.matmul %510, %496, %cst_371 {dimension_numbers = #tpu.dot_dimension_numbers<[1], [0], [0], [1], [0, 0, 1, 1], [], []>} : vector<1x256xbf16>, vector<256x512xbf16>, vector<1x512xf32> -> vector<1x512xf32>
    %512 = arith.addf %508, %511 : vector<1x512xf32>
    %c3_372 = arith.constant 3 : index
    %c0_373 = arith.constant 0 : index
    %513 = vector.load %arg20[%c3_372, %c0_373] : memref<4x256xf32, #tpu.memory_space<vmem>>, vector<1x256xf32>
    %514 = arith.truncf %513 : vector<1x256xf32> to vector<1x256xbf16>
    %cst_374 = arith.constant dense<0.000000e+00> : vector<1x512xf32>
    %515 = tpu.matmul %514, %498, %cst_374 {dimension_numbers = #tpu.dot_dimension_numbers<[1], [0], [0], [1], [0, 0, 1, 1], [], []>} : vector<1x256xbf16>, vector<256x512xbf16>, vector<1x512xf32> -> vector<1x512xf32>
    %516 = arith.addf %512, %515 : vector<1x512xf32>
    %cst_375 = arith.constant 0.000000e+00 : f32
    %517 = vector.broadcast %cst_375 : f32 to vector<1x512xf32>
    %518 = arith.maximumf %516, %517 : vector<1x512xf32>
    %cst_376 = arith.constant dense<0.000000e+00> : vector<512xf32>
    %519 = vector.multi_reduction <add>, %518, %cst_376 [0] : vector<1x512xf32> to vector<512xf32>
    %520 = vector.shape_cast %519 : vector<512xf32> to vector<1x512xf32>
    %521 = arith.addf %500, %520 : vector<1x512xf32>
    %cst_377 = arith.constant 1.000000e+00 : f32
    %522 = vector.broadcast %cst_377 : f32 to vector<1x512xf32>
    %523 = arith.mulf %521, %522 : vector<1x512xf32>
    %524 = arith.truncf %523 : vector<1x512xf32> to vector<1x512xbf16>
    %c0_378 = arith.constant 0 : index
    %c0_379 = arith.constant 0 : index
    %525 = vector.load %arg12[%c0_378, %c0_379] : memref<512x810xbf16, #tpu.memory_space<vmem>>, vector<512x810xbf16>
    %cst_380 = arith.constant dense<0.000000e+00> : vector<1x810xf32>
    %526 = tpu.matmul %524, %525, %cst_380 {dimension_numbers = #tpu.dot_dimension_numbers<[1], [0], [0], [1], [0, 0, 1, 1], [], []>} : vector<1x512xbf16>, vector<512x810xbf16>, vector<1x810xf32> -> vector<1x810xf32>
    %c0_381 = arith.constant 0 : index
    %c0_382 = arith.constant 0 : index
    %527 = vector.load %arg13[%c0_381, %c0_382] : memref<1x810xf32, #tpu.memory_space<vmem>>, vector<1x810xf32>
    %528 = arith.addf %526, %527 : vector<1x810xf32>
    %cst_383 = arith.constant dense<0xFF800000> : vector<1xf32>
    %529 = vector.multi_reduction <maximumf>, %528, %cst_383 [1] : vector<1x810xf32> to vector<1xf32>
    %530 = vector.shape_cast %529 : vector<1xf32> to vector<1x1xf32>
    %531 = vector.broadcast %530 : vector<1x1xf32> to vector<1x810xf32>
    %532 = arith.subf %528, %531 : vector<1x810xf32>
    %533 = math.exp %532 : vector<1x810xf32>
    %c0_384 = arith.constant 0 : index
    %c0_385 = arith.constant 0 : index
    %534 = vector.load %arg14[%c0_384, %c0_385] : memref<810x81xf32, #tpu.memory_space<vmem>>, vector<810x81xf32>
    %cst_386 = arith.constant dense<0.000000e+00> : vector<1x81xf32>
    %535 = tpu.matmul %533, %534, %cst_386 {dimension_numbers = #tpu.dot_dimension_numbers<[1], [0], [0], [1], [0, 0, 1, 1], [], []>} : vector<1x810xf32>, vector<810x81xf32>, vector<1x81xf32> -> vector<1x81xf32>
    %c0_387 = arith.constant 0 : index
    %c0_388 = arith.constant 0 : index
    %536 = vector.load %arg15[%c0_387, %c0_388] : memref<81x810xf32, #tpu.memory_space<vmem>>, vector<81x810xf32>
    %cst_389 = arith.constant dense<0.000000e+00> : vector<1x810xf32>
    %537 = tpu.matmul %535, %536, %cst_389 {dimension_numbers = #tpu.dot_dimension_numbers<[1], [0], [0], [1], [0, 0, 1, 1], [], []>} : vector<1x81xf32>, vector<81x810xf32>, vector<1x810xf32> -> vector<1x810xf32>
    %538 = arith.divf %533, %537 : vector<1x810xf32>
    %c0_390 = arith.constant 0 : index
    %c0_391 = arith.constant 0 : index
    %c0_392 = arith.constant 0 : index
    %539 = vector.load %arg16[%c0_390, %c0_391, %c0_392] : memref<1x1x810xf32, #tpu.memory_space<vmem>>, vector<1x1x810xf32>
    %540 = vector.shape_cast %539 : vector<1x1x810xf32> to vector<1x810xf32>
    %541 = vector.shape_cast %538 : vector<1x810xf32> to vector<1x1x810xf32>
    tpu.vector_store %arg16[%c0_390, %c0_391, %c0_392], %541 {strides = array<i32>} : memref<1x1x810xf32, #tpu.memory_space<vmem>>, vector<1x1x810xf32>,
    return
  }
  func.func @transform_0(%arg0: i32) -> (i32, i32, i32) {
    %c0_i32 = arith.constant 0 : i32
    %c0_i32_0 = arith.constant 0 : i32
    %c0_i32_1 = arith.constant 0 : i32
    return %arg0, %c0_i32, %c0_i32_0 : i32, i32, i32
  }
  func.func @transform_1(%arg0: i32) -> (i32, i32) {
    %c0_i32 = arith.constant 0 : i32
    %c0_i32_0 = arith.constant 0 : i32
    %c0_i32_1 = arith.constant 0 : i32
    return %c0_i32, %c0_i32_0 : i32, i32
  }
  func.func @transform_2(%arg0: i32) -> (i32, i32) {
    %c0_i32 = arith.constant 0 : i32
    %c0_i32_0 = arith.constant 0 : i32
    %c0_i32_1 = arith.constant 0 : i32
    return %c0_i32, %c0_i32_0 : i32, i32
  }
  func.func @transform_3(%arg0: i32) -> (i32, i32, i32) {
    %c0_i32 = arith.constant 0 : i32
    %c0_i32_0 = arith.constant 0 : i32
    %c0_i32_1 = arith.constant 0 : i32
    %c0_i32_2 = arith.constant 0 : i32
    return %c0_i32, %c0_i32_0, %c0_i32_1 : i32, i32, i32
  }
  func.func @transform_4(%arg0: i32) -> (i32, i32) {
    %c0_i32 = arith.constant 0 : i32
    %c0_i32_0 = arith.constant 0 : i32
    %c0_i32_1 = arith.constant 0 : i32
    return %c0_i32, %c0_i32_0 : i32, i32
  }
  func.func @transform_5(%arg0: i32) -> (i32, i32, i32) {
    %c0_i32 = arith.constant 0 : i32
    %c0_i32_0 = arith.constant 0 : i32
    %c0_i32_1 = arith.constant 0 : i32
    %c0_i32_2 = arith.constant 0 : i32
    return %c0_i32, %c0_i32_0, %c0_i32_1 : i32, i32, i32
  }
  func.func @transform_6(%arg0: i32) -> (i32, i32) {
    %c0_i32 = arith.constant 0 : i32
    %c0_i32_0 = arith.constant 0 : i32
    %c0_i32_1 = arith.constant 0 : i32
    return %c0_i32, %c0_i32_0 : i32, i32
  }
  func.func @transform_7(%arg0: i32) -> (i32, i32, i32) {
    %c0_i32 = arith.constant 0 : i32
    %c0_i32_0 = arith.constant 0 : i32
    %c0_i32_1 = arith.constant 0 : i32
    %c0_i32_2 = arith.constant 0 : i32
    return %c0_i32, %c0_i32_0, %c0_i32_1 : i32, i32, i32
  }
  func.func @transform_8(%arg0: i32) -> (i32, i32) {
    %c0_i32 = arith.constant 0 : i32
    %c0_i32_0 = arith.constant 0 : i32
    %c0_i32_1 = arith.constant 0 : i32
    return %c0_i32, %c0_i32_0 : i32, i32
  }
  func.func @transform_9(%arg0: i32) -> (i32, i32, i32) {
    %c0_i32 = arith.constant 0 : i32
    %c0_i32_0 = arith.constant 0 : i32
    %c0_i32_1 = arith.constant 0 : i32
    %c0_i32_2 = arith.constant 0 : i32
    return %c0_i32, %c0_i32_0, %c0_i32_1 : i32, i32, i32
  }
  func.func @transform_10(%arg0: i32) -> (i32, i32) {
    %c0_i32 = arith.constant 0 : i32
    %c0_i32_0 = arith.constant 0 : i32
    %c0_i32_1 = arith.constant 0 : i32
    return %c0_i32, %c0_i32_0 : i32, i32
  }
  func.func @transform_11(%arg0: i32) -> (i32, i32) {
    %c0_i32 = arith.constant 0 : i32
    %c0_i32_0 = arith.constant 0 : i32
    %c0_i32_1 = arith.constant 0 : i32
    return %c0_i32, %c0_i32_0 : i32, i32
  }
  func.func @transform_12(%arg0: i32) -> (i32, i32) {
    %c0_i32 = arith.constant 0 : i32
    %c0_i32_0 = arith.constant 0 : i32
    %c0_i32_1 = arith.constant 0 : i32
    return %c0_i32, %c0_i32_0 : i32, i32
  }
  func.func @transform_13(%arg0: i32) -> (i32, i32) {
    %c0_i32 = arith.constant 0 : i32
    %c0_i32_0 = arith.constant 0 : i32
    %c0_i32_1 = arith.constant 0 : i32
    return %c0_i32, %c0_i32_0 : i32, i32
  }
  func.func @transform_14(%arg0: i32) -> (i32, i32) {
    %c0_i32 = arith.constant 0 : i32
    %c0_i32_0 = arith.constant 0 : i32
    %c0_i32_1 = arith.constant 0 : i32
    return %c0_i32, %c0_i32_0 : i32, i32
  }
  func.func @transform_15(%arg0: i32) -> (i32, i32, i32) {
    %c0_i32 = arith.constant 0 : i32
    %c0_i32_0 = arith.constant 0 : i32
    %c0_i32_1 = arith.constant 0 : i32
    return %arg0, %c0_i32, %c0_i32_0 : i32, i32, i32
  }
}

</mosaic_0001>

<bundles_post_ra>
// kernel: tpu_custom_call.1
= control target key start
LH: loop header
LB: loop body
LE: loop exit
PB: predicated region body
PF: predicated region fallthrough
CT: control target
= control target key end

     0   :  { %s19319_s0 = inlined_call_operand.vmem [shape: bf16[2,225,16], index: 0, kind: input, shape index: {}]   ;;  %s19320_s1 = inlined_call_operand.vmem [shape: bf16[16,32], index: 1, kind: input, shape index: {}]   ;;  %s19321_s2 = inlined_call_operand.vmem [shape: f32[1,32], index: 2, kind: input, shape index: {}]   ;;  %s19322_s3 = inlined_call_operand.hbm [shape: bf16[9,32,64], index: 3, kind: input, shape index: {}]   ;;  %s19323_s4 = inlined_call_operand.vmem [shape: f32[1,64], index: 4, kind: input, shape index: {}]   ;;  %s19324_s5 = inlined_call_operand.vmem [shape: bf16[9,64,128], index: 5, kind: input, shape index: {}]   ;;  %s19325_s6 = inlined_call_operand.vmem [shape: f32[1,128], index: 6, kind: input, shape index: {}]   ;;  %s19326_s7 = inlined_call_operand.vmem [shape: bf16[4,128,256], index: 7, kind: input, shape index: {}]   ;;  %s19327_s8 = inlined_call_operand.vmem [shape: f32[1,256], index: 8, kind: input, shape index: {}]   ;;  %s19328_s9 = inlined_call_operand.vmem [shape: bf16[4,256,512], index: 9, kind: input, shape index: {}]   ;;  %s19329_s10 = inlined_call_operand.vmem [shape: f32[1,512], index: 10, kind: input, shape index: {}]   ;;  %s19330_s11 = inlined_call_operand.vmem [shape: bf16[512,810], index: 11, kind: input, shape index: {}]   ;;  %s19331_s12 = inlined_call_operand.vmem [shape: f32[1,810], index: 12, kind: input, shape index: {}]   ;;  %s19332_s13 = inlined_call_operand.vmem [shape: f32[810,81], index: 13, kind: input, shape index: {}]   ;;  %s19333_s14 = inlined_call_operand.vmem [shape: f32[81,810], index: 14, kind: input, shape index: {}]   ;;  %s19334_s15 = inlined_call_operand.hbm [shape: f32[2,1,810], index: 15, kind: output, shape index: {}]  }
   0x1   :  { %19343 = sst [smem:[#allocation17_spill]] %s19319_s0 }
   0x2   :  { %20 = vsyncpa [#allocation7], 0 }
   0x3   :  { %21 = vsyncpa [#allocation8], 0 }
   0x4   :  { %23 = vsyncpa [#allocation8 + $0x1], 0  ;;  %s15374_s18 = smov 0   ;;  %s15376_s19 = smov 0  }
   0x5   :  { %s15378_s20 = smov 0   ;;  %s15380_s21 = smov 0  }
   0x6 LB: > { %19344 = sst [smem:[#allocation12_spill]] %s15270_s18  ;;  %s15395_s22 = sadd.s32 4294967295, %s15282_s21   ;;  %s15282_s21 = sphi %s15380_s21, %s19361_s21   ;;  %s15278_s20 = sphi %s15378_s20, %s19363_s20   ;;  %s15274_s19 = sphi %s15376_s19, %s19365_s19   ;;  %s15270_s18 = sphi %s15374_s18, %s19364_s18  }
   0x7   : > { %19345 = sst [smem:[#allocation13_spill]] %s15278_s20  ;;  %s11166_s23 = sadd.s32 4294967294, %s15282_s21  }
   0x8   : > { %s15399_s24 = sadd.s32 1, %s15282_s21   ;;  %s356_s25 = sadd.s32 1, %s15278_s20 }
   0x9   : > { %19346 = sst [smem:[#allocation14_spill]] %s15399_s24  ;;  %s353_s26 = ssub.s32 %s15282_s21, %s15399_s24 }
   0xa   : > { %p366_p0 = scmp.ne.s32.totalorder %s15278_s20, %s15274_s19  ;;  %p354_p1 = scmp.eq.s32.totalorder %s353_s26, 0 }
   0xb   : > { %p367_p2 = scmp.eq.s32.totalorder %s15395_s22, 1  ;;  %p372_p3 = scmp.ne.s32.totalorder %s15274_s19, %s15270_s18 }
   0xc   : > { %p373_p4 = scmp.eq.s32.totalorder %s11166_s23, 1  ;;  %p11167_p7 = scmp.ge.s32.totalorder %s15282_s21, 1 }
   0xd   : > { %s15410_s27 = scalar_select %p354_p1, %s15278_s20, %s356_s25  }
   0xe   : > { %p15412_p5 = por %p367_p2, %p366_p0  ;;  %p15416_p6 = por %p373_p4, %p372_p3 }
   0xf   : > { %19347 = sst [smem:[#allocation15_spill]] %s15410_s27  ;;  %p380_p8 = scmp.lt.s32.totalorder %s15282_s21, 3 }
  0x10   : > { %s19348_s28 = scalar_select %p15412_p5, 1, 0 }
  0x11   : > { %s19349_s29 = scalar_select %p15416_p6, 1, 0 }
  0x12   : > { %p19340_p9 = scmp.eq.s32.totalorder %s15395_s22, 0  ;;  %p15423_p10 = pnand %p11167_p7, %p380_p8 }
  0x13   : > { %19350 = sst [smem:[#allocation16_spill]] %s19349_s29  ;;  %s15284_s16 = smov [#allocation6]  }
  0x14   : > { %s19351_s30 = scalar_select %p15423_p10, 1, 0 }
  0x15   : > { %s398_s17 = sshll.u32 %s15284_s16, 4  ;;  %p14219_p11 = pneg %p15423_p10  ;;  %s399_s17 = int_to_ptr.vmem [resolvable:$true] %s398_s17 }
  0x16   : > { %s15188_s27 = scalar_lea.hbm %s19322_s3, 2304 }
  0x17   : > { %p15431_p12 = pnand %p19340_p9, %p14219_p11  ;;  %p15189_p13 = scmp.ne.s32.totalorder %s19322_s3, %s15188_s27 }
  0x18   : > { %p15195_p3 = scmp.lt.u32.totalorder %s15188_s27, %s19322_s3 }
  0x19   : > { %p15190_p0 = pneg %p15431_p12 }
  0x1b   : > { %p15191_p1 = pnand %p15190_p0, %p15189_p13 }
  0x1d   : > { %p15192_p2 = pneg %p15191_p1 }
  0x1f   : > { %p15197_p4 = pnand %p15195_p3, %p15192_p2 }
  0x21   : > { %15200 = shalt.err (!%p15197_p4)
}
  0x22   : > { %s15201_s18 = scalar_lea.vmem %s399_s17, 2304  ;;  %p15209_p9 = scmp.lt.s32.totalorder %s399_s17, %s399_s17 }
  0x23   : > { %p15202_p7 = scmp.ne.s32.totalorder %s399_s17, %s15201_s18  ;;  %p15210_p6 = scmp.lt.s32.totalorder %s15201_s18, %s15201_s18 }
  0x25   : > { %p15204_p8 = pnand %p15202_p7, %p15190_p0  ;;  %p15211_p5 = por %p15210_p6, %p15209_p9 }
  0x27   : > { %p15205_p11 = pneg %p15204_p8 }
  0x29   : > { %p15212_p10 = pnand %p15211_p5, %p15205_p11 }
  0x2b   : > { %15215 = shalt.err (!%p15212_p10)
}
  0x2c   : > { %s15285_s20 = smov 64   ;;  %s15286_s24 = smov 4  }
  0x2d   : > { %14222 = dma.hbm_to_vmem [thread:$0]  (!%p15431_p12), %s19322_s3, 2304, %s399_s17, [#allocation7], %s15285_s20, %s15285_s20, %s15286_s24  }
  0x2e   : > { %p19353_p13 = scmp.ne.s32.totalorder %s19351_s30, 0 }
  0x2f   : > { %p19354_p1 = scmp.eq.s32.totalorder (!%p19353_p13), %s15395_s22, 0 }
  0x30   : > { %455 = sbr.rel (%p19353_p13) target bundleno = 2988 (0xbac), region = 80 }
  0x37   : > { %15261 = dma.done.wait (%p19354_p1), [#allocation7], 2304   ;;  %p19355_p0 = pmov %p19354_p1 }
  0x38   : > { %p503_p5 = scmp.lt.s32.totalorder %s15395_s22, 1  ;;  %v15287_v0 = vmov 0.0   ;;  %vm15288_vm0 = vmmov 0   ;;  %s19356_s0 = sld [smem:[#allocation17_spill]]  ;;  %v14271_v1 = vld [vmem:[%s19320_s1] sm:$0xff]   ;;  %vm626_vm1 = vcmask 130048  }
  0x39   : > { %15263 = vsyncadd (%p19355_p0), [#allocation7], 4294964992  ;;  %12723 = vmatprep.subr.bf16.mxu0 %v15287_v0  ;;  %12725 = vmatprep.mubr.msk.bf16.mxu0 %vm15288_vm0, %v15287_v0  ;;  %v14283_v13 = vld [vmem:[#allocation6] sm:$0xff]   ;;  %v14284_v14 = vld [vmem:[#allocation6 + $0x8] sm:$0xff]   ;;  %vm853_vm2 = vcmask 261120   ;;  %vm882_vm3 = vcmask 253952  }
  0x3a   : > { %s504_s18 = scalar_select %p503_p5, %s15395_s22, 1  ;;  %12785 = vmatprep.subr.bf16.mxu1 %v15287_v0  ;;  %12789 = vmatprep.mubr.msk.bf16.mxu1 %vm15288_vm0, %v15287_v0  ;;  %v15541_v19 = vld [vmem:[%s19321_s2] ss:$0 sm:$0xff]  ;;  %v15553_v39 = vld [vmem:[#allocation6 + $0x18] sm:$0xff]   ;;  %v15566_v50 = vld [vmem:[#allocation6 + $0x20] sm:$0xff]   ;;  %vm1466_vm4 = vcmask 522240  }
  0x3b   : > { %12724 = vmatpush3.bf16.msra.mxu0 %v14271_v1  ;;  %12786 = vmatpush3.bf16.msra.mxu1 %v14283_v13  ;;  %v15550_v37 = vld [vmem:[#allocation6 + $0x10] sm:$0xff]   ;;  %v15573_v59 = vld [vmem:[#allocation6 + $0x28] sm:$0xff]   ;;  %vm4113_vm5 = vcmask 523264   ;;  %vm10201_vm6 = vcmask 335872   ;;  %vm10192_vm7 = vcmask 1040384   ;;  %vm10336_vm8 = vcmask 1041408  }
  0x3c   : > { %s14211_s27 = smul.u32 116, %s504_s18  ;;  %12929 = vmatprep.subr.bf16.mxu0 %v15287_v0  ;;  %12787 = vmatprep.subr.bf16.mxu1 %v15287_v0  ;;  %vm15292_vm9 = vmmov 1   ;;  %vm10332_vm11 = vcmask 343040   ;;  %vm10697_vm12 = vcmask 662528   ;;  %s500_s23 = sand.u32 1, %s15274_s19  }
  0x3d   : > { %vm13757_vm10 = vmpackc.low %vm10336_vm8, %vm15292_vm9  ;;  %s14210_s16 = smul.u32 7, %s500_s23  ;;  %p19357_p9 = scmp.ne.s32.totalorder %s19348_s28, 0 }
  0x3e   : > { %s15468_s17 = scalar_lea.vmem %s19356_s0, %s14211_s27  ;;  %s14212_s20 = smul.u32 112, %s15395_s22 }
  0x3f   : > { %v14272_v2 = vld [vmem:[%s15468_s17] sm:$0xff]   ;;  %v14273_v3 = vld [vmem:[%s15468_s17 + $0x8] sm:$0xff]   ;;  %v14274_v4 = vld [vmem:[%s15468_s17 + $0x10] sm:$0xff]   ;;  %12788 = vmatpush3.bf16.msra.mxu1 %v14284_v14  ;;  %s502_s24 = scalar_lea.vmem [#allocation9], %s14210_s16  ;;  %s11081_s22 = scalar_lea.sflag [#allocation8], %s500_s23 }
  0x40   : > { %12726 = vmatmul.mubr.msk.bf16.vlgmr.msra.gmra.mrb[0].mxu0 %vm626_vm1, %v14272_v2  ;;  %v14275_v5 = vld [vmem:[%s15468_s17 + $0x18] sm:$0xff]   ;;  %v14276_v6 = vld [vmem:[%s15468_s17 + $0x20] sm:$0xff]   ;;  %v14277_v7 = vld [vmem:[%s15468_s17 + $0x28] sm:$0xff]   ;;  %12793 = vmatprep.subr.bf16.mxu1 %v15287_v0  ;;  %s11095_s0 = sshll.u32 %s502_s24, 4  ;;  %s19277_s18 = scalar_lea.hbm %s19334_s15, %s14212_s20  ;;  %s19279_s0 = int_to_ptr.vmem [resolvable:$true] %s11095_s0 }
  0x41   : > { %12729 = vmatprep.mubr.msk.bf16.mxu0 %vm15288_vm0, %v15287_v0  ;;  %v14278_v8 = vld [vmem:[%s15468_s17 + $0x30] sm:$0xff]   ;;  %v14279_v9 = vld [vmem:[%s15468_s17 + $0x38] sm:$0xff]   ;;  %v14280_v10 = vld [vmem:[%s15468_s17 + $0x40] sm:$0xff]   ;;  %12930 = vmatpush3.bf16.msra.mxu0 %v14283_v13  ;;  %s15216_s27 = scalar_lea.vmem %s19279_s0, 112  ;;  %s15293_s29 = smov [#allocation9]  }
  0x42   : > { %v14281_v11 = vld [vmem:[%s15468_s17 + $0x48] sm:$0xff]   ;;  %v14282_v12 = vld [vmem:[%s15468_s17 + $0x50] sm:$0xff]   ;;  %12931 = vmatprep.subr.bf16.mxu0 %v15287_v0  ;;  %v14285_v15 = vld [vmem:[%s15468_s17 + $0x58] sm:$0xff]   ;;  %p15217_p6 = scmp.ne.s32.totalorder %s19279_s0, %s15216_s27  ;;  %s15220_s30 = sshll.u32 %s15293_s29, 4  ;;  %s15221_s30 = int_to_ptr.vmem [resolvable:$false] %s15220_s30 }
  0x43   : > { %v14288_v16 = vld [vmem:[%s15468_s17 + $0x60] sm:$0xff]   ;;  %v14290_v17 = vld [vmem:[%s15468_s17 + $0x68] sm:$0xff]   ;;  %v14292_v18 = vld [vmem:[%s15468_s17 + $0x70] ss:$0 sps:$4 sm:$0x11]   ;;  %s15222_s17 = scalar_lea.vmem %s15221_s30, 224  ;;  %p15223_p2 = scmp.lt.s32.totalorder %s19279_s0, %s15221_s30 }
  0x44   : > { %p15218_p10 = pnand %p15217_p6, %p19357_p9  ;;  %p15224_p3 = scmp.lt.s32.totalorder %s15222_s17, %s15216_s27 }
  0x45   : > { %12932 = vmatpush3.bf16.msra.mxu0 %v14284_v14 }
  0x46   : > { %12937 = vmatprep.subr.bf16.mxu0 %v15287_v0  ;;  %p15219_p12 = pneg %p15218_p10  ;;  %p15225_p4 = por %p15224_p3, %p15223_p2 }
  0x48   : > { %12730 = vmatmul.mubr.msk.bf16.gmra.mrb[4].mxu0 %vm626_vm1, %v14273_v3  ;;  %p15226_p7 = pnand %p15225_p4, %p15219_p12 }
  0x49   : > { %12733 = vmatprep.mubr.msk.bf16.mxu0 %vm15288_vm0, %v15287_v0 }
  0x50   : > { %12734 = vmatmul.mubr.msk.bf16.gmra.mrb[8].mxu0 %vm626_vm1, %v14274_v4 }
  0x51   : > { %12737 = vmatprep.mubr.msk.bf16.mxu0 %vm15288_vm0, %v15287_v0 }
  0x58   : > { %12738 = vmatmul.mubr.msk.bf16.gmra.mrb[12].mxu0 %vm626_vm1, %v14275_v5 }
  0x59   : > { %12741 = vmatprep.mubr.msk.bf16.mxu0 %vm15288_vm0, %v15287_v0 }
  0x60   : > { %12742 = vmatmul.mubr.msk.bf16.gmra.mrb[16].mxu0 %vm626_vm1, %v14276_v6  ;;  %v15584_v6 = vld [vmem:[#allocation6 + $0x30] sm:$0xff]  }
  0x61   : > { %12745 = vmatprep.mubr.msk.bf16.mxu0 %vm15288_vm0, %v15287_v0 }
  0x68   : > { %12746 = vmatmul.mubr.msk.bf16.gmra.mrb[20].mxu0 %vm626_vm1, %v14277_v7 }
  0x69   : > { %12749 = vmatprep.mubr.msk.bf16.mxu0 %vm15288_vm0, %v15287_v0 }
  0x70   : > { %12750 = vmatmul.mubr.msk.bf16.gmra.mrb[24].mxu0 %vm626_vm1, %v14278_v8 }
  0x71   : > { %12753 = vmatprep.mubr.msk.bf16.mxu0 %vm15288_vm0, %v15287_v0 }
  0x78   : > { %12754 = vmatmul.mubr.msk.bf16.gmra.mrb[28].mxu0 %vm626_vm1, %v14279_v9 }
  0x79   : > { %12757 = vmatprep.mubr.msk.bf16.mxu0 %vm15288_vm0, %v15287_v0 }
  0x80   : > { %12758 = vmatmul.mubr.msk.bf16.gmra.mrb[32].mxu0 %vm626_vm1, %v14280_v10 }
  0x81   : > { %12761 = vmatprep.mubr.msk.bf16.mxu0 %vm15288_vm0, %v15287_v0 }
  0x88   : > { %12762 = vmatmul.mubr.msk.bf16.gmra.mrb[36].mxu0 %vm626_vm1, %v14281_v11  ;;  %v15590_v11 = vld [vmem:[#allocation6 + $0x38] sm:$0xff]  }
  0x89   : > { %12765 = vmatprep.mubr.msk.bf16.mxu0 %vm15288_vm0, %v15287_v0 }
  0x90   : > { %12766 = vmatmul.mubr.msk.bf16.gmra.mrb[40].mxu0 %vm626_vm1, %v14282_v12 }
  0x91   : > { %12769 = vmatprep.mubr.msk.bf16.mxu0 %vm15288_vm0, %v15287_v0 }
  0x98   : > { %12770 = vmatmul.mubr.msk.bf16.gmra.mrb[44].mxu0 %vm626_vm1, %v14285_v15 }
  0x99   : > { %12773 = vmatprep.mubr.msk.bf16.mxu0 %vm15288_vm0, %v15287_v0 }
  0xa0   : > { %12774 = vmatmul.mubr.msk.bf16.gmra.mrb[48].mxu0 %vm626_vm1, %v14288_v16 }
  0xa1   : > { %12777 = vmatprep.mubr.msk.bf16.mxu0 %vm15288_vm0, %v15287_v0 }
  0xa8   : > { %12778 = vmatmul.mubr.msk.bf16.gmra.mrb[52].mxu0 %vm626_vm1, %v14290_v17 }
  0xa9   : > { %12781 = vmatprep.mubr.msk.bf16.mxu0 %vm15288_vm0, %v15287_v0 }
  0xb0   : > { %12782 = vmatmul.mubr.msk.bf16.gmra.mrb[56].mxu0 %vm626_vm1, %v14292_v18 }
  0xb1   : > { %12933 = vmatprep.mubr.msk.bf16.mxu0 %vm15288_vm0, %v15287_v0 }
 0x113   : > { %v706_v20 = vpop.f32.mrb[0].mxu0 }
 0x114   : > { %v707_v21 = vadd.f32 %v15541_v19, %v706_v20  ;;  %v12727_v22 = vpop.f32.mrb[1].mxu0 }
 0x115   : > { %v709_v23 = vpop.f32.mrb[2].mxu0 }
 0x116   : > { %v824_v24 = vmax.f32 %v707_v21, 0.0  ;;  %v710_v25 = vadd.f32 %v15541_v19, %v709_v23  ;;  %v12728_v26 = vpop.f32.mrb[3].mxu0 }
 0x118   : > { %854 = vst.msk [vmem:[#allocation2] sm:$0xff] %vm853_vm2, %v824_v24  ;;  %v825_v27 = vmax.f32 %v710_v25, 0.0  ;;  %v15602_v24 = vld [vmem:[#allocation6 + $0x40] sm:$0xff]  }
 0x11a   : > { %855 = vst.msk [vmem:[#allocation2 + $0x8] sm:$0xff] %vm853_vm2, %v825_v27 }
 0x11b   : > { %v714_v28 = vpop.f32.mrb[4].mxu0 }
 0x11c   : > { %v715_v29 = vadd.f32 %v15541_v19, %v714_v28  ;;  %v12731_v30 = vpop.f32.mrb[5].mxu0 }
 0x11d   : > { %v717_v31 = vpop.f32.mrb[6].mxu0 }
 0x11e   : > { %v826_v32 = vmax.f32 %v715_v29, 0.0  ;;  %v718_v33 = vadd.f32 %v15541_v19, %v717_v31  ;;  %v12732_v34 = vpop.f32.mrb[7].mxu0  ;;  %v15613_v31 = vld [vmem:[#allocation6 + $0x48] sm:$0xff]  }
 0x120   : > { %856 = vst.msk [vmem:[#allocation2 + $0x10] sm:$0xff] %vm853_vm2, %v826_v32  ;;  %v827_v35 = vmax.f32 %v718_v33, 0.0 }
 0x121   : > { %v935_v36 = vld [vmem:[#allocation2] ss:$2 sm:$0x7f]  ;;  %v994_v48 = vld [vmem:[#allocation2 + $0x1] ss:$2 sm:$0x7f] }
 0x122   : > { %857 = vst.msk [vmem:[#allocation2 + $0x18] sm:$0xff] %vm853_vm2, %v827_v35  ;;  %v936_v38 = vpack.c.bf16 %v935_v36, %v935_v36  ;;  %v995_v55 = vpack.c.bf16 %v994_v48, %v994_v48  ;;  %v1053_v1 = vld [vmem:[#allocation2 + $0x2] ss:$2 sm:$0x7f] }
 0x123   : > { %v722_v40 = vpop.f32.mrb[8].mxu0  ;;  %v1054_v7 = vpack.c.bf16 %v1053_v1, %v1053_v1  ;;  %v15650_v1 = vld [vmem:[#allocation6 + $0x60] sm:$0xff]  }
 0x124   : > { %12790 = vmatmul.mubr.msk.bf16.vlgmr.msra.gmra.mrb[0].mxu1 %vm853_vm2, %v936_v38  ;;  %v723_v41 = vadd.f32 %v15541_v19, %v722_v40  ;;  %v12735_v42 = vpop.f32.mrb[9].mxu0 }
 0x125   : > { %12794 = vmatpush3.bf16.msra.mxu1 %v15550_v37  ;;  %v725_v43 = vpop.f32.mrb[10].mxu0  ;;  %12797 = vmatprep.mubr.msk.bf16.mxu1 %vm15288_vm0, %v15287_v0 }
 0x126   : > { %12795 = vmatprep.subr.bf16.mxu1 %v15287_v0  ;;  %v828_v44 = vmax.f32 %v723_v41, 0.0  ;;  %v726_v45 = vadd.f32 %v15541_v19, %v725_v43  ;;  %v12736_v46 = vpop.f32.mrb[11].mxu0 }
 0x128   : > { %858 = vst.msk [vmem:[#allocation2 + $0x20] sm:$0xff] %vm853_vm2, %v828_v44  ;;  %v829_v47 = vmax.f32 %v726_v45, 0.0  ;;  %v15626_v45 = vld [vmem:[#allocation6 + $0x50] sm:$0xff]  }
 0x129   : > { %12796 = vmatpush3.bf16.msra.mxu1 %v15553_v39  ;;  %v1112_v20 = vld [vmem:[#allocation2 + $0xf] ss:$2 sm:$0x7f]  ;;  %v1171_v43 = vld [vmem:[#allocation2 + $0x10] ss:$2 sm:$0x7f] }
 0x12a   : > { %859 = vst.msk [vmem:[#allocation2 + $0x28] sm:$0xff] %vm853_vm2, %v829_v47  ;;  %12801 = vmatprep.subr.bf16.mxu1 %v15287_v0  ;;  %v1113_v26 = vpack.c.bf16 %v1112_v20, %v1112_v20  ;;  %v1172_v46 = vpack.c.bf16 %v1171_v43, %v1171_v43  ;;  %v15716_v43 = vld [vmem:[#allocation6] sm:$0xff]  }
 0x12b   : > { %v730_v49 = vpop.f32.mrb[12].mxu0 }
 0x12c   : > { %v731_v51 = vadd.f32 %v15541_v19, %v730_v49  ;;  %v12739_v52 = vpop.f32.mrb[13].mxu0 }
 0x12d   : > { %v733_v53 = vpop.f32.mrb[14].mxu0 }
 0x12e   : > { %v830_v54 = vmax.f32 %v731_v51, 0.0  ;;  %v734_v56 = vadd.f32 %v15541_v19, %v733_v53  ;;  %v12740_v57 = vpop.f32.mrb[15].mxu0  ;;  %v15637_v51 = vld [vmem:[#allocation6 + $0x58] sm:$0xff]  }
 0x130   : > { %860 = vst.msk [vmem:[#allocation2 + $0x30] sm:$0xff] %vm853_vm2, %v830_v54  ;;  %12798 = vmatmul.mubr.msk.bf16.vlgmr.msra.gmra.mrb[0].mxu1 %vm853_vm2, %v995_v55  ;;  %v831_v58 = vmax.f32 %v734_v56, 0.0 }
 0x131   : > { %12802 = vmatpush3.bf16.msra.mxu1 %v15566_v50  ;;  %12805 = vmatprep.mubr.msk.bf16.mxu1 %vm15288_vm0, %v15287_v0 }
 0x132   : > { %861 = vst.msk [vmem:[#allocation2 + $0x38] sm:$0xff] %vm853_vm2, %v831_v58  ;;  %12803 = vmatprep.subr.bf16.mxu1 %v15287_v0 }
 0x133   : > { %v738_v60 = vpop.f32.mrb[16].mxu0 }
 0x134   : > { %v739_v61 = vadd.f32 %v15541_v19, %v738_v60  ;;  %v12743_v62 = vpop.f32.mrb[17].mxu0  ;;  %v1230_v60 = vld [vmem:[#allocation2 + $0x11] ss:$2 sm:$0x7f] }
 0x135   : > { %v741_v63 = vpop.f32.mrb[18].mxu0  ;;  %12804 = vmatpush3.bf16.msra.mxu1 %v15573_v59 }
 0x136   : > { %v832_v2 = vmax.f32 %v739_v61, 0.0  ;;  %v742_v3 = vadd.f32 %v15541_v19, %v741_v63  ;;  %12809 = vmatprep.subr.bf16.mxu1 %v15287_v0  ;;  %v12744_v4 = vpop.f32.mrb[19].mxu0 }
 0x137   : > { %v15660_v4 = vld [vmem:[#allocation6 + $0x68] sm:$0xff]  }
 0x138   : > { %862 = vst.msk [vmem:[#allocation2 + $0x40] sm:$0xff] %vm853_vm2, %v832_v2  ;;  %v833_v5 = vmax.f32 %v742_v3, 0.0  ;;  %v1231_v2 = vpack.c.bf16 %v1230_v60, %v1230_v60 }
 0x13a   : > { %863 = vst.msk [vmem:[#allocation2 + $0x48] sm:$0xff] %vm853_vm2, %v833_v5 }
 0x13b   : > { %v746_v8 = vpop.f32.mrb[20].mxu0 }
 0x13c   : > { %12806 = vmatmul.mubr.msk.bf16.vlgmr.msra.gmra.mrb[0].mxu1 %vm853_vm2, %v1054_v7  ;;  %v747_v9 = vadd.f32 %v15541_v19, %v746_v8  ;;  %v12747_v10 = vpop.f32.mrb[21].mxu0 }
 0x13d   : > { %12810 = vmatpush3.bf16.msra.mxu1 %v15584_v6  ;;  %12813 = vmatprep.mubr.msk.bf16.mxu1 %vm15288_vm0, %v15287_v0  ;;  %v749_v12 = vpop.f32.mrb[22].mxu0 }
 0x13e   : > { %12811 = vmatprep.subr.bf16.mxu1 %v15287_v0  ;;  %v834_v13 = vmax.f32 %v747_v9, 0.0  ;;  %v750_v14 = vadd.f32 %v15541_v19, %v749_v12  ;;  %v12748_v15 = vpop.f32.mrb[23].mxu0 }
 0x13f   : > { %v15671_v15 = vld [vmem:[#allocation6 + $0x70] sm:$0xff]  }
 0x140   : > { %864 = vst.msk [vmem:[#allocation2 + $0x50] sm:$0xff] %vm853_vm2, %v834_v13  ;;  %v835_v16 = vmax.f32 %v750_v14, 0.0  ;;  %v1289_v13 = vld [vmem:[#allocation2 + $0x1e] ss:$2 sm:$0x7f] }
 0x141   : > { %12812 = vmatpush3.bf16.msra.mxu1 %v15590_v11  ;;  %v1890_v17 = vld [vmem:[#allocation2 + $0x3c] ss:$2 sm:$0x7f]  ;;  %v1936_v32 = vld [vmem:[#allocation2 + $0x3d] ss:$2 sm:$0x7f] }
 0x142   : > { %v1891_v18 = vpack.c.bf16 %v1890_v17, %v1890_v17  ;;  %12817 = vmatprep.subr.bf16.mxu1 %v15287_v0  ;;  %865 = vst.msk [vmem:[#allocation2 + $0x58] sm:$0xff] %vm853_vm2, %v835_v16  ;;  %v1937_v34 = vpack.c.bf16 %v1936_v32, %v1936_v32  ;;  %v1982_v52 = vld [vmem:[#allocation2 + $0x3e] ss:$2 sm:$0x7f] }
 0x143   : > { %v754_v21 = vpop.f32.mrb[24].mxu0  ;;  %v1983_v57 = vpack.c.bf16 %v1982_v52, %v1982_v52  ;;  %v1407_v32 = vld [vmem:[#allocation2 + $0x20] ss:$2 sm:$0x7f] }
 0x144   : > { %12934 = vmatmul.mubr.msk.bf16.vlgmr.msra.gmra.mrb[60].mxu0 %vm853_vm2, %v1891_v18  ;;  %v755_v22 = vadd.f32 %v15541_v19, %v754_v21  ;;  %v12751_v23 = vpop.f32.mrb[25].mxu0  ;;  %v1290_v18 = vpack.c.bf16 %v1289_v13, %v1289_v13  ;;  %v15681_v21 = vld [vmem:[#allocation6 + $0x78] sm:$0xff]   ;;  %v1468_v52 = vld [vmem:[#allocation2 + $0x1e] ss:$2 sm:$0x7f] }
 0x145   : > { %12938 = vmatpush3.bf16.msra.mxu0 %v15550_v37  ;;  %12941 = vmatprep.mubr.msk.bf16.mxu0 %vm15288_vm0, %v15287_v0  ;;  %v757_v25 = vpop.f32.mrb[26].mxu0  ;;  %v1469_v60 = vpack.c.bf16 %v1468_v52, %v1468_v52 }
 0x146   : > { %12939 = vmatprep.subr.bf16.mxu0 %v15287_v0  ;;  %v836_v27 = vmax.f32 %v755_v22, 0.0  ;;  %v758_v28 = vadd.f32 %v15541_v19, %v757_v25  ;;  %v12752_v29 = vpop.f32.mrb[27].mxu0  ;;  %v1348_v25 = vld [vmem:[#allocation2 + $0x1f] ss:$2 sm:$0x7f] }
 0x147   : > { %v2029_v5 = vld [vmem:[#allocation2 + $0x4b] ss:$2 sm:$0x7f] }
 0x148   : > { %12814 = vmatmul.mubr.msk.bf16.vlgmr.msra.gmra.mrb[0].mxu1 %vm853_vm2, %v1113_v26  ;;  %866 = vst.msk [vmem:[#allocation2 + $0x60] sm:$0xff] %vm853_vm2, %v836_v27  ;;  %v837_v30 = vmax.f32 %v758_v28, 0.0  ;;  %v2030_v10 = vpack.c.bf16 %v2029_v5, %v2029_v5  ;;  %v15691_v26 = vld [vmem:[#allocation6 + $0x80] sm:$0xff]   ;;  %v1349_v27 = vpack.c.bf16 %v1348_v25, %v1348_v25  ;;  %v15700_v28 = vld [vmem:[#allocation6 + $0x88] sm:$0xff]  }
 0x149   : > { %12818 = vmatpush3.bf16.msra.mxu1 %v15602_v24  ;;  %12940 = vmatpush3.bf16.msra.mxu0 %v15553_v39  ;;  %v2076_v22 = vld [vmem:[#allocation2 + $0x4c] ss:$2 sm:$0x7f]  ;;  %v2123_v29 = vld [vmem:[#allocation2 + $0x4d] ss:$2 sm:$0x7f] }
 0x14a   : > { %12819 = vmatprep.subr.bf16.mxu1 %v15287_v0  ;;  %12821 = vmatprep.mubr.msk.bf16.mxu1 %vm15288_vm0, %v15287_v0  ;;  %867 = vst.msk [vmem:[#allocation2 + $0x68] sm:$0xff] %vm853_vm2, %v837_v30  ;;  %v2077_v23 = vpack.c.bf16 %v2076_v22, %v2076_v22  ;;  %v2124_v30 = vpack.c.bf16 %v2123_v29, %v2123_v29 }
 0x14b   : > { %12945 = vmatprep.subr.bf16.mxu0 %v15287_v0  ;;  %v762_v33 = vpop.f32.mrb[28].mxu0 }
 0x14c   : > { %v763_v35 = vadd.f32 %v15541_v19, %v762_v33  ;;  %v12755_v36 = vpop.f32.mrb[29].mxu0 }
 0x14d   : > { %12820 = vmatpush3.bf16.msra.mxu1 %v15613_v31  ;;  %v765_v38 = vpop.f32.mrb[30].mxu0 }
 0x14e   : > { %12825 = vmatprep.subr.bf16.mxu1 %v15287_v0  ;;  %v838_v40 = vmax.f32 %v763_v35, 0.0  ;;  %v766_v41 = vadd.f32 %v15541_v19, %v765_v38  ;;  %v12756_v42 = vpop.f32.mrb[31].mxu0 }
 0x150   : > { %12942 = vmatmul.mubr.msk.bf16.vlgmr.msra.gmra.mrb[60].mxu0 %vm853_vm2, %v1937_v34  ;;  %868 = vst.msk [vmem:[#allocation2 + $0x70] sm:$0xff] %vm853_vm2, %v838_v40  ;;  %v839_v44 = vmax.f32 %v766_v41, 0.0  ;;  %v1408_v34 = vpack.c.bf16 %v1407_v32, %v1407_v32 }
 0x151   : > { %12946 = vmatpush3.bf16.msra.mxu0 %v15566_v50  ;;  %12949 = vmatprep.mubr.msk.bf16.mxu0 %vm15288_vm0, %v15287_v0  ;;  %v2264_v5 = vld [vmem:[#allocation2 + $0x5c] ss:$2 sm:$0x7f] }
 0x152   : > { %12947 = vmatprep.subr.bf16.mxu0 %v15287_v0  ;;  %869 = vst.msk [vmem:[#allocation2 + $0x78] sm:$0xff] %vm853_vm2, %v839_v44  ;;  %v2170_v44 = vld [vmem:[#allocation2 + $0x5a] ss:$2 sm:$0x7f] }
 0x153   : > { %v770_v47 = vpop.f32.mrb[32].mxu0 }
 0x154   : > { %12822 = vmatmul.mubr.msk.bf16.vlgmr.msra.gmra.mrb[0].mxu1 %vm853_vm2, %v1172_v46  ;;  %v771_v48 = vadd.f32 %v15541_v19, %v770_v47  ;;  %v12759_v49 = vpop.f32.mrb[33].mxu0 }
 0x155   : > { %12826 = vmatpush3.bf16.msra.mxu1 %v15626_v45  ;;  %12948 = vmatpush3.bf16.msra.mxu0 %v15573_v59  ;;  %v773_v53 = vpop.f32.mrb[34].mxu0 }
 0x156   : > { %12827 = vmatprep.subr.bf16.mxu1 %v15287_v0  ;;  %12829 = vmatprep.mubr.msk.bf16.mxu1 %vm15288_vm0, %v15287_v0  ;;  %v840_v54 = vmax.f32 %v771_v48, 0.0  ;;  %v774_v55 = vadd.f32 %v15541_v19, %v773_v53  ;;  %v12760_v56 = vpop.f32.mrb[35].mxu0 }
 0x157   : > { %12953 = vmatprep.subr.bf16.mxu0 %v15287_v0 }
 0x158   : > { %870 = vst.msk [vmem:[#allocation2 + $0x80] sm:$0xff] %vm853_vm2, %v840_v54  ;;  %v841_v58 = vmax.f32 %v774_v55, 0.0  ;;  %v2171_v54 = vpack.c.bf16 %v2170_v44, %v2170_v44 }
 0x159   : > { %12828 = vmatpush3.bf16.msra.mxu1 %v15637_v51 }
 0x15a   : > { %12833 = vmatprep.subr.bf16.mxu1 %v15287_v0  ;;  %871 = vst.msk [vmem:[#allocation2 + $0x88] sm:$0xff] %vm853_vm2, %v841_v58  ;;  %v15728_v58 = vld [vmem:[#allocation6 + $0x8] sm:$0xff]  }
 0x15b   : > { %v778_v61 = vpop.f32.mrb[36].mxu0 }
 0x15c   : > { %12950 = vmatmul.mubr.msk.bf16.vlgmr.msra.gmra.mrb[60].mxu0 %vm853_vm2, %v1983_v57  ;;  %v779_v62 = vadd.f32 %v15541_v19, %v778_v61  ;;  %v12763_v63 = vpop.f32.mrb[37].mxu0 }
 0x15d   : > { %12954 = vmatpush3.bf16.msra.mxu0 %v15584_v6  ;;  %12957 = vmatprep.mubr.msk.bf16.mxu0 %vm15288_vm0, %v15287_v0  ;;  %v781_v7 = vpop.f32.mrb[38].mxu0  ;;  %v1514_v63 = vld [vmem:[#allocation2 + $0x1f] ss:$2 sm:$0x7f] }
 0x15e   : > { %12955 = vmatprep.subr.bf16.mxu0 %v15287_v0  ;;  %v842_v3 = vmax.f32 %v779_v62, 0.0  ;;  %v782_v8 = vadd.f32 %v15541_v19, %v781_v7  ;;  %v12764_v9 = vpop.f32.mrb[39].mxu0  ;;  %v2217_v62 = vld [vmem:[#allocation2 + $0x5b] ss:$2 sm:$0x7f] }
 0x15f   : > { %v1560_v7 = vld [vmem:[#allocation2 + $0x20] ss:$2 sm:$0x7f]  ;;  %v2780_v22 = vld [vmem:[#allocation2 + $0x79] ss:$2 sm:$0x7f] }
 0x160   : > { %12830 = vmatmul.mubr.msk.bf16.vlgmr.msra.gmra.mrb[0].mxu1 %vm853_vm2, %v1231_v2  ;;  %872 = vst.msk [vmem:[#allocation2 + $0x90] sm:$0xff] %vm853_vm2, %v842_v3  ;;  %v843_v12 = vmax.f32 %v782_v8, 0.0  ;;  %v2218_v2 = vpack.c.bf16 %v2217_v62, %v2217_v62  ;;  %v1515_v3 = vpack.c.bf16 %v1514_v63, %v1514_v63  ;;  %v2265_v8 = vpack.c.bf16 %v2264_v5, %v2264_v5  ;;  %v1842_v5 = vld [vmem:[#allocation2 + $0x3e] ss:$2 sm:$0x7f] }
 0x161   : > { %12834 = vmatpush3.bf16.msra.mxu1 %v15650_v1  ;;  %12956 = vmatpush3.bf16.msra.mxu0 %v15590_v11  ;;  %v1561_v9 = vpack.c.bf16 %v1560_v7, %v1560_v7  ;;  %v1843_v7 = vpack.c.bf16 %v1842_v5, %v1842_v5  ;;  %v15176_v5 = vld [vmem:[#allocation6 + $0x30] sm:$0xff]  }
 0x162   : > { %12835 = vmatprep.subr.bf16.mxu1 %v15287_v0  ;;  %12837 = vmatprep.mubr.msk.bf16.mxu1 %vm15288_vm0, %v15287_v0  ;;  %873 = vst.msk [vmem:[#allocation2 + $0x98] sm:$0xff] %vm853_vm2, %v843_v12 }
 0x163   : > { %12961 = vmatprep.subr.bf16.mxu0 %v15287_v0  ;;  %v786_v14 = vpop.f32.mrb[40].mxu0 }
 0x164   : > { %v787_v16 = vadd.f32 %v15541_v19, %v786_v14  ;;  %v12767_v17 = vpop.f32.mrb[41].mxu0 }
 0x165   : > { %12836 = vmatpush3.bf16.msra.mxu1 %v15660_v4  ;;  %v789_v33 = vpop.f32.mrb[42].mxu0  ;;  %v1607_v17 = vld [vmem:[#allocation2 + $0x2d] ss:$2 sm:$0x7f] }
 0x166   : > { %12841 = vmatprep.subr.bf16.mxu1 %v15287_v0  ;;  %v844_v20 = vmax.f32 %v787_v16, 0.0  ;;  %v790_v35 = vadd.f32 %v15541_v19, %v789_v33  ;;  %v12768_v36 = vpop.f32.mrb[43].mxu0 }
 0x167   : > { %v1701_v36 = vld [vmem:[#allocation2 + $0x2f] ss:$2 sm:$0x7f] }
 0x168   : > { %12958 = vmatmul.mubr.msk.bf16.vlgmr.msra.gmra.mrb[60].mxu0 %vm853_vm2, %v2030_v10  ;;  %874 = vst.msk [vmem:[#allocation2 + $0xa0] sm:$0xff] %vm853_vm2, %v844_v20  ;;  %v845_v40 = vmax.f32 %v790_v35, 0.0  ;;  %v2734_v10 = vld [vmem:[#allocation2 + $0x78] ss:$2 sm:$0x7f]  ;;  %v1608_v20 = vpack.c.bf16 %v1607_v17, %v1607_v17 }
 0x169   : > { %12962 = vmatpush3.bf16.msra.mxu0 %v15602_v24  ;;  %12965 = vmatprep.mubr.msk.bf16.mxu0 %vm15288_vm0, %v15287_v0  ;;  %v2735_v12 = vpack.c.bf16 %v2734_v10, %v2734_v10  ;;  %v2404_v17 = vld [vmem:[#allocation2 + $0x5c] ss:$2 sm:$0x7f] }
 0x16a   : > { %12963 = vmatprep.subr.bf16.mxu0 %v15287_v0  ;;  %875 = vst.msk [vmem:[#allocation2 + $0xa8] sm:$0xff] %vm853_vm2, %v845_v40  ;;  %v2873_v40 = vld [vmem:[#allocation2 + $0x87] ss:$2 sm:$0x7f] }
 0x16b   : > { %v794_v38 = vpop.f32.mrb[44].mxu0 }
 0x16c   : > { %12838 = vmatmul.mubr.msk.bf16.vlgmr.msra.gmra.mrb[0].mxu1 %vm853_vm2, %v1290_v18  ;;  %v795_v41 = vadd.f32 %v15541_v19, %v794_v38  ;;  %v12771_v42 = vpop.f32.mrb[45].mxu0  ;;  %v1702_v38 = vpack.c.bf16 %v1701_v36, %v1701_v36 }
 0x16d   : > { %12842 = vmatpush3.bf16.msra.mxu1 %v15671_v15  ;;  %12964 = vmatpush3.bf16.msra.mxu0 %v15613_v31  ;;  %v797_v46 = vpop.f32.mrb[46].mxu0 }
 0x16e   : > { %12843 = vmatprep.subr.bf16.mxu1 %v15287_v0  ;;  %12845 = vmatprep.mubr.msk.bf16.mxu1 %vm15288_vm0, %v15287_v0  ;;  %v846_v47 = vmax.f32 %v795_v41, 0.0  ;;  %v798_v48 = vadd.f32 %v15541_v19, %v797_v46  ;;  %v12772_v49 = vpop.f32.mrb[47].mxu0  ;;  %v2874_v41 = vpack.c.bf16 %v2873_v40, %v2873_v40 }
 0x16f   : > { %12969 = vmatprep.subr.bf16.mxu0 %v15287_v0 }
 0x170   : > { %876 = vst.msk [vmem:[#allocation2 + $0xb0] sm:$0xff] %vm853_vm2, %v846_v47  ;;  %v847_v55 = vmax.f32 %v798_v48, 0.0  ;;  %v1748_v47 = vld [vmem:[#allocation2 + $0x3c] ss:$2 sm:$0x7f] }
 0x171   : > { %12844 = vmatpush3.bf16.msra.mxu1 %v15681_v21  ;;  %v1749_v49 = vpack.c.bf16 %v1748_v47, %v1748_v47  ;;  %v2686_v47 = vld [vmem:[#allocation2 + $0x7a] ss:$2 sm:$0x7f] }
 0x172   : > { %12849 = vmatprep.subr.bf16.mxu1 %v15287_v0  ;;  %877 = vst.msk [vmem:[#allocation2 + $0xb8] sm:$0xff] %vm853_vm2, %v847_v55  ;;  %v2967_v55 = vld [vmem:[#allocation2 + $0x89] ss:$2 sm:$0x7f] }
 0x173   : > { %v802_v53 = vpop.f32.mrb[48].mxu0  ;;  %v2968_v63 = vpack.c.bf16 %v2967_v55, %v2967_v55 }
 0x174   : > { %12966 = vmatmul.mubr.msk.bf16.vlgmr.msra.gmra.mrb[60].mxu0 %vm853_vm2, %v2077_v23  ;;  %v803_v56 = vadd.f32 %v15541_v19, %v802_v53  ;;  %v12775_v57 = vpop.f32.mrb[49].mxu0  ;;  %v2781_v23 = vpack.c.bf16 %v2780_v22, %v2780_v22  ;;  %v1795_v53 = vld [vmem:[#allocation2 + $0x3d] ss:$2 sm:$0x7f] }
 0x175   : > { %12970 = vmatpush3.bf16.msra.mxu0 %v15626_v45  ;;  %12973 = vmatprep.mubr.msk.bf16.mxu0 %vm15288_vm0, %v15287_v0  ;;  %v805_v13 = vpop.f32.mrb[50].mxu0  ;;  %v15171_v57 = vld [vmem:[%s19321_s2] ss:$0 sm:$0xff] }
 0x176   : > { %12971 = vmatprep.subr.bf16.mxu0 %v15287_v0  ;;  %v848_v61 = vmax.f32 %v803_v56, 0.0  ;;  %v806_v14 = vadd.f32 %v15541_v19, %v805_v13  ;;  %v12776_v16 = vpop.f32.mrb[51].mxu0  ;;  %v3061_v13 = vld [vmem:[#allocation2 + $0x97] ss:$2 sm:$0x7f] }
 0x178   : > { %12846 = vmatmul.mubr.msk.bf16.vlgmr.msra.gmra.mrb[0].mxu1 %vm853_vm2, %v1349_v27  ;;  %878 = vst.msk [vmem:[#allocation2 + $0xc0] sm:$0xff] %vm853_vm2, %v848_v61  ;;  %v849_v18 = vmax.f32 %v806_v14, 0.0  ;;  %v3062_v14 = vpack.c.bf16 %v3061_v13, %v3061_v13 }
 0x179   : > { %12850 = vmatpush3.bf16.msra.mxu1 %v15691_v26  ;;  %12972 = vmatpush3.bf16.msra.mxu0 %v15637_v51 }
 0x17a   : > { %12851 = vmatprep.subr.bf16.mxu1 %v15287_v0  ;;  %12853 = vmatprep.mubr.msk.bf16.mxu1 %vm15288_vm0, %v15287_v0  ;;  %879 = vst.msk [vmem:[#allocation2 + $0xc8] sm:$0xff] %vm853_vm2, %v849_v18 }
 0x17b   : > { %12977 = vmatprep.subr.bf16.mxu0 %v15287_v0  ;;  %v810_v25 = vpop.f32.mrb[52].mxu0 }
 0x17c   : > { %v811_v27 = vadd.f32 %v15541_v19, %v810_v25  ;;  %v12779_v29 = vpop.f32.mrb[53].mxu0  ;;  %v2451_v25 = vld [vmem:[#allocation2 + $0x69] ss:$2 sm:$0x7f] }
 0x17d   : > { %12852 = vmatpush3.bf16.msra.mxu1 %v15700_v28  ;;  %v813_v42 = vpop.f32.mrb[54].mxu0  ;;  %v2452_v29 = vpack.c.bf16 %v2451_v25, %v2451_v25  ;;  %v15179_v25 = vld [vmem:[#allocation6 + $0x48] sm:$0xff]  }
 0x17e   : > { %12857 = vmatprep.subr.bf16.mxu1 %v15287_v0  ;;  %v850_v32 = vmax.f32 %v811_v27, 0.0  ;;  %v814_v44 = vadd.f32 %v15541_v19, %v813_v42  ;;  %v12780_v46 = vpop.f32.mrb[55].mxu0  ;;  %v2920_v19 = vld [vmem:[#allocation2 + $0x88] ss:$2 sm:$0x7f] }
 0x17f   : > { %v2921_v52 = vpack.c.bf16 %v2920_v19, %v2920_v19  ;;  %v3578_v22 = vld [vmem:[#allocation2 + $0xb4] ss:$2 sm:$0x7f]  ;;  %v15912_v27 = vld [vmem:[#allocation6 + $0x10] sm:$0xff]  }
 0x180   : > { %12974 = vmatmul.mubr.msk.bf16.vlgmr.msra.gmra.mrb[60].mxu0 %vm853_vm2, %v2124_v30  ;;  %v1654_v30 = vld [vmem:[#allocation2 + $0x2e] ss:$2 sm:$0x7f]  ;;  %880 = vst.msk [vmem:[#allocation2 + $0xd0] sm:$0xff] %vm853_vm2, %v850_v32  ;;  %v851_v48 = vmax.f32 %v814_v44, 0.0 }
 0x181   : > { %12978 = vmatpush3.bf16.msra.mxu0 %v15650_v1  ;;  %12981 = vmatprep.mubr.msk.bf16.mxu0 %vm15288_vm0, %v15287_v0  ;;  %v1655_v33 = vpack.c.bf16 %v1654_v30, %v1654_v30  ;;  %v15920_v30 = vld [vmem:[#allocation6 + $0x18] sm:$0xff]   ;;  %v3717_v40 = vld [vmem:[#allocation2 + $0xc3] ss:$2 sm:$0x7f] }
 0x182   : > { %12979 = vmatprep.subr.bf16.mxu0 %v15287_v0  ;;  %881 = vst.msk [vmem:[#allocation2 + $0xd8] sm:$0xff] %vm853_vm2, %v851_v48  ;;  %v3624_v32 = vld [vmem:[#allocation2 + $0xb5] ss:$2 sm:$0x7f]  ;;  %v15995_v48 = vld [vmem:[%s19323_s4] ss:$0 sm:$0xff] }
 0x183   : > { %v818_v56 = vpop.f32.mrb[56].mxu0  ;;  %v3670_v36 = vld [vmem:[#allocation2 + $0xb6] ss:$2 sm:$0x7f] }
 0x184   : > { %12854 = vmatmul.mubr.msk.bf16.vlgmr.msra.gmra.mrb[0].mxu1 %vm853_vm2, %v1408_v34  ;;  %v2826_v34 = vld [vmem:[#allocation2 + $0x7a] ss:$2 sm:$0x7f]  ;;  %v12783_v61 = vpop.f32.mrb[57].mxu0 }
 0x185   : > { %12858 = vmatpush3.bf16.msra.mxu1 %v15716_v43  ;;  %12980 = vmatpush3.bf16.msra.mxu0 %v15660_v4  ;;  %v2827_v35 = vpack.c.bf16 %v2826_v34, %v2826_v34  ;;  %v821_v62 = vpop.f32.mrb[58].mxu0  ;;  %v2498_v34 = vld [vmem:[#allocation2 + $0x6a] ss:$2 sm:$0x7f]  ;;  %v15174_v61 = vld [vmem:[#allocation6 + $0x20] sm:$0xff]  }
 0x186   : > { %12859 = vmatprep.subr.bf16.mxu1 %v15287_v0  ;;  %12861 = vmatprep.mubr.msk.bf16.mxu1 %vm15288_vm0, %v15287_v0  ;;  %v2639_v44 = vld [vmem:[#allocation2 + $0x79] ss:$2 sm:$0x7f]  ;;  %v3156_v19 = vld [vmem:[#allocation2 + $0x96] ss:$2 sm:$0x7f] }
 0x187   : > { %12985 = vmatprep.subr.bf16.mxu0 %v15287_v0  ;;  %v3764_v42 = vld [vmem:[#allocation2 + $0xc4] ss:$2 sm:$0x7f]  ;;  %v3811_v46 = vld [vmem:[#allocation2 + $0xc5] ss:$2 sm:$0x7f] }
 0x189   : > { %12860 = vmatpush3.bf16.msra.mxu1 %v15728_v58 }
 0x18a   : > { %12865 = vmatprep.subr.bf16.mxu1 %v15287_v0 }
 0x18c   : > { %12862 = vmatmul.mubr.msk.bf16.vlgmr.msra.gmra.mrb[4].mxu1 %vm853_vm2, %v1469_v60  ;;  %12982 = vmatmul.mubr.msk.bf16.vlgmr.msra.gmra.mrb[60].mxu0 %vm853_vm2, %v2171_v54  ;;  %v1796_v54 = vpack.c.bf16 %v1795_v53, %v1795_v53  ;;  %v819_v60 = vadd.f32 %v15171_v57, %v818_v56  ;;  %v3157_v57 = vpack.c.bf16 %v3156_v19, %v3156_v19  ;;  %v3483_v19 = vld [vmem:[#allocation2 + $0xb5] ss:$2 sm:$0x7f] }
 0x18d   : > { %12866 = vmatpush3.bf16.msra.mxu1 %v15550_v37  ;;  %12986 = vmatpush3.bf16.msra.mxu0 %v15671_v15 }
 0x18e   : > { %12867 = vmatprep.subr.bf16.mxu1 %v15287_v0  ;;  %12987 = vmatprep.subr.bf16.mxu0 %v15287_v0 }
 0x18f   : > { %12869 = vmatprep.mubr.msk.bf16.mxu1 %vm15288_vm0, %v15287_v0  ;;  %12989 = vmatprep.mubr.msk.bf16.mxu0 %vm15288_vm0, %v15287_v0 }
 0x191   : > { %12868 = vmatpush3.bf16.msra.mxu1 %v15553_v39  ;;  %12988 = vmatpush3.bf16.msra.mxu0 %v15681_v21 }
 0x192   : > { %12873 = vmatprep.subr.bf16.mxu1 %v15287_v0  ;;  %12993 = vmatprep.subr.bf16.mxu0 %v15287_v0 }
 0x198   : > { %12870 = vmatmul.mubr.msk.bf16.vlgmr.msra.gmra.mrb[4].mxu1 %vm853_vm2, %v1515_v3  ;;  %12990 = vmatmul.mubr.msk.bf16.vlgmr.msra.gmra.mrb[60].mxu0 %vm853_vm2, %v2218_v2  ;;  %v852_v2 = vmax.f32 %v819_v60, 0.0  ;;  %v12784_v3 = vpop.f32.mrb[59].mxu0 }
 0x199   : > { %12874 = vmatpush3.bf16.msra.mxu1 %v15566_v50  ;;  %12994 = vmatpush3.bf16.msra.mxu0 %v15691_v26 }
 0x19a   : > { %12875 = vmatprep.subr.bf16.mxu1 %v15287_v0  ;;  %12995 = vmatprep.subr.bf16.mxu0 %v15287_v0  ;;  %883 = vst.msk [vmem:[#allocation2 + $0xe0] sm:$0x1] %vm882_vm3, %v852_v2  ;;  %v16035_v2 = vld [vmem:[%s19324_s5] sm:$0xff]  }
 0x19b   : > { %12877 = vmatprep.mubr.msk.bf16.mxu1 %vm15288_vm0, %v15287_v0  ;;  %12997 = vmatprep.mubr.msk.bf16.mxu0 %vm15288_vm0, %v15287_v0 }
 0x19d   : > { %12876 = vmatpush3.bf16.msra.mxu1 %v15573_v59  ;;  %12996 = vmatpush3.bf16.msra.mxu0 %v15700_v28 }
 0x19e   : > { %12881 = vmatprep.subr.bf16.mxu1 %v15287_v0  ;;  %13073 = vmatprep.subr.bf16.mxu0 %v15287_v0 }
 0x1a1   : > { %v3952_v62 = vld [vmem:[#allocation2 + $0xd4] ss:$2 sm:$0x7f] }
 0x1a4   : > { %12878 = vmatmul.mubr.msk.bf16.vlgmr.msra.gmra.mrb[4].mxu1 %vm853_vm2, %v1561_v9  ;;  %12998 = vmatmul.mubr.msk.bf16.vlgmr.msra.gmra.mrb[60].mxu0 %vm853_vm2, %v2265_v8  ;;  %v3014_v8 = vld [vmem:[#allocation2 + $0x96] ss:$2 sm:$0x7f] }
 0x1a5   : > { %12882 = vmatpush3.bf16.msra.mxu1 %v15584_v6  ;;  %13074 = vmatpush3.bf16.msra.mxu0 %v15716_v43  ;;  %v2312_v9 = vld [vmem:[#allocation2 + $0x5a] ss:$2 sm:$0x7f]  ;;  %v3015_v10 = vpack.c.bf16 %v3014_v8, %v3014_v8 }
 0x1a6   : > { %12883 = vmatprep.subr.bf16.mxu1 %v15287_v0  ;;  %13075 = vmatprep.subr.bf16.mxu0 %v15287_v0 }
 0x1a7   : > { %13077 = vmatprep.mubr.msk.bf16.mxu0 %vm15288_vm0, %v15287_v0  ;;  %12885 = vmatprep.mubr.msk.bf16.mxu1 %vm15288_vm0, %v15287_v0 }
 0x1a9   : > { %12884 = vmatpush3.bf16.msra.mxu1 %v15590_v11  ;;  %13076 = vmatpush3.bf16.msra.mxu0 %v15728_v58 }
 0x1aa   : > { %12889 = vmatprep.subr.bf16.mxu1 %v15287_v0  ;;  %13081 = vmatprep.subr.bf16.mxu0 %v15287_v0 }
 0x1ac   : > { %13078 = vmatmul.mubr.msk.bf16.vlgmr.msra.gmra.mrb[64].mxu0 %vm853_vm2, %v2735_v12  ;;  %v2313_v12 = vpack.c.bf16 %v2312_v9, %v2312_v9 }
 0x1ad   : > { %13082 = vmatpush3.bf16.msra.mxu0 %v15550_v37  ;;  %13085 = vmatprep.mubr.msk.bf16.mxu0 %vm15288_vm0, %v15287_v0 }
 0x1ae   : > { %13083 = vmatprep.subr.bf16.mxu0 %v15287_v0 }
 0x1b0   : > { %12886 = vmatmul.mubr.msk.bf16.vlgmr.msra.gmra.mrb[4].mxu1 %vm853_vm2, %v1608_v20  ;;  %v2405_v20 = vpack.c.bf16 %v2404_v17, %v2404_v17 }
 0x1b1   : > { %12890 = vmatpush3.bf16.msra.mxu1 %v15602_v24  ;;  %13084 = vmatpush3.bf16.msra.mxu0 %v15553_v39 }
 0x1b2   : > { %12891 = vmatprep.subr.bf16.mxu1 %v15287_v0  ;;  %12893 = vmatprep.mubr.msk.bf16.mxu1 %vm15288_vm0, %v15287_v0 }
 0x1b3   : > { %13089 = vmatprep.subr.bf16.mxu0 %v15287_v0 }
 0x1b5   : > { %12892 = vmatpush3.bf16.msra.mxu1 %v15613_v31 }
 0x1b6   : > { %12897 = vmatprep.subr.bf16.mxu1 %v15287_v0 }
 0x1b8   : > { %13086 = vmatmul.mubr.msk.bf16.vlgmr.msra.gmra.mrb[64].mxu0 %vm853_vm2, %v2781_v23  ;;  %v3579_v23 = vpack.c.bf16 %v3578_v22, %v3578_v22  ;;  %v16075_v22 = vld [vmem:[%s19324_s5 + $0x20] sm:$0xff]  }
 0x1b9   : > { %13090 = vmatpush3.bf16.msra.mxu0 %v15566_v50  ;;  %13093 = vmatprep.mubr.msk.bf16.mxu0 %vm15288_vm0, %v15287_v0 }
 0x1ba   : > { %13091 = vmatprep.subr.bf16.mxu0 %v15287_v0 }
 0x1bc   : > { %12894 = vmatmul.mubr.msk.bf16.vlgmr.msra.gmra.mrb[4].mxu1 %vm853_vm2, %v1655_v33  ;;  %v3625_v33 = vpack.c.bf16 %v3624_v32, %v3624_v32  ;;  %v16094_v32 = vld [vmem:[%s19324_s5 + $0x30] sm:$0xff]  }
 0x1bd   : > { %12898 = vmatpush3.bf16.msra.mxu1 %v15626_v45  ;;  %13092 = vmatpush3.bf16.msra.mxu0 %v15573_v59 }
 0x1be   : > { %12899 = vmatprep.subr.bf16.mxu1 %v15287_v0  ;;  %12901 = vmatprep.mubr.msk.bf16.mxu1 %vm15288_vm0, %v15287_v0 }
 0x1bf   : > { %13097 = vmatprep.subr.bf16.mxu0 %v15287_v0 }
 0x1c1   : > { %12900 = vmatpush3.bf16.msra.mxu1 %v15637_v51 }
 0x1c2   : > { %12905 = vmatprep.subr.bf16.mxu1 %v15287_v0 }
 0x1c4   : > { %13094 = vmatmul.mubr.msk.bf16.vlgmr.msra.gmra.mrb[64].mxu0 %vm853_vm2, %v2827_v35  ;;  %v2499_v35 = vpack.c.bf16 %v2498_v34, %v2498_v34  ;;  %v16105_v34 = vld [vmem:[%s19324_s5 + $0x38] sm:$0xff]  }
 0x1c5   : > { %13098 = vmatpush3.bf16.msra.mxu0 %v15584_v6  ;;  %13101 = vmatprep.mubr.msk.bf16.mxu0 %vm15288_vm0, %v15287_v0 }
 0x1c6   : > { %13099 = vmatprep.subr.bf16.mxu0 %v15287_v0 }
 0x1c8   : > { %12902 = vmatmul.mubr.msk.bf16.vlgmr.msra.gmra.mrb[4].mxu1 %vm853_vm2, %v1702_v38  ;;  %v2545_v38 = vld [vmem:[#allocation2 + $0x6b] ss:$2 sm:$0x7f] }
 0x1c9   : > { %12906 = vmatpush3.bf16.msra.mxu1 %v15650_v1  ;;  %13100 = vmatpush3.bf16.msra.mxu0 %v15590_v11 }
 0x1ca   : > { %12907 = vmatprep.subr.bf16.mxu1 %v15287_v0  ;;  %12909 = vmatprep.mubr.msk.bf16.mxu1 %vm15288_vm0, %v15287_v0 }
 0x1cb   : > { %13105 = vmatprep.subr.bf16.mxu0 %v15287_v0 }
 0x1cd   : > { %12908 = vmatpush3.bf16.msra.mxu1 %v15660_v4 }
 0x1ce   : > { %12913 = vmatprep.subr.bf16.mxu1 %v15287_v0 }
 0x1d0   : > { %13102 = vmatmul.mubr.msk.bf16.vlgmr.msra.gmra.mrb[64].mxu0 %vm853_vm2, %v2874_v41  ;;  %v2592_v41 = vld [vmem:[#allocation2 + $0x78] ss:$2 sm:$0x7f] }
 0x1d1   : > { %13106 = vmatpush3.bf16.msra.mxu0 %v15602_v24  ;;  %13109 = vmatprep.mubr.msk.bf16.mxu0 %vm15288_vm0, %v15287_v0 }
 0x1d2   : > { %13107 = vmatprep.subr.bf16.mxu0 %v15287_v0 }
 0x1d4   : > { %12910 = vmatmul.mubr.msk.bf16.vlgmr.msra.gmra.mrb[4].mxu1 %vm853_vm2, %v1749_v49  ;;  %v3858_v49 = vld [vmem:[#allocation2 + $0xd2] ss:$2 sm:$0x7f] }
 0x1d5   : > { %12914 = vmatpush3.bf16.msra.mxu1 %v15671_v15  ;;  %13108 = vmatpush3.bf16.msra.mxu0 %v15613_v31  ;;  %v3859_v53 = vpack.c.bf16 %v3858_v49, %v3858_v49  ;;  %v15185_v49 = vld [vmem:[#allocation6 + $0x78] sm:$0xff]  }
 0x1d6   : > { %12915 = vmatprep.subr.bf16.mxu1 %v15287_v0  ;;  %12917 = vmatprep.mubr.msk.bf16.mxu1 %vm15288_vm0, %v15287_v0 }
 0x1d7   : > { %13113 = vmatprep.subr.bf16.mxu0 %v15287_v0 }
 0x1d9   : > { %12916 = vmatpush3.bf16.msra.mxu1 %v15681_v21 }
 0x1da   : > { %12921 = vmatprep.subr.bf16.mxu1 %v15287_v0 }
 0x1dc   : > { %13110 = vmatmul.mubr.msk.bf16.vlgmr.msra.gmra.mrb[64].mxu0 %vm853_vm2, %v2921_v52 }
 0x1dd   : > { %13114 = vmatpush3.bf16.msra.mxu0 %v15626_v45  ;;  %13117 = vmatprep.mubr.msk.bf16.mxu0 %vm15288_vm0, %v15287_v0 }
 0x1de   : > { %13115 = vmatprep.subr.bf16.mxu0 %v15287_v0 }
 0x1e0   : > { %12918 = vmatmul.mubr.msk.bf16.vlgmr.msra.gmra.mrb[4].mxu1 %vm853_vm2, %v1796_v54 }
 0x1e1   : > { %12922 = vmatpush3.bf16.msra.mxu1 %v15691_v26  ;;  %13116 = vmatpush3.bf16.msra.mxu0 %v15637_v51 }
 0x1e2   : > { %12923 = vmatprep.subr.bf16.mxu1 %v15287_v0  ;;  %12925 = vmatprep.mubr.msk.bf16.mxu1 %vm15288_vm0, %v15287_v0 }
 0x1e3   : > { %13121 = vmatprep.subr.bf16.mxu0 %v15287_v0 }
 0x1e5   : > { %12924 = vmatpush3.bf16.msra.mxu1 %v15700_v28 }
 0x1e6   : > { %13001 = vmatprep.subr.bf16.mxu1 %v15287_v0 }
 0x1e8   : > { %13118 = vmatmul.mubr.msk.bf16.vlgmr.msra.gmra.mrb[64].mxu0 %vm853_vm2, %v2968_v63  ;;  %v3953_v63 = vpack.c.bf16 %v3952_v62, %v3952_v62 }
 0x1e9   : > { %13122 = vmatpush3.bf16.msra.mxu0 %v15650_v1  ;;  %13125 = vmatprep.mubr.msk.bf16.mxu0 %vm15288_vm0, %v15287_v0 }
 0x1ea   : > { %13123 = vmatprep.subr.bf16.mxu0 %v15287_v0 }
 0x1ec   : > { %12926 = vmatmul.mubr.msk.bf16.vlgmr.msra.gmra.mrb[4].mxu1 %vm853_vm2, %v1843_v7 }
 0x1ed   : > { %13002 = vmatpush3.bf16.msra.mxu1 %v15716_v43  ;;  %13005 = vmatprep.mubr.msk.bf16.mxu1 %vm15288_vm0, %v15287_v0 }
 0x1ee   : > { %13003 = vmatprep.subr.bf16.mxu1 %v15287_v0  ;;  %13124 = vmatpush3.bf16.msra.mxu0 %v15660_v4 }
 0x1ef   : > { %13129 = vmatprep.subr.bf16.mxu0 %v15287_v0 }
 0x1f1   : > { %13004 = vmatpush3.bf16.msra.mxu1 %v15728_v58 }
 0x1f2   : > { %13009 = vmatprep.subr.bf16.mxu1 %v15287_v0 }
 0x1f4   : > { %13006 = vmatmul.mubr.msk.bf16.vlgmr.msra.gmra.mrb[8].mxu1 %vm853_vm2, %v2313_v12  ;;  %13126 = vmatmul.mubr.msk.bf16.vlgmr.msra.gmra.mrb[64].mxu0 %vm853_vm2, %v3015_v10  ;;  %v15177_v10 = vld [vmem:[#allocation6 + $0x38] sm:$0xff]   ;;  %v16056_v12 = vld [vmem:[%s19324_s5 + $0x10] sm:$0xff]  }
 0x1f5   : > { %13010 = vmatpush3.bf16.msra.mxu1 %v15550_v37  ;;  %13130 = vmatpush3.bf16.msra.mxu0 %v15671_v15  ;;  %v2358_v37 = vld [vmem:[#allocation2 + $0x5b] ss:$2 sm:$0x7f] }
 0x1f6   : > { %13011 = vmatprep.subr.bf16.mxu1 %v15287_v0  ;;  %13131 = vmatprep.subr.bf16.mxu0 %v15287_v0  ;;  %v2359_v16 = vpack.c.bf16 %v2358_v37, %v2358_v37 }
 0x1f7   : > { %13013 = vmatprep.mubr.msk.bf16.mxu1 %vm15288_vm0, %v15287_v0  ;;  %13133 = vmatprep.mubr.msk.bf16.mxu0 %vm15288_vm0, %v15287_v0 }
 0x1f9   : > { %13012 = vmatpush3.bf16.msra.mxu1 %v15553_v39  ;;  %13132 = vmatpush3.bf16.msra.mxu0 %v15681_v21  ;;  %v3108_v39 = vld [vmem:[#allocation2 + $0x98] ss:$2 sm:$0x7f] }
 0x1fa   : > { %13017 = vmatprep.subr.bf16.mxu1 %v15287_v0  ;;  %13137 = vmatprep.subr.bf16.mxu0 %v15287_v0  ;;  %v3109_v18 = vpack.c.bf16 %v3108_v39, %v3108_v39  ;;  %v16065_v39 = vld [vmem:[%s19324_s5 + $0x18] sm:$0xff]  }
 0x200   : > { %13014 = vmatmul.mubr.msk.bf16.vlgmr.msra.gmra.mrb[8].mxu1 %vm853_vm2, %v2359_v16  ;;  %13134 = vmatmul.mubr.msk.bf16.vlgmr.msra.gmra.mrb[64].mxu0 %vm853_vm2, %v3062_v14  ;;  %v3295_v16 = vld [vmem:[#allocation2 + $0xa5] ss:$2 sm:$0x7f] }
 0x201   : > { %13018 = vmatpush3.bf16.msra.mxu1 %v15566_v50  ;;  %13138 = vmatpush3.bf16.msra.mxu0 %v15691_v26  ;;  %v3296_v17 = vpack.c.bf16 %v3295_v16, %v3295_v16 }
 0x202   : > { %13019 = vmatprep.subr.bf16.mxu1 %v15287_v0  ;;  %13139 = vmatprep.subr.bf16.mxu0 %v15287_v0 }
 0x203   : > { %13021 = vmatprep.mubr.msk.bf16.mxu1 %vm15288_vm0, %v15287_v0  ;;  %13141 = vmatprep.mubr.msk.bf16.mxu0 %vm15288_vm0, %v15287_v0 }
 0x205   : > { %13020 = vmatpush3.bf16.msra.mxu1 %v15573_v59  ;;  %13140 = vmatpush3.bf16.msra.mxu0 %v15700_v28 }
 0x206   : > { %13025 = vmatprep.subr.bf16.mxu1 %v15287_v0  ;;  %13217 = vmatprep.subr.bf16.mxu0 %v15287_v0 }
 0x20c   : > { %13022 = vmatmul.mubr.msk.bf16.vlgmr.msra.gmra.mrb[8].mxu1 %vm853_vm2, %v2405_v20  ;;  %13142 = vmatmul.mubr.msk.bf16.vlgmr.msra.gmra.mrb[64].mxu0 %vm853_vm2, %v3109_v18  ;;  %v15178_v18 = vld [vmem:[#allocation6 + $0x40] sm:$0xff]  }
 0x20d   : > { %13026 = vmatpush3.bf16.msra.mxu1 %v15584_v6  ;;  %13218 = vmatpush3.bf16.msra.mxu0 %v15716_v43 }
 0x20e   : > { %13027 = vmatprep.subr.bf16.mxu1 %v15287_v0  ;;  %13219 = vmatprep.subr.bf16.mxu0 %v15287_v0 }
 0x20f   : > { %13221 = vmatprep.mubr.msk.bf16.mxu0 %vm15288_vm0, %v15287_v0  ;;  %13029 = vmatprep.mubr.msk.bf16.mxu1 %vm15288_vm0, %v15287_v0 }
 0x211   : > { %13028 = vmatpush3.bf16.msra.mxu1 %v15590_v11  ;;  %13220 = vmatpush3.bf16.msra.mxu0 %v15728_v58 }
 0x212   : > { %13033 = vmatprep.subr.bf16.mxu1 %v15287_v0  ;;  %13225 = vmatprep.subr.bf16.mxu0 %v15287_v0 }
 0x214   : > { %13222 = vmatmul.mubr.msk.bf16.vlgmr.msra.gmra.mrb[68].mxu0 %vm853_vm2, %v3579_v23 }
 0x215   : > { %13226 = vmatpush3.bf16.msra.mxu0 %v15912_v27  ;;  %13229 = vmatprep.mubr.msk.bf16.mxu0 %vm15288_vm0, %v15287_v0 }
 0x216   : > { %13227 = vmatprep.subr.bf16.mxu0 %v15287_v0 }
 0x218   : > { %13030 = vmatmul.mubr.msk.bf16.vlgmr.msra.gmra.mrb[8].mxu1 %vm853_vm2, %v2452_v29  ;;  %v3342_v29 = vld [vmem:[#allocation2 + $0xa6] ss:$2 sm:$0x7f] }
 0x219   : > { %13034 = vmatpush3.bf16.msra.mxu1 %v15602_v24  ;;  %13228 = vmatpush3.bf16.msra.mxu0 %v15920_v30 }
 0x21a   : > { %13035 = vmatprep.subr.bf16.mxu1 %v15287_v0  ;;  %13037 = vmatprep.mubr.msk.bf16.mxu1 %vm15288_vm0, %v15287_v0 }
 0x21b   : > { %13233 = vmatprep.subr.bf16.mxu0 %v15287_v0 }
 0x21d   : > { %13036 = vmatpush3.bf16.msra.mxu1 %v15613_v31 }
 0x21e   : > { %13041 = vmatprep.subr.bf16.mxu1 %v15287_v0 }
 0x220   : > { %13230 = vmatmul.mubr.msk.bf16.vlgmr.msra.gmra.mrb[68].mxu0 %vm853_vm2, %v3625_v33  ;;  %v15180_v33 = vld [vmem:[#allocation6 + $0x50] sm:$0xff]  }
 0x221   : > { %13234 = vmatpush3.bf16.msra.mxu0 %v15566_v50  ;;  %13237 = vmatprep.mubr.msk.bf16.mxu0 %vm15288_vm0, %v15287_v0  ;;  %v3671_v50 = vpack.c.bf16 %v3670_v36, %v3670_v36 }
 0x222   : > { %13235 = vmatprep.subr.bf16.mxu0 %v15287_v0 }
 0x224   : > { %13038 = vmatmul.mubr.msk.bf16.vlgmr.msra.gmra.mrb[8].mxu1 %vm853_vm2, %v2499_v35  ;;  %v15181_v35 = vld [vmem:[#allocation6 + $0x58] sm:$0xff]  }
 0x225   : > { %13042 = vmatpush3.bf16.msra.mxu1 %v15626_v45  ;;  %13236 = vmatpush3.bf16.msra.mxu0 %v15573_v59  ;;  %v2546_v59 = vpack.c.bf16 %v2545_v38, %v2545_v38  ;;  %v3389_v38 = vld [vmem:[#allocation2 + $0xa7] ss:$2 sm:$0x7f] }
 0x226   : > { %13043 = vmatprep.subr.bf16.mxu1 %v15287_v0  ;;  %13045 = vmatprep.mubr.msk.bf16.mxu1 %vm15288_vm0, %v15287_v0 }
 0x227   : > { %13241 = vmatprep.subr.bf16.mxu0 %v15287_v0 }
 0x229   : > { %13044 = vmatpush3.bf16.msra.mxu1 %v15637_v51 }
 0x22a   : > { %13049 = vmatprep.subr.bf16.mxu1 %v15287_v0 }
 0x22c   : > { %13238 = vmatmul.mubr.msk.bf16.vlgmr.msra.gmra.mrb[68].mxu0 %vm853_vm2, %v3671_v50  ;;  %v16113_v50 = vld [vmem:[%s19324_s5 + $0x40] sm:$0xff]  }
 0x22d   : > { %13242 = vmatpush3.bf16.msra.mxu0 %v15584_v6  ;;  %13245 = vmatprep.mubr.msk.bf16.mxu0 %vm15288_vm0, %v15287_v0  ;;  %v3718_v6 = vpack.c.bf16 %v3717_v40, %v3717_v40  ;;  %v3390_v40 = vpack.c.bf16 %v3389_v38, %v3389_v38  ;;  %v16293_v38 = vld [vmem:[%s19324_s5 + $0xb8] sm:$0xff]  }
 0x22e   : > { %13243 = vmatprep.subr.bf16.mxu0 %v15287_v0 }
 0x230   : > { %13046 = vmatmul.mubr.msk.bf16.vlgmr.msra.gmra.mrb[8].mxu1 %vm853_vm2, %v2546_v59 }
 0x231   : > { %13050 = vmatpush3.bf16.msra.mxu1 %v15650_v1  ;;  %13244 = vmatpush3.bf16.msra.mxu0 %v15590_v11  ;;  %v2593_v11 = vpack.c.bf16 %v2592_v41, %v2592_v41  ;;  %v15182_v41 = vld [vmem:[#allocation6 + $0x60] sm:$0xff]  }
 0x232   : > { %13051 = vmatprep.subr.bf16.mxu1 %v15287_v0  ;;  %13053 = vmatprep.mubr.msk.bf16.mxu1 %vm15288_vm0, %v15287_v0 }
 0x233   : > { %13249 = vmatprep.subr.bf16.mxu0 %v15287_v0 }
 0x235   : > { %13052 = vmatpush3.bf16.msra.mxu1 %v15660_v4 }
 0x236   : > { %13057 = vmatprep.subr.bf16.mxu1 %v15287_v0 }
 0x238   : > { %13246 = vmatmul.mubr.msk.bf16.vlgmr.msra.gmra.mrb[68].mxu0 %vm853_vm2, %v3718_v6  ;;  %v16121_v6 = vld [vmem:[%s19324_s5 + $0x48] sm:$0xff]  }
 0x239   : > { %13250 = vmatpush3.bf16.msra.mxu0 %v15602_v24  ;;  %13253 = vmatprep.mubr.msk.bf16.mxu0 %vm15288_vm0, %v15287_v0  ;;  %v3765_v24 = vpack.c.bf16 %v3764_v42, %v3764_v42  ;;  %v15183_v42 = vld [vmem:[#allocation6 + $0x68] sm:$0xff]  }
 0x23a   : > { %13251 = vmatprep.subr.bf16.mxu0 %v15287_v0 }
 0x23c   : > { %13054 = vmatmul.mubr.msk.bf16.vlgmr.msra.gmra.mrb[8].mxu1 %vm853_vm2, %v2593_v11  ;;  %v16134_v11 = vld [vmem:[%s19324_s5 + $0x50] sm:$0xff]  }
 0x23d   : > { %13058 = vmatpush3.bf16.msra.mxu1 %v15671_v15  ;;  %13252 = vmatpush3.bf16.msra.mxu0 %v15613_v31  ;;  %v2640_v31 = vpack.c.bf16 %v2639_v44, %v2639_v44  ;;  %v3436_v44 = vld [vmem:[#allocation2 + $0xb4] ss:$2 sm:$0x7f] }
 0x23e   : > { %13059 = vmatprep.subr.bf16.mxu1 %v15287_v0  ;;  %13061 = vmatprep.mubr.msk.bf16.mxu1 %vm15288_vm0, %v15287_v0 }
 0x23f   : > { %13257 = vmatprep.subr.bf16.mxu0 %v15287_v0 }
 0x241   : > { %13060 = vmatpush3.bf16.msra.mxu1 %v15681_v21 }
 0x242   : > { %13065 = vmatprep.subr.bf16.mxu1 %v15287_v0 }
 0x244   : > { %13254 = vmatmul.mubr.msk.bf16.vlgmr.msra.gmra.mrb[68].mxu0 %vm853_vm2, %v3765_v24  ;;  %v16142_v24 = vld [vmem:[%s19324_s5 + $0x58] sm:$0xff]  }
 0x245   : > { %13258 = vmatpush3.bf16.msra.mxu0 %v15626_v45  ;;  %13261 = vmatprep.mubr.msk.bf16.mxu0 %vm15288_vm0, %v15287_v0  ;;  %v3812_v45 = vpack.c.bf16 %v3811_v46, %v3811_v46  ;;  %v3437_v46 = vpack.c.bf16 %v3436_v44, %v3436_v44  ;;  %v16317_v44 = vld [vmem:[%s19324_s5 + $0xd0] sm:$0xff]  }
 0x246   : > { %13259 = vmatprep.subr.bf16.mxu0 %v15287_v0 }
 0x248   : > { %13062 = vmatmul.mubr.msk.bf16.vlgmr.msra.gmra.mrb[8].mxu1 %vm853_vm2, %v2640_v31 }
 0x249   : > { %13066 = vmatpush3.bf16.msra.mxu1 %v15691_v26  ;;  %13260 = vmatpush3.bf16.msra.mxu0 %v15637_v51  ;;  %v2687_v51 = vpack.c.bf16 %v2686_v47, %v2686_v47  ;;  %v15184_v47 = vld [vmem:[#allocation6 + $0x70] sm:$0xff]  }
 0x24a   : > { %13067 = vmatprep.subr.bf16.mxu1 %v15287_v0  ;;  %13069 = vmatprep.mubr.msk.bf16.mxu1 %vm15288_vm0, %v15287_v0 }
 0x24b   : > { %13265 = vmatprep.subr.bf16.mxu0 %v15287_v0 }
 0x24d   : > { %13068 = vmatpush3.bf16.msra.mxu1 %v15700_v28 }
 0x24e   : > { %13145 = vmatprep.subr.bf16.mxu1 %v15287_v0 }
 0x250   : > { %13262 = vmatmul.mubr.msk.bf16.vlgmr.msra.gmra.mrb[68].mxu0 %vm853_vm2, %v3812_v45 }
 0x251   : > { %13266 = vmatpush3.bf16.msra.mxu0 %v15650_v1  ;;  %13269 = vmatprep.mubr.msk.bf16.mxu0 %vm15288_vm0, %v15287_v0 }
 0x252   : > { %13267 = vmatprep.subr.bf16.mxu0 %v15287_v0 }
 0x254   : > { %13070 = vmatmul.mubr.msk.bf16.vlgmr.msra.gmra.mrb[8].mxu1 %vm853_vm2, %v2687_v51  ;;  %v16153_v51 = vld [vmem:[%s19324_s5 + $0x60] sm:$0xff]  }
 0x255   : > { %13146 = vmatpush3.bf16.msra.mxu1 %v15716_v43  ;;  %13149 = vmatprep.mubr.msk.bf16.mxu1 %vm15288_vm0, %v15287_v0 }
 0x256   : > { %13147 = vmatprep.subr.bf16.mxu1 %v15287_v0  ;;  %13268 = vmatpush3.bf16.msra.mxu0 %v15660_v4  ;;  %v3905_v4 = vld [vmem:[#allocation2 + $0xd3] ss:$2 sm:$0x7f] }
 0x257   : > { %v1458_v1 = vpop.f32.mrb[0].mxu1  ;;  %13273 = vmatprep.subr.bf16.mxu0 %v15287_v0 }
 0x258   : > { %v13834_v52 = vadd.f32 %v15995_v48, %v1458_v1  ;;  %v12855_v43 = vpop.f32.mrb[1].mxu1  ;;  %v16164_v1 = vld [vmem:[%s19324_s5 + $0x68] sm:$0xff]  }
 0x259   : > { %13148 = vmatpush3.bf16.msra.mxu1 %v15728_v58  ;;  %v1461_v54 = vpop.f32.mrb[2].mxu1  ;;  %v3906_v58 = vpack.c.bf16 %v3905_v4, %v3905_v4  ;;  %v3484_v43 = vpack.c.bf16 %v3483_v19, %v3483_v19 }
 0x25a   : > { %v1465_v55 = vmax.f32 %v13834_v52, 0.0  ;;  %v12856_v56 = vpop.f32.mrb[3].mxu1  ;;  %13153 = vmatprep.subr.bf16.mxu1 %v15287_v0  ;;  %v16172_v52 = vld [vmem:[%s19324_s5 + $0x70] sm:$0xff]   ;;  %v16182_v54 = vld [vmem:[%s19324_s5 + $0x78] sm:$0xff]  }
 0x25b   : > { %v3530_v56 = vld [vmem:[#allocation2 + $0xb6] ss:$2 sm:$0x7f] }
 0x25c   : > { %1467 = vst.msk [vmem:[#allocation3] sm:$0x7f] %vm1466_vm4, %v1465_v55  ;;  %13150 = vmatmul.mubr.msk.bf16.vlgmr.msra.gmra.mrb[12].mxu1 %vm853_vm2, %v3157_v57  ;;  %13270 = vmatmul.mubr.msk.bf16.vlgmr.msra.gmra.mrb[68].mxu0 %vm853_vm2, %v3859_v53  ;;  %v15186_v53 = vld [vmem:[#allocation6 + $0x80] sm:$0xff]   ;;  %v15187_v55 = vld [vmem:[#allocation6 + $0x88] sm:$0xff]   ;;  %v3531_v57 = vpack.c.bf16 %v3530_v56, %v3530_v56 }
 0x25d   : > { %13154 = vmatpush3.bf16.msra.mxu1 %v15912_v27  ;;  %13274 = vmatpush3.bf16.msra.mxu0 %v15671_v15  ;;  %v3202_v15 = vld [vmem:[#allocation2 + $0x97] ss:$2 sm:$0x7f] }
 0x25e   : > { %13155 = vmatprep.subr.bf16.mxu1 %v15287_v0  ;;  %13275 = vmatprep.subr.bf16.mxu0 %v15287_v0  ;;  %v3203_v60 = vpack.c.bf16 %v3202_v15, %v3202_v15  ;;  %v16085_v27 = vld [vmem:[%s19324_s5 + $0x28] sm:$0xff]  }
 0x25f   : > { %13157 = vmatprep.mubr.msk.bf16.mxu1 %vm15288_vm0, %v15287_v0  ;;  %13277 = vmatprep.mubr.msk.bf16.mxu0 %vm15288_vm0, %v15287_v0 }
 0x261   : > { %13156 = vmatpush3.bf16.msra.mxu1 %v15920_v30  ;;  %13276 = vmatpush3.bf16.msra.mxu0 %v15681_v21  ;;  %v15175_v21 = vld [vmem:[#allocation6 + $0x28] sm:$0xff]   ;;  %v3343_v30 = vpack.c.bf16 %v3342_v29, %v3342_v29 }
 0x262   : > { %13161 = vmatprep.subr.bf16.mxu1 %v15287_v0  ;;  %13281 = vmatprep.subr.bf16.mxu0 %v15287_v0 }
 0x263   : > { %v4087_v62 = vld [vmem:[#allocation3] ss:$2 sm:$0x7] }
 0x268   : > { %13158 = vmatmul.mubr.msk.bf16.vlgmr.msra.gmra.mrb[12].mxu1 %vm853_vm2, %v3203_v60  ;;  %13278 = vmatmul.mubr.msk.bf16.vlgmr.msra.gmra.mrb[68].mxu0 %vm853_vm2, %v3906_v58 }
 0x269   : > { %13162 = vmatpush3.bf16.msra.mxu1 %v15174_v61  ;;  %13282 = vmatpush3.bf16.msra.mxu0 %v15691_v26  ;;  %v3248_v26 = vld [vmem:[#allocation2 + $0x98] ss:$2 sm:$0x7f] }
 0x26a   : > { %13163 = vmatprep.subr.bf16.mxu1 %v15287_v0  ;;  %13283 = vmatprep.subr.bf16.mxu0 %v15287_v0  ;;  %v3249_v3 = vpack.c.bf16 %v3248_v26, %v3248_v26  ;;  %v4088_v26 = vpack.c.bf16 %v4087_v62, %v4087_v62 }
 0x26b   : > { %13165 = vmatprep.mubr.msk.bf16.mxu1 %vm15288_vm0, %v15287_v0  ;;  %13285 = vmatprep.mubr.msk.bf16.mxu0 %vm15288_vm0, %v15287_v0 }
 0x26d   : > { %13164 = vmatpush3.bf16.msra.mxu1 %v15175_v21  ;;  %13284 = vmatpush3.bf16.msra.mxu0 %v15700_v28  ;;  %v16043_v28 = vld [vmem:[%s19324_s5 + $0x8] sm:$0xff]  }
 0x26e   : > { %13169 = vmatprep.subr.bf16.mxu1 %v15287_v0  ;;  %13397 = vmatprep.subr.bf16.mxu0 %v15287_v0 }
 0x274   : > { %13166 = vmatmul.mubr.msk.bf16.vlgmr.msra.gmra.mrb[12].mxu1 %vm853_vm2, %v3249_v3  ;;  %13286 = vmatmul.mubr.msk.bf16.vlgmr.msra.gmra.mrb[68].mxu0 %vm853_vm2, %v3953_v63  ;;  %v4159_v63 = vld [vmem:[#allocation3 + $0x1] ss:$2 sm:$0x7] }
 0x275   : > { %13170 = vmatpush3.bf16.msra.mxu1 %v15176_v5  ;;  %13398 = vmatpush3.bf16.msra.mxu0 %v16035_v2  ;;  %v4160_v3 = vpack.c.bf16 %v4159_v63, %v4159_v63  ;;  %v16390_v63 = vld [vmem:[%s19324_s5 + $0x110] sm:$0xff]  }
 0x276   : > { %13171 = vmatprep.subr.bf16.mxu1 %v15287_v0  ;;  %13399 = vmatprep.subr.bf16.mxu0 %v15287_v0 }
 0x277   : > { %v2303_v7 = vpop.f32.mrb[60].mxu0  ;;  %13173 = vmatprep.mubr.msk.bf16.mxu1 %vm15288_vm0, %v15287_v0  ;;  %13405 = vmatprep.mubr.msk.bf16.mxu0 %vm15288_vm0, %v15287_v0 }
 0x278   : > { %v13836_v8 = vadd.f32 %v15995_v48, %v2303_v7  ;;  %v12999_v9 = vpop.f32.mrb[61].mxu0 }
 0x279   : > { %13172 = vmatpush3.bf16.msra.mxu1 %v15177_v10  ;;  %13400 = vmatpush3.bf16.msra.mxu0 %v16043_v28  ;;  %v2306_v13 = vpop.f32.mrb[62].mxu0 }
 0x27a   : > { %v2310_v37 = vmax.f32 %v13836_v8, 0.0  ;;  %13401 = vmatprep.subr.bf16.mxu0 %v15287_v0  ;;  %13177 = vmatprep.subr.bf16.mxu1 %v15287_v0  ;;  %v13000_v14 = vpop.f32.mrb[63].mxu0 }
 0x27c   : > { %2311 = vst.msk [vmem:[#allocation3 + $0xe] sm:$0x7f] %vm1466_vm4, %v2310_v37  ;;  %v4230_v37 = vld [vmem:[#allocation3 + $0x2] ss:$2 sm:$0x7] }
 0x27d   : > { %13402 = vmatpush3.bf16.msra.mxu0 %v16056_v12  ;;  %v4231_v14 = vpack.c.bf16 %v4230_v37, %v4230_v37 }
 0x27e   : > { %13403 = vmatprep.subr.bf16.mxu0 %v15287_v0 }
 0x280   : > { %13174 = vmatmul.mubr.msk.bf16.vlgmr.msra.gmra.mrb[12].mxu1 %vm853_vm2, %v3296_v17  ;;  %v16238_v17 = vld [vmem:[%s19324_s5 + $0x80] sm:$0xff]  }
 0x281   : > { %13178 = vmatpush3.bf16.msra.mxu1 %v15178_v18  ;;  %13404 = vmatpush3.bf16.msra.mxu0 %v16065_v39 }
 0x282   : > { %13179 = vmatprep.subr.bf16.mxu1 %v15287_v0  ;;  %13409 = vmatprep.subr.bf16.mxu0 %v15287_v0 }
 0x283   : > { %v4728_v20 = vld [vmem:[#allocation3 + $0xe] ss:$2 sm:$0x7]  ;;  %13181 = vmatprep.mubr.msk.bf16.mxu1 %vm15288_vm0, %v15287_v0  ;;  %v4774_v36 = vld [vmem:[#allocation3 + $0xf] ss:$2 sm:$0x7] }
 0x284   : > { %v4729_v23 = vpack.c.bf16 %v4728_v20, %v4728_v20  ;;  %v4775_v59 = vpack.c.bf16 %v4774_v36, %v4774_v36  ;;  %v4820_v31 = vld [vmem:[#allocation3 + $0x10] ss:$2 sm:$0x7]  ;;  %v16246_v20 = vld [vmem:[%s19324_s5 + $0x88] sm:$0xff]  }
 0x285   : > { %13180 = vmatpush3.bf16.msra.mxu1 %v15179_v25  ;;  %v4821_v45 = vpack.c.bf16 %v4820_v31, %v4820_v31  ;;  %v16262_v25 = vld [vmem:[%s19324_s5 + $0x98] sm:$0xff]   ;;  %v16286_v36 = vld [vmem:[%s19324_s5 + $0xb0] sm:$0xff]  }
 0x286   : > { %13406 = vmatmul.mubr.msk.bf16.vlgmr.msra.gmra.mrb[72].mxu0 %vm4113_vm5, %v4729_v23  ;;  %13185 = vmatprep.subr.bf16.mxu1 %v15287_v0  ;;  %v16255_v23 = vld [vmem:[%s19324_s5 + $0x90] sm:$0xff]   ;;  %v16324_v31 = vld [vmem:[%s19324_s5 + $0xd8] sm:$0xff]  }
 0x287   : > { %13410 = vmatpush3.bf16.msra.mxu0 %v16075_v22  ;;  %13417 = vmatprep.mubr.msk.bf16.mxu0 %vm15288_vm0, %v15287_v0 }
 0x288   : > { %13411 = vmatprep.subr.bf16.mxu0 %v15287_v0 }
 0x28b   : > { %13412 = vmatpush3.bf16.msra.mxu0 %v16085_v27 }
 0x28c   : > { %13182 = vmatmul.mubr.msk.bf16.vlgmr.msra.gmra.mrb[12].mxu1 %vm853_vm2, %v3343_v30  ;;  %13413 = vmatprep.subr.bf16.mxu0 %v15287_v0  ;;  %v16269_v30 = vld [vmem:[%s19324_s5 + $0xa0] sm:$0xff]  }
 0x28d   : > { %13186 = vmatpush3.bf16.msra.mxu1 %v15180_v33  ;;  %13189 = vmatprep.mubr.msk.bf16.mxu1 %vm15288_vm0, %v15287_v0 }
 0x28e   : > { %13187 = vmatprep.subr.bf16.mxu1 %v15287_v0 }
 0x28f   : > { %13414 = vmatpush3.bf16.msra.mxu0 %v16094_v32 }
 0x290   : > { %13415 = vmatprep.subr.bf16.mxu0 %v15287_v0 }
 0x291   : > { %13188 = vmatpush3.bf16.msra.mxu1 %v15181_v35  ;;  %v16277_v35 = vld [vmem:[%s19324_s5 + $0xa8] sm:$0xff]  }
 0x292   : > { %13193 = vmatprep.subr.bf16.mxu1 %v15287_v0 }
 0x293   : > { %13416 = vmatpush3.bf16.msra.mxu0 %v16105_v34 }
 0x294   : > { %13421 = vmatprep.subr.bf16.mxu0 %v15287_v0 }
 0x296   : > { %13418 = vmatmul.mubr.msk.bf16.vlgmr.msra.gmra.mrb[72].mxu0 %vm4113_vm5, %v4775_v59 }
 0x297   : > { %13422 = vmatpush3.bf16.msra.mxu0 %v16113_v50  ;;  %13429 = vmatprep.mubr.msk.bf16.mxu0 %vm15288_vm0, %v15287_v0 }
 0x298   : > { %13190 = vmatmul.mubr.msk.bf16.vlgmr.msra.gmra.mrb[12].mxu1 %vm853_vm2, %v3390_v40  ;;  %13423 = vmatprep.subr.bf16.mxu0 %v15287_v0  ;;  %v16300_v40 = vld [vmem:[%s19324_s5 + $0xc0] sm:$0xff]  }
 0x299   : > { %13194 = vmatpush3.bf16.msra.mxu1 %v15182_v41  ;;  %13197 = vmatprep.mubr.msk.bf16.mxu1 %vm15288_vm0, %v15287_v0 }
 0x29a   : > { %13195 = vmatprep.subr.bf16.mxu1 %v15287_v0 }
 0x29b   : > { %13424 = vmatpush3.bf16.msra.mxu0 %v16121_v6 }
 0x29c   : > { %13425 = vmatprep.subr.bf16.mxu0 %v15287_v0 }
 0x29d   : > { %13196 = vmatpush3.bf16.msra.mxu1 %v15183_v42  ;;  %v16308_v42 = vld [vmem:[%s19324_s5 + $0xc8] sm:$0xff]  }
 0x29e   : > { %13201 = vmatprep.subr.bf16.mxu1 %v15287_v0 }
 0x29f   : > { %13426 = vmatpush3.bf16.msra.mxu0 %v16134_v11 }
 0x2a0   : > { %13427 = vmatprep.subr.bf16.mxu0 %v15287_v0 }
 0x2a3   : > { %13428 = vmatpush3.bf16.msra.mxu0 %v16142_v24 }
 0x2a4   : > { %13198 = vmatmul.mubr.msk.bf16.vlgmr.msra.gmra.mrb[12].mxu1 %vm853_vm2, %v3437_v46  ;;  %13433 = vmatprep.subr.bf16.mxu0 %v15287_v0 }
 0x2a5   : > { %13202 = vmatpush3.bf16.msra.mxu1 %v15184_v47  ;;  %13205 = vmatprep.mubr.msk.bf16.mxu1 %vm15288_vm0, %v15287_v0 }
 0x2a6   : > { %13430 = vmatmul.mubr.msk.bf16.vlgmr.msra.gmra.mrb[72].mxu0 %vm4113_vm5, %v4821_v45  ;;  %13203 = vmatprep.subr.bf16.mxu1 %v15287_v0  ;;  %v4514_v45 = vld [vmem:[#allocation3 + $0xe] ss:$2 sm:$0x7] }
 0x2a7   : > { %13434 = vmatpush3.bf16.msra.mxu0 %v16153_v51  ;;  %13441 = vmatprep.mubr.msk.bf16.mxu0 %vm15288_vm0, %v15287_v0  ;;  %v4515_v56 = vpack.c.bf16 %v4514_v45, %v4514_v45  ;;  %v16532_v45 = vld [vmem:[%s19326_s7 + $0x34] ss:$8 sps:$4 sm:$0xff]  }
 0x2a8   : > { %13435 = vmatprep.subr.bf16.mxu0 %v15287_v0 }
 0x2a9   : > { %13204 = vmatpush3.bf16.msra.mxu1 %v15185_v49 }
 0x2aa   : > { %13209 = vmatprep.subr.bf16.mxu1 %v15287_v0 }
 0x2ab   : > { %13436 = vmatpush3.bf16.msra.mxu0 %v16164_v1 }
 0x2ac   : > { %13437 = vmatprep.subr.bf16.mxu0 %v15287_v0 }
 0x2af   : > { %13438 = vmatpush3.bf16.msra.mxu0 %v16172_v52 }
 0x2b0   : > { %13206 = vmatmul.mubr.msk.bf16.vlgmr.msra.gmra.mrb[12].mxu1 %vm853_vm2, %v3484_v43  ;;  %13439 = vmatprep.subr.bf16.mxu0 %v15287_v0  ;;  %v16332_v43 = vld [vmem:[%s19324_s5 + $0xe0] sm:$0xff]  }
 0x2b1   : > { %13210 = vmatpush3.bf16.msra.mxu1 %v15186_v53  ;;  %13213 = vmatprep.mubr.msk.bf16.mxu1 %vm15288_vm0, %v15287_v0 }
 0x2b2   : > { %13211 = vmatprep.subr.bf16.mxu1 %v15287_v0 }
 0x2b3   : > { %13440 = vmatpush3.bf16.msra.mxu0 %v16182_v54 }
 0x2b4   : > { %13445 = vmatprep.subr.bf16.mxu0 %v15287_v0 }
 0x2b5   : > { %13212 = vmatpush3.bf16.msra.mxu1 %v15187_v55 }
 0x2b6   : > { %13289 = vmatprep.subr.bf16.mxu1 %v15287_v0 }
 0x2bc   : > { %13214 = vmatmul.mubr.msk.bf16.vlgmr.msra.gmra.mrb[12].mxu1 %vm853_vm2, %v3531_v57  ;;  %v16341_v57 = vld [vmem:[%s19324_s5 + $0xe8] sm:$0xff]  }
 0x2bd   : > { %13290 = vmatpush3.bf16.msra.mxu1 %v16035_v2  ;;  %13297 = vmatprep.mubr.msk.bf16.mxu1 %vm15288_vm0, %v15287_v0 }
 0x2be   : > { %13291 = vmatprep.subr.bf16.mxu1 %v15287_v0 }
 0x2bf   : > { %v1881_v4 = vpop.f32.mrb[4].mxu1 }
 0x2c0   : > { %v13835_v15 = vadd.f32 %v15995_v48, %v1881_v4  ;;  %v12927_v58 = vpop.f32.mrb[5].mxu1  ;;  %v16350_v4 = vld [vmem:[%s19324_s5 + $0xf0] sm:$0xff]  }
 0x2c1   : > { %13292 = vmatpush3.bf16.msra.mxu1 %v16043_v28  ;;  %v1884_v60 = vpop.f32.mrb[6].mxu1 }
 0x2c2   : > { %v1888_v61 = vmax.f32 %v13835_v15, 0.0  ;;  %v12928_v21 = vpop.f32.mrb[7].mxu1  ;;  %13293 = vmatprep.subr.bf16.mxu1 %v15287_v0  ;;  %v16357_v60 = vld [vmem:[%s19324_s5 + $0xf8] sm:$0xff]  }
 0x2c3   : > { %v16369_v21 = vld [vmem:[%s19324_s5 + $0x100] sm:$0xff]  }
 0x2c4   : > { %1889 = vst.msk [vmem:[#allocation3 + $0x7] sm:$0x7f] %vm1466_vm4, %v1888_v61  ;;  %v4585_v61 = vld [vmem:[#allocation3 + $0xf] ss:$2 sm:$0x7] }
 0x2c5   : > { %13294 = vmatpush3.bf16.msra.mxu1 %v16056_v12  ;;  %v4586_v62 = vpack.c.bf16 %v4585_v61, %v4585_v61 }
 0x2c6   : > { %13295 = vmatprep.subr.bf16.mxu1 %v15287_v0 }
 0x2c9   : > { %13296 = vmatpush3.bf16.msra.mxu1 %v16065_v39 }
 0x2ca   : > { %13301 = vmatprep.subr.bf16.mxu1 %v15287_v0 }
 0x2cb   : > { %v4301_v16 = vld [vmem:[#allocation3 + $0x7] ss:$2 sm:$0x7]  ;;  %v4372_v29 = vld [vmem:[#allocation3 + $0x8] ss:$2 sm:$0x7] }
 0x2cc   : > { %13298 = vmatmul.mubr.msk.bf16.vlgmr.msra.gmra.mrb[16].mxu1 %vm4113_vm5, %v4088_v26  ;;  %v4302_v18 = vpack.c.bf16 %v4301_v16, %v4301_v16  ;;  %v4373_v33 = vpack.c.bf16 %v4372_v29, %v4372_v29  ;;  %v4443_v59 = vld [vmem:[#allocation3 + $0x9] ss:$2 sm:$0x7] }
 0x2cd   : > { %13302 = vmatpush3.bf16.msra.mxu1 %v16075_v22  ;;  %13309 = vmatprep.mubr.msk.bf16.mxu1 %vm15288_vm0, %v15287_v0  ;;  %v4444_v41 = vpack.c.bf16 %v4443_v59, %v4443_v59  ;;  %v16379_v26 = vld [vmem:[%s19324_s5 + $0x108] sm:$0xff]  }
 0x2ce   : > { %13303 = vmatprep.subr.bf16.mxu1 %v15287_v0 }
 0x2d1   : > { %13304 = vmatpush3.bf16.msra.mxu1 %v16085_v27 }
 0x2d2   : > { %13305 = vmatprep.subr.bf16.mxu1 %v15287_v0 }
 0x2d5   : > { %13306 = vmatpush3.bf16.msra.mxu1 %v16094_v32 }
 0x2d6   : > { %13307 = vmatprep.subr.bf16.mxu1 %v15287_v0 }
 0x2d9   : > { %13308 = vmatpush3.bf16.msra.mxu1 %v16105_v34 }
 0x2da   : > { %13313 = vmatprep.subr.bf16.mxu1 %v15287_v0 }
 0x2dc   : > { %13310 = vmatmul.mubr.msk.bf16.vlgmr.msra.gmra.mrb[16].mxu1 %vm4113_vm5, %v4160_v3 }
 0x2dd   : > { %13314 = vmatpush3.bf16.msra.mxu1 %v16113_v50  ;;  %13321 = vmatprep.mubr.msk.bf16.mxu1 %vm15288_vm0, %v15287_v0 }
 0x2de   : > { %13315 = vmatprep.subr.bf16.mxu1 %v15287_v0 }
 0x2df   : > { %v3147_v5 = vpop.f32.mrb[64].mxu0 }
 0x2e0   : > { %v13838_v7 = vadd.f32 %v15995_v48, %v3147_v5  ;;  %v13143_v8 = vpop.f32.mrb[65].mxu0 }
 0x2e1   : > { %13316 = vmatpush3.bf16.msra.mxu1 %v16121_v6  ;;  %v3150_v9 = vpop.f32.mrb[66].mxu0  ;;  %v4656_v8 = vld [vmem:[#allocation3 + $0x10] ss:$2 sm:$0x7] }
 0x2e2   : > { %13317 = vmatprep.subr.bf16.mxu1 %v15287_v0  ;;  %v3154_v10 = vmax.f32 %v13838_v7, 0.0  ;;  %v13144_v13 = vpop.f32.mrb[67].mxu0  ;;  %v16399_v7 = vld [vmem:[%s19324_s5 + $0x118] sm:$0xff]  }
 0x2e4   : > { %3155 = vst.msk [vmem:[#allocation3 + $0x1c] sm:$0x7f] %vm1466_vm4, %v3154_v10 }
 0x2e5   : > { %13318 = vmatpush3.bf16.msra.mxu1 %v16134_v11 }
 0x2e6   : > { %13319 = vmatprep.subr.bf16.mxu1 %v15287_v0 }
 0x2e9   : > { %13320 = vmatpush3.bf16.msra.mxu1 %v16142_v24 }
 0x2ea   : > { %13325 = vmatprep.subr.bf16.mxu1 %v15287_v0 }
 0x2ec   : > { %13322 = vmatmul.mubr.msk.bf16.vlgmr.msra.gmra.mrb[16].mxu1 %vm4113_vm5, %v4231_v14  ;;  %v4657_v14 = vpack.c.bf16 %v4656_v8, %v4656_v8  ;;  %v16588_v8 = vld [vmem:[%s19326_s7 + $0x74] ss:$8 sps:$4 sm:$0xff]  }
 0x2ed   : > { %13326 = vmatpush3.bf16.msra.mxu1 %v16153_v51  ;;  %13333 = vmatprep.mubr.msk.bf16.mxu1 %vm15288_vm0, %v15287_v0 }
 0x2ee   : > { %13327 = vmatprep.subr.bf16.mxu1 %v15287_v0 }
 0x2f1   : > { %13328 = vmatpush3.bf16.msra.mxu1 %v16164_v1 }
 0x2f2   : > { %13329 = vmatprep.subr.bf16.mxu1 %v15287_v0 }
 0x2f5   : > { %13330 = vmatpush3.bf16.msra.mxu1 %v16172_v52 }
 0x2f6   : > { %13331 = vmatprep.subr.bf16.mxu1 %v15287_v0 }
 0x2f9   : > { %13332 = vmatpush3.bf16.msra.mxu1 %v16182_v54 }
 0x2fa   : > { %13337 = vmatprep.subr.bf16.mxu1 %v15287_v0 }
 0x2fc   : > { %13334 = vmatmul.mubr.msk.bf16.vlgmr.msra.gmra.mrb[16].mxu1 %vm4113_vm5, %v4302_v18 }
 0x2fd   : > { %13338 = vmatpush3.bf16.msra.mxu1 %v16238_v17  ;;  %13345 = vmatprep.mubr.msk.bf16.mxu1 %vm15288_vm0, %v15287_v0 }
 0x2fe   : > { %13339 = vmatprep.subr.bf16.mxu1 %v15287_v0 }
 0x301   : > { %13340 = vmatpush3.bf16.msra.mxu1 %v16246_v20 }
 0x302   : > { %13341 = vmatprep.subr.bf16.mxu1 %v15287_v0 }
 0x305   : > { %13342 = vmatpush3.bf16.msra.mxu1 %v16255_v23 }
 0x306   : > { %13343 = vmatprep.subr.bf16.mxu1 %v15287_v0 }
 0x309   : > { %13344 = vmatpush3.bf16.msra.mxu1 %v16262_v25 }
 0x30a   : > { %13349 = vmatprep.subr.bf16.mxu1 %v15287_v0 }
 0x30c   : > { %13346 = vmatmul.mubr.msk.bf16.vlgmr.msra.gmra.mrb[16].mxu1 %vm4113_vm5, %v4373_v33 }
 0x30d   : > { %13350 = vmatpush3.bf16.msra.mxu1 %v16269_v30  ;;  %13357 = vmatprep.mubr.msk.bf16.mxu1 %vm15288_vm0, %v15287_v0 }
 0x30e   : > { %13351 = vmatprep.subr.bf16.mxu1 %v15287_v0 }
 0x311   : > { %13352 = vmatpush3.bf16.msra.mxu1 %v16277_v35 }
 0x312   : > { %13353 = vmatprep.subr.bf16.mxu1 %v15287_v0 }
 0x315   : > { %13354 = vmatpush3.bf16.msra.mxu1 %v16286_v36 }
 0x316   : > { %13355 = vmatprep.subr.bf16.mxu1 %v15287_v0 }
 0x319   : > { %13356 = vmatpush3.bf16.msra.mxu1 %v16293_v38 }
 0x31a   : > { %13361 = vmatprep.subr.bf16.mxu1 %v15287_v0 }
 0x31c   : > { %13358 = vmatmul.mubr.msk.bf16.vlgmr.msra.gmra.mrb[16].mxu1 %vm4113_vm5, %v4444_v41  ;;  %v16503_v41 = vld [vmem:[%s19326_s7 + $0x14] ss:$8 sps:$4 sm:$0xff]  }
 0x31d   : > { %13362 = vmatpush3.bf16.msra.mxu1 %v16300_v40  ;;  %13369 = vmatprep.mubr.msk.bf16.mxu1 %vm15288_vm0, %v15287_v0 }
 0x31e   : > { %13363 = vmatprep.subr.bf16.mxu1 %v15287_v0 }
 0x321   : > { %13364 = vmatpush3.bf16.msra.mxu1 %v16308_v42 }
 0x322   : > { %13365 = vmatprep.subr.bf16.mxu1 %v15287_v0 }
 0x325   : > { %13366 = vmatpush3.bf16.msra.mxu1 %v16317_v44 }
 0x326   : > { %13367 = vmatprep.subr.bf16.mxu1 %v15287_v0 }
 0x327   : > { %v2725_v46 = vpop.f32.mrb[8].mxu1 }
 0x328   : > { %v13837_v47 = vadd.f32 %v15995_v48, %v2725_v46  ;;  %v13071_v49 = vpop.f32.mrb[9].mxu1  ;;  %v16518_v46 = vld [vmem:[%s19326_s7 + $0x24] ss:$8 sps:$4 sm:$0xff]  }
 0x329   : > { %13368 = vmatpush3.bf16.msra.mxu1 %v16324_v31  ;;  %v2728_v19 = vpop.f32.mrb[10].mxu1 }
 0x32a   : > { %v2732_v53 = vmax.f32 %v13837_v47, 0.0  ;;  %v13072_v55 = vpop.f32.mrb[11].mxu1  ;;  %13373 = vmatprep.subr.bf16.mxu1 %v15287_v0 }
 0x32c   : > { %2733 = vst.msk [vmem:[#allocation3 + $0x15] sm:$0x7f] %vm1466_vm4, %v2732_v53  ;;  %13370 = vmatmul.mubr.msk.bf16.vlgmr.msra.gmra.mrb[16].mxu1 %vm4113_vm5, %v4515_v56  ;;  %v16545_v53 = vld [vmem:[%s19326_s7 + $0x44] ss:$8 sps:$4 sm:$0xff]  }
 0x32d   : > { %13374 = vmatpush3.bf16.msra.mxu1 %v16332_v43  ;;  %13381 = vmatprep.mubr.msk.bf16.mxu1 %vm15288_vm0, %v15287_v0 }
 0x32e   : > { %13375 = vmatprep.subr.bf16.mxu1 %v15287_v0 }
 0x331   : > { %13376 = vmatpush3.bf16.msra.mxu1 %v16341_v57 }
 0x332   : > { %13377 = vmatprep.subr.bf16.mxu1 %v15287_v0 }
 0x333   : > { %v4867_v15 = vld [vmem:[#allocation3 + $0x15] ss:$2 sm:$0x7]  ;;  %v4914_v3 = vld [vmem:[#allocation3 + $0x16] ss:$2 sm:$0x7] }
 0x334   : > { %v4868_v58 = vpack.c.bf16 %v4867_v15, %v4867_v15  ;;  %v4915_v5 = vpack.c.bf16 %v4914_v3, %v4914_v3  ;;  %v4961_v29 = vld [vmem:[#allocation3 + $0x17] ss:$2 sm:$0x7] }
 0x335   : > { %13378 = vmatpush3.bf16.msra.mxu1 %v16350_v4  ;;  %v4962_v33 = vpack.c.bf16 %v4961_v29, %v4961_v29  ;;  %v16569_v3 = vld [vmem:[%s19326_s7 + $0x50] ss:$8 sps:$4 sm:$0xff]   ;;  %v16705_v29 = vld [vmem:[%s19326_s7 + $0xa0] ss:$8 sps:$4 sm:$0xff]  }
 0x336   : > { %13442 = vmatmul.mubr.msk.bf16.vlgmr.msra.gmra.mrb[72].mxu0 %vm4113_vm5, %v4868_v58  ;;  %13379 = vmatprep.subr.bf16.mxu1 %v15287_v0  ;;  %v16551_v58 = vld [vmem:[%s19326_s7 + $0x40] ss:$8 sps:$4 sm:$0xff]  }
 0x337   : > { %13446 = vmatpush3.bf16.msra.mxu0 %v16238_v17  ;;  %13453 = vmatprep.mubr.msk.bf16.mxu0 %vm15288_vm0, %v15287_v0 }
 0x338   : > { %13447 = vmatprep.subr.bf16.mxu0 %v15287_v0 }
 0x339   : > { %13380 = vmatpush3.bf16.msra.mxu1 %v16357_v60 }
 0x33a   : > { %13385 = vmatprep.subr.bf16.mxu1 %v15287_v0 }
 0x33b   : > { %13448 = vmatpush3.bf16.msra.mxu0 %v16246_v20 }
 0x33c   : > { %13382 = vmatmul.mubr.msk.bf16.vlgmr.msra.gmra.mrb[16].mxu1 %vm4113_vm5, %v4586_v62  ;;  %13449 = vmatprep.subr.bf16.mxu0 %v15287_v0  ;;  %v16563_v62 = vld [vmem:[%s19326_s7 + $0x54] ss:$8 sps:$4 sm:$0xff]  }
 0x33d   : > { %13386 = vmatpush3.bf16.msra.mxu1 %v16369_v21  ;;  %13393 = vmatprep.mubr.msk.bf16.mxu1 %vm15288_vm0, %v15287_v0 }
 0x33e   : > { %13387 = vmatprep.subr.bf16.mxu1 %v15287_v0 }
 0x33f   : > { %13450 = vmatpush3.bf16.msra.mxu0 %v16255_v23 }
 0x340   : > { %13451 = vmatprep.subr.bf16.mxu0 %v15287_v0 }
 0x341   : > { %13388 = vmatpush3.bf16.msra.mxu1 %v16379_v26 }
 0x342   : > { %13389 = vmatprep.subr.bf16.mxu1 %v15287_v0 }
 0x343   : > { %13452 = vmatpush3.bf16.msra.mxu0 %v16262_v25 }
 0x344   : > { %13457 = vmatprep.subr.bf16.mxu0 %v15287_v0 }
 0x345   : > { %13390 = vmatpush3.bf16.msra.mxu1 %v16390_v63 }
 0x346   : > { %13454 = vmatmul.mubr.msk.bf16.vlgmr.msra.gmra.mrb[72].mxu0 %vm4113_vm5, %v4915_v5  ;;  %13391 = vmatprep.subr.bf16.mxu1 %v15287_v0  ;;  %v16583_v5 = vld [vmem:[%s19326_s7 + $0x60] ss:$8 sps:$4 sm:$0xff]  }
 0x347   : > { %13458 = vmatpush3.bf16.msra.mxu0 %v16269_v30  ;;  %v3991_v9 = vpop.f32.mrb[68].mxu0  ;;  %13465 = vmatprep.mubr.msk.bf16.mxu0 %vm15288_vm0, %v15287_v0 }
 0x348   : > { %13459 = vmatprep.subr.bf16.mxu0 %v15287_v0  ;;  %v13840_v10 = vadd.f32 %v15995_v48, %v3991_v9  ;;  %v13287_v13 = vpop.f32.mrb[69].mxu0  ;;  %v15289_v9 = vmov 0  }
 0x349   : > { %13392 = vmatpush3.bf16.msra.mxu1 %v16399_v7  ;;  %v3994_v37 = vpop.f32.mrb[70].mxu0 }
 0x34a   : > { %13505 = vmatprep.subr.bf16.mxu1 %v15287_v0  ;;  %v3998_v16 = vmax.f32 %v13840_v10, 0.0  ;;  %v13288_v18 = vpop.f32.mrb[71].mxu0  ;;  %v16603_v10 = vld [vmem:[%s19326_s7 + $0x84] ss:$8 sps:$4 sm:$0xff]  }
 0x34b   : > { %13460 = vmatpush3.bf16.msra.mxu0 %v16277_v35  ;;  %v16699_v18 = vld [vmem:[%s19326_s7 + $0xa4] ss:$8 sps:$4 sm:$0xff]  }
 0x34c   : > { %13394 = vmatmul.mubr.msk.bf16.vlgmr.msra.gmra.mrb[16].mxu1 %vm4113_vm5, %v4657_v14  ;;  %13461 = vmatprep.subr.bf16.mxu0 %v15287_v0  ;;  %3999 = vst.msk [vmem:[#allocation3 + $0x2a] sm:$0x7f] %vm1466_vm4, %v3998_v16  ;;  %v16686_v14 = vld [vmem:[%s19326_s7 + $0x94] ss:$8 sps:$4 sm:$0xff]   ;;  %v16692_v16 = vld [vmem:[%s19326_s7 + $0x90] ss:$8 sps:$4 sm:$0xff]  }
 0x34d   : > { %13506 = vmatpush3.bf16.msra.mxu1 %v16035_v2  ;;  %13513 = vmatprep.mubr.msk.bf16.mxu1 %vm15288_vm0, %v15287_v0  ;;  %v5150_v2 = vld [vmem:[#allocation3 + $0x1c] ss:$2 sm:$0x7] }
 0x34e   : > { %13507 = vmatprep.subr.bf16.mxu1 %v15287_v0 }
 0x34f   : > { %13462 = vmatpush3.bf16.msra.mxu0 %v16286_v36 }
 0x350   : > { %13463 = vmatprep.subr.bf16.mxu0 %v15287_v0 }
 0x351   : > { %13508 = vmatpush3.bf16.msra.mxu1 %v16043_v28  ;;  %v5151_v28 = vpack.c.bf16 %v5150_v2, %v5150_v2  ;;  %v16717_v2 = vld [vmem:[%s19326_s7 + $0xb0] ss:$8 sps:$4 sm:$0xff]  }
 0x352   : > { %13509 = vmatprep.subr.bf16.mxu1 %v15287_v0 }
 0x353   : > { %13464 = vmatpush3.bf16.msra.mxu0 %v16293_v38 }
 0x354   : > { %13469 = vmatprep.subr.bf16.mxu0 %v15287_v0 }
 0x355   : > { %13510 = vmatpush3.bf16.msra.mxu1 %v16056_v12  ;;  %v5008_v12 = vld [vmem:[#allocation3 + $0x1c] ss:$2 sm:$0x7] }
 0x356   : > { %13466 = vmatmul.mubr.msk.bf16.vlgmr.msra.gmra.mrb[72].mxu0 %vm4113_vm5, %v4962_v33  ;;  %13511 = vmatprep.subr.bf16.mxu1 %v15287_v0  ;;  %v16711_v33 = vld [vmem:[%s19326_s7 + $0xb4] ss:$8 sps:$4 sm:$0xff]  }
 0x357   : > { %13470 = vmatpush3.bf16.msra.mxu0 %v16300_v40  ;;  %13477 = vmatprep.mubr.msk.bf16.mxu0 %vm15288_vm0, %v15287_v0 }
 0x358   : > { %13471 = vmatprep.subr.bf16.mxu0 %v15287_v0 }
 0x359   : > { %13512 = vmatpush3.bf16.msra.mxu1 %v16065_v39  ;;  %v5009_v39 = vpack.c.bf16 %v5008_v12, %v5008_v12  ;;  %v16729_v12 = vld [vmem:[%s19326_s7 + $0xc0] ss:$8 sps:$4 sm:$0xff]  }
 0x35a   : > { %13517 = vmatprep.subr.bf16.mxu1 %v15287_v0 }
 0x35b   : > { %13472 = vmatpush3.bf16.msra.mxu0 %v16308_v42 }
 0x35c   : > { %13514 = vmatmul.mubr.msk.bf16.vlgmr.msra.gmra.mrb[20].mxu1 %vm4113_vm5, %v5151_v28  ;;  %13473 = vmatprep.subr.bf16.mxu0 %v15287_v0  ;;  %v16723_v28 = vld [vmem:[%s19326_s7 + $0xc4] ss:$8 sps:$4 sm:$0xff]  }
 0x35d   : > { %13518 = vmatpush3.bf16.msra.mxu1 %v16075_v22  ;;  %13525 = vmatprep.mubr.msk.bf16.mxu1 %vm15288_vm0, %v15287_v0  ;;  %v5196_v22 = vld [vmem:[#allocation3 + $0x1d] ss:$2 sm:$0x7] }
 0x35e   : > { %13519 = vmatprep.subr.bf16.mxu1 %v15287_v0 }
 0x35f   : > { %13474 = vmatpush3.bf16.msra.mxu0 %v16317_v44 }
 0x360   : > { %13475 = vmatprep.subr.bf16.mxu0 %v15287_v0 }
 0x361   : > { %13520 = vmatpush3.bf16.msra.mxu1 %v16085_v27  ;;  %v5197_v27 = vpack.c.bf16 %v5196_v22, %v5196_v22  ;;  %v16741_v22 = vld [vmem:[%s19326_s7 + $0xd0] ss:$8 sps:$4 sm:$0xff]  }
 0x362   : > { %13521 = vmatprep.subr.bf16.mxu1 %v15287_v0 }
 0x363   : > { %13476 = vmatpush3.bf16.msra.mxu0 %v16324_v31 }
 0x364   : > { %13481 = vmatprep.subr.bf16.mxu0 %v15287_v0 }
 0x365   : > { %13522 = vmatpush3.bf16.msra.mxu1 %v16094_v32  ;;  %v5055_v32 = vld [vmem:[#allocation3 + $0x1d] ss:$2 sm:$0x7] }
 0x366   : > { %13478 = vmatmul.mubr.msk.bf16.vlgmr.msra.gmra.mrb[72].mxu0 %vm4113_vm5, %v5009_v39  ;;  %13523 = vmatprep.subr.bf16.mxu1 %v15287_v0  ;;  %v16735_v39 = vld [vmem:[%s19326_s7 + $0xd4] ss:$8 sps:$4 sm:$0xff]  }
 0x367   : > { %13482 = vmatpush3.bf16.msra.mxu0 %v16332_v43  ;;  %13489 = vmatprep.mubr.msk.bf16.mxu0 %vm15288_vm0, %v15287_v0 }
 0x368   : > { %13483 = vmatprep.subr.bf16.mxu0 %v15287_v0 }
 0x369   : > { %13524 = vmatpush3.bf16.msra.mxu1 %v16105_v34  ;;  %v5056_v34 = vpack.c.bf16 %v5055_v32, %v5055_v32  ;;  %v16753_v32 = vld [vmem:[%s19326_s7 + $0xe0] ss:$8 sps:$4 sm:$0xff]  }
 0x36a   : > { %13529 = vmatprep.subr.bf16.mxu1 %v15287_v0 }
 0x36b   : > { %13484 = vmatpush3.bf16.msra.mxu0 %v16341_v57 }
 0x36c   : > { %13526 = vmatmul.mubr.msk.bf16.vlgmr.msra.gmra.mrb[20].mxu1 %vm4113_vm5, %v5197_v27  ;;  %13485 = vmatprep.subr.bf16.mxu0 %v15287_v0  ;;  %v16747_v27 = vld [vmem:[%s19326_s7 + $0xe4] ss:$8 sps:$4 sm:$0xff]  }
 0x36d   : > { %13530 = vmatpush3.bf16.msra.mxu1 %v16113_v50  ;;  %13537 = vmatprep.mubr.msk.bf16.mxu1 %vm15288_vm0, %v15287_v0  ;;  %v5242_v50 = vld [vmem:[#allocation3 + $0x1e] ss:$2 sm:$0x7] }
 0x36e   : > { %13531 = vmatprep.subr.bf16.mxu1 %v15287_v0 }
 0x36f   : > { %13486 = vmatpush3.bf16.msra.mxu0 %v16350_v4 }
 0x370   : > { %13487 = vmatprep.subr.bf16.mxu0 %v15287_v0 }
 0x371   : > { %13532 = vmatpush3.bf16.msra.mxu1 %v16121_v6  ;;  %v5243_v6 = vpack.c.bf16 %v5242_v50, %v5242_v50  ;;  %v16765_v50 = vld [vmem:[%s19326_s7 + $0xf0] ss:$8 sps:$4 sm:$0xff]  }
 0x372   : > { %13533 = vmatprep.subr.bf16.mxu1 %v15287_v0 }
 0x373   : > { %13488 = vmatpush3.bf16.msra.mxu0 %v16357_v60 }
 0x374   : > { %13493 = vmatprep.subr.bf16.mxu0 %v15287_v0 }
 0x375   : > { %13534 = vmatpush3.bf16.msra.mxu1 %v16134_v11  ;;  %v16489_v11 = vld [vmem:[%s19326_s7 + $0x4] ss:$8 sps:$4 sm:$0xff]  }
 0x376   : > { %13490 = vmatmul.mubr.msk.bf16.vlgmr.msra.gmra.mrb[72].mxu0 %vm4113_vm5, %v5056_v34  ;;  %13535 = vmatprep.subr.bf16.mxu1 %v15287_v0  ;;  %v16759_v34 = vld [vmem:[%s19326_s7 + $0xf4] ss:$8 sps:$4 sm:$0xff]  }
 0x377   : > { %13494 = vmatpush3.bf16.msra.mxu0 %v16369_v21  ;;  %13501 = vmatprep.mubr.msk.bf16.mxu0 %vm15288_vm0, %v15287_v0 }
 0x378   : > { %13495 = vmatprep.subr.bf16.mxu0 %v15287_v0 }
 0x379   : > { %13536 = vmatpush3.bf16.msra.mxu1 %v16142_v24  ;;  %v5102_v24 = vld [vmem:[#allocation3 + $0x1e] ss:$2 sm:$0x7] }
 0x37a   : > { %13541 = vmatprep.subr.bf16.mxu1 %v15287_v0  ;;  %v5103_v59 = vpack.c.bf16 %v5102_v24, %v5102_v24  ;;  %v16777_v24 = vld [vmem:[%s19326_s7 + $0x100] ss:$8 sps:$4 sm:$0xff]  }
 0x37b   : > { %13496 = vmatpush3.bf16.msra.mxu0 %v16379_v26 }
 0x37c   : > { %13538 = vmatmul.mubr.msk.bf16.vlgmr.msra.gmra.mrb[20].mxu1 %vm4113_vm5, %v5243_v6  ;;  %13497 = vmatprep.subr.bf16.mxu0 %v15287_v0  ;;  %v16771_v6 = vld [vmem:[%s19326_s7 + $0x104] ss:$8 sps:$4 sm:$0xff]  }
 0x37d   : > { %13542 = vmatpush3.bf16.msra.mxu1 %v16153_v51  ;;  %13549 = vmatprep.mubr.msk.bf16.mxu1 %vm15288_vm0, %v15287_v0  ;;  %v16497_v51 = vld [vmem:[%s19326_s7] ss:$8 sps:$4 sm:$0xff]  }
 0x37e   : > { %13543 = vmatprep.subr.bf16.mxu1 %v15287_v0 }
 0x37f   : > { %13498 = vmatpush3.bf16.msra.mxu0 %v16390_v63 }
 0x380   : > { %13499 = vmatprep.subr.bf16.mxu0 %v15287_v0 }
 0x381   : > { %13544 = vmatpush3.bf16.msra.mxu1 %v16164_v1  ;;  %v16512_v1 = vld [vmem:[%s19326_s7 + $0x10] ss:$8 sps:$4 sm:$0xff]  }
 0x382   : > { %13545 = vmatprep.subr.bf16.mxu1 %v15287_v0 }
 0x383   : > { %13500 = vmatpush3.bf16.msra.mxu0 %v16399_v7 }
 0x384   : > { %5733 = vmatprep.subr.bf16.mxu0 %v16489_v11 }
 0x385   : > { %13546 = vmatpush3.bf16.msra.mxu1 %v16172_v52  ;;  %v16526_v52 = vld [vmem:[%s19326_s7 + $0x20] ss:$8 sps:$4 sm:$0xff]  }
 0x386   : > { %13502 = vmatmul.mubr.msk.bf16.vlgmr.msra.gmra.mrb[72].mxu0 %vm4113_vm5, %v5103_v59  ;;  %13547 = vmatprep.subr.bf16.mxu1 %v15287_v0  ;;  %v16783_v59 = vld [vmem:[%s19326_s7 + $0x114] ss:$8 sps:$4 sm:$0xff]  }
 0x387   : > { %5734 = vmatpush1.bf16.msra.mxu0 %v16497_v51  ;;  %5765 = vmatprep.mubr.bf16.mxu0 %v15289_v9 }
 0x388   : > { %5735 = vmatprep.subr.bf16.mxu0 %v16503_v41 }
 0x389   : > { %13548 = vmatpush3.bf16.msra.mxu1 %v16182_v54  ;;  %v16538_v54 = vld [vmem:[%s19326_s7 + $0x30] ss:$8 sps:$4 sm:$0xff]  }
 0x38a   : > { %13553 = vmatprep.subr.bf16.mxu1 %v15287_v0 }
 0x38b   : > { %5736 = vmatpush1.bf16.msra.mxu0 %v16512_v1 }
 0x38c   : > { %5737 = vmatprep.subr.bf16.mxu0 %v16518_v46 }
 0x38f   : > { %v3569_v47 = vpop.f32.mrb[12].mxu1  ;;  %5738 = vmatpush1.bf16.msra.mxu0 %v16526_v52 }
 0x390   : > { %v13839_v49 = vadd.f32 %v15995_v48, %v3569_v47  ;;  %v13215_v19 = vpop.f32.mrb[13].mxu1  ;;  %5739 = vmatprep.subr.bf16.mxu0 %v16532_v45  ;;  %v16820_v47 = vld [vmem:[%s19326_s7 + $0x144] ss:$8 sps:$4 sm:$0xff]  }
 0x391   : > { %v3572_v55 = vpop.f32.mrb[14].mxu1 }
 0x392   : > { %v3576_v56 = vmax.f32 %v13839_v49, 0.0  ;;  %v13216_v15 = vpop.f32.mrb[15].mxu1  ;;  %v16827_v55 = vld [vmem:[%s19326_s7 + $0x140] ss:$8 sps:$4 sm:$0xff]  }
 0x393   : > { %5740 = vmatpush1.bf16.msra.mxu0 %v16538_v54 }
 0x394   : > { %3577 = vst.msk [vmem:[#allocation3 + $0x23] sm:$0x7f] %vm1466_vm4, %v3576_v56  ;;  %5741 = vmatprep.subr.bf16.mxu0 %v16545_v53 }
 0x397   : > { %5742 = vmatpush1.bf16.msra.mxu0 %v16551_v58 }
 0x398   : > { %5743 = vmatprep.subr.bf16.mxu0 %v16563_v62 }
 0x39b   : > { %v5289_v48 = vld [vmem:[#allocation3 + $0x23] ss:$2 sm:$0x7]  ;;  %5744 = vmatpush1.bf16.msra.mxu0 %v16569_v3  ;;  %v5336_v13 = vld [vmem:[#allocation3 + $0x24] ss:$2 sm:$0x7] }
 0x39c   : > { %v5290_v61 = vpack.c.bf16 %v5289_v48, %v5289_v48  ;;  %v5337_v37 = vpack.c.bf16 %v5336_v13, %v5336_v13  ;;  %v16839_v48 = vld [vmem:[%s19326_s7 + $0x150] ss:$8 sps:$4 sm:$0xff]   ;;  %v16878_v13 = vld [vmem:[%s19326_s7 + $0x180] ss:$8 sps:$4 sm:$0xff]  }
 0x39e   : > { %13550 = vmatmul.mubr.msk.bf16.vlgmr.msra.gmra.mrb[20].mxu1 %vm4113_vm5, %v5290_v61  ;;  %v16845_v61 = vld [vmem:[%s19326_s7 + $0x164] ss:$8 sps:$4 sm:$0xff]  }
 0x39f   : > { %13554 = vmatpush3.bf16.msra.mxu1 %v16238_v17  ;;  %13561 = vmatprep.mubr.msk.bf16.mxu1 %vm15288_vm0, %v15287_v0  ;;  %v16577_v17 = vld [vmem:[%s19326_s7 + $0x64] ss:$8 sps:$4 sm:$0xff]  }
 0x3a0   : > { %13555 = vmatprep.subr.bf16.mxu1 %v15287_v0  ;;  %5745 = vmatprep.subr.bf16.mxu0 %v16577_v17 }
 0x3a1   : > { %5746 = vmatpush1.bf16.msra.mxu0 %v16583_v5 }
 0x3a2   : > { %5747 = vmatprep.subr.bf16.mxu0 %v16588_v8 }
 0x3a3   : > { %13556 = vmatpush3.bf16.msra.mxu1 %v16246_v20  ;;  %v16595_v20 = vld [vmem:[%s19326_s7 + $0x70] ss:$8 sps:$4 sm:$0xff]  }
 0x3a4   : > { %13557 = vmatprep.subr.bf16.mxu1 %v15287_v0 }
 0x3a5   : > { %5748 = vmatpush1.bf16.msra.mxu0 %v16595_v20 }
 0x3a6   : > { %5858 = vmatprep.subr.bf16.mxu0 %v16603_v10 }
 0x3a7   : > { %13558 = vmatpush3.bf16.msra.mxu1 %v16255_v23  ;;  %v5383_v23 = vld [vmem:[#allocation3 + $0x25] ss:$2 sm:$0x7] }
 0x3a8   : > { %13559 = vmatprep.subr.bf16.mxu1 %v15287_v0 }
 0x3ab   : > { %13560 = vmatpush3.bf16.msra.mxu1 %v16262_v25  ;;  %v5384_v25 = vpack.c.bf16 %v5383_v23, %v5383_v23  ;;  %v16884_v23 = vld [vmem:[%s19326_s7 + $0x194] ss:$8 sps:$4 sm:$0xff]  }
 0x3ac   : > { %13565 = vmatprep.subr.bf16.mxu1 %v15287_v0 }
 0x3ae   : > { %13562 = vmatmul.mubr.msk.bf16.vlgmr.msra.gmra.mrb[20].mxu1 %vm4113_vm5, %v5337_v37 }
 0x3af   : > { %13566 = vmatpush3.bf16.msra.mxu1 %v16269_v30  ;;  %13573 = vmatprep.mubr.msk.bf16.mxu1 %vm15288_vm0, %v15287_v0  ;;  %v5430_v30 = vld [vmem:[#allocation3 + $0x2a] ss:$2 sm:$0x7] }
 0x3b0   : > { %13567 = vmatprep.subr.bf16.mxu1 %v15287_v0 }
 0x3b3   : > { %13568 = vmatpush3.bf16.msra.mxu1 %v16277_v35  ;;  %v5431_v35 = vpack.c.bf16 %v5430_v30, %v5430_v30  ;;  %v16899_v30 = vld [vmem:[%s19326_s7 + $0x1a4] ss:$8 sps:$4 sm:$0xff]  }
 0x3b4   : > { %13569 = vmatprep.subr.bf16.mxu1 %v15287_v0 }
 0x3b7   : > { %13570 = vmatpush3.bf16.msra.mxu1 %v16286_v36  ;;  %v5477_v36 = vld [vmem:[#allocation3 + $0x2b] ss:$2 sm:$0x7] }
 0x3b8   : > { %13571 = vmatprep.subr.bf16.mxu1 %v15287_v0 }
 0x3bb   : > { %13572 = vmatpush3.bf16.msra.mxu1 %v16293_v38  ;;  %v5478_v38 = vpack.c.bf16 %v5477_v36, %v5477_v36  ;;  %v16913_v36 = vld [vmem:[%s19326_s7 + $0x1b4] ss:$8 sps:$4 sm:$0xff]  }
 0x3bc   : > { %13577 = vmatprep.subr.bf16.mxu1 %v15287_v0 }
 0x3be   : > { %13574 = vmatmul.mubr.msk.bf16.vlgmr.msra.gmra.mrb[20].mxu1 %vm4113_vm5, %v5384_v25  ;;  %v16892_v25 = vld [vmem:[%s19326_s7 + $0x190] ss:$8 sps:$4 sm:$0xff]  }
 0x3bf   : > { %13578 = vmatpush3.bf16.msra.mxu1 %v16300_v40  ;;  %13585 = vmatprep.mubr.msk.bf16.mxu1 %vm15288_vm0, %v15287_v0  ;;  %v5524_v40 = vld [vmem:[#allocation3 + $0x2c] ss:$2 sm:$0x7] }
 0x3c0   : > { %13579 = vmatprep.subr.bf16.mxu1 %v15287_v0 }
 0x3c3   : > { %13580 = vmatpush3.bf16.msra.mxu1 %v16308_v42  ;;  %v5525_v42 = vpack.c.bf16 %v5524_v40, %v5524_v40  ;;  %v16927_v40 = vld [vmem:[%s19326_s7 + $0x1c4] ss:$8 sps:$4 sm:$0xff]  }
 0x3c4   : > { %13581 = vmatprep.subr.bf16.mxu1 %v15287_v0 }
 0x3c7   : > { %13582 = vmatpush3.bf16.msra.mxu1 %v16317_v44  ;;  %v16675_v44 = vld [vmem:[%s19325_s6] ss:$0 sm:$0xff] }
 0x3c8   : > { %13583 = vmatprep.subr.bf16.mxu1 %v15287_v0 }
 0x3cb   : > { %13584 = vmatpush3.bf16.msra.mxu1 %v16324_v31 }
 0x3cc   : > { %13589 = vmatprep.subr.bf16.mxu1 %v15287_v0 }
 0x3ce   : > { %13586 = vmatmul.mubr.msk.bf16.vlgmr.msra.gmra.mrb[20].mxu1 %vm4113_vm5, %v5431_v35  ;;  %v16907_v35 = vld [vmem:[%s19326_s7 + $0x1a0] ss:$8 sps:$4 sm:$0xff]  }
 0x3cf   : > { %13590 = vmatpush3.bf16.msra.mxu1 %v16332_v43  ;;  %13597 = vmatprep.mubr.msk.bf16.mxu1 %vm15288_vm0, %v15287_v0 }
 0x3d0   : > { %13591 = vmatprep.subr.bf16.mxu1 %v15287_v0 }
 0x3d3   : > { %13592 = vmatpush3.bf16.msra.mxu1 %v16341_v57 }
 0x3d4   : > { %13593 = vmatprep.subr.bf16.mxu1 %v15287_v0 }
 0x3d7   : > { %13594 = vmatpush3.bf16.msra.mxu1 %v16350_v4 }
 0x3d8   : > { %13595 = vmatprep.subr.bf16.mxu1 %v15287_v0 }
 0x3db   : > { %13596 = vmatpush3.bf16.msra.mxu1 %v16357_v60 }
 0x3dc   : > { %13601 = vmatprep.subr.bf16.mxu1 %v15287_v0 }
 0x3de   : > { %13598 = vmatmul.mubr.msk.bf16.vlgmr.msra.gmra.mrb[20].mxu1 %vm4113_vm5, %v5478_v38  ;;  %v16921_v38 = vld [vmem:[%s19326_s7 + $0x1b0] ss:$8 sps:$4 sm:$0xff]  }
 0x3df   : > { %13602 = vmatpush3.bf16.msra.mxu1 %v16369_v21  ;;  %13609 = vmatprep.mubr.msk.bf16.mxu1 %vm15288_vm0, %v15287_v0 }
 0x3e0   : > { %13603 = vmatprep.subr.bf16.mxu1 %v15287_v0 }
 0x3e3   : > { %13604 = vmatpush3.bf16.msra.mxu1 %v16379_v26  ;;  %v16681_v26 = vld [vmem:[%s19326_s7 + $0x80] ss:$8 sps:$4 sm:$0xff]  }
 0x3e4   : > { %13605 = vmatprep.subr.bf16.mxu1 %v15287_v0 }
 0x3e7   : > { %13606 = vmatpush3.bf16.msra.mxu1 %v16390_v63 }
 0x3e8   : > { %13607 = vmatprep.subr.bf16.mxu1 %v15287_v0 }
 0x3eb   : > { %13608 = vmatpush3.bf16.msra.mxu1 %v16399_v7 }
 0x3ec   : > { %6160 = vmatprep.subr.bf16.mxu1 %v16489_v11 }
 0x3ee   : > { %13610 = vmatmul.mubr.msk.bf16.vlgmr.msra.gmra.mrb[20].mxu1 %vm4113_vm5, %v5525_v42  ;;  %v16935_v42 = vld [vmem:[%s19326_s7 + $0x1c0] ss:$8 sps:$4 sm:$0xff]  }
 0x3ef   : > { %6161 = vmatpush1.bf16.msra.mxu1 %v16497_v51  ;;  %6192 = vmatprep.mubr.bf16.mxu1 %v15289_v9 }
 0x3f0   : > { %6162 = vmatprep.subr.bf16.mxu1 %v16503_v41  ;;  %v16789_v41 = vld [vmem:[%s19326_s7 + $0x110] ss:$8 sps:$4 sm:$0xff]  }
 0x3f3   : > { %6163 = vmatpush1.bf16.msra.mxu1 %v16512_v1  ;;  %v16796_v1 = vld [vmem:[%s19326_s7 + $0x124] ss:$8 sps:$4 sm:$0xff]  }
 0x3f4   : > { %6164 = vmatprep.subr.bf16.mxu1 %v16518_v46  ;;  %v16802_v46 = vld [vmem:[%s19326_s7 + $0x120] ss:$8 sps:$4 sm:$0xff]  }
 0x3f7   : > { %6165 = vmatpush1.bf16.msra.mxu1 %v16526_v52  ;;  %v16808_v52 = vld [vmem:[%s19326_s7 + $0x134] ss:$8 sps:$4 sm:$0xff]  }
 0x3f8   : > { %6166 = vmatprep.subr.bf16.mxu1 %v16532_v45  ;;  %v16814_v45 = vld [vmem:[%s19326_s7 + $0x130] ss:$8 sps:$4 sm:$0xff]  }
 0x3fb   : > { %6167 = vmatpush1.bf16.msra.mxu1 %v16538_v54 }
 0x3fc   : > { %6168 = vmatprep.subr.bf16.mxu1 %v16545_v53 }
 0x3ff   : > { %6169 = vmatpush1.bf16.msra.mxu1 %v16551_v58  ;;  %v16833_v58 = vld [vmem:[%s19326_s7 + $0x154] ss:$8 sps:$4 sm:$0xff]  }
 0x400   : > { %6170 = vmatprep.subr.bf16.mxu1 %v16563_v62  ;;  %v16851_v62 = vld [vmem:[%s19326_s7 + $0x160] ss:$8 sps:$4 sm:$0xff]  }
 0x403   : > { %6171 = vmatpush1.bf16.msra.mxu1 %v16569_v3  ;;  %v16857_v3 = vld [vmem:[%s19326_s7 + $0x174] ss:$8 sps:$4 sm:$0xff]  }
 0x404   : > { %6172 = vmatprep.subr.bf16.mxu1 %v16577_v17 }
 0x407   : > { %6173 = vmatpush1.bf16.msra.mxu1 %v16583_v5 }
 0x408   : > { %6174 = vmatprep.subr.bf16.mxu1 %v16588_v8  ;;  %v16863_v8 = vld [vmem:[%s19326_s7 + $0x170] ss:$8 sps:$4 sm:$0xff]  }
 0x40b   : > { %6175 = vmatpush1.bf16.msra.mxu1 %v16595_v20  ;;  %v16869_v20 = vld [vmem:[%s19326_s7 + $0x184] ss:$8 sps:$4 sm:$0xff]  }
 0x40c   : > { %6205 = vmatprep.subr.bf16.mxu1 %v16603_v10 }
 0x41f   : > { %v4719_v31 = vpop.f32.mrb[16].mxu1 }
 0x420   : > { %v13841_v43 = vadd.f32 %v16675_v44, %v4719_v31  ;;  %v13395_v57 = vpop.f32.mrb[17].mxu1  ;;  %v16941_v31 = vld [vmem:[%s19326_s7 + $0x1d4] ss:$8 sps:$4 sm:$0xff]  }
 0x421   : > { %v4722_v4 = vpop.f32.mrb[18].mxu1  ;;  %v16955_v57 = vld [vmem:[%s19326_s7 + $0x1e4] ss:$8 sps:$4 sm:$0xff]  }
 0x422   : > { %v4726_v60 = vmax.f32 %v13841_v43, 0.0  ;;  %v13396_v21 = vpop.f32.mrb[19].mxu1  ;;  %v16949_v43 = vld [vmem:[%s19326_s7 + $0x1d0] ss:$8 sps:$4 sm:$0xff]   ;;  %v16963_v4 = vld [vmem:[%s19326_s7 + $0x1e0] ss:$8 sps:$4 sm:$0xff]  }
 0x423   : > { %v16969_v21 = vld [vmem:[%s19326_s7 + $0x1f4] ss:$8 sps:$4 sm:$0xff]  }
 0x424   : > { %4727 = vst [vmem:[#allocation4] sm:$0x7] %v4726_v60 }
 0x42b   : > { %v5651_v63 = vld [vmem:[#allocation4] sm:$0x3] }
 0x42c   : > { %v5652_v7 = vpack.c.bf16 %v5651_v63, %v5651_v63  ;;  %v5776_v11 = vld [vmem:[#allocation4 + $0x1] sm:$0x3] }
 0x42d   : > { %v5777_v51 = vpack.c.bf16 %v5776_v11, %v5776_v11  ;;  %v16977_v63 = vld [vmem:[%s19326_s7 + $0x1f0] ss:$8 sps:$4 sm:$0xff]   ;;  %v14481_v11 = vld [vmem:[%s19328_s9 + $0xe4] ss:$16 sps:$4 sm:$0xff]  }
 0x42e   : > { %5766 = vmatmul.mubr.bf16.vlgmr.msra.gmra.mrb[76].mxu0 %v5652_v7  ;;  %v14439_v7 = vld [vmem:[%s19328_s9 + $0x4] ss:$16 sps:$4 sm:$0xff]  }
 0x42f   : > { %5859 = vmatpush1.bf16.msra.mxu0 %v16681_v26  ;;  %5890 = vmatprep.mubr.bf16.mxu0 %v15289_v9 }
 0x430   : > { %5860 = vmatprep.subr.bf16.mxu0 %v16686_v14 }
 0x433   : > { %5861 = vmatpush1.bf16.msra.mxu0 %v16692_v16 }
 0x434   : > { %5862 = vmatprep.subr.bf16.mxu0 %v16699_v18 }
 0x437   : > { %5863 = vmatpush1.bf16.msra.mxu0 %v16705_v29 }
 0x438   : > { %5864 = vmatprep.subr.bf16.mxu0 %v16711_v33 }
 0x43b   : > { %5865 = vmatpush1.bf16.msra.mxu0 %v16717_v2 }
 0x43c   : > { %5866 = vmatprep.subr.bf16.mxu0 %v16723_v28 }
 0x43f   : > { %5867 = vmatpush1.bf16.msra.mxu0 %v16729_v12 }
 0x440   : > { %5868 = vmatprep.subr.bf16.mxu0 %v16735_v39 }
 0x443   : > { %5869 = vmatpush1.bf16.msra.mxu0 %v16741_v22 }
 0x444   : > { %5870 = vmatprep.subr.bf16.mxu0 %v16747_v27 }
 0x447   : > { %5871 = vmatpush1.bf16.msra.mxu0 %v16753_v32 }
 0x448   : > { %5872 = vmatprep.subr.bf16.mxu0 %v16759_v34 }
 0x44b   : > { %5873 = vmatpush1.bf16.msra.mxu0 %v16765_v50 }
 0x44c   : > { %5983 = vmatprep.subr.bf16.mxu0 %v16771_v6 }
 0x44e   : > { %5891 = vmatmul.mubr.bf16.vlgmr.msra.gmra.mrb[76].mxu0 %v5777_v51  ;;  %v14487_v51 = vld [vmem:[%s19328_s9 + $0x104] ss:$16 sps:$4 sm:$0xff]  }
 0x44f   : > { %5984 = vmatpush1.bf16.msra.mxu0 %v16777_v24  ;;  %6015 = vmatprep.mubr.bf16.mxu0 %v15289_v9 }
 0x450   : > { %5985 = vmatprep.subr.bf16.mxu0 %v16783_v59 }
 0x453   : > { %5986 = vmatpush1.bf16.msra.mxu0 %v16789_v41 }
 0x454   : > { %5987 = vmatprep.subr.bf16.mxu0 %v16796_v1 }
 0x457   : > { %5988 = vmatpush1.bf16.msra.mxu0 %v16802_v46 }
 0x458   : > { %5989 = vmatprep.subr.bf16.mxu0 %v16808_v52 }
 0x459   : > { %v5141_v54 = vpop.f32.mrb[72].mxu0 }
 0x45a   : > { %v13842_v49 = vadd.f32 %v16675_v44, %v5141_v54  ;;  %v13503_v19 = vpop.f32.mrb[73].mxu0 }
 0x45b   : > { %5990 = vmatpush1.bf16.msra.mxu0 %v16814_v45  ;;  %v5144_v53 = vpop.f32.mrb[74].mxu0 }
 0x45c   : > { %v5148_v56 = vmax.f32 %v13842_v49, 0.0  ;;  %v13504_v15 = vpop.f32.mrb[75].mxu0  ;;  %5991 = vmatprep.subr.bf16.mxu0 %v16820_v47 }
 0x45d   : > { %v14511_v15 = vld [vmem:[%s19328_s9 + $0x184] ss:$16 sps:$4 sm:$0xff]  }
 0x45e   : > { %5149 = vst [vmem:[#allocation4 + $0x3] sm:$0x7] %v5148_v56 }
 0x45f   : > { %5992 = vmatpush1.bf16.msra.mxu0 %v16827_v55 }
 0x460   : > { %5993 = vmatprep.subr.bf16.mxu0 %v16833_v58 }
 0x463   : > { %5994 = vmatpush1.bf16.msra.mxu0 %v16839_v48 }
 0x464   : > { %5995 = vmatprep.subr.bf16.mxu0 %v16845_v61 }
 0x465   : > { %v6158_v17 = vld [vmem:[#allocation4 + $0x3] sm:$0x3] }
 0x466   : > { %v6159_v5 = vpack.c.bf16 %v6158_v17, %v6158_v17  ;;  %v5901_v10 = vld [vmem:[#allocation4 + $0x3] sm:$0x3]  ;;  %v14521_v17 = vld [vmem:[%s19328_s9 + $0x1c0] ss:$16 sps:$4 sm:$0xff]  }
 0x467   : > { %5996 = vmatpush1.bf16.msra.mxu0 %v16851_v62  ;;  %v5902_v37 = vpack.c.bf16 %v5901_v10, %v5901_v10  ;;  %v6203_v60 = vld [vmem:[#allocation4 + $0x4] sm:$0x3] }
 0x468   : > { %6193 = vmatmul.mubr.bf16.vlgmr.msra.gmra.mrb[24].mxu1 %v6159_v5  ;;  %5997 = vmatprep.subr.bf16.mxu0 %v16857_v3 }
 0x469   : > { %6206 = vmatpush1.bf16.msra.mxu1 %v16681_v26  ;;  %6237 = vmatprep.mubr.bf16.mxu1 %v15289_v9  ;;  %v6204_v26 = vpack.c.bf16 %v6203_v60, %v6203_v60  ;;  %v14484_v60 = vld [vmem:[%s19328_s9 + $0x2e4] ss:$16 sps:$4 sm:$0xff]  }
 0x46a   : > { %6207 = vmatprep.subr.bf16.mxu1 %v16686_v14  ;;  %v6026_v14 = vld [vmem:[#allocation4 + $0x4] sm:$0x3] }
 0x46b   : > { %5998 = vmatpush1.bf16.msra.mxu0 %v16863_v8 }
 0x46c   : > { %6108 = vmatprep.subr.bf16.mxu0 %v16869_v20 }
 0x46d   : > { %6208 = vmatpush1.bf16.msra.mxu1 %v16692_v16  ;;  %v14437_v16 = vld [vmem:[%s19328_s9] ss:$16 sps:$4 sm:$0xff]  }
 0x46e   : > { %6016 = vmatmul.mubr.bf16.vlgmr.msra.gmra.mrb[76].mxu0 %v5902_v37  ;;  %6209 = vmatprep.subr.bf16.mxu1 %v16699_v18  ;;  %v6027_v18 = vpack.c.bf16 %v6026_v14, %v6026_v14  ;;  %v14527_v37 = vld [vmem:[%s19328_s9 + $0x1e0] ss:$16 sps:$4 sm:$0xff]  }
 0x46f   : > { %6109 = vmatpush1.bf16.msra.mxu0 %v16878_v13  ;;  %6140 = vmatprep.mubr.bf16.mxu0 %v15289_v9  ;;  %v14494_v14 = vld [vmem:[%s19328_s9 + $0x320] ss:$16 sps:$4 sm:$0xff]  }
 0x470   : > { %6110 = vmatprep.subr.bf16.mxu0 %v16884_v23 }
 0x471   : > { %6210 = vmatpush1.bf16.msra.mxu1 %v16705_v29  ;;  %v14445_v29 = vld [vmem:[%s19328_s9 + $0x24] ss:$16 sps:$4 sm:$0xff]  }
 0x472   : > { %6211 = vmatprep.subr.bf16.mxu1 %v16711_v33  ;;  %v14443_v33 = vld [vmem:[%s19328_s9 + $0x20] ss:$16 sps:$4 sm:$0xff]  }
 0x473   : > { %6111 = vmatpush1.bf16.msra.mxu0 %v16892_v25 }
 0x474   : > { %6112 = vmatprep.subr.bf16.mxu0 %v16899_v30 }
 0x475   : > { %6212 = vmatpush1.bf16.msra.mxu1 %v16717_v2  ;;  %v14451_v2 = vld [vmem:[%s19328_s9 + $0x44] ss:$16 sps:$4 sm:$0xff]  }
 0x476   : > { %6213 = vmatprep.subr.bf16.mxu1 %v16723_v28  ;;  %v14449_v28 = vld [vmem:[%s19328_s9 + $0x40] ss:$16 sps:$4 sm:$0xff]  }
 0x477   : > { %6113 = vmatpush1.bf16.msra.mxu0 %v16907_v35 }
 0x478   : > { %6114 = vmatprep.subr.bf16.mxu0 %v16913_v36 }
 0x479   : > { %6214 = vmatpush1.bf16.msra.mxu1 %v16729_v12  ;;  %v14457_v12 = vld [vmem:[%s19328_s9 + $0x64] ss:$16 sps:$4 sm:$0xff]  }
 0x47a   : > { %6215 = vmatprep.subr.bf16.mxu1 %v16735_v39  ;;  %v14455_v39 = vld [vmem:[%s19328_s9 + $0x60] ss:$16 sps:$4 sm:$0xff]  }
 0x47b   : > { %6115 = vmatpush1.bf16.msra.mxu0 %v16921_v38 }
 0x47c   : > { %6116 = vmatprep.subr.bf16.mxu0 %v16927_v40 }
 0x47d   : > { %6216 = vmatpush1.bf16.msra.mxu1 %v16741_v22  ;;  %v14463_v22 = vld [vmem:[%s19328_s9 + $0x84] ss:$16 sps:$4 sm:$0xff]  }
 0x47e   : > { %6217 = vmatprep.subr.bf16.mxu1 %v16747_v27  ;;  %v14461_v27 = vld [vmem:[%s19328_s9 + $0x80] ss:$16 sps:$4 sm:$0xff]  }
 0x47f   : > { %6117 = vmatpush1.bf16.msra.mxu0 %v16935_v42 }
 0x480   : > { %6118 = vmatprep.subr.bf16.mxu0 %v16941_v31 }
 0x481   : > { %6218 = vmatpush1.bf16.msra.mxu1 %v16753_v32  ;;  %v14469_v32 = vld [vmem:[%s19328_s9 + $0xa4] ss:$16 sps:$4 sm:$0xff]  }
 0x482   : > { %6219 = vmatprep.subr.bf16.mxu1 %v16759_v34  ;;  %v14467_v34 = vld [vmem:[%s19328_s9 + $0xa0] ss:$16 sps:$4 sm:$0xff]  }
 0x483   : > { %6119 = vmatpush1.bf16.msra.mxu0 %v16949_v43 }
 0x484   : > { %6120 = vmatprep.subr.bf16.mxu0 %v16955_v57 }
 0x485   : > { %6220 = vmatpush1.bf16.msra.mxu1 %v16765_v50  ;;  %v14475_v50 = vld [vmem:[%s19328_s9 + $0xc4] ss:$16 sps:$4 sm:$0xff]  }
 0x486   : > { %6250 = vmatprep.subr.bf16.mxu1 %v16771_v6  ;;  %v14473_v6 = vld [vmem:[%s19328_s9 + $0xc0] ss:$16 sps:$4 sm:$0xff]  }
 0x487   : > { %6121 = vmatpush1.bf16.msra.mxu0 %v16963_v4 }
 0x488   : > { %6238 = vmatmul.mubr.bf16.vlgmr.msra.gmra.mrb[24].mxu1 %v6204_v26  ;;  %6122 = vmatprep.subr.bf16.mxu0 %v16969_v21  ;;  %v14490_v26 = vld [vmem:[%s19328_s9 + $0x304] ss:$16 sps:$4 sm:$0xff]  }
 0x489   : > { %6251 = vmatpush1.bf16.msra.mxu1 %v16777_v24  ;;  %6282 = vmatprep.mubr.bf16.mxu1 %v15289_v9  ;;  %v14479_v24 = vld [vmem:[%s19328_s9 + $0xe0] ss:$16 sps:$4 sm:$0xff]  }
 0x48a   : > { %6252 = vmatprep.subr.bf16.mxu1 %v16783_v59  ;;  %v14485_v59 = vld [vmem:[%s19328_s9 + $0x100] ss:$16 sps:$4 sm:$0xff]  }
 0x48b   : > { %6123 = vmatpush1.bf16.msra.mxu0 %v16977_v63 }
 0x48c   : > { %6940 = vmatprep.subr.bf16.mxu0 %v14439_v7  ;;  %v14496_v7 = vld [vmem:[%s19328_s9 + $0x324] ss:$16 sps:$4 sm:$0xff]  }
 0x48d   : > { %6253 = vmatpush1.bf16.msra.mxu1 %v16789_v41  ;;  %v14493_v41 = vld [vmem:[%s19328_s9 + $0x124] ss:$16 sps:$4 sm:$0xff]  }
 0x48e   : > { %6141 = vmatmul.mubr.bf16.vlgmr.msra.gmra.mrb[76].mxu0 %v6027_v18  ;;  %6254 = vmatprep.subr.bf16.mxu1 %v16796_v1  ;;  %v14491_v1 = vld [vmem:[%s19328_s9 + $0x120] ss:$16 sps:$4 sm:$0xff]  }
 0x48f   : > { %6941 = vmatpush1.bf16.msra.mxu0 %v14437_v16  ;;  %v14502_v16 = vld [vmem:[%s19328_s9 + $0x344] ss:$16 sps:$4 sm:$0xff]   ;;  %v14500_v18 = vld [vmem:[%s19328_s9 + $0x340] ss:$16 sps:$4 sm:$0xff]  }
 0x490   : > { %6942 = vmatprep.subr.bf16.mxu0 %v14445_v29  ;;  %v14508_v29 = vld [vmem:[%s19328_s9 + $0x364] ss:$16 sps:$4 sm:$0xff]  }
 0x491   : > { %6255 = vmatpush1.bf16.msra.mxu1 %v16802_v46  ;;  %v14499_v46 = vld [vmem:[%s19328_s9 + $0x144] ss:$16 sps:$4 sm:$0xff]  }
 0x492   : > { %6256 = vmatprep.subr.bf16.mxu1 %v16808_v52  ;;  %v14497_v52 = vld [vmem:[%s19328_s9 + $0x140] ss:$16 sps:$4 sm:$0xff]  }
 0x493   : > { %6943 = vmatpush1.bf16.msra.mxu0 %v14443_v33  ;;  %v14506_v33 = vld [vmem:[%s19328_s9 + $0x360] ss:$16 sps:$4 sm:$0xff]  }
 0x494   : > { %6944 = vmatprep.subr.bf16.mxu0 %v14451_v2  ;;  %v14514_v2 = vld [vmem:[%s19328_s9 + $0x384] ss:$16 sps:$4 sm:$0xff]  }
 0x495   : > { %6257 = vmatpush1.bf16.msra.mxu1 %v16814_v45 }
 0x496   : > { %6258 = vmatprep.subr.bf16.mxu1 %v16820_v47 }
 0x497   : > { %6945 = vmatpush1.bf16.msra.mxu0 %v14449_v28  ;;  %v14512_v28 = vld [vmem:[%s19328_s9 + $0x380] ss:$16 sps:$4 sm:$0xff]  }
 0x498   : > { %6946 = vmatprep.subr.bf16.mxu0 %v14457_v12  ;;  %v14520_v12 = vld [vmem:[%s19328_s9 + $0x3a4] ss:$16 sps:$4 sm:$0xff]  }
 0x499   : > { %6259 = vmatpush1.bf16.msra.mxu1 %v16827_v55 }
 0x49a   : > { %6260 = vmatprep.subr.bf16.mxu1 %v16833_v58  ;;  %v14509_v58 = vld [vmem:[%s19328_s9 + $0x180] ss:$16 sps:$4 sm:$0xff]  }
 0x49b   : > { %6947 = vmatpush1.bf16.msra.mxu0 %v14455_v39  ;;  %v14518_v39 = vld [vmem:[%s19328_s9 + $0x3a0] ss:$16 sps:$4 sm:$0xff]  }
 0x49c   : > { %6948 = vmatprep.subr.bf16.mxu0 %v14463_v22  ;;  %v14526_v22 = vld [vmem:[%s19328_s9 + $0x3c4] ss:$16 sps:$4 sm:$0xff]  }
 0x49d   : > { %6261 = vmatpush1.bf16.msra.mxu1 %v16839_v48  ;;  %v14517_v48 = vld [vmem:[%s19328_s9 + $0x1a4] ss:$16 sps:$4 sm:$0xff]  }
 0x49e   : > { %6262 = vmatprep.subr.bf16.mxu1 %v16845_v61  ;;  %v14515_v61 = vld [vmem:[%s19328_s9 + $0x1a0] ss:$16 sps:$4 sm:$0xff]  }
 0x49f   : > { %6949 = vmatpush1.bf16.msra.mxu0 %v14461_v27  ;;  %v14524_v27 = vld [vmem:[%s19328_s9 + $0x3c0] ss:$16 sps:$4 sm:$0xff]  }
 0x4a0   : > { %6950 = vmatprep.subr.bf16.mxu0 %v14469_v32  ;;  %v14532_v32 = vld [vmem:[%s19328_s9 + $0x3e4] ss:$16 sps:$4 sm:$0xff]  }
 0x4a1   : > { %6263 = vmatpush1.bf16.msra.mxu1 %v16851_v62  ;;  %v14523_v62 = vld [vmem:[%s19328_s9 + $0x1c4] ss:$16 sps:$4 sm:$0xff]  }
 0x4a2   : > { %6264 = vmatprep.subr.bf16.mxu1 %v16857_v3  ;;  %v14442_v3 = vld [vmem:[%s19328_s9 + $0x204] ss:$16 sps:$4 sm:$0xff]  }
 0x4a3   : > { %6951 = vmatpush1.bf16.msra.mxu0 %v14467_v34  ;;  %v14530_v34 = vld [vmem:[%s19328_s9 + $0x3e0] ss:$16 sps:$4 sm:$0xff]  }
 0x4a4   : > { %6952 = vmatprep.subr.bf16.mxu0 %v14475_v50  ;;  %v14565_v50 = vld [vmem:[%s19328_s9 + $0x404] ss:$16 sps:$4 sm:$0xff]  }
 0x4a5   : > { %6265 = vmatpush1.bf16.msra.mxu1 %v16863_v8  ;;  %v14529_v8 = vld [vmem:[%s19328_s9 + $0x1e4] ss:$16 sps:$4 sm:$0xff]  }
 0x4a6   : > { %6295 = vmatprep.subr.bf16.mxu1 %v16869_v20  ;;  %v14440_v20 = vld [vmem:[%s19328_s9 + $0x200] ss:$16 sps:$4 sm:$0xff]  }
 0x4a7   : > { %6953 = vmatpush1.bf16.msra.mxu0 %v14473_v6  ;;  %v5641_v6 = vlaneseq }
 0x4a8   : > { %6954 = vmatprep.subr.bf16.mxu0 %v14481_v11 }
 0x4a9   : > { %v17214_v11 = vshrl.u32 %v5641_v6, 7  ;;  %vm11077_vm13 = vcmp.lt.s32.totalorder %v5641_v6, 810 }
 0x4ab   : > { %6955 = vmatpush1.bf16.msra.mxu0 %v14479_v24  ;;  %v17217_v24 = vsub.s32 0, %v17214_v11 }
 0x4ac   : > { %6956 = vmatprep.subr.bf16.mxu0 %v14487_v51  ;;  %v5639_v51 = vld [vmem:[%s19327_s8] sm:$0x3] }
 0x4af   : > { %6957 = vmatpush1.bf16.msra.mxu0 %v14485_v59  ;;  %v17223_v59 = vsub.s32 1, %v17214_v11 }
 0x4b0   : > { %6958 = vmatprep.subr.bf16.mxu0 %v14493_v41  ;;  %v17226_v41 = vrot.slane %v5639_v51, %v17217_v24 }
 0x4b3   : > { %6959 = vmatpush1.bf16.msra.mxu0 %v14491_v1  ;;  %v17229_v1 = vrot.slane %v5639_v51, %v17223_v59  ;;  %v14568_v51 = vld [vmem:[%s19328_s9 + $0x14c] ss:$16 sps:$4 sm:$0xff]  }
 0x4b4   : > { %6960 = vmatprep.subr.bf16.mxu0 %v14499_v46 }
 0x4b7   : > { %6961 = vmatpush1.bf16.msra.mxu0 %v14497_v52 }
 0x4c1   : > { %v5563_v45 = vpop.f32.mrb[20].mxu1 }
 0x4c2   : > { %v13843_v47 = vadd.f32 %v16675_v44, %v5563_v45  ;;  %v13611_v54 = vpop.f32.mrb[21].mxu1  ;;  %v14505_v44 = vld [vmem:[%s19328_s9 + $0x164] ss:$16 sps:$4 sm:$0xff]  }
 0x4c3   : > { %v5566_v49 = vpop.f32.mrb[22].mxu1  ;;  %6962 = vmatprep.subr.bf16.mxu0 %v14505_v44 }
 0x4c4   : > { %v5570_v19 = vmax.f32 %v13843_v47, 0.0  ;;  %v13612_v53 = vpop.f32.mrb[23].mxu1 }
 0x4c6   : > { %5571 = vst [vmem:[#allocation4 + $0x6] sm:$0x7] %v5570_v19 }
 0x4cd   : > { %v6248_v55 = vld [vmem:[#allocation4 + $0x6] sm:$0x3] }
 0x4ce   : > { %v6249_v56 = vpack.c.bf16 %v6248_v55, %v6248_v55  ;;  %v6293_v5 = vld [vmem:[#allocation4 + $0x7] sm:$0x3] }
 0x4cf   : > { %v6294_v10 = vpack.c.bf16 %v6293_v5, %v6293_v5 }
 0x4d0   : > { %6283 = vmatmul.mubr.bf16.vlgmr.msra.gmra.mrb[24].mxu1 %v6249_v56 }
 0x4d1   : > { %6296 = vmatpush1.bf16.msra.mxu1 %v16878_v13  ;;  %6327 = vmatprep.mubr.bf16.mxu1 %v15289_v9  ;;  %v14503_v9 = vld [vmem:[%s19328_s9 + $0x160] ss:$16 sps:$4 sm:$0xff]   ;;  %v14448_v13 = vld [vmem:[%s19328_s9 + $0x224] ss:$16 sps:$4 sm:$0xff]  }
 0x4d2   : > { %6297 = vmatprep.subr.bf16.mxu1 %v16884_v23  ;;  %6963 = vmatpush1.bf16.msra.mxu0 %v14503_v9  ;;  %v14446_v23 = vld [vmem:[%s19328_s9 + $0x220] ss:$16 sps:$4 sm:$0xff]  }
 0x4d3   : > { %6964 = vmatprep.subr.bf16.mxu0 %v14511_v15 }
 0x4d5   : > { %6298 = vmatpush1.bf16.msra.mxu1 %v16892_v25  ;;  %v14454_v25 = vld [vmem:[%s19328_s9 + $0x244] ss:$16 sps:$4 sm:$0xff]  }
 0x4d6   : > { %6299 = vmatprep.subr.bf16.mxu1 %v16899_v30  ;;  %6965 = vmatpush1.bf16.msra.mxu0 %v14509_v58  ;;  %v14535_v30 = vld [vmem:[%s19328_s9 + $0xc] ss:$16 sps:$4 sm:$0xff]  }
 0x4d7   : > { %6966 = vmatprep.subr.bf16.mxu0 %v14517_v48 }
 0x4d9   : > { %6300 = vmatpush1.bf16.msra.mxu1 %v16907_v35  ;;  %v14452_v35 = vld [vmem:[%s19328_s9 + $0x240] ss:$16 sps:$4 sm:$0xff]  }
 0x4da   : > { %6301 = vmatprep.subr.bf16.mxu1 %v16913_v36  ;;  %6967 = vmatpush1.bf16.msra.mxu0 %v14515_v61  ;;  %v14460_v36 = vld [vmem:[%s19328_s9 + $0x264] ss:$16 sps:$4 sm:$0xff]  }
 0x4db   : > { %6968 = vmatprep.subr.bf16.mxu0 %v14523_v62 }
 0x4dd   : > { %6302 = vmatpush1.bf16.msra.mxu1 %v16921_v38  ;;  %v14458_v38 = vld [vmem:[%s19328_s9 + $0x260] ss:$16 sps:$4 sm:$0xff]  }
 0x4de   : > { %6303 = vmatprep.subr.bf16.mxu1 %v16927_v40  ;;  %6969 = vmatpush1.bf16.msra.mxu0 %v14521_v17  ;;  %v14466_v40 = vld [vmem:[%s19328_s9 + $0x284] ss:$16 sps:$4 sm:$0xff]  }
 0x4df   : > { %6970 = vmatprep.subr.bf16.mxu0 %v14529_v8  ;;  %v14538_v8 = vld [vmem:[%s19328_s9 + $0x2c] ss:$16 sps:$4 sm:$0xff]  }
 0x4e1   : > { %6304 = vmatpush1.bf16.msra.mxu1 %v16935_v42  ;;  %v14464_v42 = vld [vmem:[%s19328_s9 + $0x280] ss:$16 sps:$4 sm:$0xff]  }
 0x4e2   : > { %6305 = vmatprep.subr.bf16.mxu1 %v16941_v31  ;;  %6971 = vmatpush1.bf16.msra.mxu0 %v14527_v37  ;;  %v14472_v31 = vld [vmem:[%s19328_s9 + $0x2a4] ss:$16 sps:$4 sm:$0xff]   ;;  %v14541_v37 = vld [vmem:[%s19328_s9 + $0x4c] ss:$16 sps:$4 sm:$0xff]  }
 0x4e3   : > { %6981 = vmatprep.subr.bf16.mxu0 %v14535_v30  ;;  %v14539_v30 = vld [vmem:[%s19328_s9 + $0x48] ss:$16 sps:$4 sm:$0xff]  }
 0x4e5   : > { %6306 = vmatpush1.bf16.msra.mxu1 %v16949_v43  ;;  %v14470_v43 = vld [vmem:[%s19328_s9 + $0x2a0] ss:$16 sps:$4 sm:$0xff]  }
 0x4e6   : > { %6307 = vmatprep.subr.bf16.mxu1 %v16955_v57  ;;  %v14478_v57 = vld [vmem:[%s19328_s9 + $0x2c4] ss:$16 sps:$4 sm:$0xff]  }
 0x4e9   : > { %6308 = vmatpush1.bf16.msra.mxu1 %v16963_v4  ;;  %v14476_v4 = vld [vmem:[%s19328_s9 + $0x2c0] ss:$16 sps:$4 sm:$0xff]  }
 0x4ea   : > { %6309 = vmatprep.subr.bf16.mxu1 %v16969_v21  ;;  %v14482_v21 = vld [vmem:[%s19328_s9 + $0x2e0] ss:$16 sps:$4 sm:$0xff]  }
 0x4ed   : > { %6310 = vmatpush1.bf16.msra.mxu1 %v16977_v63  ;;  %v14488_v63 = vld [vmem:[%s19328_s9 + $0x300] ss:$16 sps:$4 sm:$0xff]  }
 0x4ee   : > { %7387 = vmatprep.subr.bf16.mxu1 %v14442_v3  ;;  %v14533_v3 = vld [vmem:[%s19328_s9 + $0x8] ss:$16 sps:$4 sm:$0xff]  }
 0x4f0   : > { %6328 = vmatmul.mubr.bf16.vlgmr.msra.gmra.mrb[24].mxu1 %v6294_v10  ;;  %v14571_v10 = vld [vmem:[%s19328_s9 + $0x424] ss:$16 sps:$4 sm:$0xff]  }
 0x4f1   : > { %7388 = vmatpush1.bf16.msra.mxu1 %v14440_v20  ;;  %v14563_v20 = vld [vmem:[%s19328_s9 + $0x400] ss:$16 sps:$4 sm:$0xff]  }
 0x4f2   : > { %7389 = vmatprep.subr.bf16.mxu1 %v14448_v13  ;;  %v14536_v13 = vld [vmem:[%s19328_s9 + $0x28] ss:$16 sps:$4 sm:$0xff]  }
 0x4f5   : > { %7390 = vmatpush1.bf16.msra.mxu1 %v14446_v23  ;;  %v14569_v23 = vld [vmem:[%s19328_s9 + $0x420] ss:$16 sps:$4 sm:$0xff]  }
 0x4f6   : > { %7391 = vmatprep.subr.bf16.mxu1 %v14454_v25  ;;  %v14577_v25 = vld [vmem:[%s19328_s9 + $0x444] ss:$16 sps:$4 sm:$0xff]  }
 0x4f9   : > { %7392 = vmatpush1.bf16.msra.mxu1 %v14452_v35  ;;  %v14544_v35 = vld [vmem:[%s19328_s9 + $0x6c] ss:$16 sps:$4 sm:$0xff]  }
 0x4fa   : > { %7393 = vmatprep.subr.bf16.mxu1 %v14460_v36  ;;  %v14575_v36 = vld [vmem:[%s19328_s9 + $0x440] ss:$16 sps:$4 sm:$0xff]  }
 0x4fd   : > { %7394 = vmatpush1.bf16.msra.mxu1 %v14458_v38  ;;  %v14583_v38 = vld [vmem:[%s19328_s9 + $0x464] ss:$16 sps:$4 sm:$0xff]  }
 0x4fe   : > { %7395 = vmatprep.subr.bf16.mxu1 %v14466_v40  ;;  %v14542_v40 = vld [vmem:[%s19328_s9 + $0x68] ss:$16 sps:$4 sm:$0xff]  }
 0x501   : > { %7396 = vmatpush1.bf16.msra.mxu1 %v14464_v42  ;;  %v14547_v42 = vld [vmem:[%s19328_s9 + $0x8c] ss:$16 sps:$4 sm:$0xff]  }
 0x502   : > { %7397 = vmatprep.subr.bf16.mxu1 %v14472_v31  ;;  %v14581_v31 = vld [vmem:[%s19328_s9 + $0x460] ss:$16 sps:$4 sm:$0xff]  }
 0x505   : > { %7398 = vmatpush1.bf16.msra.mxu1 %v14470_v43  ;;  %v14589_v43 = vld [vmem:[%s19328_s9 + $0x484] ss:$16 sps:$4 sm:$0xff]  }
 0x506   : > { %7399 = vmatprep.subr.bf16.mxu1 %v14478_v57  ;;  %v14545_v57 = vld [vmem:[%s19328_s9 + $0x88] ss:$16 sps:$4 sm:$0xff]  }
 0x509   : > { %7400 = vmatpush1.bf16.msra.mxu1 %v14476_v4  ;;  %v14550_v4 = vld [vmem:[%s19328_s9 + $0xac] ss:$16 sps:$4 sm:$0xff]  }
 0x50a   : > { %7401 = vmatprep.subr.bf16.mxu1 %v14484_v60  ;;  %v14587_v60 = vld [vmem:[%s19328_s9 + $0x480] ss:$16 sps:$4 sm:$0xff]  }
 0x50d   : > { %7402 = vmatpush1.bf16.msra.mxu1 %v14482_v21  ;;  %v14595_v21 = vld [vmem:[%s19328_s9 + $0x4a4] ss:$16 sps:$4 sm:$0xff]  }
 0x50e   : > { %7403 = vmatprep.subr.bf16.mxu1 %v14490_v26  ;;  %v14548_v26 = vld [vmem:[%s19328_s9 + $0xa8] ss:$16 sps:$4 sm:$0xff]  }
 0x511   : > { %7404 = vmatpush1.bf16.msra.mxu1 %v14488_v63  ;;  %v14553_v63 = vld [vmem:[%s19328_s9 + $0xcc] ss:$16 sps:$4 sm:$0xff]  }
 0x512   : > { %7405 = vmatprep.subr.bf16.mxu1 %v14496_v7  ;;  %v14593_v7 = vld [vmem:[%s19328_s9 + $0x4a0] ss:$16 sps:$4 sm:$0xff]  }
 0x515   : > { %7406 = vmatpush1.bf16.msra.mxu1 %v14494_v14  ;;  %v14601_v14 = vld [vmem:[%s19328_s9 + $0x4c4] ss:$16 sps:$4 sm:$0xff]  }
 0x516   : > { %7407 = vmatprep.subr.bf16.mxu1 %v14502_v16  ;;  %v14551_v16 = vld [vmem:[%s19328_s9 + $0xc8] ss:$16 sps:$4 sm:$0xff]  }
 0x519   : > { %7408 = vmatpush1.bf16.msra.mxu1 %v14500_v18  ;;  %v14556_v18 = vld [vmem:[%s19328_s9 + $0xec] ss:$16 sps:$4 sm:$0xff]  }
 0x51a   : > { %7409 = vmatprep.subr.bf16.mxu1 %v14508_v29  ;;  %v14599_v29 = vld [vmem:[%s19328_s9 + $0x4c0] ss:$16 sps:$4 sm:$0xff]  }
 0x51d   : > { %7410 = vmatpush1.bf16.msra.mxu1 %v14506_v33  ;;  %v14607_v33 = vld [vmem:[%s19328_s9 + $0x4e4] ss:$16 sps:$4 sm:$0xff]  }
 0x51e   : > { %7411 = vmatprep.subr.bf16.mxu1 %v14514_v2  ;;  %v14554_v2 = vld [vmem:[%s19328_s9 + $0xe8] ss:$16 sps:$4 sm:$0xff]  }
 0x521   : > { %7412 = vmatpush1.bf16.msra.mxu1 %v14512_v28  ;;  %v14559_v28 = vld [vmem:[%s19328_s9 + $0x10c] ss:$16 sps:$4 sm:$0xff]  }
 0x522   : > { %7413 = vmatprep.subr.bf16.mxu1 %v14520_v12  ;;  %v14605_v12 = vld [vmem:[%s19328_s9 + $0x4e0] ss:$16 sps:$4 sm:$0xff]  }
 0x525   : > { %7414 = vmatpush1.bf16.msra.mxu1 %v14518_v39  ;;  %v14613_v39 = vld [vmem:[%s19328_s9 + $0x504] ss:$16 sps:$4 sm:$0xff]  }
 0x526   : > { %7415 = vmatprep.subr.bf16.mxu1 %v14526_v22  ;;  %v14557_v22 = vld [vmem:[%s19328_s9 + $0x108] ss:$16 sps:$4 sm:$0xff]  }
 0x529   : > { %7416 = vmatpush1.bf16.msra.mxu1 %v14524_v27  ;;  %v14562_v27 = vld [vmem:[%s19328_s9 + $0x12c] ss:$16 sps:$4 sm:$0xff]  }
 0x52a   : > { %7417 = vmatprep.subr.bf16.mxu1 %v14532_v32  ;;  %v14611_v32 = vld [vmem:[%s19328_s9 + $0x500] ss:$16 sps:$4 sm:$0xff]  }
 0x52d   : > { %7418 = vmatpush1.bf16.msra.mxu1 %v14530_v34  ;;  %v14619_v34 = vld [vmem:[%s19328_s9 + $0x524] ss:$16 sps:$4 sm:$0xff]  }
 0x52e   : > { %7834 = vmatprep.subr.bf16.mxu1 %v14565_v50  ;;  %v14560_v50 = vld [vmem:[%s19328_s9 + $0x128] ss:$16 sps:$4 sm:$0xff]  }
 0x561   : > { %v6142_v46 = vpop.f32.mrb[76].mxu0 }
 0x562   : > { %v13844_v52 = vadd.f32 %v6142_v46, %v17226_v41  ;;  %v6144_v45 = vpop.f32.mrb[77].mxu0  ;;  %v14617_v46 = vld [vmem:[%s19328_s9 + $0x520] ss:$16 sps:$4 sm:$0xff]  }
 0x563   : > { %v13845_v47 = vadd.f32 %v6144_v45, %v17229_v1  ;;  %v6146_v54 = vpop.f32.mrb[78].mxu0  ;;  %v14566_v45 = vld [vmem:[%s19328_s9 + $0x148] ss:$16 sps:$4 sm:$0xff]  }
 0x564   : > { %v6151_v49 = vmax.f32 %v13844_v52, 0.0  ;;  %v6147_v19 = vpop.f32.mrb[79].mxu0  ;;  %v14625_v52 = vld [vmem:[%s19328_s9 + $0x544] ss:$16 sps:$4 sm:$0xff]   ;;  %v14623_v54 = vld [vmem:[%s19328_s9 + $0x540] ss:$16 sps:$4 sm:$0xff]  }
 0x565   : > { %v6152_v53 = vmax.f32 %v13845_v47, 0.0  ;;  %v14574_v47 = vld [vmem:[%s19328_s9 + $0x16c] ss:$16 sps:$4 sm:$0xff]   ;;  %v14572_v19 = vld [vmem:[%s19328_s9 + $0x168] ss:$16 sps:$4 sm:$0xff]  }
 0x567   : > { %v6155_v55 = vcombine.low %v6151_v49, %v6152_v53  ;;  %v14631_v49 = vld [vmem:[%s19328_s9 + $0x564] ss:$16 sps:$4 sm:$0xff]   ;;  %v14580_v53 = vld [vmem:[%s19328_s9 + $0x18c] ss:$16 sps:$4 sm:$0xff]  }
 0x569   : > { %6157 = vst [vmem:[#allocation5] sm:$0x33] %v6155_v55  ;;  %v14629_v55 = vld [vmem:[%s19328_s9 + $0x560] ss:$16 sps:$4 sm:$0xff]  }
 0x570   : > { %v6606_v56 = vld [vmem:[#allocation5] ss:$4 sm:$0x3]  ;;  %v7053_v44 = vld [vmem:[#allocation5 + $0x1] ss:$4 sm:$0x3] }
 0x571   : > { %v6611_v9 = vrot.slane %v6606_v56, %v17217_v24  ;;  %v6615_v15 = vrot.slane %v6606_v56, %v17223_v59  ;;  %v7058_v58 = vrot.slane %v7053_v44, %v17217_v24  ;;  %v7062_v48 = vrot.slane %v7053_v44, %v17223_v59  ;;  %v14637_v56 = vld [vmem:[%s19328_s9 + $0x584] ss:$16 sps:$4 sm:$0xff]   ;;  %v14578_v44 = vld [vmem:[%s19328_s9 + $0x188] ss:$16 sps:$4 sm:$0xff]  }
 0x573   : > { %v17237_v61 = vpack.c.bf16 %v6611_v9, %v6611_v9  ;;  %v6619_v62 = vpack.c.bf16 %v6615_v15, %v6615_v15  ;;  %v17242_v17 = vpack.c.bf16 %v7058_v58, %v7058_v58  ;;  %v17244_v5 = vpack.c.bf16 %v7062_v48, %v7062_v48  ;;  %v14586_v9 = vld [vmem:[%s19328_s9 + $0x1ac] ss:$16 sps:$4 sm:$0xff]   ;;  %v14635_v15 = vld [vmem:[%s19328_s9 + $0x580] ss:$16 sps:$4 sm:$0xff]   ;;  %v14643_v58 = vld [vmem:[%s19328_s9 + $0x5a4] ss:$16 sps:$4 sm:$0xff]  }
 0x574   : > { %v14584_v48 = vld [vmem:[%s19328_s9 + $0x1a8] ss:$16 sps:$4 sm:$0xff]  }
 0x575   : > { %6972 = vmatprep.mubr.bf16.mxu0 %v6619_v62  ;;  %7419 = vmatprep.mubr.bf16.mxu1 %v17244_v5 }
 0x576   : > { %6973 = vmatmul.mubr.bf16.vlgmr.msra.gmra.mrb[80].mxu0 %v17237_v61  ;;  %7420 = vmatmul.mubr.bf16.vlgmr.msra.gmra.mrb[28].mxu1 %v17242_v17 }
 0x577   : > { %6982 = vmatpush1.bf16.msra.mxu0 %v14533_v3  ;;  %7013 = vmatprep.mubr.bf16.mxu0 %v6619_v62  ;;  %v14592_v62 = vld [vmem:[%s19328_s9 + $0x1cc] ss:$16 sps:$4 sm:$0xff]   ;;  %v14641_v3 = vld [vmem:[%s19328_s9 + $0x5a0] ss:$16 sps:$4 sm:$0xff]  }
 0x578   : > { %6983 = vmatprep.subr.bf16.mxu0 %v14538_v8  ;;  %7835 = vmatpush1.bf16.msra.mxu1 %v14563_v20  ;;  %v14649_v8 = vld [vmem:[%s19328_s9 + $0x5c4] ss:$16 sps:$4 sm:$0xff]   ;;  %v14590_v20 = vld [vmem:[%s19328_s9 + $0x1c8] ss:$16 sps:$4 sm:$0xff]  }
 0x579   : > { %7836 = vmatprep.subr.bf16.mxu1 %v14571_v10  ;;  %v14598_v10 = vld [vmem:[%s19328_s9 + $0x1ec] ss:$16 sps:$4 sm:$0xff]  }
 0x57b   : > { %6984 = vmatpush1.bf16.msra.mxu0 %v14536_v13  ;;  %v14647_v13 = vld [vmem:[%s19328_s9 + $0x5c0] ss:$16 sps:$4 sm:$0xff]  }
 0x57c   : > { %6985 = vmatprep.subr.bf16.mxu0 %v14541_v37  ;;  %7837 = vmatpush1.bf16.msra.mxu1 %v14569_v23  ;;  %v14655_v37 = vld [vmem:[%s19328_s9 + $0x5e4] ss:$16 sps:$4 sm:$0xff]   ;;  %v14596_v23 = vld [vmem:[%s19328_s9 + $0x1e8] ss:$16 sps:$4 sm:$0xff]  }
 0x57d   : > { %7838 = vmatprep.subr.bf16.mxu1 %v14577_v25  ;;  %v14604_v25 = vld [vmem:[%s19328_s9 + $0x20c] ss:$16 sps:$4 sm:$0xff]  }
 0x57f   : > { %6986 = vmatpush1.bf16.msra.mxu0 %v14539_v30  ;;  %v14653_v30 = vld [vmem:[%s19328_s9 + $0x5e0] ss:$16 sps:$4 sm:$0xff]  }
 0x580   : > { %6987 = vmatprep.subr.bf16.mxu0 %v14544_v35  ;;  %7839 = vmatpush1.bf16.msra.mxu1 %v14575_v36  ;;  %v14661_v35 = vld [vmem:[%s19328_s9 + $0x604] ss:$16 sps:$4 sm:$0xff]   ;;  %v14602_v36 = vld [vmem:[%s19328_s9 + $0x208] ss:$16 sps:$4 sm:$0xff]  }
 0x581   : > { %7840 = vmatprep.subr.bf16.mxu1 %v14583_v38  ;;  %v14610_v38 = vld [vmem:[%s19328_s9 + $0x22c] ss:$16 sps:$4 sm:$0xff]  }
 0x583   : > { %6988 = vmatpush1.bf16.msra.mxu0 %v14542_v40  ;;  %v14608_v40 = vld [vmem:[%s19328_s9 + $0x228] ss:$16 sps:$4 sm:$0xff]  }
 0x584   : > { %6989 = vmatprep.subr.bf16.mxu0 %v14547_v42  ;;  %7841 = vmatpush1.bf16.msra.mxu1 %v14581_v31  ;;  %v14616_v42 = vld [vmem:[%s19328_s9 + $0x24c] ss:$16 sps:$4 sm:$0xff]   ;;  %v14614_v31 = vld [vmem:[%s19328_s9 + $0x248] ss:$16 sps:$4 sm:$0xff]  }
 0x585   : > { %7842 = vmatprep.subr.bf16.mxu1 %v14589_v43  ;;  %v14628_v43 = vld [vmem:[%s19328_s9 + $0x28c] ss:$16 sps:$4 sm:$0xff]  }
 0x587   : > { %6990 = vmatpush1.bf16.msra.mxu0 %v14545_v57 }
 0x588   : > { %6991 = vmatprep.subr.bf16.mxu0 %v14550_v4  ;;  %7843 = vmatpush1.bf16.msra.mxu1 %v14587_v60  ;;  %v14626_v4 = vld [vmem:[%s19328_s9 + $0x288] ss:$16 sps:$4 sm:$0xff]  }
 0x589   : > { %7844 = vmatprep.subr.bf16.mxu1 %v14595_v21 }
 0x58b   : > { %6992 = vmatpush1.bf16.msra.mxu0 %v14548_v26  ;;  %v14634_v26 = vld [vmem:[%s19328_s9 + $0x2ac] ss:$16 sps:$4 sm:$0xff]  }
 0x58c   : > { %6993 = vmatprep.subr.bf16.mxu0 %v14553_v63  ;;  %7845 = vmatpush1.bf16.msra.mxu1 %v14593_v7 }
 0x58d   : > { %7846 = vmatprep.subr.bf16.mxu1 %v14601_v14 }
 0x58f   : > { %6994 = vmatpush1.bf16.msra.mxu0 %v14551_v16 }
 0x590   : > { %6995 = vmatprep.subr.bf16.mxu0 %v14556_v18  ;;  %7847 = vmatpush1.bf16.msra.mxu1 %v14599_v29  ;;  %v14632_v29 = vld [vmem:[%s19328_s9 + $0x2a8] ss:$16 sps:$4 sm:$0xff]  }
 0x591   : > { %7848 = vmatprep.subr.bf16.mxu1 %v14607_v33 }
 0x593   : > { %6996 = vmatpush1.bf16.msra.mxu0 %v14554_v2 }
 0x594   : > { %6997 = vmatprep.subr.bf16.mxu0 %v14559_v28  ;;  %7849 = vmatpush1.bf16.msra.mxu1 %v14605_v12  ;;  %v14646_v28 = vld [vmem:[%s19328_s9 + $0x2ec] ss:$16 sps:$4 sm:$0xff]   ;;  %v14644_v12 = vld [vmem:[%s19328_s9 + $0x2e8] ss:$16 sps:$4 sm:$0xff]  }
 0x595   : > { %7850 = vmatprep.subr.bf16.mxu1 %v14613_v39  ;;  %v14652_v39 = vld [vmem:[%s19328_s9 + $0x30c] ss:$16 sps:$4 sm:$0xff]  }
 0x597   : > { %6998 = vmatpush1.bf16.msra.mxu0 %v14557_v22  ;;  %v14650_v22 = vld [vmem:[%s19328_s9 + $0x308] ss:$16 sps:$4 sm:$0xff]  }
 0x598   : > { %6999 = vmatprep.subr.bf16.mxu0 %v14562_v27  ;;  %7851 = vmatpush1.bf16.msra.mxu1 %v14611_v32  ;;  %v14658_v27 = vld [vmem:[%s19328_s9 + $0x32c] ss:$16 sps:$4 sm:$0xff]  }
 0x599   : > { %7852 = vmatprep.subr.bf16.mxu1 %v14619_v34 }
 0x59b   : > { %7000 = vmatpush1.bf16.msra.mxu0 %v14560_v50 }
 0x59c   : > { %7001 = vmatprep.subr.bf16.mxu0 %v14568_v51  ;;  %7853 = vmatpush1.bf16.msra.mxu1 %v14617_v46 }
 0x59d   : > { %7854 = vmatprep.subr.bf16.mxu1 %v14625_v52  ;;  %v14656_v52 = vld [vmem:[%s19328_s9 + $0x328] ss:$16 sps:$4 sm:$0xff]  }
 0x59f   : > { %7002 = vmatpush1.bf16.msra.mxu0 %v14566_v45 }
 0x5a0   : > { %7003 = vmatprep.subr.bf16.mxu0 %v14574_v47  ;;  %7855 = vmatpush1.bf16.msra.mxu1 %v14623_v54  ;;  %v14659_v54 = vld [vmem:[%s19328_s9 + $0x600] ss:$16 sps:$4 sm:$0xff]  }
 0x5a1   : > { %7856 = vmatprep.subr.bf16.mxu1 %v14631_v49  ;;  %v14664_v49 = vld [vmem:[%s19328_s9 + $0x34c] ss:$16 sps:$4 sm:$0xff]  }
 0x5a3   : > { %7004 = vmatpush1.bf16.msra.mxu0 %v14572_v19  ;;  %v14667_v19 = vld [vmem:[%s19328_s9 + $0x624] ss:$16 sps:$4 sm:$0xff]  }
 0x5a4   : > { %7005 = vmatprep.subr.bf16.mxu0 %v14580_v53  ;;  %7857 = vmatpush1.bf16.msra.mxu1 %v14629_v55  ;;  %v14662_v55 = vld [vmem:[%s19328_s9 + $0x348] ss:$16 sps:$4 sm:$0xff]  }
 0x5a5   : > { %7858 = vmatprep.subr.bf16.mxu1 %v14637_v56  ;;  %v14665_v56 = vld [vmem:[%s19328_s9 + $0x620] ss:$16 sps:$4 sm:$0xff]  }
 0x5a7   : > { %7006 = vmatpush1.bf16.msra.mxu0 %v14578_v44  ;;  %v14670_v44 = vld [vmem:[%s19328_s9 + $0x36c] ss:$16 sps:$4 sm:$0xff]  }
 0x5a8   : > { %7007 = vmatprep.subr.bf16.mxu0 %v14586_v9  ;;  %7859 = vmatpush1.bf16.msra.mxu1 %v14635_v15  ;;  %v14673_v9 = vld [vmem:[%s19328_s9 + $0x644] ss:$16 sps:$4 sm:$0xff]   ;;  %v14668_v15 = vld [vmem:[%s19328_s9 + $0x368] ss:$16 sps:$4 sm:$0xff]  }
 0x5a9   : > { %7860 = vmatprep.subr.bf16.mxu1 %v14643_v58  ;;  %v14671_v58 = vld [vmem:[%s19328_s9 + $0x640] ss:$16 sps:$4 sm:$0xff]  }
 0x5ab   : > { %7008 = vmatpush1.bf16.msra.mxu0 %v14584_v48  ;;  %v14676_v48 = vld [vmem:[%s19328_s9 + $0x38c] ss:$16 sps:$4 sm:$0xff]  }
 0x5ac   : > { %7009 = vmatprep.subr.bf16.mxu0 %v14592_v62  ;;  %7861 = vmatpush1.bf16.msra.mxu1 %v14641_v3  ;;  %v14679_v62 = vld [vmem:[%s19328_s9 + $0x664] ss:$16 sps:$4 sm:$0xff]   ;;  %v14674_v3 = vld [vmem:[%s19328_s9 + $0x388] ss:$16 sps:$4 sm:$0xff]  }
 0x5ad   : > { %7862 = vmatprep.subr.bf16.mxu1 %v14649_v8  ;;  %v14677_v8 = vld [vmem:[%s19328_s9 + $0x660] ss:$16 sps:$4 sm:$0xff]  }
 0x5af   : > { %7010 = vmatpush1.bf16.msra.mxu0 %v14590_v20  ;;  %v14682_v20 = vld [vmem:[%s19328_s9 + $0x3ac] ss:$16 sps:$4 sm:$0xff]  }
 0x5b0   : > { %7011 = vmatprep.subr.bf16.mxu0 %v14598_v10  ;;  %7863 = vmatpush1.bf16.msra.mxu1 %v14647_v13  ;;  %v14685_v10 = vld [vmem:[%s19328_s9 + $0x684] ss:$16 sps:$4 sm:$0xff]   ;;  %v14680_v13 = vld [vmem:[%s19328_s9 + $0x3a8] ss:$16 sps:$4 sm:$0xff]  }
 0x5b1   : > { %7864 = vmatprep.subr.bf16.mxu1 %v14655_v37  ;;  %v14683_v37 = vld [vmem:[%s19328_s9 + $0x680] ss:$16 sps:$4 sm:$0xff]  }
 0x5b3   : > { %7012 = vmatpush1.bf16.msra.mxu0 %v14596_v23  ;;  %v14688_v23 = vld [vmem:[%s19328_s9 + $0x3cc] ss:$16 sps:$4 sm:$0xff]  }
 0x5b4   : > { %7428 = vmatprep.subr.bf16.mxu0 %v14604_v25  ;;  %7865 = vmatpush1.bf16.msra.mxu1 %v14653_v30  ;;  %v14691_v25 = vld [vmem:[%s19328_s9 + $0x6a4] ss:$16 sps:$4 sm:$0xff]   ;;  %v14686_v30 = vld [vmem:[%s19328_s9 + $0x3c8] ss:$16 sps:$4 sm:$0xff]  }
 0x5b5   : > { %8281 = vmatprep.subr.bf16.mxu1 %v14661_v35  ;;  %v14689_v35 = vld [vmem:[%s19328_s9 + $0x6a0] ss:$16 sps:$4 sm:$0xff]  }
 0x5b6   : > { %7014 = vmatmul.mubr.bf16.vlgmr.msra.gmra.mrb[84].mxu0 %v17237_v61  ;;  %v14622_v61 = vld [vmem:[%s19328_s9 + $0x26c] ss:$16 sps:$4 sm:$0xff]  }
 0x5b7   : > { %7429 = vmatpush1.bf16.msra.mxu0 %v14602_v36  ;;  %7460 = vmatprep.mubr.bf16.mxu0 %v17244_v5  ;;  %v14620_v5 = vld [vmem:[%s19328_s9 + $0x268] ss:$16 sps:$4 sm:$0xff]   ;;  %v14694_v36 = vld [vmem:[%s19328_s9 + $0x3ec] ss:$16 sps:$4 sm:$0xff]  }
 0x5b8   : > { %7430 = vmatprep.subr.bf16.mxu0 %v14610_v38  ;;  %v14697_v38 = vld [vmem:[%s19328_s9 + $0x6c4] ss:$16 sps:$4 sm:$0xff]  }
 0x5bb   : > { %7431 = vmatpush1.bf16.msra.mxu0 %v14608_v40  ;;  %v14692_v40 = vld [vmem:[%s19328_s9 + $0x3e8] ss:$16 sps:$4 sm:$0xff]  }
 0x5bc   : > { %7432 = vmatprep.subr.bf16.mxu0 %v14616_v42  ;;  %v14695_v42 = vld [vmem:[%s19328_s9 + $0x6c0] ss:$16 sps:$4 sm:$0xff]  }
 0x5bf   : > { %7433 = vmatpush1.bf16.msra.mxu0 %v14614_v31  ;;  %v14700_v31 = vld [vmem:[%s19328_s9 + $0x40c] ss:$16 sps:$4 sm:$0xff]  }
 0x5c0   : > { %7434 = vmatprep.subr.bf16.mxu0 %v14622_v61  ;;  %v14703_v61 = vld [vmem:[%s19328_s9 + $0x6e4] ss:$16 sps:$4 sm:$0xff]  }
 0x5c3   : > { %7435 = vmatpush1.bf16.msra.mxu0 %v14620_v5  ;;  %v6329_v57 = vpop.f32.mrb[24].mxu1  ;;  %v14698_v5 = vld [vmem:[%s19328_s9 + $0x408] ss:$16 sps:$4 sm:$0xff]  }
 0x5c4   : > { %v13846_v60 = vadd.f32 %v6329_v57, %v17226_v41  ;;  %v6331_v21 = vpop.f32.mrb[25].mxu1  ;;  %7436 = vmatprep.subr.bf16.mxu0 %v14628_v43  ;;  %v14640_v41 = vld [vmem:[%s19328_s9 + $0x2cc] ss:$16 sps:$4 sm:$0xff]   ;;  %v14701_v43 = vld [vmem:[%s19328_s9 + $0x6e0] ss:$16 sps:$4 sm:$0xff]  }
 0x5c5   : > { %v13847_v63 = vadd.f32 %v6331_v21, %v17229_v1  ;;  %v6333_v7 = vpop.f32.mrb[26].mxu1  ;;  %v14638_v1 = vld [vmem:[%s19328_s9 + $0x2c8] ss:$16 sps:$4 sm:$0xff]   ;;  %v14706_v57 = vld [vmem:[%s19328_s9 + $0x42c] ss:$16 sps:$4 sm:$0xff]  }
 0x5c6   : > { %v6338_v14 = vmax.f32 %v13846_v60, 0.0  ;;  %v6334_v16 = vpop.f32.mrb[27].mxu1  ;;  %v14704_v60 = vld [vmem:[%s19328_s9 + $0x428] ss:$16 sps:$4 sm:$0xff]   ;;  %v14707_v21 = vld [vmem:[%s19328_s9 + $0x700] ss:$16 sps:$4 sm:$0xff]  }
 0x5c7   : > { %v6339_v18 = vmax.f32 %v13847_v63, 0.0  ;;  %7437 = vmatpush1.bf16.msra.mxu0 %v14626_v4  ;;  %v14709_v4 = vld [vmem:[%s19328_s9 + $0x704] ss:$16 sps:$4 sm:$0xff]   ;;  %v14710_v63 = vld [vmem:[%s19328_s9 + $0x448] ss:$16 sps:$4 sm:$0xff]  }
 0x5c8   : > { %7438 = vmatprep.subr.bf16.mxu0 %v14634_v26  ;;  %v14712_v26 = vld [vmem:[%s19328_s9 + $0x44c] ss:$16 sps:$4 sm:$0xff]   ;;  %v14713_v7 = vld [vmem:[%s19328_s9 + $0x720] ss:$16 sps:$4 sm:$0xff]   ;;  %v14721_v16 = vld [vmem:[%s19328_s9 + $0x744] ss:$16 sps:$4 sm:$0xff]  }
 0x5c9   : > { %v6342_v33 = vcombine.low %v6338_v14, %v6339_v18  ;;  %v14718_v14 = vld [vmem:[%s19328_s9 + $0x46c] ss:$16 sps:$4 sm:$0xff]   ;;  %v14716_v18 = vld [vmem:[%s19328_s9 + $0x468] ss:$16 sps:$4 sm:$0xff]  }
 0x5cb   : > { %v6343_v2 = vrot.slane %v6342_v33, 6  ;;  %7439 = vmatpush1.bf16.msra.mxu0 %v14632_v29  ;;  %v14719_v29 = vld [vmem:[%s19328_s9 + $0x740] ss:$16 sps:$4 sm:$0xff]   ;;  %v14727_v33 = vld [vmem:[%s19328_s9 + $0x764] ss:$16 sps:$4 sm:$0xff]  }
 0x5cc   : > { %7440 = vmatprep.subr.bf16.mxu0 %v14640_v41  ;;  %v14724_v41 = vld [vmem:[%s19328_s9 + $0x48c] ss:$16 sps:$4 sm:$0xff]  }
 0x5cd   : > { %6345 = vst [vmem:[#allocation5] sm:$0xcc] %v6343_v2  ;;  %v14722_v2 = vld [vmem:[%s19328_s9 + $0x488] ss:$16 sps:$4 sm:$0xff]  }
 0x5cf   : > { %7441 = vmatpush1.bf16.msra.mxu0 %v14638_v1  ;;  %v14725_v1 = vld [vmem:[%s19328_s9 + $0x760] ss:$16 sps:$4 sm:$0xff]  }
 0x5d0   : > { %7442 = vmatprep.subr.bf16.mxu0 %v14646_v28  ;;  %v14730_v28 = vld [vmem:[%s19328_s9 + $0x4ac] ss:$16 sps:$4 sm:$0xff]  }
 0x5d3   : > { %7443 = vmatpush1.bf16.msra.mxu0 %v14644_v12  ;;  %v14733_v12 = vld [vmem:[%s19328_s9 + $0x784] ss:$16 sps:$4 sm:$0xff]  }
 0x5d4   : > { %7444 = vmatprep.subr.bf16.mxu0 %v14652_v39  ;;  %v7500_v32 = vld [vmem:[#allocation5 + $0x2] ss:$4 sm:$0x3]  ;;  %v17496_v34 = vld [vmem:[#allocation5 + $0x3] ss:$4 sm:$0x3] }
 0x5d5   : > { %v7505_v50 = vrot.slane %v7500_v32, %v17217_v24  ;;  %v7509_v51 = vrot.slane %v7500_v32, %v17223_v59  ;;  %v7956_v46 = vrot.slane %v17496_v34, %v17223_v59  ;;  %v14728_v39 = vld [vmem:[%s19328_s9 + $0x4a8] ss:$16 sps:$4 sm:$0xff]   ;;  %v14739_v32 = vld [vmem:[%s19328_s9 + $0x7a4] ss:$16 sps:$4 sm:$0xff]  }
 0x5d7   : > { %7445 = vmatpush1.bf16.msra.mxu0 %v14650_v22  ;;  %v17505_v45 = vpack.c.bf16 %v7505_v50, %v7505_v50  ;;  %v17507_v47 = vpack.c.bf16 %v7509_v51, %v7509_v51  ;;  %v17520_v53 = vpack.c.bf16 %v7956_v46, %v7956_v46  ;;  %v14731_v22 = vld [vmem:[%s19328_s9 + $0x780] ss:$16 sps:$4 sm:$0xff]   ;;  %v14734_v50 = vld [vmem:[%s19328_s9 + $0x4c8] ss:$16 sps:$4 sm:$0xff]   ;;  %v14742_v46 = vld [vmem:[%s19328_s9 + $0x4ec] ss:$16 sps:$4 sm:$0xff]  }
 0x5d8   : > { %7446 = vmatprep.subr.bf16.mxu0 %v14658_v27  ;;  %v14736_v27 = vld [vmem:[%s19328_s9 + $0x4cc] ss:$16 sps:$4 sm:$0xff]   ;;  %v14737_v51 = vld [vmem:[%s19328_s9 + $0x7a0] ss:$16 sps:$4 sm:$0xff]  }
 0x5d9   : > { %7866 = vmatprep.mubr.bf16.mxu1 %v17507_v47 }
 0x5da   : > { %7867 = vmatmul.mubr.bf16.vlgmr.msra.gmra.mrb[32].mxu1 %v17505_v45 }
 0x5db   : > { %7447 = vmatpush1.bf16.msra.mxu0 %v14656_v52  ;;  %8282 = vmatpush1.bf16.msra.mxu1 %v14659_v54  ;;  %v14745_v52 = vld [vmem:[%s19328_s9 + $0x7c4] ss:$16 sps:$4 sm:$0xff]   ;;  %v14743_v54 = vld [vmem:[%s19328_s9 + $0x7c0] ss:$16 sps:$4 sm:$0xff]  }
 0x5dc   : > { %8313 = vmatprep.mubr.bf16.mxu1 %v17520_v53  ;;  %7448 = vmatprep.subr.bf16.mxu0 %v14664_v49  ;;  %v14748_v49 = vld [vmem:[%s19328_s9 + $0x50c] ss:$16 sps:$4 sm:$0xff]  }
 0x5dd   : > { %8283 = vmatprep.subr.bf16.mxu1 %v14667_v19  ;;  %v14751_v19 = vld [vmem:[%s19328_s9 + $0x7e4] ss:$16 sps:$4 sm:$0xff]  }
 0x5df   : > { %7449 = vmatpush1.bf16.msra.mxu0 %v14662_v55  ;;  %8284 = vmatpush1.bf16.msra.mxu1 %v14665_v56  ;;  %v14746_v55 = vld [vmem:[%s19328_s9 + $0x508] ss:$16 sps:$4 sm:$0xff]   ;;  %v14749_v56 = vld [vmem:[%s19328_s9 + $0x7e0] ss:$16 sps:$4 sm:$0xff]  }
 0x5e0   : > { %7450 = vmatprep.subr.bf16.mxu0 %v14670_v44  ;;  %8285 = vmatprep.subr.bf16.mxu1 %v14673_v9  ;;  %v14754_v44 = vld [vmem:[%s19328_s9 + $0x52c] ss:$16 sps:$4 sm:$0xff]   ;;  %v7952_v9 = vrot.slane %v17496_v34, %v17217_v24  ;;  %v14755_v34 = vld [vmem:[%s19328_s9 + $0x548] ss:$16 sps:$4 sm:$0xff]  }
 0x5e3   : > { %7451 = vmatpush1.bf16.msra.mxu0 %v14668_v15  ;;  %8286 = vmatpush1.bf16.msra.mxu1 %v14671_v58  ;;  %v14752_v15 = vld [vmem:[%s19328_s9 + $0x528] ss:$16 sps:$4 sm:$0xff]   ;;  %v14757_v58 = vld [vmem:[%s19328_s9 + $0x54c] ss:$16 sps:$4 sm:$0xff]  }
 0x5e4   : > { %7452 = vmatprep.subr.bf16.mxu0 %v14676_v48  ;;  %8287 = vmatprep.subr.bf16.mxu1 %v14679_v62  ;;  %v17710_v48 = vpack.c.bf16 %v7952_v9, %v7952_v9  ;;  %v14760_v62 = vld [vmem:[%s19328_s9 + $0x56c] ss:$16 sps:$4 sm:$0xff]  }
 0x5e7   : > { %7453 = vmatpush1.bf16.msra.mxu0 %v14674_v3  ;;  %8288 = vmatpush1.bf16.msra.mxu1 %v14677_v8  ;;  %v14758_v3 = vld [vmem:[%s19328_s9 + $0x568] ss:$16 sps:$4 sm:$0xff]   ;;  %v14763_v8 = vld [vmem:[%s19328_s9 + $0x58c] ss:$16 sps:$4 sm:$0xff]  }
 0x5e8   : > { %7454 = vmatprep.subr.bf16.mxu0 %v14682_v20  ;;  %8289 = vmatprep.subr.bf16.mxu1 %v14685_v10  ;;  %v14761_v20 = vld [vmem:[%s19328_s9 + $0x588] ss:$16 sps:$4 sm:$0xff]   ;;  %v14766_v10 = vld [vmem:[%s19328_s9 + $0x5ac] ss:$16 sps:$4 sm:$0xff]  }
 0x5eb   : > { %7455 = vmatpush1.bf16.msra.mxu0 %v14680_v13  ;;  %8290 = vmatpush1.bf16.msra.mxu1 %v14683_v37  ;;  %v14764_v13 = vld [vmem:[%s19328_s9 + $0x5a8] ss:$16 sps:$4 sm:$0xff]   ;;  %v14769_v37 = vld [vmem:[%s19328_s9 + $0x5cc] ss:$16 sps:$4 sm:$0xff]  }
 0x5ec   : > { %7456 = vmatprep.subr.bf16.mxu0 %v14688_v23  ;;  %8291 = vmatprep.subr.bf16.mxu1 %v14691_v25  ;;  %v14767_v23 = vld [vmem:[%s19328_s9 + $0x5c8] ss:$16 sps:$4 sm:$0xff]   ;;  %v14772_v25 = vld [vmem:[%s19328_s9 + $0x5ec] ss:$16 sps:$4 sm:$0xff]  }
 0x5ef   : > { %7457 = vmatpush1.bf16.msra.mxu0 %v14686_v30  ;;  %8292 = vmatpush1.bf16.msra.mxu1 %v14689_v35  ;;  %v14770_v30 = vld [vmem:[%s19328_s9 + $0x5e8] ss:$16 sps:$4 sm:$0xff]   ;;  %v14775_v35 = vld [vmem:[%s19328_s9 + $0x60c] ss:$16 sps:$4 sm:$0xff]  }
 0x5f0   : > { %7458 = vmatprep.subr.bf16.mxu0 %v14694_v36  ;;  %8293 = vmatprep.subr.bf16.mxu1 %v14697_v38  ;;  %v14773_v36 = vld [vmem:[%s19328_s9 + $0x608] ss:$16 sps:$4 sm:$0xff]   ;;  %v14778_v38 = vld [vmem:[%s19328_s9 + $0x62c] ss:$16 sps:$4 sm:$0xff]  }
 0x5f3   : > { %7459 = vmatpush1.bf16.msra.mxu0 %v14692_v40  ;;  %8294 = vmatpush1.bf16.msra.mxu1 %v14695_v42  ;;  %v14776_v40 = vld [vmem:[%s19328_s9 + $0x628] ss:$16 sps:$4 sm:$0xff]   ;;  %v14781_v42 = vld [vmem:[%s19328_s9 + $0x64c] ss:$16 sps:$4 sm:$0xff]  }
 0x5f4   : > { %7875 = vmatprep.subr.bf16.mxu0 %v14700_v31  ;;  %8295 = vmatprep.subr.bf16.mxu1 %v14703_v61  ;;  %v14779_v31 = vld [vmem:[%s19328_s9 + $0x648] ss:$16 sps:$4 sm:$0xff]   ;;  %v14787_v61 = vld [vmem:[%s19328_s9 + $0x68c] ss:$16 sps:$4 sm:$0xff]  }
 0x5f6   : > { %7461 = vmatmul.mubr.bf16.vlgmr.msra.gmra.mrb[88].mxu0 %v17242_v17  ;;  %v14715_v17 = vld [vmem:[%s19328_s9 + $0x724] ss:$16 sps:$4 sm:$0xff]  }
 0x5f7   : > { %7876 = vmatpush1.bf16.msra.mxu0 %v14698_v5  ;;  %7907 = vmatprep.mubr.bf16.mxu0 %v17507_v47  ;;  %v14740_v47 = vld [vmem:[%s19328_s9 + $0x4e8] ss:$16 sps:$4 sm:$0xff]  }
 0x5f8   : > { %8296 = vmatpush1.bf16.msra.mxu1 %v14701_v43  ;;  %7877 = vmatprep.subr.bf16.mxu0 %v14706_v57  ;;  %v14785_v5 = vld [vmem:[%s19328_s9 + $0x688] ss:$16 sps:$4 sm:$0xff]   ;;  %v14790_v43 = vld [vmem:[%s19328_s9 + $0x6ac] ss:$16 sps:$4 sm:$0xff]  }
 0x5f9   : > { %8297 = vmatprep.subr.bf16.mxu1 %v14709_v4  ;;  %v14788_v57 = vld [vmem:[%s19328_s9 + $0x6a8] ss:$16 sps:$4 sm:$0xff]   ;;  %v14793_v4 = vld [vmem:[%s19328_s9 + $0x6cc] ss:$16 sps:$4 sm:$0xff]  }
 0x5fb   : > { %7878 = vmatpush1.bf16.msra.mxu0 %v14704_v60 }
 0x5fc   : > { %8298 = vmatpush1.bf16.msra.mxu1 %v14707_v21  ;;  %7879 = vmatprep.subr.bf16.mxu0 %v14712_v26 }
 0x5fd   : > { %8299 = vmatprep.subr.bf16.mxu1 %v14715_v17 }
 0x5ff   : > { %7880 = vmatpush1.bf16.msra.mxu0 %v14710_v63 }
 0x600   : > { %8300 = vmatpush1.bf16.msra.mxu1 %v14713_v7  ;;  %7881 = vmatprep.subr.bf16.mxu0 %v14718_v14 }
 0x601   : > { %8301 = vmatprep.subr.bf16.mxu1 %v14721_v16 }
 0x603   : > { %7882 = vmatpush1.bf16.msra.mxu0 %v14716_v18  ;;  %v14791_v18 = vld [vmem:[%s19328_s9 + $0x6c8] ss:$16 sps:$4 sm:$0xff]  }
 0x604   : > { %8302 = vmatpush1.bf16.msra.mxu1 %v14719_v29  ;;  %7883 = vmatprep.subr.bf16.mxu0 %v14724_v41 }
 0x605   : > { %8303 = vmatprep.subr.bf16.mxu1 %v14727_v33  ;;  %v14796_v33 = vld [vmem:[%s19328_s9 + $0x6ec] ss:$16 sps:$4 sm:$0xff]  }
 0x607   : > { %7884 = vmatpush1.bf16.msra.mxu0 %v14722_v2  ;;  %v14794_v2 = vld [vmem:[%s19328_s9 + $0x6e8] ss:$16 sps:$4 sm:$0xff]  }
 0x608   : > { %8304 = vmatpush1.bf16.msra.mxu1 %v14725_v1  ;;  %7885 = vmatprep.subr.bf16.mxu0 %v14730_v28  ;;  %v14799_v1 = vld [vmem:[%s19328_s9 + $0x70c] ss:$16 sps:$4 sm:$0xff]   ;;  %v14797_v28 = vld [vmem:[%s19328_s9 + $0x708] ss:$16 sps:$4 sm:$0xff]  }
 0x609   : > { %8305 = vmatprep.subr.bf16.mxu1 %v14733_v12  ;;  %v14802_v12 = vld [vmem:[%s19328_s9 + $0x72c] ss:$16 sps:$4 sm:$0xff]  }
 0x60b   : > { %7886 = vmatpush1.bf16.msra.mxu0 %v14728_v39  ;;  %v14800_v39 = vld [vmem:[%s19328_s9 + $0x728] ss:$16 sps:$4 sm:$0xff]  }
 0x60c   : > { %8306 = vmatpush1.bf16.msra.mxu1 %v14731_v22  ;;  %7887 = vmatprep.subr.bf16.mxu0 %v14736_v27  ;;  %v14805_v22 = vld [vmem:[%s19328_s9 + $0x74c] ss:$16 sps:$4 sm:$0xff]   ;;  %v14803_v27 = vld [vmem:[%s19328_s9 + $0x748] ss:$16 sps:$4 sm:$0xff]  }
 0x60d   : > { %8307 = vmatprep.subr.bf16.mxu1 %v14739_v32  ;;  %v14808_v32 = vld [vmem:[%s19328_s9 + $0x76c] ss:$16 sps:$4 sm:$0xff]  }
 0x60f   : > { %7888 = vmatpush1.bf16.msra.mxu0 %v14734_v50  ;;  %v14806_v50 = vld [vmem:[%s19328_s9 + $0x768] ss:$16 sps:$4 sm:$0xff]  }
 0x610   : > { %8308 = vmatpush1.bf16.msra.mxu1 %v14737_v51  ;;  %7889 = vmatprep.subr.bf16.mxu0 %v14742_v46  ;;  %v14811_v51 = vld [vmem:[%s19328_s9 + $0x78c] ss:$16 sps:$4 sm:$0xff]   ;;  %v14809_v46 = vld [vmem:[%s19328_s9 + $0x788] ss:$16 sps:$4 sm:$0xff]  }
 0x611   : > { %8309 = vmatprep.subr.bf16.mxu1 %v14745_v52  ;;  %v14814_v52 = vld [vmem:[%s19328_s9 + $0x7ac] ss:$16 sps:$4 sm:$0xff]  }
 0x613   : > { %7890 = vmatpush1.bf16.msra.mxu0 %v14740_v47  ;;  %v14812_v47 = vld [vmem:[%s19328_s9 + $0x7a8] ss:$16 sps:$4 sm:$0xff]  }
 0x614   : > { %8310 = vmatpush1.bf16.msra.mxu1 %v14743_v54  ;;  %7891 = vmatprep.subr.bf16.mxu0 %v14748_v49  ;;  %v14817_v54 = vld [vmem:[%s19328_s9 + $0x7cc] ss:$16 sps:$4 sm:$0xff]   ;;  %v14815_v49 = vld [vmem:[%s19328_s9 + $0x7c8] ss:$16 sps:$4 sm:$0xff]  }
 0x615   : > { %8311 = vmatprep.subr.bf16.mxu1 %v14751_v19  ;;  %v14820_v19 = vld [vmem:[%s19328_s9 + $0x7ec] ss:$16 sps:$4 sm:$0xff]  }
 0x617   : > { %7892 = vmatpush1.bf16.msra.mxu0 %v14746_v55  ;;  %v14818_v55 = vld [vmem:[%s19328_s9 + $0x7e8] ss:$16 sps:$4 sm:$0xff]  }
 0x618   : > { %8312 = vmatpush1.bf16.msra.mxu1 %v14749_v56  ;;  %7893 = vmatprep.subr.bf16.mxu0 %v14754_v44  ;;  %v15290_v56 = vmov 1966171168  }
 0x619   : > { %v7029_v44 = vunpack.c.l.s4 %v15290_v56  ;;  %v14878_v56 = vld [vmem:[%s19330_s11 + $0x200] ss:$28 sps:$4 sm:$0xff]  }
 0x61b   : > { %8314 = vmatmul.mubr.bf16.vlgmr.msra.gmra.mrb[36].mxu1 %v17710_v48  ;;  %7894 = vmatpush1.bf16.msra.mxu0 %v14752_v15  ;;  %v7030_v9 = vunpack.c.0.s8 %v7029_v44  ;;  %v14883_v44 = vld [vmem:[%s19330_s11 + $0x234] ss:$28 sps:$4 sm:$0xff]  }
 0x61c   : > { %7895 = vmatprep.subr.bf16.mxu0 %v14757_v58 }
 0x61d   : > { %v17852_v15 = vsub.s32 %v7030_v9, %v17214_v11  ;;  %v14886_v9 = vld [vmem:[%s19330_s11 + $0x23c] ss:$28 sps:$4 sm:$0xff]  }
 0x61f   : > { %7896 = vmatpush1.bf16.msra.mxu0 %v14755_v34 }
 0x620   : > { %7897 = vmatprep.subr.bf16.mxu0 %v14760_v62 }
 0x623   : > { %7898 = vmatpush1.bf16.msra.mxu0 %v14758_v3 }
 0x624   : > { %7899 = vmatprep.subr.bf16.mxu0 %v14763_v8 }
 0x627   : > { %7900 = vmatpush1.bf16.msra.mxu0 %v14761_v20 }
 0x628   : > { %7901 = vmatprep.subr.bf16.mxu0 %v14766_v10 }
 0x62b   : > { %7902 = vmatpush1.bf16.msra.mxu0 %v14764_v13  ;;  %v14821_v13 = vld [vmem:[%s19330_s11] ss:$28 sps:$4 sm:$0xff]  }
 0x62c   : > { %7903 = vmatprep.subr.bf16.mxu0 %v14769_v37  ;;  %v14823_v37 = vld [vmem:[%s19330_s11 + $0x4] ss:$28 sps:$4 sm:$0xff]  }
 0x62d   : > { %9866 = vmatprep.subr.bf16.mxu1 %v14823_v37 }
 0x62e   : > { %9867 = vmatpush1.bf16.msra.mxu1 %v14821_v13  ;;  %v14890_v13 = vld [vmem:[%s19330_s11 + $0x270] ss:$28 sps:$4 sm:$0xff]  }
 0x62f   : > { %7904 = vmatpush1.bf16.msra.mxu0 %v14767_v23  ;;  %v14824_v23 = vld [vmem:[%s19330_s11 + $0x8] ss:$28 sps:$4 sm:$0xff]  }
 0x630   : > { %7905 = vmatprep.subr.bf16.mxu0 %v14772_v25  ;;  %v14826_v25 = vld [vmem:[%s19330_s11 + $0xc] ss:$28 sps:$4 sm:$0xff]  }
 0x633   : > { %7906 = vmatpush1.bf16.msra.mxu0 %v14770_v30  ;;  %v14829_v30 = vld [vmem:[%s19330_s11 + $0x3c] ss:$28 sps:$4 sm:$0xff]  }
 0x634   : > { %8322 = vmatprep.subr.bf16.mxu0 %v14775_v35  ;;  %v14832_v35 = vld [vmem:[%s19330_s11 + $0x44] ss:$28 sps:$4 sm:$0xff]   ;;  %9868 = vmatprep.subr.bf16.mxu1 %v14829_v30  ;;  %v14898_v30 = vld [vmem:[%s19330_s11 + $0x2ac] ss:$28 sps:$4 sm:$0xff]  }
 0x636   : > { %7908 = vmatmul.mubr.bf16.vlgmr.msra.gmra.mrb[92].mxu0 %v17505_v45  ;;  %v14784_v45 = vld [vmem:[%s19328_s9 + $0x66c] ss:$16 sps:$4 sm:$0xff]  }
 0x637   : > { %8323 = vmatpush1.bf16.msra.mxu0 %v14773_v36  ;;  %8354 = vmatprep.mubr.bf16.mxu0 %v17520_v53  ;;  %v14782_v53 = vld [vmem:[%s19328_s9 + $0x668] ss:$16 sps:$4 sm:$0xff]  }
 0x638   : > { %8324 = vmatprep.subr.bf16.mxu0 %v14778_v38  ;;  %v14827_v36 = vld [vmem:[%s19330_s11 + $0x38] ss:$28 sps:$4 sm:$0xff]   ;;  %v14830_v38 = vld [vmem:[%s19330_s11 + $0x40] ss:$28 sps:$4 sm:$0xff]  }
 0x639   : > { %9869 = vmatpush1.bf16.msra.mxu1 %v14827_v36 }
 0x63b   : > { %8325 = vmatpush1.bf16.msra.mxu0 %v14776_v40  ;;  %v14835_v40 = vld [vmem:[%s19330_s11 + $0x74] ss:$28 sps:$4 sm:$0xff]  }
 0x63c   : > { %8326 = vmatprep.subr.bf16.mxu0 %v14781_v42  ;;  %v14838_v42 = vld [vmem:[%s19330_s11 + $0x7c] ss:$28 sps:$4 sm:$0xff]   ;;  %9870 = vmatprep.subr.bf16.mxu1 %v14835_v40  ;;  %v14896_v40 = vld [vmem:[%s19330_s11 + $0x2a8] ss:$28 sps:$4 sm:$0xff]  }
 0x63f   : > { %8327 = vmatpush1.bf16.msra.mxu0 %v14779_v31  ;;  %v14833_v31 = vld [vmem:[%s19330_s11 + $0x70] ss:$28 sps:$4 sm:$0xff]  }
 0x640   : > { %8328 = vmatprep.subr.bf16.mxu0 %v14784_v45  ;;  %v14836_v45 = vld [vmem:[%s19330_s11 + $0x78] ss:$28 sps:$4 sm:$0xff]   ;;  %9871 = vmatpush1.bf16.msra.mxu1 %v14833_v31 }
 0x643   : > { %8329 = vmatpush1.bf16.msra.mxu0 %v14782_v53  ;;  %v14841_v53 = vld [vmem:[%s19330_s11 + $0xac] ss:$28 sps:$4 sm:$0xff]  }
 0x644   : > { %8330 = vmatprep.subr.bf16.mxu0 %v14787_v61  ;;  %v14844_v61 = vld [vmem:[%s19330_s11 + $0xb4] ss:$28 sps:$4 sm:$0xff]   ;;  %9872 = vmatprep.subr.bf16.mxu1 %v14841_v53 }
 0x647   : > { %8331 = vmatpush1.bf16.msra.mxu0 %v14785_v5  ;;  %v14839_v5 = vld [vmem:[%s19330_s11 + $0xa8] ss:$28 sps:$4 sm:$0xff]  }
 0x648   : > { %8332 = vmatprep.subr.bf16.mxu0 %v14790_v43  ;;  %v14842_v43 = vld [vmem:[%s19330_s11 + $0xb0] ss:$28 sps:$4 sm:$0xff]   ;;  %9873 = vmatpush1.bf16.msra.mxu1 %v14839_v5  ;;  %v14901_v5 = vld [vmem:[%s19330_s11 + $0x2dc] ss:$28 sps:$4 sm:$0xff]  }
 0x649   : > { %v6974_v60 = vpop.f32.mrb[80].mxu0  ;;  %v17787_v21 = vpop.f32.mrb[28].mxu1 }
 0x64a   : > { %v6976_v26 = vpop.f32.mrb[81].mxu0  ;;  %v17789_v17 = vpop.f32.mrb[29].mxu1 }
 0x64b   : > { %v7026_v63 = vcombine.low %v6974_v60, %v6976_v26  ;;  %v7473_v7 = vcombine.low %v17787_v21, %v17789_v17  ;;  %8333 = vmatpush1.bf16.msra.mxu0 %v14788_v57  ;;  %v6978_v14 = vpop.f32.mrb[82].mxu0  ;;  %v7425_v16 = vpop.f32.mrb[30].mxu1  ;;  %v14847_v57 = vld [vmem:[%s19330_s11 + $0xe4] ss:$28 sps:$4 sm:$0xff]  }
 0x64c   : > { %v6979_v29 = vpop.f32.mrb[83].mxu0  ;;  %v7426_v41 = vpop.f32.mrb[31].mxu1  ;;  %8334 = vmatprep.subr.bf16.mxu0 %v14793_v4  ;;  %v14850_v4 = vld [vmem:[%s19330_s11 + $0xec] ss:$28 sps:$4 sm:$0xff]   ;;  %v14845_v60 = vld [vmem:[%s19330_s11 + $0xe0] ss:$28 sps:$4 sm:$0xff]   ;;  %9874 = vmatprep.subr.bf16.mxu1 %v14847_v57 }
 0x64d   : > { %v17855_v20 = vrot.slane %v7026_v63, %v17852_v15  ;;  %v14848_v26 = vld [vmem:[%s19330_s11 + $0xe8] ss:$28 sps:$4 sm:$0xff]   ;;  %v14853_v63 = vld [vmem:[%s19330_s11 + $0x11c] ss:$28 sps:$4 sm:$0xff]   ;;  %9875 = vmatpush1.bf16.msra.mxu1 %v14845_v60  ;;  %v14859_v29 = vld [vmem:[%s19330_s11 + $0x154] ss:$28 sps:$4 sm:$0xff]   ;;  %v7481_v31 = vrot.slane %v7473_v7, %v17852_v15 }
 0x64e   : > { %v14856_v14 = vld [vmem:[%s19330_s11 + $0x124] ss:$28 sps:$4 sm:$0xff]   ;;  %v14851_v16 = vld [vmem:[%s19330_s11 + $0x118] ss:$28 sps:$4 sm:$0xff]   ;;  %9876 = vmatprep.subr.bf16.mxu1 %v14853_v63  ;;  %v14905_v60 = vld [vmem:[%s19330_s11 + $0x310] ss:$28 sps:$4 sm:$0xff]  }
 0x64f   : > { %8335 = vmatpush1.bf16.msra.mxu0 %v14791_v18  ;;  %v14854_v18 = vld [vmem:[%s19330_s11 + $0x120] ss:$28 sps:$4 sm:$0xff]   ;;  %v14899_v7 = vld [vmem:[%s19330_s11 + $0x2d8] ss:$28 sps:$4 sm:$0xff]   ;;  %v14911_v63 = vld [vmem:[%s19330_s11 + $0x348] ss:$28 sps:$4 sm:$0xff]  }
 0x650   : > { %8336 = vmatprep.subr.bf16.mxu0 %v14796_v33  ;;  %v14862_v41 = vld [vmem:[%s19330_s11 + $0x15c] ss:$28 sps:$4 sm:$0xff]   ;;  %v14857_v33 = vld [vmem:[%s19330_s11 + $0x150] ss:$28 sps:$4 sm:$0xff]   ;;  %v14904_v21 = vld [vmem:[%s19330_s11 + $0x2e4] ss:$28 sps:$4 sm:$0xff]  }
 0x651   : > { %9877 = vmatpush1.bf16.msra.mxu1 %v14851_v16  ;;  %v14910_v57 = vld [vmem:[%s19330_s11 + $0x31c] ss:$28 sps:$4 sm:$0xff]   ;;  %v14914_v16 = vld [vmem:[%s19330_s11 + $0x350] ss:$28 sps:$4 sm:$0xff]  }
 0x652   : > { %9878 = vmatprep.subr.bf16.mxu1 %v14859_v29  ;;  %v14919_v29 = vld [vmem:[%s19330_s11 + $0x384] ss:$28 sps:$4 sm:$0xff]  }
 0x653   : > { %8337 = vmatpush1.bf16.msra.mxu0 %v14794_v2  ;;  %v14860_v2 = vld [vmem:[%s19330_s11 + $0x158] ss:$28 sps:$4 sm:$0xff]  }
 0x654   : > { %8338 = vmatprep.subr.bf16.mxu0 %v14799_v1  ;;  %v14865_v1 = vld [vmem:[%s19330_s11 + $0x18c] ss:$28 sps:$4 sm:$0xff]  }
 0x655   : > { %9879 = vmatpush1.bf16.msra.mxu1 %v14857_v33 }
 0x656   : > { %9880 = vmatprep.subr.bf16.mxu1 %v14865_v1 }
 0x657   : > { %8339 = vmatpush1.bf16.msra.mxu0 %v14797_v28  ;;  %v14868_v28 = vld [vmem:[%s19330_s11 + $0x194] ss:$28 sps:$4 sm:$0xff]  }
 0x658   : > { %8340 = vmatprep.subr.bf16.mxu0 %v14802_v12 }
 0x65b   : > { %8341 = vmatpush1.bf16.msra.mxu0 %v14800_v39 }
 0x65c   : > { %8342 = vmatprep.subr.bf16.mxu0 %v14805_v22  ;;  %v14863_v22 = vld [vmem:[%s19330_s11 + $0x188] ss:$28 sps:$4 sm:$0xff]  }
 0x65d   : > { %9881 = vmatpush1.bf16.msra.mxu1 %v14863_v22 }
 0x65f   : > { %8343 = vmatpush1.bf16.msra.mxu0 %v14803_v27 }
 0x660   : > { %8344 = vmatprep.subr.bf16.mxu0 %v14808_v32 }
 0x663   : > { %8345 = vmatpush1.bf16.msra.mxu0 %v14806_v50  ;;  %v14866_v50 = vld [vmem:[%s19330_s11 + $0x190] ss:$28 sps:$4 sm:$0xff]  }
 0x664   : > { %8346 = vmatprep.subr.bf16.mxu0 %v14811_v51  ;;  %v14871_v51 = vld [vmem:[%s19330_s11 + $0x1c4] ss:$28 sps:$4 sm:$0xff]  }
 0x665   : > { %9882 = vmatprep.subr.bf16.mxu1 %v14871_v51 }
 0x667   : > { %8347 = vmatpush1.bf16.msra.mxu0 %v14809_v46 }
 0x668   : > { %8348 = vmatprep.subr.bf16.mxu0 %v14814_v52  ;;  %v14874_v52 = vld [vmem:[%s19330_s11 + $0x1cc] ss:$28 sps:$4 sm:$0xff]  }
 0x66b   : > { %8349 = vmatpush1.bf16.msra.mxu0 %v14812_v47  ;;  %v14869_v47 = vld [vmem:[%s19330_s11 + $0x1c0] ss:$28 sps:$4 sm:$0xff]  }
 0x66c   : > { %8350 = vmatprep.subr.bf16.mxu0 %v14817_v54  ;;  %v14872_v54 = vld [vmem:[%s19330_s11 + $0x1c8] ss:$28 sps:$4 sm:$0xff]   ;;  %9883 = vmatpush1.bf16.msra.mxu1 %v14869_v47 }
 0x66f   : > { %8351 = vmatpush1.bf16.msra.mxu0 %v14815_v49  ;;  %v14877_v49 = vld [vmem:[%s19330_s11 + $0x1fc] ss:$28 sps:$4 sm:$0xff]  }
 0x670   : > { %8352 = vmatprep.subr.bf16.mxu0 %v14820_v19  ;;  %v14880_v19 = vld [vmem:[%s19330_s11 + $0x204] ss:$28 sps:$4 sm:$0xff]   ;;  %9884 = vmatprep.subr.bf16.mxu1 %v14877_v49 }
 0x673   : > { %8353 = vmatpush1.bf16.msra.mxu0 %v14818_v55  ;;  %v14875_v55 = vld [vmem:[%s19330_s11 + $0x1f8] ss:$28 sps:$4 sm:$0xff]  }
 0x674   : > { %9948 = vmatprep.subr.bf16.mxu0 %v14826_v25  ;;  %9885 = vmatpush1.bf16.msra.mxu1 %v14875_v55  ;;  %v14895_v25 = vld [vmem:[%s19330_s11 + $0x2a4] ss:$28 sps:$4 sm:$0xff]  }
 0x675   : > { %9886 = vmatprep.subr.bf16.mxu1 %v14883_v44 }
 0x676   : > { %8355 = vmatmul.mubr.bf16.vlgmr.msra.gmra.mrb[96].mxu0 %v17710_v48 }
 0x677   : > { %9949 = vmatpush1.bf16.msra.mxu0 %v14824_v23 }
 0x678   : > { %9950 = vmatprep.subr.bf16.mxu0 %v14832_v35 }
 0x67b   : > { %9951 = vmatpush1.bf16.msra.mxu0 %v14830_v38  ;;  %v14893_v38 = vld [vmem:[%s19330_s11 + $0x2a0] ss:$28 sps:$4 sm:$0xff]  }
 0x67c   : > { %9952 = vmatprep.subr.bf16.mxu0 %v14838_v42 }
 0x67f   : > { %9953 = vmatpush1.bf16.msra.mxu0 %v14836_v45 }
 0x680   : > { %9954 = vmatprep.subr.bf16.mxu0 %v14844_v61  ;;  %v6605_v61 = vld [vmem:[%s19329_s10] sm:$0xf] }
 0x683   : > { %9955 = vmatpush1.bf16.msra.mxu0 %v14842_v43  ;;  %v14907_v43 = vld [vmem:[%s19330_s11 + $0x314] ss:$28 sps:$4 sm:$0xff]  }
 0x684   : > { %9956 = vmatprep.subr.bf16.mxu0 %v14850_v4 }
 0x687   : > { %9957 = vmatpush1.bf16.msra.mxu0 %v14848_v26  ;;  %v14908_v26 = vld [vmem:[%s19330_s11 + $0x318] ss:$28 sps:$4 sm:$0xff]  }
 0x688   : > { %9958 = vmatprep.subr.bf16.mxu0 %v14856_v14  ;;  %v14913_v14 = vld [vmem:[%s19330_s11 + $0x34c] ss:$28 sps:$4 sm:$0xff]  }
 0x689   : > { %v7015_v58 = vpop.f32.mrb[84].mxu0 }
 0x68a   : > { %v7017_v34 = vpop.f32.mrb[85].mxu0 }
 0x68b   : > { %v7027_v62 = vcombine.low %v7015_v58, %v7017_v34  ;;  %v7019_v3 = vpop.f32.mrb[86].mxu0  ;;  %9959 = vmatpush1.bf16.msra.mxu0 %v14854_v18  ;;  %v14881_v58 = vld [vmem:[%s19330_s11 + $0x230] ss:$28 sps:$4 sm:$0xff]   ;;  %v14884_v34 = vld [vmem:[%s19330_s11 + $0x238] ss:$28 sps:$4 sm:$0xff]  }
 0x68c   : > { %v7020_v8 = vpop.f32.mrb[87].mxu0  ;;  %9960 = vmatprep.subr.bf16.mxu0 %v14862_v41  ;;  %v14892_v3 = vld [vmem:[%s19330_s11 + $0x274] ss:$28 sps:$4 sm:$0xff]   ;;  %9887 = vmatpush1.bf16.msra.mxu1 %v14881_v58  ;;  %v14922_v41 = vld [vmem:[%s19330_s11 + $0x38c] ss:$28 sps:$4 sm:$0xff]  }
 0x68d   : > { %v17858_v10 = vrot.slane %v7027_v62, %v17852_v15  ;;  %v14889_v62 = vld [vmem:[%s19330_s11 + $0x26c] ss:$28 sps:$4 sm:$0xff]   ;;  %v14916_v18 = vld [vmem:[%s19330_s11 + $0x354] ss:$28 sps:$4 sm:$0xff]  }
 0x68e   : > { %v14887_v8 = vld [vmem:[%s19330_s11 + $0x268] ss:$28 sps:$4 sm:$0xff]   ;;  %9888 = vmatprep.subr.bf16.mxu1 %v14889_v62 }
 0x68f   : > { %v7042_v48 = vcombine.low %v17855_v20, %v17858_v10  ;;  %9961 = vmatpush1.bf16.msra.mxu0 %v14860_v2  ;;  %v14902_v20 = vld [vmem:[%s19330_s11 + $0x2e0] ss:$28 sps:$4 sm:$0xff]  }
 0x690   : > { %9962 = vmatprep.subr.bf16.mxu0 %v14868_v28  ;;  %9889 = vmatpush1.bf16.msra.mxu1 %v14887_v8 }
 0x691   : > { %9890 = vmatprep.subr.bf16.mxu1 %v14895_v25  ;;  %v7049_v45 = vrot.slane %v7042_v48, %v17852_v15 }
 0x693   : > { %9963 = vmatpush1.bf16.msra.mxu0 %v14866_v50  ;;  %v7051_v10 = vadd.f32 %v7049_v45, %v6605_v61  ;;  %v14923_v45 = vld [vmem:[%s19330_s11 + $0x3b8] ss:$28 sps:$4 sm:$0xff]  }
 0x694   : > { %9964 = vmatprep.subr.bf16.mxu0 %v14874_v52  ;;  %9891 = vmatpush1.bf16.msra.mxu1 %v14893_v38  ;;  %v14931_v61 = vld [vmem:[%s19330_s11 + $0x3f4] ss:$28 sps:$4 sm:$0xff]  }
 0x695   : > { %9892 = vmatprep.subr.bf16.mxu1 %v14901_v5  ;;  %v14934_v5 = vld [vmem:[%s19330_s11 + $0x3fc] ss:$28 sps:$4 sm:$0xff]  }
 0x697   : > { %9965 = vmatpush1.bf16.msra.mxu0 %v14872_v54 }
 0x698   : > { %9966 = vmatprep.subr.bf16.mxu0 %v14880_v19  ;;  %9893 = vmatpush1.bf16.msra.mxu1 %v14899_v7  ;;  %v14937_v7 = vld [vmem:[%s19330_s11 + $0x42c] ss:$28 sps:$4 sm:$0xff]  }
 0x699   : > { %9894 = vmatprep.subr.bf16.mxu1 %v14907_v43  ;;  %v14943_v43 = vld [vmem:[%s19330_s11 + $0x464] ss:$28 sps:$4 sm:$0xff]  }
 0x69b   : > { %9967 = vmatpush1.bf16.msra.mxu0 %v14878_v56 }
 0x69c   : > { %9968 = vmatprep.subr.bf16.mxu0 %v14886_v9  ;;  %9895 = vmatpush1.bf16.msra.mxu1 %v14905_v60  ;;  %v14944_v60 = vld [vmem:[%s19330_s11 + $0x468] ss:$28 sps:$4 sm:$0xff]  }
 0x69d   : > { %9896 = vmatprep.subr.bf16.mxu1 %v14913_v14  ;;  %v14947_v14 = vld [vmem:[%s19330_s11 + $0x498] ss:$28 sps:$4 sm:$0xff]  }
 0x69f   : > { %9969 = vmatpush1.bf16.msra.mxu0 %v14884_v34 }
 0x6a0   : > { %9970 = vmatprep.subr.bf16.mxu0 %v14892_v3  ;;  %9897 = vmatpush1.bf16.msra.mxu1 %v14911_v63  ;;  %v14952_v63 = vld [vmem:[%s19330_s11 + $0x4a4] ss:$28 sps:$4 sm:$0xff]  }
 0x6a1   : > { %9907 = vmatprep.subr.bf16.mxu1 %v14919_v29  ;;  %v14958_v29 = vld [vmem:[%s19330_s11 + $0x4dc] ss:$28 sps:$4 sm:$0xff]  }
 0x6a3   : > { %9971 = vmatpush1.bf16.msra.mxu0 %v14890_v13 }
 0x6a4   : > { %9972 = vmatprep.subr.bf16.mxu0 %v14898_v30 }
 0x6a7   : > { %9973 = vmatpush1.bf16.msra.mxu0 %v14896_v40  ;;  %v14925_v40 = vld [vmem:[%s19330_s11 + $0x3bc] ss:$28 sps:$4 sm:$0xff]  }
 0x6a8   : > { %9974 = vmatprep.subr.bf16.mxu0 %v14904_v21  ;;  %v14929_v21 = vld [vmem:[%s19330_s11 + $0x3f0] ss:$28 sps:$4 sm:$0xff]  }
 0x6ab   : > { %9975 = vmatpush1.bf16.msra.mxu0 %v14902_v20  ;;  %v14940_v20 = vld [vmem:[%s19330_s11 + $0x434] ss:$28 sps:$4 sm:$0xff]  }
 0x6ac   : > { %9976 = vmatprep.subr.bf16.mxu0 %v14910_v57  ;;  %v14946_v57 = vld [vmem:[%s19330_s11 + $0x46c] ss:$28 sps:$4 sm:$0xff]  }
 0x6ad   : > { %v17952_v12 = vpop.f32.mrb[32].mxu1 }
 0x6ae   : > { %v17954_v39 = vpop.f32.mrb[33].mxu1 }
 0x6af   : > { %v7920_v27 = vcombine.low %v17952_v12, %v17954_v39  ;;  %v7872_v32 = vpop.f32.mrb[34].mxu1  ;;  %9977 = vmatpush1.bf16.msra.mxu0 %v14908_v26  ;;  %v8411_v39 = vsub.s32 3, %v17214_v11  ;;  %v14949_v26 = vld [vmem:[%s19330_s11 + $0x49c] ss:$28 sps:$4 sm:$0xff]  }
 0x6b0   : > { %v7873_v46 = vpop.f32.mrb[35].mxu1  ;;  %9978 = vmatprep.subr.bf16.mxu0 %v14916_v18  ;;  %v14955_v18 = vld [vmem:[%s19330_s11 + $0x4d4] ss:$28 sps:$4 sm:$0xff]  }
 0x6b1   : > { %v7928_v47 = vrot.slane %v7920_v27, %v17852_v15 }
 0x6b3   : > { %9979 = vmatpush1.bf16.msra.mxu0 %v14914_v16  ;;  %v14950_v16 = vld [vmem:[%s19330_s11 + $0x4a0] ss:$28 sps:$4 sm:$0xff]  }
 0x6b4   : > { %9989 = vmatprep.subr.bf16.mxu0 %v14922_v41  ;;  %v14953_v41 = vld [vmem:[%s19330_s11 + $0x4d0] ss:$28 sps:$4 sm:$0xff]  }
 0x6c9   : > { %v7462_v37 = vpop.f32.mrb[88].mxu0 }
 0x6ca   : > { %v7464_v23 = vpop.f32.mrb[89].mxu0 }
 0x6cb   : > { %v7474_v35 = vcombine.low %v7462_v37, %v7464_v23  ;;  %v7466_v36 = vpop.f32.mrb[90].mxu0 }
 0x6cc   : > { %v7467_v42 = vpop.f32.mrb[91].mxu0  ;;  %v14920_v36 = vld [vmem:[%s19330_s11 + $0x388] ss:$28 sps:$4 sm:$0xff]  }
 0x6cd   : > { %v7488_v53 = vrot.slane %v7474_v35, %v17852_v15  ;;  %v14917_v35 = vld [vmem:[%s19330_s11 + $0x380] ss:$28 sps:$4 sm:$0xff]  }
 0x6ce   : > { %v14928_v42 = vld [vmem:[%s19330_s11 + $0x3c4] ss:$28 sps:$4 sm:$0xff]  }
 0x6cf   : > { %v7489_v17 = vcombine.low %v7481_v31, %v7488_v53  ;;  %v14926_v53 = vld [vmem:[%s19330_s11 + $0x3c0] ss:$28 sps:$4 sm:$0xff]  }
 0x6d1   : > { %v7496_v48 = vrot.slane %v7489_v17, %v17852_v15  ;;  %v14932_v17 = vld [vmem:[%s19330_s11 + $0x3f8] ss:$28 sps:$4 sm:$0xff]  }
 0x6d3   : > { %v7498_v4 = vadd.f32 %v7496_v48, %v7051_v10  ;;  %v14935_v10 = vld [vmem:[%s19330_s11 + $0x428] ss:$28 sps:$4 sm:$0xff]   ;;  %v14938_v48 = vld [vmem:[%s19330_s11 + $0x430] ss:$28 sps:$4 sm:$0xff]  }
 0x6ee   : > { %v8315_v33 = vpop.f32.mrb[36].mxu1 }
 0x6ef   : > { %v8317_v2 = vpop.f32.mrb[37].mxu1 }
 0x6f0   : > { %v8367_v1 = vcombine.low %v8315_v33, %v8317_v2  ;;  %v8319_v28 = vpop.f32.mrb[38].mxu1  ;;  %v14956_v33 = vld [vmem:[%s19330_s11 + $0x4d8] ss:$28 sps:$4 sm:$0xff]   ;;  %v14961_v2 = vld [vmem:[%s19330_s11 + $0x50c] ss:$28 sps:$4 sm:$0xff]  }
 0x6f1   : > { %v8320_v22 = vpop.f32.mrb[39].mxu1  ;;  %v14959_v28 = vld [vmem:[%s19330_s11 + $0x508] ss:$28 sps:$4 sm:$0xff]  }
 0x6f2   : > { %v8375_v62 = vrot.slane %v8367_v1, %v17852_v15  ;;  %v14964_v1 = vld [vmem:[%s19330_s11 + $0x514] ss:$28 sps:$4 sm:$0xff]  }
 0x6f3   : > { %v14962_v22 = vld [vmem:[%s19330_s11 + $0x510] ss:$28 sps:$4 sm:$0xff]  }
 0x709   : > { %v7909_v32 = vpop.f32.mrb[92].mxu0 }
 0x70a   : > { %v7911_v50 = vpop.f32.mrb[93].mxu0 }
 0x70b   : > { %v7921_v51 = vcombine.low %v7909_v32, %v7911_v50  ;;  %v7913_v46 = vpop.f32.mrb[94].mxu0  ;;  %v14967_v32 = vld [vmem:[%s19330_s11 + $0x544] ss:$28 sps:$4 sm:$0xff]   ;;  %v14970_v50 = vld [vmem:[%s19330_s11 + $0x54c] ss:$28 sps:$4 sm:$0xff]  }
 0x70c   : > { %v7914_v52 = vpop.f32.mrb[95].mxu0  ;;  %v14968_v46 = vld [vmem:[%s19330_s11 + $0x548] ss:$28 sps:$4 sm:$0xff]  }
 0x70d   : > { %v7935_v54 = vrot.slane %v7921_v51, %v17852_v15  ;;  %v14965_v51 = vld [vmem:[%s19330_s11 + $0x540] ss:$28 sps:$4 sm:$0xff]  }
 0x70e   : > { %v14973_v52 = vld [vmem:[%s19330_s11 + $0x57c] ss:$28 sps:$4 sm:$0xff]  }
 0x70f   : > { %v7936_v49 = vcombine.low %v7928_v47, %v7935_v54  ;;  %v14976_v47 = vld [vmem:[%s19330_s11 + $0x584] ss:$28 sps:$4 sm:$0xff]   ;;  %v14971_v54 = vld [vmem:[%s19330_s11 + $0x578] ss:$28 sps:$4 sm:$0xff]  }
 0x711   : > { %v7943_v19 = vrot.slane %v7936_v49, %v17852_v15  ;;  %v14974_v49 = vld [vmem:[%s19330_s11 + $0x580] ss:$28 sps:$4 sm:$0xff]  }
 0x713   : > { %v7945_v55 = vadd.f32 %v7943_v19, %v7498_v4  ;;  %v14941_v4 = vld [vmem:[%s19330_s11 + $0x460] ss:$28 sps:$4 sm:$0xff]   ;;  %v14979_v19 = vld [vmem:[%s19330_s11 + $0x5b4] ss:$28 sps:$4 sm:$0xff]  }
 0x749   : > { %v8356_v56 = vpop.f32.mrb[96].mxu0 }
 0x74a   : > { %v8358_v44 = vpop.f32.mrb[97].mxu0 }
 0x74b   : > { %v8368_v9 = vcombine.low %v8356_v56, %v8358_v44  ;;  %v8360_v58 = vpop.f32.mrb[98].mxu0  ;;  %v14977_v56 = vld [vmem:[%s19330_s11 + $0x5b0] ss:$28 sps:$4 sm:$0xff]   ;;  %v14980_v44 = vld [vmem:[%s19330_s11 + $0x5b8] ss:$28 sps:$4 sm:$0xff]  }
 0x74c   : > { %v8361_v34 = vpop.f32.mrb[99].mxu0  ;;  %v14988_v58 = vld [vmem:[%s19330_s11 + $0x5f4] ss:$28 sps:$4 sm:$0xff]  }
 0x74d   : > { %v8382_v3 = vrot.slane %v8368_v9, %v17852_v15  ;;  %v14985_v9 = vld [vmem:[%s19330_s11 + $0x5ec] ss:$28 sps:$4 sm:$0xff]  }
 0x74e   : > { %v14983_v34 = vld [vmem:[%s19330_s11 + $0x5e8] ss:$28 sps:$4 sm:$0xff]  }
 0x74f   : > { %v8383_v8 = vcombine.low %v8375_v62, %v8382_v3  ;;  %v14986_v62 = vld [vmem:[%s19330_s11 + $0x5f0] ss:$28 sps:$4 sm:$0xff]   ;;  %v14991_v3 = vld [vmem:[%s19330_s11 + $0x624] ss:$28 sps:$4 sm:$0xff]  }
 0x751   : > { %v8390_v13 = vrot.slane %v8383_v8, %v17852_v15  ;;  %v14994_v8 = vld [vmem:[%s19330_s11 + $0x62c] ss:$28 sps:$4 sm:$0xff]  }
 0x753   : > { %v8392_v12 = vadd.f32 %v8390_v13, %v7945_v55  ;;  %v14982_v55 = vld [vmem:[%s19330_s11 + $0x5bc] ss:$28 sps:$4 sm:$0xff]  }
 0x754   : > { %v14989_v13 = vld [vmem:[%s19330_s11 + $0x620] ss:$28 sps:$4 sm:$0xff]  }
 0x755   : > { %v18089_v27 = vmax.f32 %v8392_v12, 0.0  ;;  %v14992_v12 = vld [vmem:[%s19330_s11 + $0x628] ss:$28 sps:$4 sm:$0xff]  }
 0x757   : > { %v8404_v37 = vrot.slane %v18089_v27, %v17223_v59  ;;  %v8400_v23 = vrot.slane %v18089_v27, %v17217_v24  ;;  %v8412_v25 = vrot.slane %v18089_v27, %v8411_v39 }
 0x759   : > { %v18098_v30 = vpack.c.bf16 %v8404_v37, %v8404_v37  ;;  %v18106_v38 = vpack.c.bf16 %v8400_v23, %v8400_v23  ;;  %v18118_v31 = vpack.c.bf16 %v8412_v25, %v8412_v25  ;;  %v14997_v37 = vld [vmem:[%s19330_s11 + $0x65c] ss:$28 sps:$4 sm:$0xff]   ;;  %v15000_v23 = vld [vmem:[%s19330_s11 + $0x664] ss:$28 sps:$4 sm:$0xff]  }
 0x75a   : > { %v14995_v25 = vld [vmem:[%s19330_s11 + $0x658] ss:$28 sps:$4 sm:$0xff]  }
 0x75b   : > { %9898 = vmatprep.mubr.bf16.mxu1 %v18098_v30  ;;  %9980 = vmatprep.mubr.bf16.mxu0 %v18098_v30 }
 0x75c   : > { %9899 = vmatmul.mubr.bf16.vlgmr.msra.gmra.mrb[40].mxu1 %v18106_v38  ;;  %9981 = vmatmul.mubr.bf16.vlgmr.msra.gmra.mrb[100].mxu0 %v18106_v38 }
 0x75d   : > { %9908 = vmatpush1.bf16.msra.mxu1 %v14917_v35  ;;  %9990 = vmatpush1.bf16.msra.mxu0 %v14920_v36  ;;  %v14998_v35 = vld [vmem:[%s19330_s11 + $0x660] ss:$28 sps:$4 sm:$0xff]   ;;  %v15003_v36 = vld [vmem:[%s19330_s11 + $0x694] ss:$28 sps:$4 sm:$0xff]  }
 0x75e   : > { %9939 = vmatprep.mubr.bf16.mxu1 %v18118_v31  ;;  %10021 = vmatprep.mubr.bf16.mxu0 %v18118_v31 }
 0x75f   : > { %9909 = vmatprep.subr.bf16.mxu1 %v14925_v40  ;;  %9991 = vmatprep.subr.bf16.mxu0 %v14928_v42  ;;  %v15006_v40 = vld [vmem:[%s19330_s11 + $0x69c] ss:$28 sps:$4 sm:$0xff]   ;;  %v15001_v42 = vld [vmem:[%s19330_s11 + $0x690] ss:$28 sps:$4 sm:$0xff]  }
 0x761   : > { %9910 = vmatpush1.bf16.msra.mxu1 %v14923_v45  ;;  %9992 = vmatpush1.bf16.msra.mxu0 %v14926_v53  ;;  %v15004_v45 = vld [vmem:[%s19330_s11 + $0x698] ss:$28 sps:$4 sm:$0xff]   ;;  %v15009_v53 = vld [vmem:[%s19330_s11 + $0x6cc] ss:$28 sps:$4 sm:$0xff]  }
 0x762   : > { %9911 = vmatprep.subr.bf16.mxu1 %v14931_v61  ;;  %9993 = vmatprep.subr.bf16.mxu0 %v14934_v5  ;;  %v15012_v61 = vld [vmem:[%s19330_s11 + $0x6d4] ss:$28 sps:$4 sm:$0xff]   ;;  %v8407_v5 = vsub.s32 2, %v17214_v11 }
 0x765   : > { %9912 = vmatpush1.bf16.msra.mxu1 %v14929_v21  ;;  %9994 = vmatpush1.bf16.msra.mxu0 %v14932_v17  ;;  %v15007_v21 = vld [vmem:[%s19330_s11 + $0x6c8] ss:$28 sps:$4 sm:$0xff]   ;;  %v15010_v17 = vld [vmem:[%s19330_s11 + $0x6d0] ss:$28 sps:$4 sm:$0xff]  }
 0x766   : > { %9913 = vmatprep.subr.bf16.mxu1 %v14937_v7  ;;  %9995 = vmatprep.subr.bf16.mxu0 %v14940_v20  ;;  %v8408_v7 = vrot.slane %v18089_v27, %v8407_v5  ;;  %v15015_v20 = vld [vmem:[%s19330_s11 + $0x14] ss:$28 sps:$4 sm:$0xff]  }
 0x767   : > { %v15017_v27 = vld [vmem:[%s19330_s11 + $0x18] ss:$28 sps:$4 sm:$0xff]  }
 0x769   : > { %9914 = vmatpush1.bf16.msra.mxu1 %v14935_v10  ;;  %9996 = vmatpush1.bf16.msra.mxu0 %v14938_v48  ;;  %v15016_v10 = vld [vmem:[%s19330_s11 + $0x1d8] ss:$28 sps:$4 sm:$0xff]   ;;  %v15013_v48 = vld [vmem:[%s19330_s11 + $0x10] ss:$28 sps:$4 sm:$0xff]  }
 0x76a   : > { %9915 = vmatprep.subr.bf16.mxu1 %v14943_v43  ;;  %9997 = vmatprep.subr.bf16.mxu0 %v14946_v57  ;;  %v18309_v43 = vpack.c.bf16 %v8408_v7, %v8408_v7  ;;  %v15020_v57 = vld [vmem:[%s19330_s11 + $0x4c] ss:$28 sps:$4 sm:$0xff]  }
 0x76b   : > { %v15080_v7 = vld [vmem:[%s19330_s11 + $0x2ec] ss:$28 sps:$4 sm:$0xff]  }
 0x76d   : > { %9916 = vmatpush1.bf16.msra.mxu1 %v14941_v4  ;;  %9998 = vmatpush1.bf16.msra.mxu0 %v14944_v60  ;;  %v15021_v4 = vld [vmem:[%s19330_s11 + $0x210] ss:$28 sps:$4 sm:$0xff]   ;;  %v15018_v60 = vld [vmem:[%s19330_s11 + $0x48] ss:$28 sps:$4 sm:$0xff]  }
 0x76e   : > { %9917 = vmatprep.subr.bf16.mxu1 %v14949_v26  ;;  %9999 = vmatprep.subr.bf16.mxu0 %v14952_v63  ;;  %v15022_v26 = vld [vmem:[%s19330_s11 + $0x50] ss:$28 sps:$4 sm:$0xff]   ;;  %v15025_v63 = vld [vmem:[%s19330_s11 + $0x84] ss:$28 sps:$4 sm:$0xff]  }
 0x771   : > { %9918 = vmatpush1.bf16.msra.mxu1 %v14947_v14  ;;  %10000 = vmatpush1.bf16.msra.mxu0 %v14950_v16  ;;  %v15026_v14 = vld [vmem:[%s19330_s11 + $0x248] ss:$28 sps:$4 sm:$0xff]   ;;  %v15023_v16 = vld [vmem:[%s19330_s11 + $0x80] ss:$28 sps:$4 sm:$0xff]  }
 0x772   : > { %9919 = vmatprep.subr.bf16.mxu1 %v14955_v18  ;;  %10001 = vmatprep.subr.bf16.mxu0 %v14958_v29  ;;  %v15030_v18 = vld [vmem:[%s19330_s11 + $0xbc] ss:$28 sps:$4 sm:$0xff]  }
 0x773   : > { %v15031_v29 = vld [vmem:[%s19330_s11 + $0x280] ss:$28 sps:$4 sm:$0xff]  }
 0x775   : > { %9920 = vmatpush1.bf16.msra.mxu1 %v14953_v41  ;;  %10002 = vmatpush1.bf16.msra.mxu0 %v14956_v33  ;;  %v15028_v41 = vld [vmem:[%s19330_s11 + $0xb8] ss:$28 sps:$4 sm:$0xff]   ;;  %v15032_v33 = vld [vmem:[%s19330_s11 + $0xc0] ss:$28 sps:$4 sm:$0xff]  }
 0x776   : > { %9921 = vmatprep.subr.bf16.mxu1 %v14961_v2  ;;  %10003 = vmatprep.subr.bf16.mxu0 %v14964_v1  ;;  %v15035_v2 = vld [vmem:[%s19330_s11 + $0xf4] ss:$28 sps:$4 sm:$0xff]  }
 0x777   : > { %v15036_v1 = vld [vmem:[%s19330_s11 + $0x2b8] ss:$28 sps:$4 sm:$0xff]  }
 0x779   : > { %9922 = vmatpush1.bf16.msra.mxu1 %v14959_v28  ;;  %10004 = vmatpush1.bf16.msra.mxu0 %v14962_v22  ;;  %v15033_v28 = vld [vmem:[%s19330_s11 + $0xf0] ss:$28 sps:$4 sm:$0xff]   ;;  %v15037_v22 = vld [vmem:[%s19330_s11 + $0xf8] ss:$28 sps:$4 sm:$0xff]  }
 0x77a   : > { %9923 = vmatprep.subr.bf16.mxu1 %v14967_v32  ;;  %10005 = vmatprep.subr.bf16.mxu0 %v14970_v50  ;;  %v15040_v32 = vld [vmem:[%s19330_s11 + $0x12c] ss:$28 sps:$4 sm:$0xff]  }
 0x77b   : > { %v15041_v50 = vld [vmem:[%s19330_s11 + $0x2f0] ss:$28 sps:$4 sm:$0xff]  }
 0x77d   : > { %9924 = vmatpush1.bf16.msra.mxu1 %v14965_v51  ;;  %10006 = vmatpush1.bf16.msra.mxu0 %v14968_v46  ;;  %v15038_v51 = vld [vmem:[%s19330_s11 + $0x128] ss:$28 sps:$4 sm:$0xff]   ;;  %v15042_v46 = vld [vmem:[%s19330_s11 + $0x130] ss:$28 sps:$4 sm:$0xff]  }
 0x77e   : > { %9925 = vmatprep.subr.bf16.mxu1 %v14973_v52  ;;  %10007 = vmatprep.subr.bf16.mxu0 %v14976_v47  ;;  %v15045_v52 = vld [vmem:[%s19330_s11 + $0x164] ss:$28 sps:$4 sm:$0xff]  }
 0x77f   : > { %v15046_v47 = vld [vmem:[%s19330_s11 + $0x328] ss:$28 sps:$4 sm:$0xff]  }
 0x781   : > { %9926 = vmatpush1.bf16.msra.mxu1 %v14971_v54  ;;  %10008 = vmatpush1.bf16.msra.mxu0 %v14974_v49  ;;  %v15043_v54 = vld [vmem:[%s19330_s11 + $0x160] ss:$28 sps:$4 sm:$0xff]   ;;  %v15047_v49 = vld [vmem:[%s19330_s11 + $0x168] ss:$28 sps:$4 sm:$0xff]  }
 0x782   : > { %9927 = vmatprep.subr.bf16.mxu1 %v14979_v19  ;;  %10009 = vmatprep.subr.bf16.mxu0 %v14982_v55  ;;  %v15050_v19 = vld [vmem:[%s19330_s11 + $0x19c] ss:$28 sps:$4 sm:$0xff]  }
 0x783   : > { %v15051_v55 = vld [vmem:[%s19330_s11 + $0x360] ss:$28 sps:$4 sm:$0xff]  }
 0x785   : > { %9928 = vmatpush1.bf16.msra.mxu1 %v14977_v56  ;;  %10010 = vmatpush1.bf16.msra.mxu0 %v14980_v44  ;;  %v15048_v56 = vld [vmem:[%s19330_s11 + $0x198] ss:$28 sps:$4 sm:$0xff]   ;;  %v15052_v44 = vld [vmem:[%s19330_s11 + $0x1a0] ss:$28 sps:$4 sm:$0xff]  }
 0x786   : > { %9929 = vmatprep.subr.bf16.mxu1 %v14985_v9  ;;  %10011 = vmatprep.subr.bf16.mxu0 %v14988_v58  ;;  %v15055_v9 = vld [vmem:[%s19330_s11 + $0x1d4] ss:$28 sps:$4 sm:$0xff]  }
 0x787   : > { %v15056_v58 = vld [vmem:[%s19330_s11 + $0x558] ss:$28 sps:$4 sm:$0xff]  }
 0x789   : > { %9930 = vmatpush1.bf16.msra.mxu1 %v14983_v34  ;;  %10012 = vmatpush1.bf16.msra.mxu0 %v14986_v62  ;;  %v15053_v34 = vld [vmem:[%s19330_s11 + $0x1d0] ss:$28 sps:$4 sm:$0xff]   ;;  %v15057_v62 = vld [vmem:[%s19330_s11 + $0x398] ss:$28 sps:$4 sm:$0xff]  }
 0x78a   : > { %9931 = vmatprep.subr.bf16.mxu1 %v14991_v3  ;;  %10013 = vmatprep.subr.bf16.mxu0 %v14994_v8  ;;  %v15060_v3 = vld [vmem:[%s19330_s11 + $0x20c] ss:$28 sps:$4 sm:$0xff]  }
 0x78b   : > { %v15061_v8 = vld [vmem:[%s19330_s11 + $0x590] ss:$28 sps:$4 sm:$0xff]  }
 0x78d   : > { %9932 = vmatpush1.bf16.msra.mxu1 %v14989_v13  ;;  %10014 = vmatpush1.bf16.msra.mxu0 %v14992_v12  ;;  %v15058_v13 = vld [vmem:[%s19330_s11 + $0x208] ss:$28 sps:$4 sm:$0xff]   ;;  %v15062_v12 = vld [vmem:[%s19330_s11 + $0x3d0] ss:$28 sps:$4 sm:$0xff]  }
 0x78e   : > { %9933 = vmatprep.subr.bf16.mxu1 %v14997_v37  ;;  %10015 = vmatprep.subr.bf16.mxu0 %v15000_v23  ;;  %v15065_v37 = vld [vmem:[%s19330_s11 + $0x244] ss:$28 sps:$4 sm:$0xff]  }
 0x78f   : > { %v15066_v23 = vld [vmem:[%s19330_s11 + $0x5c8] ss:$28 sps:$4 sm:$0xff]  }
 0x791   : > { %9934 = vmatpush1.bf16.msra.mxu1 %v14995_v25  ;;  %10016 = vmatpush1.bf16.msra.mxu0 %v14998_v35  ;;  %v15063_v25 = vld [vmem:[%s19330_s11 + $0x240] ss:$28 sps:$4 sm:$0xff]   ;;  %v15067_v35 = vld [vmem:[%s19330_s11 + $0x408] ss:$28 sps:$4 sm:$0xff]  }
 0x792   : > { %9935 = vmatprep.subr.bf16.mxu1 %v15003_v36  ;;  %10017 = vmatprep.subr.bf16.mxu0 %v15006_v40  ;;  %v15070_v36 = vld [vmem:[%s19330_s11 + $0x27c] ss:$28 sps:$4 sm:$0xff]  }
 0x793   : > { %v15071_v40 = vld [vmem:[%s19330_s11 + $0x600] ss:$28 sps:$4 sm:$0xff]  }
 0x795   : > { %9936 = vmatpush1.bf16.msra.mxu1 %v15001_v42  ;;  %10018 = vmatpush1.bf16.msra.mxu0 %v15004_v45  ;;  %v15068_v42 = vld [vmem:[%s19330_s11 + $0x278] ss:$28 sps:$4 sm:$0xff]   ;;  %v15072_v45 = vld [vmem:[%s19330_s11 + $0x440] ss:$28 sps:$4 sm:$0xff]  }
 0x796   : > { %9937 = vmatprep.subr.bf16.mxu1 %v15009_v53  ;;  %10019 = vmatprep.subr.bf16.mxu0 %v15012_v61  ;;  %v15075_v53 = vld [vmem:[%s19330_s11 + $0x2b4] ss:$28 sps:$4 sm:$0xff]  }
 0x797   : > { %v15076_v61 = vld [vmem:[%s19330_s11 + $0x638] ss:$28 sps:$4 sm:$0xff]  }
 0x799   : > { %9938 = vmatpush1.bf16.msra.mxu1 %v15007_v21  ;;  %10020 = vmatpush1.bf16.msra.mxu0 %v15010_v17  ;;  %v15073_v21 = vld [vmem:[%s19330_s11 + $0x2b0] ss:$28 sps:$4 sm:$0xff]   ;;  %v15077_v17 = vld [vmem:[%s19330_s11 + $0x478] ss:$28 sps:$4 sm:$0xff]  }
 0x79a   : > { %10030 = vmatprep.subr.bf16.mxu1 %v15015_v20  ;;  %12555 = vmatprep.subr.bf16.mxu0 %v15016_v10  ;;  %v15081_v20 = vld [vmem:[%s19330_s11 + $0x670] ss:$28 sps:$4 sm:$0xff]   ;;  %v15078_v10 = vld [vmem:[%s19330_s11 + $0x2e8] ss:$28 sps:$4 sm:$0xff]  }
 0x79c   : > { %9940 = vmatmul.mubr.bf16.vlgmr.msra.gmra.mrb[40].mxu1 %v18309_v43  ;;  %10022 = vmatmul.mubr.bf16.vlgmr.msra.gmra.mrb[100].mxu0 %v18309_v43 }
 0x79d   : > { %10031 = vmatpush1.bf16.msra.mxu1 %v15013_v48  ;;  %10062 = vmatprep.mubr.bf16.mxu1 %v18098_v30  ;;  %v15082_v48 = vld [vmem:[%s19330_s11 + $0x4b0] ss:$28 sps:$4 sm:$0xff]  }
 0x79e   : > { %12556 = vmatpush3.bf16.msra.mxu0 %v15017_v27  ;;  %10144 = vmatprep.mubr.bf16.mxu0 %v18098_v30  ;;  %v15027_v30 = vld [vmem:[%s19330_s11 + $0x88] ss:$28 sps:$4 sm:$0xff]  }
 0x79f   : > { %10032 = vmatprep.subr.bf16.mxu1 %v15020_v57  ;;  %12557 = vmatprep.subr.bf16.mxu0 %v15021_v4  ;;  %v15085_v27 = vld [vmem:[%s19330_s11 + $0x324] ss:$28 sps:$4 sm:$0xff]  }
 0x7a0   : > { %v15086_v57 = vld [vmem:[%s19330_s11 + $0x6a8] ss:$28 sps:$4 sm:$0xff]   ;;  %v15083_v4 = vld [vmem:[%s19330_s11 + $0x320] ss:$28 sps:$4 sm:$0xff]  }
 0x7a1   : > { %10033 = vmatpush1.bf16.msra.mxu1 %v15018_v60  ;;  %v15087_v60 = vld [vmem:[%s19330_s11 + $0x4e8] ss:$28 sps:$4 sm:$0xff]  }
 0x7a2   : > { %12558 = vmatpush3.bf16.msra.mxu0 %v15022_v26  ;;  %10034 = vmatprep.subr.bf16.mxu1 %v15025_v63  ;;  %v15090_v26 = vld [vmem:[%s19330_s11 + $0x35c] ss:$28 sps:$4 sm:$0xff]  }
 0x7a3   : > { %12559 = vmatprep.subr.bf16.mxu0 %v15026_v14  ;;  %v15091_v63 = vld [vmem:[%s19330_s11 + $0x6e0] ss:$28 sps:$4 sm:$0xff]   ;;  %v15088_v14 = vld [vmem:[%s19330_s11 + $0x358] ss:$28 sps:$4 sm:$0xff]  }
 0x7a5   : > { %10035 = vmatpush1.bf16.msra.mxu1 %v15023_v16  ;;  %v15092_v16 = vld [vmem:[%s19330_s11 + $0x520] ss:$28 sps:$4 sm:$0xff]  }
 0x7a6   : > { %12560 = vmatpush3.bf16.msra.mxu0 %v15027_v30  ;;  %10036 = vmatprep.subr.bf16.mxu1 %v15030_v18  ;;  %v15095_v30 = vld [vmem:[%s19330_s11 + $0x394] ss:$28 sps:$4 sm:$0xff]  }
 0x7a7   : > { %12561 = vmatprep.subr.bf16.mxu0 %v15031_v29  ;;  %v15093_v18 = vld [vmem:[%s19330_s11 + $0x390] ss:$28 sps:$4 sm:$0xff]  }
 0x7a8   : > { %v15098_v29 = vld [vmem:[%s19330_s11 + $0x3cc] ss:$28 sps:$4 sm:$0xff]  }
 0x7a9   : > { %10037 = vmatpush1.bf16.msra.mxu1 %v15028_v41  ;;  %v15096_v41 = vld [vmem:[%s19330_s11 + $0x3c8] ss:$28 sps:$4 sm:$0xff]  }
 0x7aa   : > { %12562 = vmatpush3.bf16.msra.mxu0 %v15032_v33  ;;  %10038 = vmatprep.subr.bf16.mxu1 %v15035_v2  ;;  %v15101_v33 = vld [vmem:[%s19330_s11 + $0x404] ss:$28 sps:$4 sm:$0xff]  }
 0x7ab   : > { %12563 = vmatprep.subr.bf16.mxu0 %v15036_v1  ;;  %v15099_v2 = vld [vmem:[%s19330_s11 + $0x400] ss:$28 sps:$4 sm:$0xff]   ;;  %v15107_v1 = vld [vmem:[%s19330_s11 + $0x474] ss:$28 sps:$4 sm:$0xff]  }
 0x7ad   : > { %10039 = vmatpush1.bf16.msra.mxu1 %v15033_v28  ;;  %v15105_v28 = vld [vmem:[%s19330_s11 + $0x470] ss:$28 sps:$4 sm:$0xff]  }
 0x7ae   : > { %12564 = vmatpush3.bf16.msra.mxu0 %v15037_v22  ;;  %10040 = vmatprep.subr.bf16.mxu1 %v15040_v32  ;;  %v15110_v22 = vld [vmem:[%s19330_s11 + $0x4ac] ss:$28 sps:$4 sm:$0xff]  }
 0x7af   : > { %12565 = vmatprep.subr.bf16.mxu0 %v15041_v50  ;;  %v15108_v32 = vld [vmem:[%s19330_s11 + $0x4a8] ss:$28 sps:$4 sm:$0xff]  }
 0x7b0   : > { %v15113_v50 = vld [vmem:[%s19330_s11 + $0x4e4] ss:$28 sps:$4 sm:$0xff]  }
 0x7b1   : > { %10041 = vmatpush1.bf16.msra.mxu1 %v15038_v51  ;;  %v15111_v51 = vld [vmem:[%s19330_s11 + $0x4e0] ss:$28 sps:$4 sm:$0xff]  }
 0x7b2   : > { %12566 = vmatpush3.bf16.msra.mxu0 %v15042_v46  ;;  %10042 = vmatprep.subr.bf16.mxu1 %v15045_v52  ;;  %v15116_v46 = vld [vmem:[%s19330_s11 + $0x51c] ss:$28 sps:$4 sm:$0xff]  }
 0x7b3   : > { %12567 = vmatprep.subr.bf16.mxu0 %v15046_v47  ;;  %v15114_v52 = vld [vmem:[%s19330_s11 + $0x518] ss:$28 sps:$4 sm:$0xff]  }
 0x7b4   : > { %v15119_v47 = vld [vmem:[%s19330_s11 + $0x554] ss:$28 sps:$4 sm:$0xff]  }
 0x7b5   : > { %10043 = vmatpush1.bf16.msra.mxu1 %v15043_v54  ;;  %v15117_v54 = vld [vmem:[%s19330_s11 + $0x550] ss:$28 sps:$4 sm:$0xff]  }
 0x7b6   : > { %12568 = vmatpush3.bf16.msra.mxu0 %v15047_v49  ;;  %10044 = vmatprep.subr.bf16.mxu1 %v15050_v19  ;;  %v15122_v49 = vld [vmem:[%s19330_s11 + $0x58c] ss:$28 sps:$4 sm:$0xff]  }
 0x7b7   : > { %12569 = vmatprep.subr.bf16.mxu0 %v15051_v55  ;;  %v15120_v19 = vld [vmem:[%s19330_s11 + $0x588] ss:$28 sps:$4 sm:$0xff]  }
 0x7b8   : > { %v15125_v55 = vld [vmem:[%s19330_s11 + $0x5c4] ss:$28 sps:$4 sm:$0xff]  }
 0x7b9   : > { %10045 = vmatpush1.bf16.msra.mxu1 %v15048_v56  ;;  %v15123_v56 = vld [vmem:[%s19330_s11 + $0x5c0] ss:$28 sps:$4 sm:$0xff]  }
 0x7ba   : > { %12570 = vmatpush3.bf16.msra.mxu0 %v15052_v44  ;;  %10046 = vmatprep.subr.bf16.mxu1 %v15055_v9  ;;  %v15128_v44 = vld [vmem:[%s19330_s11 + $0x5fc] ss:$28 sps:$4 sm:$0xff]  }
 0x7bb   : > { %12577 = vmatprep.subr.bf16.mxu0 %v15056_v58  ;;  %v15126_v9 = vld [vmem:[%s19330_s11 + $0x5f8] ss:$28 sps:$4 sm:$0xff]  }
 0x7bc   : > { %v15131_v58 = vld [vmem:[%s19330_s11 + $0x634] ss:$28 sps:$4 sm:$0xff]  }
 0x7bd   : > { %10145 = vmatmul.mubr.bf16.vlgmr.msra.gmra.mrb[104].mxu0 %v18106_v38  ;;  %10047 = vmatpush1.bf16.msra.mxu1 %v15053_v34  ;;  %v15129_v34 = vld [vmem:[%s19330_s11 + $0x630] ss:$28 sps:$4 sm:$0xff]  }
 0x7be   : > { %12578 = vmatpush3.bf16.msra.mxu0 %v15057_v62  ;;  %10184 = vmatprep.mubr.bf16.mxu0 %v18118_v31  ;;  %v15134_v62 = vld [vmem:[%s19330_s11 + $0x66c] ss:$28 sps:$4 sm:$0xff]  }
 0x7bf   : > { %10048 = vmatprep.subr.bf16.mxu1 %v15060_v3  ;;  %12579 = vmatprep.subr.bf16.mxu0 %v15061_v8  ;;  %v15132_v3 = vld [vmem:[%s19330_s11 + $0x668] ss:$28 sps:$4 sm:$0xff]  }
 0x7c0   : > { %v15137_v8 = vld [vmem:[%s19330_s11 + $0x6a4] ss:$28 sps:$4 sm:$0xff]  }
 0x7c1   : > { %10049 = vmatpush1.bf16.msra.mxu1 %v15058_v13  ;;  %v15135_v13 = vld [vmem:[%s19330_s11 + $0x6a0] ss:$28 sps:$4 sm:$0xff]  }
 0x7c2   : > { %12580 = vmatpush3.bf16.msra.mxu0 %v15062_v12  ;;  %10050 = vmatprep.subr.bf16.mxu1 %v15065_v37  ;;  %v15140_v12 = vld [vmem:[%s19330_s11 + $0x6dc] ss:$28 sps:$4 sm:$0xff]  }
 0x7c3   : > { %12581 = vmatprep.subr.bf16.mxu0 %v15066_v23  ;;  %v15138_v37 = vld [vmem:[%s19330_s11 + $0x6d8] ss:$28 sps:$4 sm:$0xff]  }
 0x7c5   : > { %10051 = vmatpush1.bf16.msra.mxu1 %v15063_v25 }
 0x7c6   : > { %12582 = vmatpush3.bf16.msra.mxu0 %v15067_v35  ;;  %10052 = vmatprep.subr.bf16.mxu1 %v15070_v36 }
 0x7c7   : > { %12583 = vmatprep.subr.bf16.mxu0 %v15071_v40 }
 0x7c9   : > { %10053 = vmatpush1.bf16.msra.mxu1 %v15068_v42 }
 0x7ca   : > { %12584 = vmatpush3.bf16.msra.mxu0 %v15072_v45  ;;  %10054 = vmatprep.subr.bf16.mxu1 %v15075_v53 }
 0x7cb   : > { %12585 = vmatprep.subr.bf16.mxu0 %v15076_v61  ;;  %v10246_v61 = vld [vmem:[%s19332_s13 + $0x80] sm:$0xff] }
 0x7cd   : > { %10055 = vmatpush1.bf16.msra.mxu1 %v15073_v21  ;;  %v10230_v21 = vld [vmem:[%s19332_s13] sm:$0xff] }
 0x7ce   : > { %12586 = vmatpush3.bf16.msra.mxu0 %v15077_v17  ;;  %10056 = vmatprep.subr.bf16.mxu1 %v15080_v7  ;;  %v10231_v7 = vld [vmem:[%s19332_s13 + $0x8] sm:$0xff] }
 0x7cf   : > { %12587 = vmatprep.subr.bf16.mxu0 %v15081_v20  ;;  %v10310_v20 = vld [vmem:[%s19332_s13 + $0x280] sm:$0xff] }
 0x7d1   : > { %10057 = vmatpush1.bf16.msra.mxu1 %v15078_v10  ;;  %v10311_v10 = vld [vmem:[%s19332_s13 + $0x288] sm:$0xff] }
 0x7d2   : > { %12588 = vmatpush3.bf16.msra.mxu0 %v15082_v48  ;;  %10058 = vmatprep.subr.bf16.mxu1 %v15085_v27  ;;  %v13655_v48 = vpack.c.bf16 %v10231_v7, %v10230_v21  ;;  %v13717_v27 = vpack.c.bf16 %v10311_v10, %v10310_v20  ;;  %v8677_v21 = vld [vmem:[%s19331_s12] sm:$0x7f] }
 0x7d3   : > { %12589 = vmatprep.subr.bf16.mxu0 %v15086_v57  ;;  %v10294_v57 = vld [vmem:[%s19332_s13 + $0x200] sm:$0xff] }
 0x7d5   : > { %10059 = vmatpush1.bf16.msra.mxu1 %v15083_v4  ;;  %v10295_v4 = vld [vmem:[%s19332_s13 + $0x208] sm:$0xff] }
 0x7d6   : > { %12590 = vmatpush3.bf16.msra.mxu0 %v15087_v60  ;;  %10060 = vmatprep.subr.bf16.mxu1 %v15090_v26  ;;  %v10248_v60 = vld [vmem:[%s19332_s13 + $0x90] sm:$0xff]  ;;  %v13719_v26 = vpack.c.bf16 %v10295_v4, %v10294_v57 }
 0x7d7   : > { %12591 = vmatprep.subr.bf16.mxu0 %v15091_v63  ;;  %v10249_v63 = vld [vmem:[%s19332_s13 + $0x98] sm:$0xff] }
 0x7d9   : > { %10061 = vmatpush1.bf16.msra.mxu1 %v15088_v14  ;;  %v10232_v14 = vld [vmem:[%s19332_s13 + $0x10] sm:$0xff] }
 0x7da   : > { %12592 = vmatpush3.bf16.msra.mxu0 %v15092_v16  ;;  %10071 = vmatprep.subr.bf16.mxu1 %v15095_v30  ;;  %v10233_v16 = vld [vmem:[%s19332_s13 + $0x18] sm:$0xff]  ;;  %v13657_v30 = vpack.c.bf16 %v10249_v63, %v10248_v60  ;;  %v9849_v60 = vsub.s32 4, %v17214_v11  ;;  %v9853_v63 = vsub.s32 5, %v17214_v11 }
 0x7dc   : > { %10063 = vmatmul.mubr.bf16.vlgmr.msra.gmra.mrb[44].mxu1 %v18106_v38  ;;  %v15104_v38 = vld [vmem:[%s19330_s11 + $0x43c] ss:$28 sps:$4 sm:$0xff]  }
 0x7dd   : > { %10185 = vmatmul.mubr.bf16.vlgmr.msra.gmra.mrb[108].mxu0 %v18309_v43  ;;  %10072 = vmatpush1.bf16.msra.mxu1 %v15093_v18  ;;  %v13659_v18 = vpack.c.bf16 %v10233_v16, %v10232_v14  ;;  %v9834_v14 = vrot.slane %v8677_v21, %v17217_v24  ;;  %v9838_v16 = vrot.slane %v8677_v21, %v17223_v59 }
 0x7de   : > { %10103 = vmatprep.mubr.bf16.mxu1 %v18118_v31  ;;  %10073 = vmatprep.subr.bf16.mxu1 %v15098_v29  ;;  %v15102_v31 = vld [vmem:[%s19330_s11 + $0x438] ss:$28 sps:$4 sm:$0xff]  }
 0x7df   : > { %v10312_v29 = vld [vmem:[%s19332_s13 + $0x290] sm:$0xff] }
 0x7e1   : > { %10074 = vmatpush1.bf16.msra.mxu1 %v15096_v41  ;;  %v10313_v41 = vld [vmem:[%s19332_s13 + $0x298] sm:$0xff] }
 0x7e2   : > { %10075 = vmatprep.subr.bf16.mxu1 %v15101_v33  ;;  %v10296_v33 = vld [vmem:[%s19332_s13 + $0x210] sm:$0xff] }
 0x7e5   : > { %10076 = vmatpush1.bf16.msra.mxu1 %v15099_v2  ;;  %v13721_v2 = vpack.c.bf16 %v10313_v41, %v10312_v29  ;;  %v9846_v29 = vrot.slane %v8677_v21, %v8411_v39  ;;  %v9854_v41 = vrot.slane %v8677_v21, %v9853_v63 }
 0x7e6   : > { %10077 = vmatprep.subr.bf16.mxu1 %v15104_v38  ;;  %v10297_v38 = vld [vmem:[%s19332_s13 + $0x218] sm:$0xff] }
 0x7e9   : > { %10078 = vmatpush1.bf16.msra.mxu1 %v15102_v31  ;;  %v10250_v31 = vld [vmem:[%s19332_s13 + $0xa0] sm:$0xff] }
 0x7ea   : > { %10079 = vmatprep.subr.bf16.mxu1 %v15107_v1  ;;  %v10251_v1 = vld [vmem:[%s19332_s13 + $0xa8] sm:$0xff] }
 0x7ed   : > { %10080 = vmatpush1.bf16.msra.mxu1 %v15105_v28  ;;  %v13723_v28 = vpack.c.bf16 %v10297_v38, %v10296_v33 }
 0x7ee   : > { %10081 = vmatprep.subr.bf16.mxu1 %v15110_v22  ;;  %v13661_v22 = vpack.c.bf16 %v10251_v1, %v10250_v31 }
 0x7f1   : > { %10082 = vmatpush1.bf16.msra.mxu1 %v15108_v32  ;;  %v10234_v32 = vld [vmem:[%s19332_s13 + $0x20] sm:$0xff] }
 0x7f2   : > { %10083 = vmatprep.subr.bf16.mxu1 %v15113_v50  ;;  %v10235_v50 = vld [vmem:[%s19332_s13 + $0x28] sm:$0xff] }
 0x7f5   : > { %10084 = vmatpush1.bf16.msra.mxu1 %v15111_v51  ;;  %v10314_v51 = vld [vmem:[%s19332_s13 + $0x2a0] sm:$0xff] }
 0x7f6   : > { %10085 = vmatprep.subr.bf16.mxu1 %v15116_v46  ;;  %v10315_v46 = vld [vmem:[%s19332_s13 + $0x2a8] sm:$0xff] }
 0x7f9   : > { %10086 = vmatpush1.bf16.msra.mxu1 %v15114_v52  ;;  %v10298_v52 = vld [vmem:[%s19332_s13 + $0x220] sm:$0xff] }
 0x7fa   : > { %10087 = vmatprep.subr.bf16.mxu1 %v15119_v47  ;;  %v10299_v47 = vld [vmem:[%s19332_s13 + $0x228] sm:$0xff] }
 0x7fd   : > { %10088 = vmatpush1.bf16.msra.mxu1 %v15117_v54  ;;  %v13663_v54 = vpack.c.bf16 %v10235_v50, %v10234_v32 }
 0x7fe   : > { %10089 = vmatprep.subr.bf16.mxu1 %v15122_v49  ;;  %v13725_v49 = vpack.c.bf16 %v10315_v46, %v10314_v51 }
 0x801   : > { %10090 = vmatpush1.bf16.msra.mxu1 %v15120_v19  ;;  %v10252_v19 = vld [vmem:[%s19332_s13 + $0xb0] sm:$0xff] }
 0x802   : > { %10091 = vmatprep.subr.bf16.mxu1 %v15125_v55  ;;  %v10253_v55 = vld [vmem:[%s19332_s13 + $0xb8] sm:$0xff] }
 0x805   : > { %10092 = vmatpush1.bf16.msra.mxu1 %v15123_v56  ;;  %v10236_v56 = vld [vmem:[%s19332_s13 + $0x30] sm:$0xff] }
 0x806   : > { %10093 = vmatprep.subr.bf16.mxu1 %v15128_v44  ;;  %v13727_v44 = vpack.c.bf16 %v10299_v47, %v10298_v52 }
 0x809   : > { %10094 = vmatpush1.bf16.msra.mxu1 %v15126_v9  ;;  %v13665_v9 = vpack.c.bf16 %v10253_v55, %v10252_v19  ;;  %v10238_v55 = vld [vmem:[%s19332_s13 + $0x40] sm:$0xff] }
 0x80a   : > { %10095 = vmatprep.subr.bf16.mxu1 %v15131_v58  ;;  %v10237_v58 = vld [vmem:[%s19332_s13 + $0x38] sm:$0xff] }
 0x80d   : > { %10096 = vmatpush1.bf16.msra.mxu1 %v15129_v34  ;;  %v10316_v34 = vld [vmem:[%s19332_s13 + $0x2b0] sm:$0xff] }
 0x80e   : > { %10097 = vmatprep.subr.bf16.mxu1 %v15134_v62  ;;  %v10317_v62 = vld [vmem:[%s19332_s13 + $0x2b8] sm:$0xff] }
 0x811   : > { %10098 = vmatpush1.bf16.msra.mxu1 %v15132_v3  ;;  %v13729_v3 = vpack.c.bf16 %v10317_v62, %v10316_v34  ;;  %v10302_v34 = vld [vmem:[%s19332_s13 + $0x240] sm:$0xff]  ;;  %v10303_v62 = vld [vmem:[%s19332_s13 + $0x248] sm:$0xff] }
 0x812   : > { %10099 = vmatprep.subr.bf16.mxu1 %v15137_v8  ;;  %v10300_v8 = vld [vmem:[%s19332_s13 + $0x230] sm:$0xff] }
 0x815   : > { %10100 = vmatpush1.bf16.msra.mxu1 %v15135_v13  ;;  %v10301_v13 = vld [vmem:[%s19332_s13 + $0x238] sm:$0xff] }
 0x816   : > { %10101 = vmatprep.subr.bf16.mxu1 %v15140_v12  ;;  %v13667_v12 = vpack.c.bf16 %v10237_v58, %v10236_v56  ;;  %v10239_v56 = vld [vmem:[%s19332_s13 + $0x48] sm:$0xff] }
 0x817   : > { %v10319_v58 = vld [vmem:[%s19332_s13 + $0x2c8] sm:$0xff] }
 0x819   : > { %10102 = vmatpush1.bf16.msra.mxu1 %v15138_v37  ;;  %v13731_v37 = vpack.c.bf16 %v10301_v13, %v10300_v8  ;;  %v13735_v8 = vpack.c.bf16 %v10303_v62, %v10302_v34  ;;  %v10256_v13 = vld [vmem:[%s19332_s13 + $0xd0] sm:$0xff] }
 0x81a   : > { %13718 = vmatprep.subr.bf16.mxu1 %v13717_v27 }
 0x81c   : > { %10104 = vmatmul.mubr.bf16.vlgmr.msra.gmra.mrb[44].mxu1 %v18309_v43  ;;  %v10247_v43 = vld [vmem:[%s19332_s13 + $0x88] sm:$0xff] }
 0x81d   : > { %v13653_v17 = vpack.c.bf16 %v10247_v43, %v10246_v61  ;;  %13720 = vmatpush3.bf16.msra.mxu1 %v13719_v26  ;;  %v9857_v43 = vsub.s32 6, %v17214_v11  ;;  %v9842_v26 = vrot.slane %v8677_v21, %v8407_v5 }
 0x81e   : > { %13722 = vmatprep.subr.bf16.mxu1 %v13721_v2 }
 0x81f   : > { %13654 = vmatprep.subr.bf16.mxu0 %v13653_v17  ;;  %v9858_v17 = vrot.slane %v8677_v21, %v9857_v43  ;;  %v10304_v43 = vld [vmem:[%s19332_s13 + $0x250] sm:$0xff] }
 0x820   : > { %13656 = vmatpush3.bf16.msra.mxu0 %v13655_v48 }
 0x821   : > { %13658 = vmatprep.subr.bf16.mxu0 %v13657_v30  ;;  %13724 = vmatpush3.bf16.msra.mxu1 %v13723_v28  ;;  %v9850_v30 = vrot.slane %v8677_v21, %v9849_v60  ;;  %v10305_v21 = vld [vmem:[%s19332_s13 + $0x258] sm:$0xff]  ;;  %v10322_v60 = vld [vmem:[%s19332_s13 + $0x2e0] sm:$0xff] }
 0x822   : > { %13726 = vmatprep.subr.bf16.mxu1 %v13725_v49  ;;  %v10255_v49 = vld [vmem:[%s19332_s13 + $0xc8] sm:$0xff] }
 0x824   : > { %13660 = vmatpush3.bf16.msra.mxu0 %v13659_v18 }
 0x825   : > { %13662 = vmatprep.subr.bf16.mxu0 %v13661_v22  ;;  %13728 = vmatpush3.bf16.msra.mxu1 %v13727_v44  ;;  %v10318_v44 = vld [vmem:[%s19332_s13 + $0x2c0] sm:$0xff] }
 0x826   : > { %13730 = vmatprep.subr.bf16.mxu1 %v13729_v3  ;;  %v13733_v3 = vpack.c.bf16 %v10319_v58, %v10318_v44 }
 0x828   : > { %13664 = vmatpush3.bf16.msra.mxu0 %v13663_v54  ;;  %v10254_v54 = vld [vmem:[%s19332_s13 + $0xc0] sm:$0xff] }
 0x829   : > { %13666 = vmatprep.subr.bf16.mxu0 %v13665_v9  ;;  %13732 = vmatpush3.bf16.msra.mxu1 %v13731_v37  ;;  %v13669_v19 = vpack.c.bf16 %v10255_v49, %v10254_v54  ;;  %v13671_v9 = vpack.c.bf16 %v10239_v56, %v10238_v55 }
 0x82a   : > { %13734 = vmatprep.subr.bf16.mxu1 %v13733_v3 }
 0x82c   : > { %13668 = vmatpush3.bf16.msra.mxu0 %v13667_v12  ;;  %v10257_v12 = vld [vmem:[%s19332_s13 + $0xd8] sm:$0xff] }
 0x82d   : > { %13670 = vmatprep.subr.bf16.mxu0 %v13669_v19  ;;  %v13673_v37 = vpack.c.bf16 %v10257_v12, %v10256_v13  ;;  %13736 = vmatpush3.bf16.msra.mxu1 %v13735_v8  ;;  %v10264_v8 = vld [vmem:[%s19332_s13 + $0x110] sm:$0xff]  ;;  %v10265_v13 = vld [vmem:[%s19332_s13 + $0x118] sm:$0xff]  ;;  %v10282_v12 = vld [vmem:[%s19332_s13 + $0x1a0] sm:$0xff] }
 0x830   : > { %13672 = vmatpush3.bf16.msra.mxu0 %v13671_v9 }
 0x831   : > { %13674 = vmatprep.subr.bf16.mxu0 %v13673_v37  ;;  %v10283_v37 = vld [vmem:[%s19332_s13 + $0x1a8] sm:$0xff] }
 0x86f   : > { %v18600_v23 = vpop.f32.mrb[40].mxu1  ;;  %v18602_v25 = vpop.f32.mrb[100].mxu0 }
 0x870   : > { %v18604_v35 = vpop.f32.mrb[41].mxu1  ;;  %v18606_v36 = vpop.f32.mrb[101].mxu0  ;;  %v18717_v18 = vadd.f32 %v18602_v25, %v9842_v26  ;;  %v18722_v33 = vadd.f32 %v18600_v23, %v9834_v14  ;;  %v10323_v26 = vld [vmem:[%s19332_s13 + $0x2e8] sm:$0xff] }
 0x871   : > { %v9945_v40 = vpop.f32.mrb[42].mxu1  ;;  %v10027_v42 = vpop.f32.mrb[102].mxu0  ;;  %v18725_v5 = vadd.f32 %v18604_v35, %v9838_v16  ;;  %v18733_v11 = vadd.f32 %v18606_v36, %v9846_v29  ;;  %v13741_v14 = vpack.c.bf16 %v10323_v26, %v10322_v60  ;;  %v10306_v16 = vld [vmem:[%s19332_s13 + $0x260] sm:$0xff]  ;;  %v10260_v29 = vld [vmem:[%s19332_s13 + $0xf0] sm:$0xff]  ;;  %v10287_v60 = vld [vmem:[%s19332_s13 + $0x1c8] sm:$0xff] }
 0x872   : > { %v9946_v45 = vpop.f32.mrb[43].mxu1  ;;  %v10028_v53 = vpop.f32.mrb[103].mxu0  ;;  %v10195_v25 = vsel %vm10192_vm7, %v18717_v18, -inf  ;;  %v10193_v31 = vsel %vm10192_vm7, %v18722_v33, -inf }
 0x873   : > { %v10194_v22 = vsel %vm10192_vm7, %v18725_v5, -inf  ;;  %v10196_v51 = vsel %vm10192_vm7, %v18733_v11, -inf }
 0x890   : > { %v12571_v40 = vpop.f32.mrb[104].mxu0 }
 0x891   : > { %v12572_v42 = vpop.f32.mrb[105].mxu0 }
 0x892   : > { %v12573_v45 = vadd.f32 %v12572_v42, %v12571_v40  ;;  %v12574_v53 = vpop.f32.mrb[106].mxu0  ;;  %v10240_v40 = vld [vmem:[%s19332_s13 + $0x50] sm:$0xff]  ;;  %v10241_v42 = vld [vmem:[%s19332_s13 + $0x58] sm:$0xff] }
 0x893   : > { %v12575_v61 = vpop.f32.mrb[107].mxu0  ;;  %v13675_v53 = vpack.c.bf16 %v10241_v42, %v10240_v40 }
 0x894   : > { %v10147_v10 = vadd.f32 %v12573_v45, %v9858_v17  ;;  %v10320_v45 = vld [vmem:[%s19332_s13 + $0x2d0] sm:$0xff]  ;;  %v10321_v61 = vld [vmem:[%s19332_s13 + $0x2d8] sm:$0xff] }
 0x895   : > { %v13737_v17 = vpack.c.bf16 %v10321_v61, %v10320_v45  ;;  %13676 = vmatpush3.bf16.msra.mxu0 %v13675_v53  ;;  %v13691_v45 = vpack.c.bf16 %v10265_v13, %v10264_v8  ;;  %v13693_v61 = vpack.c.bf16 %v10283_v37, %v10282_v12  ;;  %v10628_v8 = vld [vmem:[%s19333_s14 + $0x40] sm:$0xff]  ;;  %v10623_v13 = vld [vmem:[%s19333_s14 + $0x18] sm:$0xff]  ;;  %v10630_v37 = vld [vmem:[%s19333_s14 + $0x50] sm:$0xff] }
 0x897   : > { %13738 = vmatprep.subr.bf16.mxu1 %v13737_v17  ;;  %v10284_v17 = vld [vmem:[%s19332_s13 + $0x1b0] sm:$0xff] }
 0x8b0   : > { %v12593_v7 = vpop.f32.mrb[108].mxu0 }
 0x8b1   : > { %v12594_v20 = vpop.f32.mrb[109].mxu0 }
 0x8b2   : > { %v12595_v48 = vadd.f32 %v12594_v20, %v12593_v7  ;;  %v12596_v27 = vpop.f32.mrb[110].mxu0  ;;  %v13739_v7 = vpack.c.bf16 %v10305_v21, %v10304_v43  ;;  %v10258_v20 = vld [vmem:[%s19332_s13 + $0xe0] sm:$0xff]  ;;  %v10267_v21 = vld [vmem:[%s19332_s13 + $0x128] sm:$0xff] }
 0x8b3   : > { %v12597_v57 = vpop.f32.mrb[111].mxu0  ;;  %v10266_v43 = vld [vmem:[%s19332_s13 + $0x120] sm:$0xff] }
 0x8b4   : > { %v18708_v4 = vadd.f32 %v12595_v48, %v10147_v10  ;;  %v10259_v10 = vld [vmem:[%s19332_s13 + $0xe8] sm:$0xff]  ;;  %v10242_v48 = vld [vmem:[%s19332_s13 + $0x60] sm:$0xff]  ;;  %13740 = vmatpush3.bf16.msra.mxu1 %v13739_v7  ;;  %v10285_v7 = vld [vmem:[%s19332_s13 + $0x1b8] sm:$0xff] }
 0x8b5   : > { %v13677_v27 = vpack.c.bf16 %v10259_v10, %v10258_v20  ;;  %v10243_v57 = vld [vmem:[%s19332_s13 + $0x68] sm:$0xff]  ;;  %13742 = vmatprep.subr.bf16.mxu1 %v13741_v14  ;;  %v13695_v20 = vpack.c.bf16 %v10267_v21, %v10266_v43  ;;  %v13697_v10 = vpack.c.bf16 %v10285_v7, %v10284_v17  ;;  %v10270_v14 = vld [vmem:[%s19332_s13 + $0x140] sm:$0xff]  ;;  %v13779_v43 = vpack.c.bf16 %v10630_v37, %v10623_v13  ;;  %v10622_v17 = vld [vmem:[%s19333_s14 + $0x10] sm:$0xff] }
 0x8b6   : > { %v10202_v24 = vsel %vm10201_vm6, %v18708_v4, -inf  ;;  %v13679_v63 = vpack.c.bf16 %v10243_v57, %v10242_v48  ;;  %v10268_v48 = vld [vmem:[%s19332_s13 + $0x130] sm:$0xff]  ;;  %v10286_v57 = vld [vmem:[%s19332_s13 + $0x1c0] sm:$0xff]  ;;  %v10629_v7 = vld [vmem:[%s19333_s14 + $0x48] sm:$0xff] }
 0x8b7   : > { %v10203_v28 = vmax.f32 %v10195_v25, %v10202_v24  ;;  %13678 = vmatprep.subr.bf16.mxu0 %v13677_v27  ;;  %v10261_v24 = vld [vmem:[%s19332_s13 + $0xf8] sm:$0xff] }
 0x8b8   : > { %13680 = vmatpush3.bf16.msra.mxu0 %v13679_v63  ;;  %v13681_v25 = vpack.c.bf16 %v10261_v24, %v10260_v29  ;;  %v10269_v27 = vld [vmem:[%s19332_s13 + $0x138] sm:$0xff]  ;;  %v13701_v63 = vpack.c.bf16 %v10287_v60, %v10286_v57  ;;  %v10644_v57 = vld [vmem:[%s19333_s14 + $0xc0] sm:$0xff] }
 0x8b9   : > { %v10205_v52 = vmax.f32 %v10203_v28, %v10196_v51  ;;  %v13699_v26 = vpack.c.bf16 %v10269_v27, %v10268_v48  ;;  %v10289_v29 = vld [vmem:[%s19332_s13 + $0x1d8] sm:$0xff]  ;;  %v10642_v48 = vld [vmem:[%s19333_s14 + $0xb0] sm:$0xff]  ;;  %v10637_v27 = vld [vmem:[%s19333_s14 + $0x88] sm:$0xff] }
 0x8ba   : > { %13682 = vmatprep.subr.bf16.mxu0 %v13681_v25  ;;  %v10273_v25 = vld [vmem:[%s19332_s13 + $0x158] sm:$0xff] }
 0x8bb   : > { %v10683_v13 = vld [vmem:[%s19333_s14 + $0x1f8] sm:$0xff] }
 0x8ef   : > { %v10105_v2 = vpop.f32.mrb[44].mxu1 }
 0x8f0   : > { %v18728_v59 = vadd.f32 %v10105_v2, %v9850_v30  ;;  %v10107_v38 = vpop.f32.mrb[45].mxu1  ;;  %v10307_v30 = vld [vmem:[%s19332_s13 + $0x268] sm:$0xff]  ;;  %v10244_v2 = vld [vmem:[%s19332_s13 + $0x70] sm:$0xff] }
 0x8f1   : > { %v18735_v39 = vadd.f32 %v10107_v38, %v9854_v41  ;;  %v10109_v23 = vpop.f32.mrb[46].mxu1  ;;  %v13743_v41 = vpack.c.bf16 %v10307_v30, %v10306_v16  ;;  %v10245_v38 = vld [vmem:[%s19332_s13 + $0x78] sm:$0xff]  ;;  %v10271_v16 = vld [vmem:[%s19332_s13 + $0x148] sm:$0xff]  ;;  %v10288_v30 = vld [vmem:[%s19332_s13 + $0x1d0] sm:$0xff] }
 0x8f2   : > { %v10197_v35 = vsel %vm10192_vm7, %v18728_v59, -inf  ;;  %v10110_v1 = vpop.f32.mrb[47].mxu1  ;;  %v13683_v23 = vpack.c.bf16 %v10245_v38, %v10244_v2  ;;  %v13703_v24 = vpack.c.bf16 %v10271_v16, %v10270_v14  ;;  %v13705_v2 = vpack.c.bf16 %v10289_v29, %v10288_v30  ;;  %v10272_v38 = vld [vmem:[%s19332_s13 + $0x150] sm:$0xff]  ;;  %v10641_v14 = vld [vmem:[%s19333_s14 + $0xa8] sm:$0xff]  ;;  %v10636_v16 = vld [vmem:[%s19333_s14 + $0x80] sm:$0xff] }
 0x8f3   : > { %v10198_v32 = vmax.f32 %v10193_v31, %v10197_v35  ;;  %v10199_v50 = vsel %vm10192_vm7, %v18735_v39, -inf  ;;  %v10324_v31 = vld [vmem:[%s19332_s13 + $0x2f0] sm:$0xff]  ;;  %v10325_v35 = vld [vmem:[%s19332_s13 + $0x2f8] sm:$0xff]  ;;  %13744 = vmatpush3.bf16.msra.mxu1 %v13743_v41 }
 0x8f4   : > { %v10200_v36 = vmax.f32 %v10194_v22, %v10199_v50  ;;  %v10308_v1 = vld [vmem:[%s19332_s13 + $0x270] sm:$0xff]  ;;  %v13745_v28 = vpack.c.bf16 %v10325_v35, %v10324_v31  ;;  %v10309_v22 = vld [vmem:[%s19332_s13 + $0x278] sm:$0xff]  ;;  %v10278_v50 = vld [vmem:[%s19332_s13 + $0x180] sm:$0xff]  ;;  %13684 = vmatpush3.bf16.msra.mxu0 %v13683_v23  ;;  %v13707_v35 = vpack.c.bf16 %v10273_v25, %v10272_v38 }
 0x8f5   : > { %v10290_v23 = vld [vmem:[%s19332_s13 + $0x1e0] sm:$0xff]  ;;  %v10643_v29 = vld [vmem:[%s19333_s14 + $0xb8] sm:$0xff] }
 0x8f6   : > { %v10204_v46 = vmax.f32 %v10198_v32, %v10200_v36  ;;  %v13747_v32 = vpack.c.bf16 %v10309_v22, %v10308_v1  ;;  %v10279_v36 = vld [vmem:[%s19332_s13 + $0x188] sm:$0xff]  ;;  %13746 = vmatprep.subr.bf16.mxu1 %v13745_v28  ;;  %v10274_v28 = vld [vmem:[%s19332_s13 + $0x160] sm:$0xff]  ;;  %v10651_v38 = vld [vmem:[%s19333_s14 + $0xf8] sm:$0xff] }
 0x8f7   : > { %v13685_v51 = vpack.c.bf16 %v10279_v36, %v10278_v50  ;;  %v10275_v22 = vld [vmem:[%s19332_s13 + $0x168] sm:$0xff]  ;;  %v10293_v50 = vld [vmem:[%s19332_s13 + $0x1f8] sm:$0xff] }
 0x8f8   : > { %v10206_v47 = vmax.f32 %v10204_v46, %v10205_v52  ;;  %13748 = vmatpush3.bf16.msra.mxu1 %v13747_v32  ;;  %v10292_v32 = vld [vmem:[%s19332_s13 + $0x1f0] sm:$0xff]  ;;  %v13711_v36 = vpack.c.bf16 %v10275_v22, %v10274_v28  ;;  %v10657_v22 = vld [vmem:[%s19333_s14 + $0x128] sm:$0xff] }
 0x8f9   : > { %13686 = vmatprep.subr.bf16.mxu0 %v13685_v51  ;;  %v13713_v51 = vpack.c.bf16 %v10293_v50, %v10292_v32  ;;  %v10663_v50 = vld [vmem:[%s19333_s14 + $0x158] sm:$0xff] }
 0x8fa   : > { %10207 = vmax.xlane.f32.xlu0 %v10206_v47 }
 0x987   : > { %v18849_v46 = vpop.xlane.xlu0 %10207 }
 0x988   : > { %v10209_v52 = vsub.f32 %v18722_v33, %v18849_v46  ;;  %v10210_v47 = vsub.f32 %v18725_v5, %v18849_v46  ;;  %v10212_v54 = vsub.f32 %v18733_v11, %v18849_v46  ;;  %v10213_v49 = vsub.f32 %v18728_v59, %v18849_v46  ;;  %v10262_v33 = vld [vmem:[%s19332_s13 + $0x100] sm:$0xff]  ;;  %v10263_v5 = vld [vmem:[%s19332_s13 + $0x108] sm:$0xff]  ;;  %v10280_v59 = vld [vmem:[%s19332_s13 + $0x190] sm:$0xff] }
 0x989   : > { %v10214_v19 = vsub.f32 %v18735_v39, %v18849_v46  ;;  %v10281_v11 = vld [vmem:[%s19332_s13 + $0x198] sm:$0xff]  ;;  %v13687_v34 = vpack.c.bf16 %v10263_v5, %v10262_v33  ;;  %v10211_v41 = vsub.f32 %v18717_v18, %v18849_v46  ;;  %v10291_v18 = vld [vmem:[%s19332_s13 + $0x1e8] sm:$0xff]  ;;  %v10330_v5 = vld [vmem:[%s19332_s13 + $0x320] sm:$0xff] }
 0x98a   : > { %v10216_v55 = vmul.f32 1.442695, %v10209_v52  ;;  %v10218_v56 = vmul.f32 1.442695, %v10210_v47  ;;  %v10222_v44 = vmul.f32 1.442695, %v10212_v54  ;;  %v13689_v3 = vpack.c.bf16 %v10281_v11, %v10280_v59 }
 0x98b   : > { %v10224_v9 = vmul.f32 1.442695, %v10213_v49  ;;  %v10226_v58 = vmul.f32 1.442695, %v10214_v19  ;;  %v10220_v31 = vmul.f32 1.442695, %v10211_v41  ;;  %v13709_v1 = vpack.c.bf16 %v10291_v18, %v10290_v23 }
 0x98c   : > { %15141 = vpow2.f32 %v10216_v55  ;;  %v10276_v52 = vld [vmem:[%s19332_s13 + $0x170] sm:$0xff]  ;;  %v10277_v47 = vld [vmem:[%s19332_s13 + $0x178] sm:$0xff]  ;;  %v10215_v54 = vsub.f32 %v18708_v4, %v18849_v46  ;;  %v10326_v19 = vld [vmem:[%s19332_s13 + $0x300] sm:$0xff]  ;;  %v13785_v41 = vpack.c.bf16 %v10643_v29, %v10636_v16 }
 0x98d   : > { %15143 = vpow2.f32 %v10218_v56  ;;  %v13715_v49 = vpack.c.bf16 %v10277_v47, %v10276_v52  ;;  %v10327_v55 = vld [vmem:[%s19332_s13 + $0x308] sm:$0xff]  ;;  %v10328_v4 = vld [vmem:[%s19332_s13 + $0x310] sm:$0xff]  ;;  %v10329_v46 = vld [vmem:[%s19332_s13 + $0x318] sm:$0xff] }
 0x98e   : > { %15145 = vpow2.f32 %v10222_v44  ;;  %v10228_v56 = vmul.f32 1.442695, %v10215_v54  ;;  %v13750_v44 = vpack.c.bf16 %v10327_v55, %v10326_v19  ;;  %v13753_v33 = vpack.c.bf16 %v10329_v46, %v10328_v4  ;;  %v10331_v59 = vld [vmem:[%s19332_s13 + $0x328] sm:$0x3]  ;;  %v10658_v23 = vld [vmem:[%s19333_s14 + $0x130] sm:$0xff]  ;;  %v10672_v47 = vld [vmem:[%s19333_s14 + $0x1a0] sm:$0xff] }
 0x98f   : > { %15147 = vpow2.f32 %v10224_v9  ;;  %v15291_v9 = vmov 0.0|0.0   ;;  %v13756_v11 = vpack.c.bf16 %v10331_v59, %v10330_v5  ;;  %v13787_v18 = vpack.c.bf16 %v10658_v23, %v10651_v38  ;;  %v10662_v54 = vld [vmem:[%s19333_s14 + $0x150] sm:$0xff]  ;;  %v10677_v4 = vld [vmem:[%s19333_s14 + $0x1c8] sm:$0xff]  ;;  %v10679_v5 = vld [vmem:[%s19333_s14 + $0x1d8] sm:$0xff] }
 0x990   : > { %15149 = vpow2.f32 %v10226_v58  ;;  %v10686_v59 = vld [vmem:[%s19333_s14 + $0x210] sm:$0xff]  ;;  %v10631_v38 = vld [vmem:[%s19333_s14 + $0x58] sm:$0xff]  ;;  %v10633_v23 = vld [vmem:[%s19333_s14 + $0x68] sm:$0xff] }
 0x991   : > { %15151 = vpow2.f32 %v10220_v31  ;;  %v10648_v31 = vld [vmem:[%s19333_s14 + $0xe0] sm:$0xff] }
 0x992   : > { %15153 = vpow2.f32 %v10228_v56  ;;  %v10664_v56 = vld [vmem:[%s19333_s14 + $0x160] sm:$0xff] }
 0x996   : > { %v18873_v39 = vpop.eup %15141 }
 0x997   : > { %v18875_v62 = vpop.eup %15143 }
 0x998   : > { %10404 = vmatprep.mubr.f32.mxu0 %v18875_v62  ;;  %v18890_v40 = vpop.eup %15145 }
 0x999   : > { %10405 = vmatmul.mubr.f32.vlgmr.msra.gmra.mrb[112].mxu0 %v18873_v39  ;;  %v18893_v42 = vpop.eup %15147 }
 0x99a   : > { %13688 = vmatpush3.bf16.msra.mxu0 %v13687_v34  ;;  %10474 = vmatprep.mubr.f32.mxu0 %v18890_v40  ;;  %v18896_v53 = vpop.eup %15149 }
 0x99b   : > { %13690 = vmatprep.subr.bf16.mxu0 %v13689_v3  ;;  %10544 = vmatprep.mubr.f32.mxu1 %v18896_v53  ;;  %v18984_v58 = vpop.eup %15151  ;;  %v10621_v3 = vld [vmem:[%s19333_s14 + $0x8] sm:$0xff] }
 0x99c   : > { %10545 = vmatmul.mubr.f32.vlgmr.msra.gmra.mrb[48].mxu1 %v18893_v42  ;;  %v18997_v34 = vpop.eup %15153  ;;  %v13759_v12 = vpack.c.bf16 %v10628_v8, %v10621_v3  ;;  %v13795_v3 = vpack.c.bf16 %v10686_v59, %v10679_v5  ;;  %v10676_v8 = vld [vmem:[%s19333_s14 + $0x1c0] sm:$0xff]  ;;  %v10667_v5 = vld [vmem:[%s19333_s14 + $0x178] sm:$0xff]  ;;  %v10674_v59 = vld [vmem:[%s19333_s14 + $0x1b0] sm:$0xff] }
 0x99d   : > { %10786 = vmatprep.mubr.f32.mxu1 %v15287_v0  ;;  %v13777_v37 = vpack.c.bf16 %v10683_v13, %v10676_v8  ;;  %v10666_v8 = vld [vmem:[%s19333_s14 + $0x170] sm:$0xff]  ;;  %v13811_v13 = vpack.c.bf16 %v10674_v59, %v10667_v5 }
 0x99e   : > { %13692 = vmatpush3.bf16.msra.mxu0 %v13691_v45  ;;  %v10620_v45 = vld [vmem:[%s19333_s14] sm:$0xff]  ;;  %13760 = vmatprep.subr.bf16.mxu1 %v13759_v12  ;;  %v10678_v12 = vld [vmem:[%s19333_s14 + $0x1d0] sm:$0xff] }
 0x99f   : > { %13694 = vmatprep.subr.bf16.mxu0 %v13693_v61  ;;  %v10627_v61 = vld [vmem:[%s19333_s14 + $0x38] sm:$0xff] }
 0x9a0   : > { %v13761_v21 = vpack.c.bf16 %v10627_v61, %v10620_v45  ;;  %v10685_v45 = vld [vmem:[%s19333_s14 + $0x208] sm:$0xff] }
 0x9a1   : > { %v13797_v61 = vpack.c.bf16 %v10685_v45, %v10678_v12  ;;  %v10673_v12 = vld [vmem:[%s19333_s14 + $0x1a8] sm:$0xff]  ;;  %v10675_v45 = vld [vmem:[%s19333_s14 + $0x1b8] sm:$0xff] }
 0x9a2   : > { %13696 = vmatpush3.bf16.msra.mxu0 %v13695_v20  ;;  %v10635_v20 = vld [vmem:[%s19333_s14 + $0x78] sm:$0xff]  ;;  %13762 = vmatpush1.bf16.msra.mxu1 %v13761_v21  ;;  %v10693_v21 = vld [vmem:[%s19333_s14 + $0x248] sm:$0x1] }
 0x9a3   : > { %13698 = vmatprep.subr.bf16.mxu0 %v13697_v10  ;;  %v13781_v10 = vpack.c.bf16 %v10629_v7, %v10622_v17  ;;  %v13763_v60 = vpack.c.bf16 %v10642_v48, %v10635_v20  ;;  %v10690_v17 = vld [vmem:[%s19333_s14 + $0x230] sm:$0x1]  ;;  %v10625_v7 = vld [vmem:[%s19333_s14 + $0x28] sm:$0xff]  ;;  %v10632_v20 = vld [vmem:[%s19333_s14 + $0x60] sm:$0xff] }
 0x9a4   : > { %v13799_v48 = vpack.c.bf16 %v10632_v20, %v10625_v7  ;;  %v10680_v7 = vld [vmem:[%s19333_s14 + $0x1e0] sm:$0xff] }
 0x9a5   : > { %13764 = vmatprep.subr.bf16.mxu1 %v13763_v60 }
 0x9a6   : > { %13700 = vmatpush3.bf16.msra.mxu0 %v13699_v26  ;;  %v13783_v26 = vpack.c.bf16 %v10644_v57, %v10637_v27 }
 0x9a7   : > { %13702 = vmatprep.subr.bf16.mxu0 %v13701_v63  ;;  %v10634_v63 = vld [vmem:[%s19333_s14 + $0x70] sm:$0xff] }
 0x9a8   : > { %v13765_v30 = vpack.c.bf16 %v10641_v14, %v10634_v63 }
 0x9aa   : > { %13704 = vmatpush3.bf16.msra.mxu0 %v13703_v24  ;;  %13766 = vmatpush1.bf16.msra.mxu1 %v13765_v30  ;;  %v10649_v24 = vld [vmem:[%s19333_s14 + $0xe8] sm:$0xff] }
 0x9ab   : > { %13706 = vmatprep.subr.bf16.mxu0 %v13705_v2  ;;  %v10656_v2 = vld [vmem:[%s19333_s14 + $0x120] sm:$0xff] }
 0x9ac   : > { %v13767_v25 = vpack.c.bf16 %v10656_v2, %v10649_v24  ;;  %v10624_v2 = vld [vmem:[%s19333_s14 + $0x20] sm:$0xff] }
 0x9ae   : > { %13708 = vmatpush3.bf16.msra.mxu0 %v13707_v35  ;;  %v10655_v35 = vld [vmem:[%s19333_s14 + $0x118] sm:$0xff]  ;;  %13768 = vmatprep.subr.bf16.mxu1 %v13767_v25  ;;  %v10626_v25 = vld [vmem:[%s19333_s14 + $0x30] sm:$0xff] }
 0x9af   : > { %13710 = vmatprep.subr.bf16.mxu0 %v13709_v1  ;;  %v10650_v1 = vld [vmem:[%s19333_s14 + $0xf0] sm:$0xff]  ;;  %v13769_v28 = vpack.c.bf16 %v10655_v35, %v10648_v31 }
 0x9b0   : > { %v13789_v32 = vpack.c.bf16 %v10657_v22, %v10650_v1  ;;  %v10646_v31 = vld [vmem:[%s19333_s14 + $0xd0] sm:$0xff]  ;;  %v13801_v1 = vpack.c.bf16 %v10631_v38, %v10624_v2 }
 0x9b1   : > { %13770 = vmatpush1.bf16.msra.mxu1 %v13769_v28  ;;  %v13820_v28 = vpack.c.bf16 %v10633_v23, %v10626_v25  ;;  %v10638_v22 = vld [vmem:[%s19333_s14 + $0x90] sm:$0xff] }
 0x9b2   : > { %13712 = vmatpush3.bf16.msra.mxu0 %v13711_v36  ;;  %v10670_v36 = vld [vmem:[%s19333_s14 + $0x190] sm:$0xff] }
 0x9b3   : > { %13714 = vmatprep.subr.bf16.mxu0 %v13713_v51  ;;  %v10665_v51 = vld [vmem:[%s19333_s14 + $0x168] sm:$0xff]  ;;  %v13771_v52 = vpack.c.bf16 %v10670_v36, %v10663_v50 }
 0x9b4   : > { %v13791_v19 = vpack.c.bf16 %v10672_v47, %v10665_v51  ;;  %v10645_v51 = vld [vmem:[%s19333_s14 + $0xc8] sm:$0xff]  ;;  %v10647_v47 = vld [vmem:[%s19333_s14 + $0xd8] sm:$0xff] }
 0x9b5   : > { %13772 = vmatprep.subr.bf16.mxu1 %v13771_v52  ;;  %v10640_v52 = vld [vmem:[%s19333_s14 + $0xa0] sm:$0xff] }
 0x9b6   : > { %13716 = vmatpush3.bf16.msra.mxu0 %v13715_v49  ;;  %v10669_v49 = vld [vmem:[%s19333_s14 + $0x188] sm:$0xff] }
 0x9b7   : > { %13749 = vmatprep.subr.bf16.mxu0 %v15291_v9  ;;  %v13773_v55 = vpack.c.bf16 %v10669_v49, %v10662_v54  ;;  %v10653_v54 = vld [vmem:[%s19333_s14 + $0x108] sm:$0xff]  ;;  %v10660_v49 = vld [vmem:[%s19333_s14 + $0x140] sm:$0xff] }
 0x9b9   : > { %10475 = vmatmul.mubr.f32.vlgmr.msra.gmra.mrb[114].mxu0 %v18984_v58  ;;  %13774 = vmatpush1.bf16.msra.mxu1 %v13773_v55  ;;  %v13823_v55 = vpack.c.bf16 %v10647_v47, %v10640_v52 }
 0x9ba   : > { %13751 = vmatpush3.bf16.msra.mxu0 %v13750_v44  ;;  %13625 = vmatprep.mubr.msk.f32.mxu0 %vm15288_vm0, %v15287_v0  ;;  %v10671_v44 = vld [vmem:[%s19333_s14 + $0x198] sm:$0xff] }
 0x9bb   : > { %13752 = vmatprep.subr.bf16.mxu0 %v15291_v9  ;;  %v13793_v46 = vpack.c.bf16 %v10671_v44, %v10664_v56  ;;  %v10652_v56 = vld [vmem:[%s19333_s14 + $0x100] sm:$0xff]  ;;  %v13807_v44 = vpack.c.bf16 %v10660_v49, %v10653_v54 }
 0x9be   : > { %13754 = vmatpush3.bf16.msra.mxu0 %v13753_v33  ;;  %v10684_v33 = vld [vmem:[%s19333_s14 + $0x200] sm:$0xff] }
 0x9bf   : > { %13755 = vmatprep.subr.bf16.mxu0 %v15291_v9 }
 0x9c2   : > { %13758 = vmatpush3.bf16.msk.msra.mxu0 %vm13757_vm10, %v13756_v11  ;;  %v13775_v11 = vpack.c.bf16 %v10684_v33, %v10677_v4  ;;  %v10659_v4 = vld [vmem:[%s19333_s14 + $0x138] sm:$0xff]  ;;  %v10661_v33 = vld [vmem:[%s19333_s14 + $0x148] sm:$0xff] }
 0x9c3   : > { %13780 = vmatprep.subr.bf16.mxu0 %v13779_v43  ;;  %v10691_v43 = vld [vmem:[%s19333_s14 + $0x238] sm:$0x1] }
 0x9c4   : > { %13776 = vmatprep.subr.bf16.mxu1 %v13775_v11  ;;  %v13809_v11 = vpack.c.bf16 %v10659_v4, %v10652_v56 }
 0x9c5   : > { %13626 = vmatmul.mubr.msk.f32.vlgmr.msra.gmra.mrb[116].mxu0 %vm10332_vm11, %v18997_v34  ;;  %13778 = vmatpush1.bf16.msra.mxu1 %v13777_v37  ;;  %v10668_v37 = vld [vmem:[%s19333_s14 + $0x180] sm:$0xff] }
 0x9c6   : > { %10857 = vmatprep.mubr.f32.mxu0 %v15287_v0  ;;  %13782 = vmatpush1.bf16.msra.mxu0 %v13781_v10  ;;  %v10692_v10 = vld [vmem:[%s19333_s14 + $0x240] sm:$0x1] }
 0x9c7   : > { %13784 = vmatprep.subr.bf16.mxu0 %v13783_v26  ;;  %12201 = vmatprep.subr.msk.mxu1 %vm10192_vm7, %v10691_v43  ;;  %v10688_v43 = vld [vmem:[%s19333_s14 + $0x220] sm:$0xff] }
 0x9c9   : > { %12202 = vmatpush1.msk.msra.mxu1 %vm10192_vm7, %v10690_v17  ;;  %v13829_v17 = vpack.c.bf16 %v10675_v45, %v10668_v37 }
 0x9ca   : > { %13786 = vmatpush1.bf16.msra.mxu0 %v13785_v41  ;;  %13800 = vmatprep.subr.bf16.mxu1 %v13799_v48  ;;  %v10682_v48 = vld [vmem:[%s19333_s14 + $0x1f0] sm:$0xff] }
 0x9cb   : > { %13788 = vmatprep.subr.bf16.mxu0 %v13787_v18  ;;  %v10639_v18 = vld [vmem:[%s19333_s14 + $0x98] sm:$0xff] }
 0x9cc   : > { %v13803_v36 = vpack.c.bf16 %v10646_v31, %v10639_v18 }
 0x9ce   : > { %13790 = vmatpush1.bf16.msra.mxu0 %v13789_v32 }
 0x9cf   : > { %13792 = vmatprep.subr.bf16.mxu0 %v13791_v19  ;;  %v13805_v19 = vpack.c.bf16 %v10645_v51, %v10638_v22 }
 0x9d2   : > { %13794 = vmatpush1.bf16.msra.mxu0 %v13793_v46  ;;  %v10654_v46 = vld [vmem:[%s19333_s14 + $0x110] sm:$0xff] }
 0x9d3   : > { %13796 = vmatprep.subr.bf16.mxu0 %v13795_v3  ;;  %v13826_v3 = vpack.c.bf16 %v10661_v33, %v10654_v46 }
 0x9d6   : > { %13798 = vmatpush1.bf16.msra.mxu0 %v13797_v61  ;;  %v10681_v61 = vld [vmem:[%s19333_s14 + $0x1e8] sm:$0xff] }
 0x9d7   : > { %12204 = vmatprep.subr.msk.mxu0 %vm10192_vm7, %v10693_v21  ;;  %v13813_v21 = vpack.c.bf16 %v10673_v12, %v10666_v8  ;;  %v13815_v20 = vpack.c.bf16 %v10688_v43, %v10681_v61 }
 0x9da   : > { %12205 = vmatpush1.msk.msra.mxu0 %vm10192_vm7, %v10692_v10  ;;  %v10687_v10 = vld [vmem:[%s19333_s14 + $0x218] sm:$0xff] }
 0x9db   : > { %13819 = vmatprep.subr.bf16.mxu0 %v15291_v9 }
 0xa6c   : > { %v12631_v27 = vpop.f32.mrb[112].mxu0 }
 0xa6d   : > { %v12632_v57 = vpop.f32.mrb[113].mxu0 }
 0xa6e   : > { %v12633_v60 = vadd.f32 %v12632_v57, %v12631_v27  ;;  %v10689_v27 = vld [vmem:[%s19333_s14 + $0x228] sm:$0xff]  ;;  %v13817_v57 = vpack.c.bf16 %v10687_v10, %v10680_v7 }
 0xa6f   : > { %v12701_v26 = vpop.f32.mrb[48].mxu1 }
 0xa70   : > { %v12702_v63 = vpop.f32.mrb[49].mxu1 }
 0xa71   : > { %v12703_v14 = vadd.f32 %v12702_v63, %v12701_v26  ;;  %v10695_v26 = vld [vmem:[%s19333_s14 + $0x258] sm:$0x1]  ;;  %v10694_v63 = vld [vmem:[%s19333_s14 + $0x250] sm:$0x1] }
 0xa8c   : > { %v12666_v16 = vpop.f32.mrb[114].mxu0 }
 0xa8d   : > { %v12667_v30 = vpop.f32.mrb[115].mxu0 }
 0xa8e   : > { %v12668_v29 = vadd.f32 %v12667_v30, %v12666_v16 }
 0xa90   : > { %v10477_v41 = vadd.f32 %v12668_v29, %v12633_v60  ;;  %v13832_v60 = vpack.c.bf16 %v10689_v27, %v10682_v48 }
 0xa92   : > { %v10547_v24 = vadd.f32 %v12703_v14, %v10477_v41  ;;  %v10696_v14 = vld [vmem:[%s19333_s14 + $0x260] sm:$0x1] }
 0xa98   : > { %v10616_v35 = vpop.f32.mrb[116].mxu0 }
 0xa99   : > { %v19165_v32 = vadd.f32 %v10616_v35, %v10547_v24  ;;  %v13627_v50 = vpop.f32.mrb[117].mxu0 }
 0xa9b   : > { %12203 = vmatmul.mubr.msk.f32.vlgmr.msra.gmra.mrb[50].mxu1 %vm10697_vm12, %v19165_v32  ;;  %12206 = vmatmul.mubr.msk.f32.vlgmr.msra.gmra.mrb[118].mxu0 %vm10697_vm12, %v19165_v32 }
 0xa9c   : > { %13802 = vmatpush1.bf16.msra.mxu1 %v13801_v1  ;;  %13821 = vmatpush3.bf16.msra.mxu0 %v13820_v28 }
 0xa9d   : > { %13804 = vmatprep.subr.bf16.mxu1 %v13803_v36  ;;  %13822 = vmatprep.subr.bf16.mxu0 %v15291_v9 }
 0xa9e   : > { %10928 = vmatprep.mubr.f32.mxu1 %v15287_v0  ;;  %13650 = vmatprep.mubr.msk.f32.mxu0 %vm15288_vm0, %v15287_v0 }
 0xaa0   : > { %13806 = vmatpush1.bf16.msra.mxu1 %v13805_v19  ;;  %13824 = vmatpush3.bf16.msra.mxu0 %v13823_v55 }
 0xaa1   : > { %13808 = vmatprep.subr.bf16.mxu1 %v13807_v44  ;;  %13825 = vmatprep.subr.bf16.mxu0 %v15291_v9 }
 0xaa4   : > { %13810 = vmatpush1.bf16.msra.mxu1 %v13809_v11  ;;  %13827 = vmatpush3.bf16.msra.mxu0 %v13826_v3 }
 0xaa5   : > { %13812 = vmatprep.subr.bf16.mxu1 %v13811_v13  ;;  %13828 = vmatprep.subr.bf16.mxu0 %v15291_v9 }
 0xaa8   : > { %13814 = vmatpush1.bf16.msra.mxu1 %v13813_v21  ;;  %13830 = vmatpush3.bf16.msra.mxu0 %v13829_v17 }
 0xaa9   : > { %13816 = vmatprep.subr.bf16.mxu1 %v13815_v20  ;;  %13831 = vmatprep.subr.bf16.mxu0 %v15291_v9 }
 0xaac   : > { %13818 = vmatpush1.bf16.msra.mxu1 %v13817_v57  ;;  %13833 = vmatpush3.bf16.msra.mxu0 %v13832_v60 }
 0xaad   : > { %12207 = vmatprep.subr.msk.mxu1 %vm10192_vm7, %v10695_v26  ;;  %13648 = vmatprep.subr.mxu0 %v15287_v0 }
 0xab0   : > { %12208 = vmatpush1.msk.msra.mxu1 %vm10192_vm7, %v10694_v63  ;;  %13649 = vmatpush3.msk.msra.mxu0 %vm10192_vm7, %v10696_v14 }
 0xab1   : > { %12209 = vmatmul.mubr.msk.f32.vlgmr.msra.gmra.mrb[52].mxu1 %vm10697_vm12, %v19165_v32  ;;  %13651 = vmatmul.mubr.msk.f32.vlgmr.msra.gmra.mrb[120].mxu0 %vm10697_vm12, %v19165_v32 }
 0xb6e   : > { %v10788_v9 = vpop.f32.mrb[50].mxu1  ;;  %v10859_v0 = vpop.f32.mrb[118].mxu0 }
 0xb6f   : > { %15155 = vrcp.f32 %v10788_v9  ;;  %v10790_v16 = vpop.f32.mrb[51].mxu1  ;;  %v10861_v30 = vpop.f32.mrb[119].mxu0 }
 0xb70   : > { %15157 = vrcp.f32 %v10859_v0 }
 0xb71   : > { %15159 = vrcp.f32 %v10790_v16 }
 0xb72   : > { %15161 = vrcp.f32 %v10861_v30 }
 0xb79   : > { %v15156_v29 = vpop.eup %15155 }
 0xb7a   : > { %v15158_v41 = vpop.eup %15157  ;;  %v11006_v24 = vmul.f32 %v15156_v29, %v18873_v39 }
 0xb7b   : > { %v15160_v2 = vpop.eup %15159  ;;  %v11010_v38 = vmul.f32 %v15158_v41, %v18984_v58 }
 0xb7c   : > { %v15162_v25 = vpop.eup %15161  ;;  %v11008_v23 = vmul.f32 %v15160_v2, %v18875_v62 }
 0xb7d   : > { %v11012_v18 = vmul.f32 %v15162_v25, %v18890_v40 }
 0xb7e   : > { %v11026_v31 = vcombine.low %v11006_v24, %v11008_v23 }
 0xb7f   : > { %v11027_v35 = vcombine.low %v11010_v38, %v11012_v18 }
 0xb80   : > { %v11035_v1 = vrot.slane %v11026_v31, %v17852_v15 }
 0xb81   : > { %v11042_v28 = vrot.slane %v11027_v35, %v17852_v15 }
 0xb83   : > { %v11057_v22 = vcombine.low %v11035_v1, %v11042_v28 }
 0xb84   : > { %v10930_v32 = vpop.f32.mrb[52].mxu1  ;;  %v11001_v50 = vpop.f32.mrb[120].mxu0 }
 0xb85   : > { %15163 = vrcp.f32 %v10930_v32  ;;  %v10932_v39 = vpop.f32.mrb[53].mxu1  ;;  %v13652_v36 = vpop.f32.mrb[121].mxu0  ;;  %v11065_v56 = vrot.slane %v11057_v22, %v17852_v15 }
 0xb86   : > { %15165 = vrcp.f32 %v11001_v50 }
 0xb87   : > { %15167 = vrcp.f32 %v10932_v39 }
 0xb8f   : > { %v15164_v58 = vpop.eup %15163 }
 0xb90   : > { %v15166_v62 = vpop.eup %15165  ;;  %v11014_v40 = vmul.f32 %v15164_v58, %v18893_v42 }
 0xb91   : > { %v15168_v51 = vpop.eup %15167  ;;  %v11018_v52 = vmul.f32 %v15166_v62, %v18997_v34 }
 0xb92   : > { %v11016_v47 = vmul.f32 %v15168_v51, %v18896_v53 }
 0xb93   : > { %v11056_v49 = vrot.slane %v11018_v52, %v17852_v15 }
 0xb94   : > { %v11028_v54 = vcombine.low %v11014_v40, %v11016_v47 }
 0xb96   : > { %v11049_v19 = vrot.slane %v11028_v54, %v17852_v15 }
 0xb98   : > { %v11058_v55 = vcombine.low %v11049_v19, %v11056_v49 }
 0xb9a   : > { %v11072_v42 = vrot.slane %v11058_v55, %v17852_v15 }
 0xb9c   : > { %v11073_v34 = vcombine.low %v11065_v56, %v11072_v42 }
 0xb9e   : > { %11079 = vst.msk [vmem:[%s502_s24] sm:$0x7f] %vm11077_vm13, %v11073_v34 }
 0xb9f   : > { %15229 = shalt.err (!%p15226_p7)
}
 0xba0   : > { %s15230_s23 = scalar_lea.hbm %s19277_s18, 112  ;;  %s15234_s24 = scalar_lea.hbm %s19334_s15, 224 }
 0xba1   : > { %p15231_p8 = scmp.ne.s32.totalorder %s19277_s18, %s15230_s23  ;;  %p15235_p1 = scmp.lt.u32.totalorder %s19277_s18, %s19334_s15 }
 0xba2   : > { %p15236_p0 = scmp.lt.u32.totalorder %s15234_s24, %s15230_s23  ;;  %p15238_p6 = scmp.lt.u32.totalorder %s15230_s23, %s19277_s18 }
 0xba3   : > { %p15232_p11 = pnand %p15231_p8, %p19357_p9 }
 0xba4   : > { %p15237_p5 = por %p15236_p0, %p15235_p1 }
 0xba5   : > { %p15233_p13 = pneg %p15232_p11 }
 0xba6   : > { %p15239_p10 = por %p15238_p6, %p15237_p5 }
 0xba8   : > { %p15240_p12 = pnand %p15239_p10, %p15233_p13 }
 0xbaa   : > { %15243 = shalt.err (!%p15240_p12)
}
 0xbab   : > { %14217 = dma.vmem_to_hbm [thread:$0]  (%p19357_p9), %s19279_s0, 112, %s19277_s18, %s11081_s22  }
 0xbac PF: > { %s19358_s27 = sld [smem:[#allocation12_spill]]  ;;  %s19359_s29 = sld [smem:[#allocation16_spill]] }
 0xbad   : > { %p14229_p2 = scmp.ge.s32.totalorder %s15282_s21, 2 }
 0xbb2   : > { %s11107_s30 = sand.u32 1, %s19358_s27   ;;  %p19360_p3 = scmp.ne.s32.totalorder %s19359_s29, 0 }
 0xbb3   : > { %s11108_s17 = scalar_lea.sflag [#allocation8], %s11107_s30 }
 0xbb4   : > { %p14224_p4 = pnand %p14229_p2, %p19360_p3 }
 0xbb6   : > { %15265 = dma.done.wait (!%p14224_p4), %s11108_s17, 112  }
 0xbb7   : > { %15267 = vsyncadd (!%p14224_p4), %s11108_s17, 4294967184  ;;  %s19361_s21 = sld [smem:[#allocation14_spill]]  ;;  %s19362_s23 = sld [smem:[#allocation13_spill]] }
 0xbb8   : > { %s19363_s20 = sld [smem:[#allocation15_spill]]  ;;  %s19364_s18 = smov %s15274_s19 }
 0xbbd   : > { %p26_p7 = scmp.ge.s32.totalorder %s19361_s21, 4   ;;  %s19365_s19 = smov %s19362_s23 }
 0xbbf   :  { %28 = sbr.rel (!%p26_p7) target bundleno = 6 (0x6), region = 209 }
 0xbc6   :  { %11113 = vsyncpa [#allocation7], 1 }
 0xbc7   :  { %11115 = vsyncpa [#allocation7 + $0x1], 1 }
 0xbc8   :  { %11116 = vsyncpa [#allocation8], 1 }
 0xbc9   :  { %11118 = vsyncpa [#allocation8 + $0x1], 1 }

</bundles_post_ra>
